<compile_context>
chip_gen: v7x
topology: tpu7x:2x2x1
jax: 0.10.0
libtpu: 0.0.40
codegen_flags: <defaults>
</compile_context>

<pallas_src>
import functools

import jax
import jax.numpy as jnp
from jax.experimental import pallas as pl
from jax.experimental.pallas import tpu as pltpu

CHANNELS = [64, 128, 256, 512, 512, 512]
LEAKY_SLOPE = 0.2
VMEM_LIMIT_BYTES = 48 * 1024 * 1024  # above 16/32 MiB defaults, below v7x physical


# ----------------------------------------------------------------------------
# Pallas kernels
# ----------------------------------------------------------------------------
def _block_kernel(x_ref, w1_ref, b1_ref, w2_ref, b2_ref, g_ref, be_ref,
                  o_ref, h1p_ref, *, H, W):
    """Fused progressive block, one batch element per grid step.

       h1  = leaky_relu(conv3x3(x) + b1)                           (MXU, bf16)
       out = leaky_relu(h1 + gamma*(conv3x3(h1) + b2) + beta)      (ERU / FiLM)

    Spatial positions are flattened on a padded-width grid with row stride
    Wp = W + 2 (two junk columns per image row, discarded by the wrapper), so
    every 3x3 tap is a contiguous row-window of the flattened padded input.
    """
    Wp = W + 2
    Q = H * Wp                     # rows of the wide output grid

    # ---- conv3x3(Cin -> Cout): 9 shifted (Q, Cin) @ (Cin, Cout) matmuls.
    acc = None
    for dy in range(3):
        for dx in range(3):
            t = dy * 3 + dx
            xs = x_ref[0, pl.ds(dy * Wp + dx, Q), :]            # (Q, Cin) bf16
            p = jnp.dot(xs, w1_ref[t], preferred_element_type=jnp.float32)
            acc = p if acc is None else acc + p
    h1 = acc + b1_ref[...]
    h1 = jnp.where(h1 > 0, h1, LEAKY_SLOPE * h1)                # LeakyReLU, f32

    # ---- Stage h1 (junk columns zeroed) into a zero-padded VMEM scratch so
    #      the second conv sees a correctly zero-padded input (no HBM trip).
    col = jax.lax.broadcasted_iota(jnp.int32, (Q, 1), 0) % Wp
    h1z = jnp.where(col < W, h1, 0.0)
    h1p_ref[...] = jnp.zeros(h1p_ref.shape, h1p_ref.dtype)
    h1p_ref[pl.ds(Wp + 1, Q), :] = h1z.astype(h1p_ref.dtype)

    # ---- ERU: FiLM-modulated residual conv3x3(Cout -> Cout).
    acc2 = None
    for dy in range(3):
        for dx in range(3):
            t = dy * 3 + dx
            hs = h1p_ref[pl.ds(dy * Wp + dx, Q), :]             # (Q, Cout) bf16
            p = jnp.dot(hs, w2_ref[t], preferred_element_type=jnp.float32)
            acc2 = p if acc2 is None else acc2 + p
    y = h1 + g_ref[0] * (acc2 + b2_ref[...]) + be_ref[0]        # in-kernel broadcast
    o_ref[0] = jnp.where(y > 0, y, LEAKY_SLOPE * y)


def _final_head_kernel(x_ref, w_ref, b_ref, o_ref, *, inv_hw):
    """AdaptiveAvgPool2d(1) + Conv2d(512,1,1) + Sigmoid, fused.
       Global pool is an in-kernel row reduction (no pooling matrix / MXU N=1)."""
    x = x_ref[...]                                              # (B, H*W, C) f32
    pooled = jnp.sum(x, axis=1) * inv_hw                        # (B, C)
    logit = jnp.sum(pooled * w_ref[...], axis=-1, keepdims=True) + b_ref[...]
    o_ref[...] = jax.nn.sigmoid(logit)


# ----------------------------------------------------------------------------
# Pallas call wrappers
# ----------------------------------------------------------------------------
def fused_block(x_nhwc, conv_w, conv_b, eru_w, eru_b, gamma, beta):
    """(B,H,W,Cin) f32 -> (B,H,W,Cout) f32, one fused pallas_call per block."""
    B, H, W, Cin = x_nhwc.shape
    Cout = conv_w.shape[0]
    Wp = W + 2
    Q = H * Wp
    P = (H + 2) * Wp
    Pp = P + Wp                      # slack rows so shifted reads stay in bounds

    # Glue: zero-pad spatially, flatten rows (stride Wp), pad tail, cast bf16.
    xp = jnp.pad(x_nhwc, ((0, 0), (1, 1), (1, 1), (0, 0))).reshape(B, P, Cin)
    xp = jnp.pad(xp, ((0, 0), (0, Pp - P), (0, 0))).astype(jnp.bfloat16)

    # Weights -> per-tap (9, Cin, Cout) bf16; biases / FiLM params stay f32.
    w1 = jnp.transpose(conv_w, (2, 3, 1, 0)).reshape(9, Cin, Cout).astype(jnp.bfloat16)
    w2 = jnp.transpose(eru_w, (2, 3, 1, 0)).reshape(9, Cout, Cout).astype(jnp.bfloat16)
    b1 = conv_b.reshape(1, Cout).astype(jnp.float32)
    b2 = eru_b.reshape(1, Cout).astype(jnp.float32)
    g = gamma.reshape(B, 1, Cout).astype(jnp.float32)
    be = beta.reshape(B, 1, Cout).astype(jnp.float32)

    out_wide = pl.pallas_call(
        functools.partial(_block_kernel, H=H, W=W),
        out_shape=jax.ShapeDtypeStruct((B, Q, Cout), jnp.float32),
        grid_spec=pltpu.PrefetchScalarGridSpec(
            num_scalar_prefetch=0,
            grid=(B,),
            in_specs=[
                pl.BlockSpec((1, Pp, Cin), lambda b: (b, 0, 0)),
                pl.BlockSpec((9, Cin, Cout), lambda b: (0, 0, 0)),
                pl.BlockSpec((1, Cout), lambda b: (0, 0)),
                pl.BlockSpec((9, Cout, Cout), lambda b: (0, 0, 0)),
                pl.BlockSpec((1, Cout), lambda b: (0, 0)),
                pl.BlockSpec((1, 1, Cout), lambda b: (b, 0, 0)),
                pl.BlockSpec((1, 1, Cout), lambda b: (b, 0, 0)),
            ],
            out_specs=pl.BlockSpec((1, Q, Cout), lambda b: (b, 0, 0)),
            scratch_shapes=[pltpu.VMEM((Pp, Cout), jnp.bfloat16)],
        ),
        compiler_params=pltpu.CompilerParams(
            dimension_semantics=("parallel",),
            vmem_limit_bytes=VMEM_LIMIT_BYTES),
    )(xp, w1, b1, w2, b2, g, be)

    # Drop the 2 junk columns of the wide grid -> (B, H, W, Cout).
    return out_wide.reshape(B, H, Wp, Cout)[:, :, :W, :]


def final_head(x_nhwc, w, b):
    B, H, W, C = x_nhwc.shape
    xf = x_nhwc.reshape(B, H * W, C).astype(jnp.float32)
    wv = w.reshape(1, C).astype(jnp.float32)
    bb = b.reshape(1, 1).astype(jnp.float32)
    return pl.pallas_call(
        functools.partial(_final_head_kernel, inv_hw=1.0 / float(H * W)),
        out_shape=jax.ShapeDtypeStruct((B, 1), jnp.float32),
    )(xf, wv, bb)


# ----------------------------------------------------------------------------
# Glue (VPU-level ops, per perf review): from_rgb 1x1 conv, avg-pool reductions
# ----------------------------------------------------------------------------
def _from_rgb(x_nhwc, w, b):
    # 1x1 conv with Cin=3: three broadcast FMAs -- not worth an MXU launch.
    return jnp.einsum("bhwc,oc->bhwo", x_nhwc, w.reshape(w.shape[0], 3)) + b


def _avg_pool2(x_nhwc):
    B, H, W, C = x_nhwc.shape
    Ho, Wo = H // 2, W // 2
    x = x_nhwc[:, :Ho * 2, :Wo * 2, :]
    return x.reshape(B, Ho, 2, Wo, 2, C).mean(axis=(2, 4))


# ----------------------------------------------------------------------------
# Parameters
# ----------------------------------------------------------------------------
def _conv_params(key, out_c, in_c, k):
    kw, kb = jax.random.split(key)
    s = 1.0 / float(in_c * k * k) ** 0.5
    w = jax.random.uniform(kw, (out_c, in_c, k, k), jnp.float32, -s, s)
    b = jax.random.uniform(kb, (out_c,), jnp.float32, -s, s)
    return w, b


def _linear_params(key, out_f, in_f):
    kw, kb = jax.random.split(key)
    s = 1.0 / float(in_f) ** 0.5
    w = jax.random.uniform(kw, (out_f, in_f), jnp.float32, -s, s)
    b = jax.random.uniform(kb, (out_f,), jnp.float32, -s, s)
    return w, b


def init_params(key):
    keys = iter(jax.random.split(key, 40))
    params = {"from_rgb": [], "blocks": [], "final": None}
    for ch in CHANNELS:
        params["from_rgb"].append(_conv_params(next(keys), ch, 3, 1))
    for i, in_ch in enumerate(CHANNELS):
        out_ch = CHANNELS[min(i + 1, len(CHANNELS) - 1)]
        params["blocks"].append({
            "conv": _conv_params(next(keys), out_ch, in_ch, 3),
            "eru_conv": _conv_params(next(keys), out_ch, out_ch, 3),
            "eru_emotion": _linear_params(next(keys), 2 * out_ch, 2),
        })
    params["final"] = _conv_params(next(keys), 1, 512, 1)
    return params


# ----------------------------------------------------------------------------
# Forward pass (mirrors Discriminator.forward)
# ----------------------------------------------------------------------------
def discriminator_forward(params, x_nchw, v, a, stage=5):
    n_blocks = len(CHANNELS)
    stage = min(stage, n_blocks - 1)
    B = x_nchw.shape[0]
    x = jnp.transpose(x_nchw, (0, 2, 3, 1)).astype(jnp.float32)   # NCHW -> NHWC

    # from_rgb[stage]: 1x1 conv (Cin=3) as VPU FMAs in glue.
    w, b = params["from_rgb"][stage]
    x = _from_rgb(x, w, b)

    features = []
    for i in range(stage, n_blocks):
        blk = params["blocks"][i]
        out_ch = CHANNELS[min(i + 1, n_blocks - 1)]

        # AvgPool2d(2), skipped when spatial size <= 2 (matches torch forward).
        if i > 0 and x.shape[1] > 2:
            x = _avg_pool2(x)

        # FiLM params from (v, a): tiny Linear(2 -> 2*out_ch) in glue.
        lw, lb = blk["eru_emotion"]
        emo = jnp.concatenate([v, a], axis=1) @ lw.T + lb          # (B, 2*out_ch)
        gamma, beta = emo[:, :out_ch], emo[:, out_ch:]

        # Fused Conv3x3 + LeakyReLU + EmotionalResidualUnit (one pallas_call).
        cw, cb = blk["conv"]
        ew, eb = blk["eru_conv"]
        x = fused_block(x, cw, cb, ew, eb, gamma, beta)
        features.append((jnp.transpose(x, (0, 3, 1, 2)), v, a))

    # final: AdaptiveAvgPool2d(1) + Conv2d(512,1,1) + Sigmoid (fused kernel).
    fw, fb = params["final"]
    validity = final_head(x, fw, fb)
    return validity.reshape(B, 1, 1, 1), features


# ----------------------------------------------------------------------------
if __name__ == "__main__":
    key = jax.random.PRNGKey(0)
    kp, kx, kv, ka = jax.random.split(key, 4)
    params = init_params(kp)

    B = 2
    x = jax.random.normal(kx, (B, 3, 8, 8), jnp.float32)           # NCHW input
    v = jax.random.uniform(kv, (B, 1), jnp.float32, -1.0, 1.0)     # valence
    a = jax.random.uniform(ka, (B, 1), jnp.float32, -1.0, 1.0)     # arousal

    fwd = jax.jit(discriminator_forward, static_argnames=("stage",))
    validity, features = fwd(params, x, v, a, stage=5)
    jax.block_until_ready((validity, features))

    assert validity.shape == (B, 1, 1, 1)
    assert features[0][0].shape == (B, 512, 4, 4)
    print("KERNEL_OK")
</pallas_src>

<mosaic_0001>
module attributes {stable_mosaic.version = 11 : i64} {
  func.func @_block_kernel(%arg0: i32, %arg1: memref<1x42x512xbf16, #tpu.memory_space<vmem>>, %arg2: memref<9x512x512xbf16, #tpu.memory_space<vmem>>, %arg3: memref<1x512xf32, #tpu.memory_space<vmem>>, %arg4: memref<9x512x512xbf16, #tpu.memory_space<vmem>>, %arg5: memref<1x512xf32, #tpu.memory_space<vmem>>, %arg6: memref<1x1x512xf32, #tpu.memory_space<vmem>>, %arg7: memref<1x1x512xf32, #tpu.memory_space<vmem>>, %arg8: memref<1x24x512xf32, #tpu.memory_space<vmem>>, %arg9: memref<42x512xbf16, #tpu.memory_space<vmem>>) attributes {dimension_semantics = [#tpu.dimension_semantics<parallel>], iteration_bounds = array<i64: 2>, scalar_prefetch = 0 : i64, scratch_operands = 1 : i64, tpu.core_type = #tpu.core_type<tc>, window_params = [{transform_indices = @transform_0, window_bounds = array<i64: 1, 42, 512>}, {pipeline_mode = #tpu.pipeline_mode<synchronous>, transform_indices = @transform_1, window_bounds = array<i64: 9, 512, 512>}, {pipeline_mode = #tpu.pipeline_mode<synchronous>, transform_indices = @transform_2, window_bounds = array<i64: 1, 512>}, {pipeline_mode = #tpu.pipeline_mode<synchronous>, transform_indices = @transform_3, window_bounds = array<i64: 9, 512, 512>}, {pipeline_mode = #tpu.pipeline_mode<synchronous>, transform_indices = @transform_4, window_bounds = array<i64: 1, 512>}, {transform_indices = @transform_5, window_bounds = array<i64: 1, 1, 512>}, {transform_indices = @transform_6, window_bounds = array<i64: 1, 1, 512>}, {transform_indices = @transform_7, window_bounds = array<i64: 1, 24, 512>}]} {
    %c0 = arith.constant 0 : index
    %c0_0 = arith.constant 0 : index
    %c0_1 = arith.constant 0 : index
    %0 = vector.load %arg1[%c0, %c0_0, %c0_1] : memref<1x42x512xbf16, #tpu.memory_space<vmem>>, vector<1x24x512xbf16>
    %1 = vector.shape_cast %0 : vector<1x24x512xbf16> to vector<24x512xbf16>
    %c0_2 = arith.constant 0 : index
    %c0_3 = arith.constant 0 : index
    %c0_4 = arith.constant 0 : index
    %2 = vector.load %arg2[%c0_2, %c0_3, %c0_4] : memref<9x512x512xbf16, #tpu.memory_space<vmem>>, vector<1x512x512xbf16>
    %3 = vector.shape_cast %2 : vector<1x512x512xbf16> to vector<512x512xbf16>
    %cst = arith.constant dense<0.000000e+00> : vector<24x512xf32>
    %4 = tpu.matmul %1, %3, %cst {dimension_numbers = #tpu.dot_dimension_numbers<[1], [0], [0], [1], [0, 0, 1, 1], [], []>} : vector<24x512xbf16>, vector<512x512xbf16>, vector<24x512xf32> -> vector<24x512xf32>
    %c0_5 = arith.constant 0 : index
    %c1 = arith.constant 1 : index
    %c0_6 = arith.constant 0 : index
    %5 = vector.load %arg1[%c0_5, %c1, %c0_6] : memref<1x42x512xbf16, #tpu.memory_space<vmem>>, vector<1x24x512xbf16>
    %6 = vector.shape_cast %5 : vector<1x24x512xbf16> to vector<24x512xbf16>
    %c1_7 = arith.constant 1 : index
    %c0_8 = arith.constant 0 : index
    %c0_9 = arith.constant 0 : index
    %7 = vector.load %arg2[%c1_7, %c0_8, %c0_9] : memref<9x512x512xbf16, #tpu.memory_space<vmem>>, vector<1x512x512xbf16>
    %8 = vector.shape_cast %7 : vector<1x512x512xbf16> to vector<512x512xbf16>
    %cst_10 = arith.constant dense<0.000000e+00> : vector<24x512xf32>
    %9 = tpu.matmul %6, %8, %cst_10 {dimension_numbers = #tpu.dot_dimension_numbers<[1], [0], [0], [1], [0, 0, 1, 1], [], []>} : vector<24x512xbf16>, vector<512x512xbf16>, vector<24x512xf32> -> vector<24x512xf32>
    %10 = arith.addf %4, %9 : vector<24x512xf32>
    %c0_11 = arith.constant 0 : index
    %c2 = arith.constant 2 : index
    %c0_12 = arith.constant 0 : index
    %11 = vector.load %arg1[%c0_11, %c2, %c0_12] : memref<1x42x512xbf16, #tpu.memory_space<vmem>>, vector<1x24x512xbf16>
    %12 = vector.shape_cast %11 : vector<1x24x512xbf16> to vector<24x512xbf16>
    %c2_13 = arith.constant 2 : index
    %c0_14 = arith.constant 0 : index
    %c0_15 = arith.constant 0 : index
    %13 = vector.load %arg2[%c2_13, %c0_14, %c0_15] : memref<9x512x512xbf16, #tpu.memory_space<vmem>>, vector<1x512x512xbf16>
    %14 = vector.shape_cast %13 : vector<1x512x512xbf16> to vector<512x512xbf16>
    %cst_16 = arith.constant dense<0.000000e+00> : vector<24x512xf32>
    %15 = tpu.matmul %12, %14, %cst_16 {dimension_numbers = #tpu.dot_dimension_numbers<[1], [0], [0], [1], [0, 0, 1, 1], [], []>} : vector<24x512xbf16>, vector<512x512xbf16>, vector<24x512xf32> -> vector<24x512xf32>
    %16 = arith.addf %10, %15 : vector<24x512xf32>
    %c0_17 = arith.constant 0 : index
    %c6 = arith.constant 6 : index
    %c0_18 = arith.constant 0 : index
    %17 = vector.load %arg1[%c0_17, %c6, %c0_18] : memref<1x42x512xbf16, #tpu.memory_space<vmem>>, vector<1x24x512xbf16>
    %18 = vector.shape_cast %17 : vector<1x24x512xbf16> to vector<24x512xbf16>
    %c3 = arith.constant 3 : index
    %c0_19 = arith.constant 0 : index
    %c0_20 = arith.constant 0 : index
    %19 = vector.load %arg2[%c3, %c0_19, %c0_20] : memref<9x512x512xbf16, #tpu.memory_space<vmem>>, vector<1x512x512xbf16>
    %20 = vector.shape_cast %19 : vector<1x512x512xbf16> to vector<512x512xbf16>
    %cst_21 = arith.constant dense<0.000000e+00> : vector<24x512xf32>
    %21 = tpu.matmul %18, %20, %cst_21 {dimension_numbers = #tpu.dot_dimension_numbers<[1], [0], [0], [1], [0, 0, 1, 1], [], []>} : vector<24x512xbf16>, vector<512x512xbf16>, vector<24x512xf32> -> vector<24x512xf32>
    %22 = arith.addf %16, %21 : vector<24x512xf32>
    %c0_22 = arith.constant 0 : index
    %c7 = arith.constant 7 : index
    %c0_23 = arith.constant 0 : index
    %23 = vector.load %arg1[%c0_22, %c7, %c0_23] : memref<1x42x512xbf16, #tpu.memory_space<vmem>>, vector<1x24x512xbf16>
    %24 = vector.shape_cast %23 : vector<1x24x512xbf16> to vector<24x512xbf16>
    %c4 = arith.constant 4 : index
    %c0_24 = arith.constant 0 : index
    %c0_25 = arith.constant 0 : index
    %25 = vector.load %arg2[%c4, %c0_24, %c0_25] : memref<9x512x512xbf16, #tpu.memory_space<vmem>>, vector<1x512x512xbf16>
    %26 = vector.shape_cast %25 : vector<1x512x512xbf16> to vector<512x512xbf16>
    %cst_26 = arith.constant dense<0.000000e+00> : vector<24x512xf32>
    %27 = tpu.matmul %24, %26, %cst_26 {dimension_numbers = #tpu.dot_dimension_numbers<[1], [0], [0], [1], [0, 0, 1, 1], [], []>} : vector<24x512xbf16>, vector<512x512xbf16>, vector<24x512xf32> -> vector<24x512xf32>
    %28 = arith.addf %22, %27 : vector<24x512xf32>
    %c0_27 = arith.constant 0 : index
    %c8 = arith.constant 8 : index
    %c0_28 = arith.constant 0 : index
    %29 = vector.load %arg1[%c0_27, %c8, %c0_28] : memref<1x42x512xbf16, #tpu.memory_space<vmem>>, vector<1x24x512xbf16>
    %30 = vector.shape_cast %29 : vector<1x24x512xbf16> to vector<24x512xbf16>
    %c5 = arith.constant 5 : index
    %c0_29 = arith.constant 0 : index
    %c0_30 = arith.constant 0 : index
    %31 = vector.load %arg2[%c5, %c0_29, %c0_30] : memref<9x512x512xbf16, #tpu.memory_space<vmem>>, vector<1x512x512xbf16>
    %32 = vector.shape_cast %31 : vector<1x512x512xbf16> to vector<512x512xbf16>
    %cst_31 = arith.constant dense<0.000000e+00> : vector<24x512xf32>
    %33 = tpu.matmul %30, %32, %cst_31 {dimension_numbers = #tpu.dot_dimension_numbers<[1], [0], [0], [1], [0, 0, 1, 1], [], []>} : vector<24x512xbf16>, vector<512x512xbf16>, vector<24x512xf32> -> vector<24x512xf32>
    %34 = arith.addf %28, %33 : vector<24x512xf32>
    %c0_32 = arith.constant 0 : index
    %c12 = arith.constant 12 : index
    %c0_33 = arith.constant 0 : index
    %35 = vector.load %arg1[%c0_32, %c12, %c0_33] : memref<1x42x512xbf16, #tpu.memory_space<vmem>>, vector<1x24x512xbf16>
    %36 = vector.shape_cast %35 : vector<1x24x512xbf16> to vector<24x512xbf16>
    %c6_34 = arith.constant 6 : index
    %c0_35 = arith.constant 0 : index
    %c0_36 = arith.constant 0 : index
    %37 = vector.load %arg2[%c6_34, %c0_35, %c0_36] : memref<9x512x512xbf16, #tpu.memory_space<vmem>>, vector<1x512x512xbf16>
    %38 = vector.shape_cast %37 : vector<1x512x512xbf16> to vector<512x512xbf16>
    %cst_37 = arith.constant dense<0.000000e+00> : vector<24x512xf32>
    %39 = tpu.matmul %36, %38, %cst_37 {dimension_numbers = #tpu.dot_dimension_numbers<[1], [0], [0], [1], [0, 0, 1, 1], [], []>} : vector<24x512xbf16>, vector<512x512xbf16>, vector<24x512xf32> -> vector<24x512xf32>
    %40 = arith.addf %34, %39 : vector<24x512xf32>
    %c0_38 = arith.constant 0 : index
    %c13 = arith.constant 13 : index
    %c0_39 = arith.constant 0 : index
    %41 = vector.load %arg1[%c0_38, %c13, %c0_39] : memref<1x42x512xbf16, #tpu.memory_space<vmem>>, vector<1x24x512xbf16>
    %42 = vector.shape_cast %41 : vector<1x24x512xbf16> to vector<24x512xbf16>
    %c7_40 = arith.constant 7 : index
    %c0_41 = arith.constant 0 : index
    %c0_42 = arith.constant 0 : index
    %43 = vector.load %arg2[%c7_40, %c0_41, %c0_42] : memref<9x512x512xbf16, #tpu.memory_space<vmem>>, vector<1x512x512xbf16>
    %44 = vector.shape_cast %43 : vector<1x512x512xbf16> to vector<512x512xbf16>
    %cst_43 = arith.constant dense<0.000000e+00> : vector<24x512xf32>
    %45 = tpu.matmul %42, %44, %cst_43 {dimension_numbers = #tpu.dot_dimension_numbers<[1], [0], [0], [1], [0, 0, 1, 1], [], []>} : vector<24x512xbf16>, vector<512x512xbf16>, vector<24x512xf32> -> vector<24x512xf32>
    %46 = arith.addf %40, %45 : vector<24x512xf32>
    %c0_44 = arith.constant 0 : index
    %c14 = arith.constant 14 : index
    %c0_45 = arith.constant 0 : index
    %47 = vector.load %arg1[%c0_44, %c14, %c0_45] : memref<1x42x512xbf16, #tpu.memory_space<vmem>>, vector<1x24x512xbf16>
    %48 = vector.shape_cast %47 : vector<1x24x512xbf16> to vector<24x512xbf16>
    %c8_46 = arith.constant 8 : index
    %c0_47 = arith.constant 0 : index
    %c0_48 = arith.constant 0 : index
    %49 = vector.load %arg2[%c8_46, %c0_47, %c0_48] : memref<9x512x512xbf16, #tpu.memory_space<vmem>>, vector<1x512x512xbf16>
    %50 = vector.shape_cast %49 : vector<1x512x512xbf16> to vector<512x512xbf16>
    %cst_49 = arith.constant dense<0.000000e+00> : vector<24x512xf32>
    %51 = tpu.matmul %48, %50, %cst_49 {dimension_numbers = #tpu.dot_dimension_numbers<[1], [0], [0], [1], [0, 0, 1, 1], [], []>} : vector<24x512xbf16>, vector<512x512xbf16>, vector<24x512xf32> -> vector<24x512xf32>
    %52 = arith.addf %46, %51 : vector<24x512xf32>
    %c0_50 = arith.constant 0 : index
    %c0_51 = arith.constant 0 : index
    %53 = vector.load %arg3[%c0_50, %c0_51] : memref<1x512xf32, #tpu.memory_space<vmem>>, vector<1x512xf32>
    %54 = vector.broadcast %53 : vector<1x512xf32> to vector<24x512xf32>
    %55 = arith.addf %52, %54 : vector<24x512xf32>
    %cst_52 = arith.constant 0.000000e+00 : f32
    %56 = vector.broadcast %cst_52 : f32 to vector<24x512xf32>
    %57 = arith.cmpf ogt, %55, %56 : vector<24x512xf32>
    %cst_53 = arith.constant 2.000000e-01 : f32
    %58 = vector.broadcast %cst_53 : f32 to vector<24x512xf32>
    %59 = arith.mulf %58, %55 : vector<24x512xf32>
    %60 = arith.select %57, %55, %59 : vector<24x512xi1>, vector<24x512xf32>
    %61 = tpu.iota {dimensions = array<i32: 0>} : vector<24x1xi32>
    %c6_i32 = arith.constant 6 : i32
    %c0_i32 = arith.constant 0 : i32
    %62 = arith.cmpi eq, %c6_i32, %c0_i32 : i32
    %c1_i32 = arith.constant 1 : i32
    %63 = arith.select %62, %c1_i32, %c6_i32 : i32
    %64 = vector.broadcast %63 : i32 to vector<24x1xi32>
    %65 = arith.remsi %61, %64 : vector<24x1xi32>
    %c0_i32_54 = arith.constant 0 : i32
    %66 = vector.broadcast %c0_i32_54 : i32 to vector<24x1xi32>
    %67 = arith.cmpi ne, %65, %66 : vector<24x1xi32>
    %c0_i32_55 = arith.constant 0 : i32
    %68 = vector.broadcast %c0_i32_55 : i32 to vector<24x1xi32>
    %69 = arith.cmpi slt, %65, %68 : vector<24x1xi32>
    %c0_i32_56 = arith.constant 0 : i32
    %70 = arith.cmpi slt, %63, %c0_i32_56 : i32
    %71 = vector.broadcast %70 : i1 to vector<24x1xi1>
    %72 = vector.broadcast %71 : vector<24x1xi1> to vector<24x1xi1>
    %73 = arith.xori %69, %72 : vector<24x1xi1>
    %74 = arith.andi %73, %67 : vector<24x1xi1>
    %75 = vector.broadcast %63 : i32 to vector<24x1xi32>
    %76 = arith.addi %65, %75 : vector<24x1xi32>
    %77 = arith.select %74, %76, %65 : vector<24x1xi1>, vector<24x1xi32>
    %c4_i32 = arith.constant 4 : i32
    %78 = vector.broadcast %c4_i32 : i32 to vector<24x1xi32>
    %79 = arith.cmpi slt, %77, %78 : vector<24x1xi32>
    %cst_57 = arith.constant 0.000000e+00 : f32
    %80 = vector.shape_cast %79 : vector<24x1xi1> to vector<24x1xi1>
    %81 = vector.broadcast %80 : vector<24x1xi1> to vector<24x512xi1>
    %82 = vector.broadcast %cst_57 : f32 to vector<24x512xf32>
    %83 = arith.select %81, %60, %82 : vector<24x512xi1>, vector<24x512xf32>
    %cst_58 = arith.constant 0.000000e+00 : bf16
    %84 = vector.broadcast %cst_58 : bf16 to vector<42x512xbf16>
    %c0_59 = arith.constant 0 : index
    %c0_60 = arith.constant 0 : index
    %85 = vector.load %arg9[%c0_59, %c0_60] : memref<42x512xbf16, #tpu.memory_space<vmem>>, vector<42x512xbf16>
    tpu.vector_store %arg9[%c0_59, %c0_60], %84 {strides = array<i32>} : memref<42x512xbf16, #tpu.memory_space<vmem>>, vector<42x512xbf16>,
    %86 = arith.truncf %83 : vector<24x512xf32> to vector<24x512xbf16>
    %c7_61 = arith.constant 7 : index
    %c0_62 = arith.constant 0 : index
    %87 = vector.load %arg9[%c7_61, %c0_62] : memref<42x512xbf16, #tpu.memory_space<vmem>>, vector<24x512xbf16>
    tpu.vector_store %arg9[%c7_61, %c0_62], %86 {strides = array<i32>} : memref<42x512xbf16, #tpu.memory_space<vmem>>, vector<24x512xbf16>,
    %c0_63 = arith.constant 0 : index
    %c0_64 = arith.constant 0 : index
    %88 = vector.load %arg9[%c0_63, %c0_64] : memref<42x512xbf16, #tpu.memory_space<vmem>>, vector<24x512xbf16>
    %c0_65 = arith.constant 0 : index
    %c0_66 = arith.constant 0 : index
    %c0_67 = arith.constant 0 : index
    %89 = vector.load %arg4[%c0_65, %c0_66, %c0_67] : memref<9x512x512xbf16, #tpu.memory_space<vmem>>, vector<1x512x512xbf16>
    %90 = vector.shape_cast %89 : vector<1x512x512xbf16> to vector<512x512xbf16>
    %cst_68 = arith.constant dense<0.000000e+00> : vector<24x512xf32>
    %91 = tpu.matmul %88, %90, %cst_68 {dimension_numbers = #tpu.dot_dimension_numbers<[1], [0], [0], [1], [0, 0, 1, 1], [], []>} : vector<24x512xbf16>, vector<512x512xbf16>, vector<24x512xf32> -> vector<24x512xf32>
    %c1_69 = arith.constant 1 : index
    %c0_70 = arith.constant 0 : index
    %92 = vector.load %arg9[%c1_69, %c0_70] : memref<42x512xbf16, #tpu.memory_space<vmem>>, vector<24x512xbf16>
    %c1_71 = arith.constant 1 : index
    %c0_72 = arith.constant 0 : index
    %c0_73 = arith.constant 0 : index
    %93 = vector.load %arg4[%c1_71, %c0_72, %c0_73] : memref<9x512x512xbf16, #tpu.memory_space<vmem>>, vector<1x512x512xbf16>
    %94 = vector.shape_cast %93 : vector<1x512x512xbf16> to vector<512x512xbf16>
    %cst_74 = arith.constant dense<0.000000e+00> : vector<24x512xf32>
    %95 = tpu.matmul %92, %94, %cst_74 {dimension_numbers = #tpu.dot_dimension_numbers<[1], [0], [0], [1], [0, 0, 1, 1], [], []>} : vector<24x512xbf16>, vector<512x512xbf16>, vector<24x512xf32> -> vector<24x512xf32>
    %96 = arith.addf %91, %95 : vector<24x512xf32>
    %c2_75 = arith.constant 2 : index
    %c0_76 = arith.constant 0 : index
    %97 = vector.load %arg9[%c2_75, %c0_76] : memref<42x512xbf16, #tpu.memory_space<vmem>>, vector<24x512xbf16>
    %c2_77 = arith.constant 2 : index
    %c0_78 = arith.constant 0 : index
    %c0_79 = arith.constant 0 : index
    %98 = vector.load %arg4[%c2_77, %c0_78, %c0_79] : memref<9x512x512xbf16, #tpu.memory_space<vmem>>, vector<1x512x512xbf16>
    %99 = vector.shape_cast %98 : vector<1x512x512xbf16> to vector<512x512xbf16>
    %cst_80 = arith.constant dense<0.000000e+00> : vector<24x512xf32>
    %100 = tpu.matmul %97, %99, %cst_80 {dimension_numbers = #tpu.dot_dimension_numbers<[1], [0], [0], [1], [0, 0, 1, 1], [], []>} : vector<24x512xbf16>, vector<512x512xbf16>, vector<24x512xf32> -> vector<24x512xf32>
    %101 = arith.addf %96, %100 : vector<24x512xf32>
    %c6_81 = arith.constant 6 : index
    %c0_82 = arith.constant 0 : index
    %102 = vector.load %arg9[%c6_81, %c0_82] : memref<42x512xbf16, #tpu.memory_space<vmem>>, vector<24x512xbf16>
    %c3_83 = arith.constant 3 : index
    %c0_84 = arith.constant 0 : index
    %c0_85 = arith.constant 0 : index
    %103 = vector.load %arg4[%c3_83, %c0_84, %c0_85] : memref<9x512x512xbf16, #tpu.memory_space<vmem>>, vector<1x512x512xbf16>
    %104 = vector.shape_cast %103 : vector<1x512x512xbf16> to vector<512x512xbf16>
    %cst_86 = arith.constant dense<0.000000e+00> : vector<24x512xf32>
    %105 = tpu.matmul %102, %104, %cst_86 {dimension_numbers = #tpu.dot_dimension_numbers<[1], [0], [0], [1], [0, 0, 1, 1], [], []>} : vector<24x512xbf16>, vector<512x512xbf16>, vector<24x512xf32> -> vector<24x512xf32>
    %106 = arith.addf %101, %105 : vector<24x512xf32>
    %c7_87 = arith.constant 7 : index
    %c0_88 = arith.constant 0 : index
    %107 = vector.load %arg9[%c7_87, %c0_88] : memref<42x512xbf16, #tpu.memory_space<vmem>>, vector<24x512xbf16>
    %c4_89 = arith.constant 4 : index
    %c0_90 = arith.constant 0 : index
    %c0_91 = arith.constant 0 : index
    %108 = vector.load %arg4[%c4_89, %c0_90, %c0_91] : memref<9x512x512xbf16, #tpu.memory_space<vmem>>, vector<1x512x512xbf16>
    %109 = vector.shape_cast %108 : vector<1x512x512xbf16> to vector<512x512xbf16>
    %cst_92 = arith.constant dense<0.000000e+00> : vector<24x512xf32>
    %110 = tpu.matmul %107, %109, %cst_92 {dimension_numbers = #tpu.dot_dimension_numbers<[1], [0], [0], [1], [0, 0, 1, 1], [], []>} : vector<24x512xbf16>, vector<512x512xbf16>, vector<24x512xf32> -> vector<24x512xf32>
    %111 = arith.addf %106, %110 : vector<24x512xf32>
    %c8_93 = arith.constant 8 : index
    %c0_94 = arith.constant 0 : index
    %112 = vector.load %arg9[%c8_93, %c0_94] : memref<42x512xbf16, #tpu.memory_space<vmem>>, vector<24x512xbf16>
    %c5_95 = arith.constant 5 : index
    %c0_96 = arith.constant 0 : index
    %c0_97 = arith.constant 0 : index
    %113 = vector.load %arg4[%c5_95, %c0_96, %c0_97] : memref<9x512x512xbf16, #tpu.memory_space<vmem>>, vector<1x512x512xbf16>
    %114 = vector.shape_cast %113 : vector<1x512x512xbf16> to vector<512x512xbf16>
    %cst_98 = arith.constant dense<0.000000e+00> : vector<24x512xf32>
    %115 = tpu.matmul %112, %114, %cst_98 {dimension_numbers = #tpu.dot_dimension_numbers<[1], [0], [0], [1], [0, 0, 1, 1], [], []>} : vector<24x512xbf16>, vector<512x512xbf16>, vector<24x512xf32> -> vector<24x512xf32>
    %116 = arith.addf %111, %115 : vector<24x512xf32>
    %c12_99 = arith.constant 12 : index
    %c0_100 = arith.constant 0 : index
    %117 = vector.load %arg9[%c12_99, %c0_100] : memref<42x512xbf16, #tpu.memory_space<vmem>>, vector<24x512xbf16>
    %c6_101 = arith.constant 6 : index
    %c0_102 = arith.constant 0 : index
    %c0_103 = arith.constant 0 : index
    %118 = vector.load %arg4[%c6_101, %c0_102, %c0_103] : memref<9x512x512xbf16, #tpu.memory_space<vmem>>, vector<1x512x512xbf16>
    %119 = vector.shape_cast %118 : vector<1x512x512xbf16> to vector<512x512xbf16>
    %cst_104 = arith.constant dense<0.000000e+00> : vector<24x512xf32>
    %120 = tpu.matmul %117, %119, %cst_104 {dimension_numbers = #tpu.dot_dimension_numbers<[1], [0], [0], [1], [0, 0, 1, 1], [], []>} : vector<24x512xbf16>, vector<512x512xbf16>, vector<24x512xf32> -> vector<24x512xf32>
    %121 = arith.addf %116, %120 : vector<24x512xf32>
    %c13_105 = arith.constant 13 : index
    %c0_106 = arith.constant 0 : index
    %122 = vector.load %arg9[%c13_105, %c0_106] : memref<42x512xbf16, #tpu.memory_space<vmem>>, vector<24x512xbf16>
    %c7_107 = arith.constant 7 : index
    %c0_108 = arith.constant 0 : index
    %c0_109 = arith.constant 0 : index
    %123 = vector.load %arg4[%c7_107, %c0_108, %c0_109] : memref<9x512x512xbf16, #tpu.memory_space<vmem>>, vector<1x512x512xbf16>
    %124 = vector.shape_cast %123 : vector<1x512x512xbf16> to vector<512x512xbf16>
    %cst_110 = arith.constant dense<0.000000e+00> : vector<24x512xf32>
    %125 = tpu.matmul %122, %124, %cst_110 {dimension_numbers = #tpu.dot_dimension_numbers<[1], [0], [0], [1], [0, 0, 1, 1], [], []>} : vector<24x512xbf16>, vector<512x512xbf16>, vector<24x512xf32> -> vector<24x512xf32>
    %126 = arith.addf %121, %125 : vector<24x512xf32>
    %c14_111 = arith.constant 14 : index
    %c0_112 = arith.constant 0 : index
    %127 = vector.load %arg9[%c14_111, %c0_112] : memref<42x512xbf16, #tpu.memory_space<vmem>>, vector<24x512xbf16>
    %c8_113 = arith.constant 8 : index
    %c0_114 = arith.constant 0 : index
    %c0_115 = arith.constant 0 : index
    %128 = vector.load %arg4[%c8_113, %c0_114, %c0_115] : memref<9x512x512xbf16, #tpu.memory_space<vmem>>, vector<1x512x512xbf16>
    %129 = vector.shape_cast %128 : vector<1x512x512xbf16> to vector<512x512xbf16>
    %cst_116 = arith.constant dense<0.000000e+00> : vector<24x512xf32>
    %130 = tpu.matmul %127, %129, %cst_116 {dimension_numbers = #tpu.dot_dimension_numbers<[1], [0], [0], [1], [0, 0, 1, 1], [], []>} : vector<24x512xbf16>, vector<512x512xbf16>, vector<24x512xf32> -> vector<24x512xf32>
    %131 = arith.addf %126, %130 : vector<24x512xf32>
    %c0_117 = arith.constant 0 : index
    %c0_118 = arith.constant 0 : index
    %c0_119 = arith.constant 0 : index
    %132 = vector.load %arg6[%c0_117, %c0_118, %c0_119] : memref<1x1x512xf32, #tpu.memory_space<vmem>>, vector<1x1x512xf32>
    %133 = vector.shape_cast %132 : vector<1x1x512xf32> to vector<1x512xf32>
    %c0_120 = arith.constant 0 : index
    %c0_121 = arith.constant 0 : index
    %134 = vector.load %arg5[%c0_120, %c0_121] : memref<1x512xf32, #tpu.memory_space<vmem>>, vector<1x512xf32>
    %135 = vector.broadcast %134 : vector<1x512xf32> to vector<24x512xf32>
    %136 = arith.addf %131, %135 : vector<24x512xf32>
    %137 = vector.broadcast %133 : vector<1x512xf32> to vector<24x512xf32>
    %138 = arith.mulf %137, %136 : vector<24x512xf32>
    %139 = arith.addf %60, %138 : vector<24x512xf32>
    %c0_122 = arith.constant 0 : index
    %c0_123 = arith.constant 0 : index
    %c0_124 = arith.constant 0 : index
    %140 = vector.load %arg7[%c0_122, %c0_123, %c0_124] : memref<1x1x512xf32, #tpu.memory_space<vmem>>, vector<1x1x512xf32>
    %141 = vector.shape_cast %140 : vector<1x1x512xf32> to vector<1x512xf32>
    %142 = vector.broadcast %141 : vector<1x512xf32> to vector<24x512xf32>
    %143 = arith.addf %139, %142 : vector<24x512xf32>
    %cst_125 = arith.constant 0.000000e+00 : f32
    %144 = vector.broadcast %cst_125 : f32 to vector<24x512xf32>
    %145 = arith.cmpf ogt, %143, %144 : vector<24x512xf32>
    %cst_126 = arith.constant 2.000000e-01 : f32
    %146 = vector.broadcast %cst_126 : f32 to vector<24x512xf32>
    %147 = arith.mulf %146, %143 : vector<24x512xf32>
    %148 = arith.select %145, %143, %147 : vector<24x512xi1>, vector<24x512xf32>
    %c0_127 = arith.constant 0 : index
    %c0_128 = arith.constant 0 : index
    %c0_129 = arith.constant 0 : index
    %149 = vector.load %arg8[%c0_127, %c0_128, %c0_129] : memref<1x24x512xf32, #tpu.memory_space<vmem>>, vector<1x24x512xf32>
    %150 = vector.shape_cast %149 : vector<1x24x512xf32> to vector<24x512xf32>
    %151 = vector.shape_cast %148 : vector<24x512xf32> to vector<1x24x512xf32>
    tpu.vector_store %arg8[%c0_127, %c0_128, %c0_129], %151 {strides = array<i32>} : memref<1x24x512xf32, #tpu.memory_space<vmem>>, vector<1x24x512xf32>,
    return
  }
  func.func @transform_0(%arg0: i32) -> (i32, i32, i32) {
    %c0_i32 = arith.constant 0 : i32
    %c0_i32_0 = arith.constant 0 : i32
    %c0_i32_1 = arith.constant 0 : i32
    return %arg0, %c0_i32, %c0_i32_0 : i32, i32, i32
  }
  func.func @transform_1(%arg0: i32) -> (i32, i32, i32) {
    %c0_i32 = arith.constant 0 : i32
    %c0_i32_0 = arith.constant 0 : i32
    %c0_i32_1 = arith.constant 0 : i32
    %c0_i32_2 = arith.constant 0 : i32
    return %c0_i32, %c0_i32_0, %c0_i32_1 : i32, i32, i32
  }
  func.func @transform_2(%arg0: i32) -> (i32, i32) {
    %c0_i32 = arith.constant 0 : i32
    %c0_i32_0 = arith.constant 0 : i32
    %c0_i32_1 = arith.constant 0 : i32
    return %c0_i32, %c0_i32_0 : i32, i32
  }
  func.func @transform_3(%arg0: i32) -> (i32, i32, i32) {
    %c0_i32 = arith.constant 0 : i32
    %c0_i32_0 = arith.constant 0 : i32
    %c0_i32_1 = arith.constant 0 : i32
    %c0_i32_2 = arith.constant 0 : i32
    return %c0_i32, %c0_i32_0, %c0_i32_1 : i32, i32, i32
  }
  func.func @transform_4(%arg0: i32) -> (i32, i32) {
    %c0_i32 = arith.constant 0 : i32
    %c0_i32_0 = arith.constant 0 : i32
    %c0_i32_1 = arith.constant 0 : i32
    return %c0_i32, %c0_i32_0 : i32, i32
  }
  func.func @transform_5(%arg0: i32) -> (i32, i32, i32) {
    %c0_i32 = arith.constant 0 : i32
    %c0_i32_0 = arith.constant 0 : i32
    %c0_i32_1 = arith.constant 0 : i32
    return %arg0, %c0_i32, %c0_i32_0 : i32, i32, i32
  }
  func.func @transform_6(%arg0: i32) -> (i32, i32, i32) {
    %c0_i32 = arith.constant 0 : i32
    %c0_i32_0 = arith.constant 0 : i32
    %c0_i32_1 = arith.constant 0 : i32
    return %arg0, %c0_i32, %c0_i32_0 : i32, i32, i32
  }
  func.func @transform_7(%arg0: i32) -> (i32, i32, i32) {
    %c0_i32 = arith.constant 0 : i32
    %c0_i32_0 = arith.constant 0 : i32
    %c0_i32_1 = arith.constant 0 : i32
    return %arg0, %c0_i32, %c0_i32_0 : i32, i32, i32
  }
}

module attributes {stable_mosaic.version = 11 : i64} {
  func.func @_final_head_kernel(%arg0: memref<2x16x512xf32, #tpu.memory_space<vmem>>, %arg1: memref<1x512xf32, #tpu.memory_space<vmem>>, %arg2: memref<1x1xf32, #tpu.memory_space<vmem>>, %arg3: memref<2x1xf32, #tpu.memory_space<vmem>>) attributes {dimension_semantics = [], scalar_prefetch = 0 : i64, scratch_operands = 0 : i64, tpu.core_type = #tpu.core_type<tc>} {
    %c0 = arith.constant 0 : index
    %c0_0 = arith.constant 0 : index
    %c0_1 = arith.constant 0 : index
    %0 = vector.load %arg0[%c0, %c0_0, %c0_1] : memref<2x16x512xf32, #tpu.memory_space<vmem>>, vector<2x16x512xf32>
    %cst = arith.constant dense<0.000000e+00> : vector<2x512xf32>
    %1 = vector.multi_reduction <add>, %0, %cst [1] : vector<2x16x512xf32> to vector<2x512xf32>
    %cst_2 = arith.constant 6.250000e-02 : f32
    %2 = vector.broadcast %cst_2 : f32 to vector<2x512xf32>
    %3 = arith.mulf %1, %2 : vector<2x512xf32>
    %c0_3 = arith.constant 0 : index
    %c0_4 = arith.constant 0 : index
    %4 = vector.load %arg1[%c0_3, %c0_4] : memref<1x512xf32, #tpu.memory_space<vmem>>, vector<1x512xf32>
    %5 = vector.broadcast %4 : vector<1x512xf32> to vector<2x512xf32>
    %6 = arith.mulf %3, %5 : vector<2x512xf32>
    %cst_5 = arith.constant dense<0.000000e+00> : vector<2xf32>
    %7 = vector.multi_reduction <add>, %6, %cst_5 [1] : vector<2x512xf32> to vector<2xf32>
    %8 = vector.shape_cast %7 : vector<2xf32> to vector<2x1xf32>
    %c0_6 = arith.constant 0 : index
    %c0_7 = arith.constant 0 : index
    %9 = vector.load %arg2[%c0_6, %c0_7] : memref<1x1xf32, #tpu.memory_space<vmem>>, vector<1x1xf32>
    %10 = vector.broadcast %9 : vector<1x1xf32> to vector<2x1xf32>
    %11 = arith.addf %8, %10 : vector<2x1xf32>
    %12 = arith.negf %11 : vector<2x1xf32>
    %13 = math.exp %12 : vector<2x1xf32>
    %cst_8 = arith.constant 1.000000e+00 : f32
    %14 = vector.broadcast %cst_8 : f32 to vector<2x1xf32>
    %15 = arith.addf %14, %13 : vector<2x1xf32>
    %16 = arith.divf %14, %15 : vector<2x1xf32>
    %c0_9 = arith.constant 0 : index
    %c0_10 = arith.constant 0 : index
    %17 = vector.load %arg3[%c0_9, %c0_10] : memref<2x1xf32, #tpu.memory_space<vmem>>, vector<2x1xf32>
    tpu.vector_store %arg3[%c0_9, %c0_10], %16 {strides = array<i32>} : memref<2x1xf32, #tpu.memory_space<vmem>>, vector<2x1xf32>,
    return
  }
}

</mosaic_0001>

<bundles_post_ra>
// kernel: discriminator_forward.3
= control target key start
LH: loop header
LB: loop body
LE: loop exit
PB: predicated region body
PF: predicated region fallthrough
CT: control target
= control target key end

     0   :  { %v98_v0 = vlaneseq  ;;  %vm135_vm0 = vcmask 1041409   ;;  %vm147_vm1 = vcmask 1041408   ;;  %vm171_vm2 = vcmask 1024   ;;  %s270_s0 = inlined_call_operand.vmem [shape: f32[2,16,512], index: 0, kind: input, shape index: {}]   ;;  %s271_s2 = inlined_call_operand.<no memory space> [shape: f32[1,1], index: 2, kind: input, shape index: {}]   ;;  %s272_s1 = inlined_call_operand.vmem [shape: f32[1,512], index: 1, kind: input, shape index: {}]   ;;  %s273_s3 = inlined_call_operand.vmem [shape: f32[2,1], index: 3, kind: output, shape index: {}]  }
   0x1   :  { %v8_v1 = vstv %s271_s2  ;;  %v16_v2 = vld [vmem:[%s270_s0] sm:$0xff]  ;;  %v17_v3 = vld [vmem:[%s270_s0 + $0x8] sm:$0xff]  ;;  %v18_v4 = vld [vmem:[%s270_s0 + $0x10] sm:$0xff] }
   0x2   :  { %9 = vst [vmem:[#allocation2] sm:$0x1] %v8_v1  ;;  %v19_v5 = vld [vmem:[%s270_s0 + $0x18] sm:$0xff]  ;;  %v20_v6 = vld [vmem:[%s270_s0 + $0x20] sm:$0xff]  ;;  %v21_v7 = vld [vmem:[%s270_s0 + $0x28] sm:$0xff]  ;;  %v224_v8 = vshrl.u32 %v98_v0, 7 }
   0x3   :  { %v22_v9 = vld [vmem:[%s270_s0 + $0x30] sm:$0xff]  ;;  %v23_v10 = vld [vmem:[%s270_s0 + $0x38] sm:$0xff]  ;;  %v24_v11 = vld [vmem:[%s270_s0 + $0x40] sm:$0xff]  ;;  %v32_v12 = vadd.f32 %v20_v6, %v16_v2  ;;  %v39_v13 = vadd.f32 %v21_v7, %v17_v3 }
   0x4   :  { %v25_v14 = vld [vmem:[%s270_s0 + $0x48] sm:$0xff]  ;;  %v26_v15 = vld [vmem:[%s270_s0 + $0x50] sm:$0xff]  ;;  %v27_v16 = vld [vmem:[%s270_s0 + $0x58] sm:$0xff]  ;;  %v46_v17 = vadd.f32 %v22_v9, %v18_v4  ;;  %v53_v18 = vadd.f32 %v23_v10, %v19_v5  ;;  %v100_v19 = vsub.s32 0, %v224_v8  ;;  %v104_v20 = vsub.s32 1, %v224_v8 }
   0x5   :  { %v28_v21 = vld [vmem:[%s270_s0 + $0x60] sm:$0xff]  ;;  %v29_v22 = vld [vmem:[%s270_s0 + $0x68] sm:$0xff]  ;;  %v30_v23 = vld [vmem:[%s270_s0 + $0x70] sm:$0xff]  ;;  %v33_v24 = vrot.slane %v32_v12, 4  ;;  %v40_v25 = vrot.slane %v39_v13, 4  ;;  %v108_v26 = vsub.s32 2, %v224_v8 }
   0x6   :  { %v31_v27 = vld [vmem:[%s270_s0 + $0x78] sm:$0xff]  ;;  %v47_v28 = vrot.slane %v46_v17, 4  ;;  %v54_v29 = vrot.slane %v53_v18, 4  ;;  %v60_v30 = vadd.f32 %v28_v21, %v24_v11  ;;  %v67_v31 = vadd.f32 %v29_v22, %v25_v14  ;;  %v96_v9 = vld [vmem:[%s272_s1] sm:$0xf] }
   0x7   :  { %v34_v32 = vadd.f32 %v33_v24, %v32_v12  ;;  %v41_v33 = vadd.f32 %v40_v25, %v39_v13  ;;  %v74_v34 = vadd.f32 %v30_v23, %v26_v15  ;;  %v81_v35 = vadd.f32 %v31_v27, %v27_v16 }
   0x8   :  { %v48_v36 = vadd.f32 %v47_v28, %v46_v17  ;;  %v55_v37 = vadd.f32 %v54_v29, %v53_v18  ;;  %v61_v38 = vrot.slane %v60_v30, 4  ;;  %v68_v39 = vrot.slane %v67_v31, 4 }
   0x9   :  { %v35_v40 = vrot.slane %v34_v32, 2  ;;  %v42_v41 = vrot.slane %v41_v33, 2  ;;  %v75_v42 = vrot.slane %v74_v34, 4  ;;  %v82_v43 = vrot.slane %v81_v35, 4 }
   0xa   :  { %v49_v44 = vrot.slane %v48_v36, 2  ;;  %v56_v45 = vrot.slane %v55_v37, 2  ;;  %v62_v46 = vadd.f32 %v61_v38, %v60_v30  ;;  %v69_v47 = vadd.f32 %v68_v39, %v67_v31 }
   0xb   :  { %v36_v48 = vadd.f32 %v35_v40, %v34_v32  ;;  %v43_v49 = vadd.f32 %v42_v41, %v41_v33  ;;  %v76_v50 = vadd.f32 %v75_v42, %v74_v34  ;;  %v83_v51 = vadd.f32 %v82_v43, %v81_v35 }
   0xc   :  { %v50_v52 = vadd.f32 %v49_v44, %v48_v36  ;;  %v57_v53 = vadd.f32 %v56_v45, %v55_v37  ;;  %v63_v54 = vrot.slane %v62_v46, 2  ;;  %v70_v55 = vrot.slane %v69_v47, 2 }
   0xd   :  { %v37_v56 = vrot.slane %v36_v48, 1  ;;  %v44_v57 = vrot.slane %v43_v49, 1  ;;  %v77_v58 = vrot.slane %v76_v50, 2  ;;  %v84_v59 = vrot.slane %v83_v51, 2 }
   0xe   :  { %v51_v60 = vrot.slane %v50_v52, 1  ;;  %v58_v61 = vrot.slane %v57_v53, 1  ;;  %v64_v62 = vadd.f32 %v63_v54, %v62_v46  ;;  %v71_v63 = vadd.f32 %v70_v55, %v69_v47 }
   0xf   :  { %v38_v0 = vadd.f32 %v37_v56, %v36_v48  ;;  %v45_v1 = vadd.f32 %v44_v57, %v43_v49  ;;  %v78_v2 = vadd.f32 %v77_v58, %v76_v50  ;;  %v85_v3 = vadd.f32 %v84_v59, %v83_v51  ;;  %v177_v51 = vld [vmem:[#allocation2] ss:$0 sm:$0xff] }
  0x10   :  { %v52_v4 = vadd.f32 %v51_v60, %v50_v52  ;;  %v59_v5 = vadd.f32 %v58_v61, %v57_v53  ;;  %v65_v6 = vrot.slane %v64_v62, 1  ;;  %v72_v7 = vrot.slane %v71_v63, 1 }
  0x11   :  { %v79_v10 = vrot.slane %v78_v2, 1  ;;  %v86_v11 = vrot.slane %v85_v3, 1  ;;  %v88_v12 = vmul.f32 0.0625, %v38_v0  ;;  %v89_v13 = vmul.f32 0.0625, %v45_v1 }
  0x12   :  { %v66_v14 = vadd.f32 %v65_v6, %v64_v62  ;;  %v73_v15 = vadd.f32 %v72_v7, %v71_v63  ;;  %v90_v16 = vmul.f32 0.0625, %v52_v4  ;;  %v91_v17 = vmul.f32 0.0625, %v59_v5 }
  0x13   :  { %v80_v18 = vadd.f32 %v79_v10, %v78_v2  ;;  %v87_v21 = vadd.f32 %v86_v11, %v85_v3  ;;  %v101_v22 = vrot.slane %v96_v9, %v100_v19  ;;  %v105_v23 = vrot.slane %v96_v9, %v104_v20 }
  0x14   :  { %v92_v24 = vmul.f32 0.0625, %v66_v14  ;;  %v93_v25 = vmul.f32 0.0625, %v73_v15  ;;  %v109_v27 = vrot.slane %v96_v9, %v108_v26  ;;  %v112_v28 = vsub.s32 3, %v224_v8 }
  0x15   :  { %v94_v29 = vmul.f32 0.0625, %v80_v18  ;;  %v95_v30 = vmul.f32 0.0625, %v87_v21  ;;  %v118_v31 = vmul.f32 %v101_v22, %v88_v12  ;;  %v119_v33 = vmul.f32 %v105_v23, %v89_v13 }
  0x16   :  { %v113_v32 = vrot.slane %v96_v9, %v112_v28  ;;  %v122_v34 = vmul.f32 %v101_v22, %v92_v24  ;;  %v123_v35 = vmul.f32 %v105_v23, %v93_v25  ;;  %v120_v36 = vmul.f32 %v109_v27, %v90_v16 }
  0x17   :  { %v124_v37 = vmul.f32 %v109_v27, %v94_v29 }
  0x18   :  { %v121_v19 = vmul.f32 %v113_v32, %v91_v17  ;;  %v125_v38 = vmul.f32 %v113_v32, %v95_v30  ;;  %v134_v39 = vrot.slane %v122_v34, 7  ;;  %v137_v20 = vrot.slane %v123_v35, 7 }
  0x19   :  { %v139_v40 = vrot.slane %v124_v37, 7 }
  0x1a   :  { %v136_v41 = vsel %vm135_vm0, %v134_v39, %v118_v31  ;;  %v138_v26 = vsel %vm135_vm0, %v137_v20, %v119_v33  ;;  %v141_v42 = vrot.slane %v125_v38, 7 }
  0x1b   :  { %v140_v8 = vsel %vm135_vm0, %v139_v40, %v120_v36  ;;  %v148_v43 = vsel %vm147_vm1, %v136_v41, 0.0  ;;  %v149_v44 = vsel %vm147_vm1, %v138_v26, 0.0 }
  0x1c   :  { %v142_v45 = vsel %vm135_vm0, %v141_v42, %v121_v19  ;;  %v150_v46 = vadd.f32 %v149_v44, %v148_v43  ;;  %v151_v47 = vsel %vm147_vm1, %v140_v8, 0.0 }
  0x1d   :  { %v153_v48 = vsel %vm147_vm1, %v142_v45, 0.0 }
  0x1e   :  { %v152_v49 = vadd.f32 %v151_v47, %v150_v46 }
  0x20   :  { %v154_v50 = vadd.f32 %v153_v48, %v152_v49 }
  0x22   :  { %155 = vadd.xlane.f32.xlu0 %v154_v50 }
  0xaf   :  { %v156_v52 = vpop.xlane.xlu0 %155 }
  0xb0   :  { %v164_v53 = vadd.f32 %v177_v51, %v156_v52 }
  0xb2   :  { %v178_v54 = vmul.f32 -1.442695, %v164_v53 }
  0xb4   :  { %179 = vpow2.f32 %v178_v54 }
  0xbe   :  { %v180_v55 = vpop.eup %179 }
  0xbf   :  { %v168_v56 = vadd.f32 1.0, %v180_v55 }
  0xc1   :  { %181 = vrcp.f32 %v168_v56 }
  0xcb   :  { %v182_v57 = vpop.eup %181 }
  0xcc   :  { %172 = vst.msk [vmem:[%s273_s3] sm:$0x3] %vm171_vm2, %v182_v57 }

// kernel: discriminator_forward.2
= control target key start
LH: loop header
LB: loop body
LE: loop exit
PB: predicated region body
PF: predicated region fallthrough
CT: control target
= control target key end

     0   :  { %s27857_s24 = smov 0   ;;  %s36348_s0 = inlined_call_operand.vmem [shape: bf16[2,42,512], index: 0, kind: input, shape index: {}]   ;;  %s36349_s1 = inlined_call_operand.vmem [shape: bf16[9,512,512], index: 1, kind: input, shape index: {}]   ;;  %s36350_s2 = inlined_call_operand.vmem [shape: f32[1,512], index: 2, kind: input, shape index: {}]   ;;  %s36351_s3 = inlined_call_operand.vmem [shape: bf16[9,512,512], index: 3, kind: input, shape index: {}]   ;;  %s36352_s4 = inlined_call_operand.vmem [shape: f32[1,512], index: 4, kind: input, shape index: {}]   ;;  %s36353_s5 = inlined_call_operand.vmem [shape: f32[2,1,512], index: 5, kind: input, shape index: {}]   ;;  %s36354_s6 = inlined_call_operand.vmem [shape: f32[2,1,512], index: 6, kind: input, shape index: {}]   ;;  %s36355_s7 = inlined_call_operand.vmem [shape: f32[2,24,512], index: 7, kind: output, shape index: {}]  }
   0x1 LB: > { %s19487_s25 = sadd.s32 4294967295, %s27814_s24   ;;  %p19491_p0 = scmp.ge.s32.totalorder %s27814_s24, 1  ;;  %s27814_s24 = sphi %s27857_s24, %s17_s24  }
   0x2   : > { %p255_p1 = scmp.lt.s32.totalorder %s27814_s24, 3 }
   0x4   : > { %p256_p2 = pnand %p19491_p0, %p255_p1 }
   0x6   : > { %259 = sbr.rel (%p256_p2) target bundleno = 2780 (0xadc), region = 48 }
   0xd   : > { %v24254_v0 = vld [vmem:[%s36349_s1 + $0x404] ss:$16 sps:$4 sm:$0xff]   ;;  %v24256_v1 = vld [vmem:[%s36349_s1 + $0x40c] ss:$16 sps:$4 sm:$0xff]   ;;  %v24258_v2 = vld [vmem:[%s36349_s1 + $0x400] ss:$16 sps:$4 sm:$0xff]  }
   0xe   : > { %1320 = vmatprep.subr.bf16.mxu0 %v24254_v0  ;;  %v24259_v3 = vld [vmem:[%s36349_s1 + $0x408] ss:$16 sps:$4 sm:$0xff]   ;;  %1422 = vmatprep.subr.bf16.mxu1 %v24256_v1  ;;  %v24260_v4 = vld [vmem:[%s36349_s1 + $0x424] ss:$16 sps:$4 sm:$0xff]   ;;  %v24262_v5 = vld [vmem:[%s36349_s1 + $0x42c] ss:$16 sps:$4 sm:$0xff]  }
   0xf   : > { %1321 = vmatpush1.bf16.msra.mxu0 %v24258_v2  ;;  %1423 = vmatpush1.bf16.msra.mxu1 %v24259_v3  ;;  %v24264_v6 = vld [vmem:[%s36349_s1 + $0x420] ss:$16 sps:$4 sm:$0xff]   ;;  %v24265_v7 = vld [vmem:[%s36349_s1 + $0x428] ss:$16 sps:$4 sm:$0xff]   ;;  %v24266_v8 = vld [vmem:[%s36349_s1 + $0x444] ss:$16 sps:$4 sm:$0xff]  }
  0x10   : > { %1322 = vmatprep.subr.bf16.mxu0 %v24260_v4  ;;  %1424 = vmatprep.subr.bf16.mxu1 %v24262_v5  ;;  %v24268_v9 = vld [vmem:[%s36349_s1 + $0x44c] ss:$16 sps:$4 sm:$0xff]   ;;  %v24270_v10 = vld [vmem:[%s36349_s1 + $0x440] ss:$16 sps:$4 sm:$0xff]   ;;  %v24271_v11 = vld [vmem:[%s36349_s1 + $0x448] ss:$16 sps:$4 sm:$0xff]  }
  0x11   : > { %v24272_v12 = vld [vmem:[%s36349_s1 + $0x464] ss:$16 sps:$4 sm:$0xff]   ;;  %v24274_v13 = vld [vmem:[%s36349_s1 + $0x46c] ss:$16 sps:$4 sm:$0xff]   ;;  %v24276_v14 = vld [vmem:[%s36349_s1 + $0x460] ss:$16 sps:$4 sm:$0xff]  }
  0x12   : > { %v24277_v15 = vld [vmem:[%s36349_s1 + $0x468] ss:$16 sps:$4 sm:$0xff]   ;;  %v24278_v16 = vld [vmem:[%s36349_s1 + $0x484] ss:$16 sps:$4 sm:$0xff]   ;;  %v24280_v17 = vld [vmem:[%s36349_s1 + $0x48c] ss:$16 sps:$4 sm:$0xff]  }
  0x13   : > { %1323 = vmatpush1.bf16.msra.mxu0 %v24264_v6  ;;  %1425 = vmatpush1.bf16.msra.mxu1 %v24265_v7  ;;  %v24282_v18 = vld [vmem:[%s36349_s1 + $0x480] ss:$16 sps:$4 sm:$0xff]   ;;  %v24283_v19 = vld [vmem:[%s36349_s1 + $0x488] ss:$16 sps:$4 sm:$0xff]   ;;  %v24284_v20 = vld [vmem:[%s36349_s1 + $0x4a4] ss:$16 sps:$4 sm:$0xff]  }
  0x14   : > { %1324 = vmatprep.subr.bf16.mxu0 %v24266_v8  ;;  %1426 = vmatprep.subr.bf16.mxu1 %v24268_v9  ;;  %v24286_v21 = vld [vmem:[%s36349_s1 + $0x4ac] ss:$16 sps:$4 sm:$0xff]   ;;  %v24288_v22 = vld [vmem:[%s36349_s1 + $0x4a0] ss:$16 sps:$4 sm:$0xff]   ;;  %v24289_v23 = vld [vmem:[%s36349_s1 + $0x4a8] ss:$16 sps:$4 sm:$0xff]  }
  0x15   : > { %v24290_v24 = vld [vmem:[%s36349_s1 + $0x4c4] ss:$16 sps:$4 sm:$0xff]   ;;  %v24292_v25 = vld [vmem:[%s36349_s1 + $0x4cc] ss:$16 sps:$4 sm:$0xff]   ;;  %v24294_v26 = vld [vmem:[%s36349_s1 + $0x4c0] ss:$16 sps:$4 sm:$0xff]  }
  0x16   : > { %v24295_v27 = vld [vmem:[%s36349_s1 + $0x4c8] ss:$16 sps:$4 sm:$0xff]   ;;  %v24296_v28 = vld [vmem:[%s36349_s1 + $0x4e4] ss:$16 sps:$4 sm:$0xff]   ;;  %v24298_v29 = vld [vmem:[%s36349_s1 + $0x4ec] ss:$16 sps:$4 sm:$0xff]  }
  0x17   : > { %1325 = vmatpush1.bf16.msra.mxu0 %v24270_v10  ;;  %1427 = vmatpush1.bf16.msra.mxu1 %v24271_v11  ;;  %v24300_v30 = vld [vmem:[%s36349_s1 + $0x4e0] ss:$16 sps:$4 sm:$0xff]   ;;  %p295_p3 = scmp.lt.s32.totalorder %s19487_s25, 1  ;;  %v24301_v31 = vld [vmem:[%s36349_s1 + $0x4e8] ss:$16 sps:$4 sm:$0xff]   ;;  %vm2521_vm1 = vcmask 1046528  }
  0x18   : > { %1326 = vmatprep.subr.bf16.mxu0 %v24272_v12  ;;  %1428 = vmatprep.subr.bf16.mxu1 %v24274_v13  ;;  %v24302_v32 = vld [vmem:[%s36349_s1 + $0x504] ss:$16 sps:$4 sm:$0xff]   ;;  %v24304_v33 = vld [vmem:[%s36349_s1 + $0x50c] ss:$16 sps:$4 sm:$0xff]   ;;  %v24306_v34 = vld [vmem:[%s36349_s1 + $0x500] ss:$16 sps:$4 sm:$0xff]  }
  0x19   : > { %v24307_v35 = vld [vmem:[%s36349_s1 + $0x508] ss:$16 sps:$4 sm:$0xff]   ;;  %s36486_s25 = smov (!%p295_p3, %s19487_s25), 1  ;;  %v24308_v36 = vld [vmem:[%s36349_s1 + $0x524] ss:$16 sps:$4 sm:$0xff]   ;;  %vm3551_vm2 = vcmask 1044480  }
  0x1a   : > { %v24310_v37 = vld [vmem:[%s36349_s1 + $0x52c] ss:$16 sps:$4 sm:$0xff]   ;;  %v24312_v38 = vld [vmem:[%s36349_s1 + $0x520] ss:$16 sps:$4 sm:$0xff]   ;;  %s24238_s18 = smul.u32 96, %s36486_s25  ;;  %vm36356_vm4 = vcmask 1045504  }
  0x1b   : > { %1327 = vmatpush1.bf16.msra.mxu0 %v24276_v14  ;;  %1429 = vmatpush1.bf16.msra.mxu1 %v24277_v15  ;;  %v24313_v39 = vld [vmem:[%s36349_s1 + $0x528] ss:$16 sps:$4 sm:$0xff]   ;;  %v24314_v40 = vld [vmem:[%s36349_s1 + $0x544] ss:$16 sps:$4 sm:$0xff]   ;;  %v24316_v41 = vld [vmem:[%s36349_s1 + $0x54c] ss:$16 sps:$4 sm:$0xff]  }
  0x1c   : > { %1328 = vmatprep.subr.bf16.mxu0 %v24278_v16  ;;  %1430 = vmatprep.subr.bf16.mxu1 %v24280_v17  ;;  %v24318_v42 = vld [vmem:[%s36349_s1 + $0x540] ss:$16 sps:$4 sm:$0xff]   ;;  %v24319_v43 = vld [vmem:[%s36349_s1 + $0x548] ss:$16 sps:$4 sm:$0xff]   ;;  %s28009_s10 = scalar_lea.vmem %s36348_s0, %s24238_s18  ;;  %v24320_v44 = vld [vmem:[%s36349_s1 + $0x564] ss:$16 sps:$4 sm:$0xff]   ;;  %s36300_s14 = scalar_lea.vmem %s36355_s7, %s24238_s18 }
  0x1d   : > { %v24322_v45 = vld [vmem:[%s36349_s1 + $0x56c] ss:$16 sps:$4 sm:$0xff]   ;;  %v24324_v46 = vld [vmem:[%s36349_s1 + $0x560] ss:$16 sps:$4 sm:$0xff]   ;;  %v24325_v47 = vld [vmem:[%s36349_s1 + $0x568] ss:$16 sps:$4 sm:$0xff]  }
  0x1e   : > { %v314_v48 = vld [vmem:[%s28009_s10] sm:$0xff]  ;;  %v316_v49 = vld [vmem:[%s28009_s10 + $0x10] sm:$0xff]  ;;  %v24328_v55 = vld [vmem:[%s36349_s1 + $0x58c] ss:$16 sps:$4 sm:$0xff]   ;;  %vm611_vm0 = vsmask.f32 7424 }
  0x1f   : > { %1329 = vmatpush1.bf16.msra.mxu0 %v24282_v18  ;;  %1431 = vmatpush1.bf16.msra.mxu1 %v24283_v19  ;;  %v318_v50 = vld [vmem:[%s28009_s10 + $0x20] sm:$0xff]  ;;  %v448_v51 = vld [vmem:[%s28009_s10 + $0x30] sm:$0x11]  ;;  %v28030_v53 = vcombine.high %v314_v48, %v316_v49  ;;  %v24331_v60 = vld [vmem:[%s36349_s1 + $0x588] ss:$16 sps:$4 sm:$0xff]   ;;  %v28049_v0 = vcombine.low %v314_v48, %v316_v49  ;;  %vm9898_vm13 = vcmask 1043459  }
  0x20   : > { %1330 = vmatprep.subr.bf16.mxu0 %v24284_v20  ;;  %1432 = vmatprep.subr.bf16.mxu1 %v24286_v21  ;;  %v24326_v52 = vld [vmem:[%s36349_s1 + $0x584] ss:$16 sps:$4 sm:$0xff]   ;;  %v28032_v54 = vcombine.high %v318_v50, %v448_v51  ;;  %v24330_v59 = vld [vmem:[%s36349_s1 + $0x580] ss:$16 sps:$4 sm:$0xff]   ;;  %v24334_v1 = vld [vmem:[%s36349_s1 + $0x5ac] ss:$16 sps:$4 sm:$0xff]   ;;  %v28064_v7 = vcombine.low %v318_v50, %v448_v51 }
  0x21   : > { %v625_v56 = vshrl.u32 %v28030_v53, 16  ;;  %v627_v57 = vshll.u32 %v28030_v53, 16  ;;  %v24332_v61 = vld [vmem:[%s36349_s1 + $0x5a4] ss:$16 sps:$4 sm:$0xff]   ;;  %v24336_v3 = vld [vmem:[%s36349_s1 + $0x5a0] ss:$16 sps:$4 sm:$0xff]  }
  0x22   : > { %v632_v58 = vshll.u32 %v28032_v54, 16  ;;  %v24337_v4 = vld [vmem:[%s36349_s1 + $0x5a8] ss:$16 sps:$4 sm:$0xff]   ;;  %v24338_v5 = vld [vmem:[%s36349_s1 + $0x5c4] ss:$16 sps:$4 sm:$0xff]   ;;  %v615_v8 = vshll.u32 %v28049_v0, 16 }
  0x23   : > { %1331 = vmatpush1.bf16.msra.mxu0 %v24288_v22  ;;  %1433 = vmatpush1.bf16.msra.mxu1 %v24289_v23  ;;  %v629_v62 = vrot.slane %v627_v57, 1  ;;  %v24340_v9 = vld [vmem:[%s36349_s1 + $0x5cc] ss:$16 sps:$4 sm:$0xff]   ;;  %v24342_v10 = vld [vmem:[%s36349_s1 + $0x5c0] ss:$16 sps:$4 sm:$0xff]   ;;  %v613_v13 = vshrl.u32 %v28049_v0, 16 }
  0x24   : > { %1332 = vmatprep.subr.bf16.mxu0 %v24290_v24  ;;  %1434 = vmatprep.subr.bf16.mxu1 %v24292_v25  ;;  %v634_v63 = vrot.slane %v632_v58, 1  ;;  %v24343_v11 = vld [vmem:[%s36349_s1 + $0x5c8] ss:$16 sps:$4 sm:$0xff]   ;;  %v24344_v12 = vld [vmem:[%s36349_s1 + $0x5e4] ss:$16 sps:$4 sm:$0xff]   ;;  %v617_v14 = vrot.slane %v615_v8, 1 }
  0x25   : > { %v630_v2 = vor.u32 %v629_v62, %v625_v56  ;;  %v620_v15 = vshll.u32 %v28064_v7, 16  ;;  %v24346_v16 = vld [vmem:[%s36349_s1 + $0x5ec] ss:$16 sps:$4 sm:$0xff]   ;;  %v24348_v17 = vld [vmem:[%s36349_s1 + $0x5e0] ss:$16 sps:$4 sm:$0xff]   ;;  %v663_v23 = vshrl.u32 %v28032_v54, 16 }
  0x26   : > { %v24349_v18 = vld [vmem:[%s36349_s1 + $0x5e8] ss:$16 sps:$4 sm:$0xff]   ;;  %v24354_v19 = vld [vmem:[%s36349_s1 + $0x604] ss:$16 sps:$4 sm:$0xff]   ;;  %v618_v20 = vor.u32 %v617_v14, %v613_v13  ;;  %v24357_v22 = vld [vmem:[%s36349_s1 + $0x60c] ss:$16 sps:$4 sm:$0xff]  }
  0x27   : > { %1333 = vmatpush1.bf16.msra.mxu0 %v24294_v26  ;;  %1435 = vmatpush1.bf16.msra.mxu1 %v24295_v27  ;;  %v635_v6 = vsel %vm611_vm0, %v630_v2, %v634_v63  ;;  %v622_v21 = vrot.slane %v620_v15, 1  ;;  %v24352_v24 = vld [vmem:[%s36349_s1 + $0x600] ss:$16 sps:$4 sm:$0xff]   ;;  %v24355_v25 = vld [vmem:[%s36349_s1 + $0x608] ss:$16 sps:$4 sm:$0xff]   ;;  %s19493_s26 = sshll.u32 %s36486_s25, 2 }
  0x28   : > { %1334 = vmatprep.subr.bf16.mxu0 %v24296_v28  ;;  %1436 = vmatprep.subr.bf16.mxu1 %v24298_v29  ;;  %v24362_v27 = vld [vmem:[%s36349_s1 + $0x624] ss:$16 sps:$4 sm:$0xff]   ;;  %v24365_v28 = vld [vmem:[%s36349_s1 + $0x62c] ss:$16 sps:$4 sm:$0xff]   ;;  %v665_v29 = vor.u32 %v663_v23, %v634_v63  ;;  %v24384_v48 = vld [vmem:[%s36349_s1 + $0x6a0] ss:$16 sps:$4 sm:$0xff]   ;;  %s303_s29 = scalar_lea.vmem %s36353_s5, %s19493_s26  ;;  %s307_s12 = scalar_lea.vmem %s36354_s6, %s19493_s26 }
  0x29   : > { %1352 = vmatprep.mubr.bf16.mxu0 %v635_v6  ;;  %1454 = vmatprep.mubr.bf16.mxu1 %v635_v6  ;;  %v623_v26 = vsel %vm611_vm0, %v618_v20, %v622_v21  ;;  %v24387_v49 = vld [vmem:[%s36349_s1 + $0x6a8] ss:$16 sps:$4 sm:$0xff]   ;;  %v24392_v50 = vld [vmem:[%s36349_s1 + $0x6c4] ss:$16 sps:$4 sm:$0xff]   ;;  %v24395_v51 = vld [vmem:[%s36349_s1 + $0x6cc] ss:$16 sps:$4 sm:$0xff]  }
  0x2a   : > { %v24398_v56 = vld [vmem:[%s36349_s1 + $0x6e4] ss:$16 sps:$4 sm:$0xff]   ;;  %v28181_v57 = vld [vmem:[%s28009_s10 + $0x8] sm:$0xff]  ;;  %v317_v58 = vld [vmem:[%s28009_s10 + $0x18] sm:$0xff]  ;;  %vm4569_vm3 = vsmask.f32 4352 }
  0x2b   : > { %1335 = vmatpush1.bf16.msra.mxu0 %v24300_v30  ;;  %1437 = vmatpush1.bf16.msra.mxu1 %v24301_v31  ;;  %v24360_v30 = vld [vmem:[%s36349_s1 + $0x620] ss:$16 sps:$4 sm:$0xff]   ;;  %v660_v31 = vshrl.u32 %v28064_v7, 16  ;;  %v28194_v62 = vcombine.high %v28181_v57, %v317_v58  ;;  %v24404_v6 = vld [vmem:[%s36349_s1 + $0x704] ss:$16 sps:$4 sm:$0xff]  }
  0x2c   : > { %1336 = vmatprep.subr.bf16.mxu0 %v24302_v32  ;;  %1438 = vmatprep.subr.bf16.mxu1 %v24304_v33  ;;  %v24363_v32 = vld [vmem:[%s36349_s1 + $0x628] ss:$16 sps:$4 sm:$0xff]   ;;  %v24368_v33 = vld [vmem:[%s36349_s1 + $0x644] ss:$16 sps:$4 sm:$0xff]   ;;  %v24407_v8 = vld [vmem:[%s36349_s1 + $0x70c] ss:$16 sps:$4 sm:$0xff]  }
  0x2d   : > { %v649_v2 = vshrl.u32 %v28194_v62, 16  ;;  %v24405_v13 = vld [vmem:[%s36349_s1 + $0x708] ss:$16 sps:$4 sm:$0xff]   ;;  %v24410_v14 = vld [vmem:[%s36349_s1 + $0x724] ss:$16 sps:$4 sm:$0xff]  }
  0x2e   : > { %v24413_v15 = vld [vmem:[%s36349_s1 + $0x72c] ss:$16 sps:$4 sm:$0xff]   ;;  %v24422_v23 = vld [vmem:[%s36349_s1 + $0x764] ss:$16 sps:$4 sm:$0xff]   ;;  %vm36357_vm5 = vsmask.f32 5376 }
  0x2f   : > { %1337 = vmatpush1.bf16.msra.mxu0 %v24306_v34  ;;  %1439 = vmatpush1.bf16.msra.mxu1 %v24307_v35  ;;  %v24371_v34 = vld [vmem:[%s36349_s1 + $0x64c] ss:$16 sps:$4 sm:$0xff]   ;;  %v24366_v35 = vld [vmem:[%s36349_s1 + $0x640] ss:$16 sps:$4 sm:$0xff]   ;;  %vm9899_vm15 = vsmask.f32 7950 }
  0x30   : > { %1338 = vmatprep.subr.bf16.mxu0 %v24308_v36  ;;  %1440 = vmatprep.subr.bf16.mxu1 %v24310_v37  ;;  %v662_v36 = vor.u32 %v660_v31, %v622_v21  ;;  %v24369_v37 = vld [vmem:[%s36349_s1 + $0x648] ss:$16 sps:$4 sm:$0xff]   ;;  %v24419_v20 = vld [vmem:[%s36349_s1 + $0x74c] ss:$16 sps:$4 sm:$0xff]   ;;  %v24414_v21 = vld [vmem:[%s36349_s1 + $0x740] ss:$16 sps:$4 sm:$0xff]   ;;  %v28274_v31 = vcombine.low %v28181_v57, %v317_v58 }
  0x31   : > { %v24454_v57 = vld [vmem:[%s36349_s1] ss:$16 sps:$4 sm:$0xff]   ;;  %v24457_v58 = vld [vmem:[%s36349_s1 + $0x8] ss:$16 sps:$4 sm:$0xff]  }
  0x33   : > { %1339 = vmatpush1.bf16.msra.mxu0 %v24312_v38  ;;  %1441 = vmatpush1.bf16.msra.mxu1 %v24313_v39  ;;  %v24374_v38 = vld [vmem:[%s36349_s1 + $0x664] ss:$16 sps:$4 sm:$0xff]   ;;  %v24377_v39 = vld [vmem:[%s36349_s1 + $0x66c] ss:$16 sps:$4 sm:$0xff]  }
  0x34   : > { %1340 = vmatprep.subr.bf16.mxu0 %v24314_v40  ;;  %1442 = vmatprep.subr.bf16.mxu1 %v24316_v41  ;;  %v24372_v40 = vld [vmem:[%s36349_s1 + $0x660] ss:$16 sps:$4 sm:$0xff]   ;;  %v24375_v41 = vld [vmem:[%s36349_s1 + $0x668] ss:$16 sps:$4 sm:$0xff]  }
  0x37   : > { %1341 = vmatpush1.bf16.msra.mxu0 %v24318_v42  ;;  %1443 = vmatpush1.bf16.msra.mxu1 %v24319_v43  ;;  %v24380_v42 = vld [vmem:[%s36349_s1 + $0x684] ss:$16 sps:$4 sm:$0xff]   ;;  %v24383_v43 = vld [vmem:[%s36349_s1 + $0x68c] ss:$16 sps:$4 sm:$0xff]  }
  0x38   : > { %1342 = vmatprep.subr.bf16.mxu0 %v24320_v44  ;;  %1444 = vmatprep.subr.bf16.mxu1 %v24322_v45  ;;  %v24378_v44 = vld [vmem:[%s36349_s1 + $0x680] ss:$16 sps:$4 sm:$0xff]   ;;  %v24381_v45 = vld [vmem:[%s36349_s1 + $0x688] ss:$16 sps:$4 sm:$0xff]  }
  0x3b   : > { %1343 = vmatpush1.bf16.msra.mxu0 %v24324_v46  ;;  %1445 = vmatpush1.bf16.msra.mxu1 %v24325_v47  ;;  %v24386_v46 = vld [vmem:[%s36349_s1 + $0x6a4] ss:$16 sps:$4 sm:$0xff]   ;;  %v24389_v47 = vld [vmem:[%s36349_s1 + $0x6ac] ss:$16 sps:$4 sm:$0xff]  }
  0x3c   : > { %1344 = vmatprep.subr.bf16.mxu0 %v24326_v52  ;;  %1446 = vmatprep.subr.bf16.mxu1 %v24328_v55  ;;  %v24390_v52 = vld [vmem:[%s36349_s1 + $0x6c0] ss:$16 sps:$4 sm:$0xff]   ;;  %v24393_v55 = vld [vmem:[%s36349_s1 + $0x6c8] ss:$16 sps:$4 sm:$0xff]  }
  0x3f   : > { %1345 = vmatpush1.bf16.msra.mxu0 %v24330_v59  ;;  %1447 = vmatpush1.bf16.msra.mxu1 %v24331_v60  ;;  %v28185_v59 = vld [vmem:[%s28009_s10 + $0x28] sm:$0xff]  ;;  %v28188_v60 = vld [vmem:[%s28009_s10 + $0x38] sm:$0x11] }
  0x40   : > { %1346 = vmatprep.subr.bf16.mxu0 %v24332_v61  ;;  %1448 = vmatprep.subr.bf16.mxu1 %v24334_v1  ;;  %v24401_v61 = vld [vmem:[%s36349_s1 + $0x6ec] ss:$16 sps:$4 sm:$0xff]   ;;  %v28198_v63 = vcombine.high %v28185_v59, %v28188_v60  ;;  %v24396_v1 = vld [vmem:[%s36349_s1 + $0x6e0] ss:$16 sps:$4 sm:$0xff]  }
  0x43   : > { %1347 = vmatpush1.bf16.msra.mxu0 %v24336_v3  ;;  %1449 = vmatpush1.bf16.msra.mxu1 %v24337_v4  ;;  %v651_v3 = vshll.u32 %v28194_v62, 16  ;;  %v24399_v4 = vld [vmem:[%s36349_s1 + $0x6e8] ss:$16 sps:$4 sm:$0xff]  }
  0x44   : > { %1348 = vmatprep.subr.bf16.mxu0 %v24338_v5  ;;  %1450 = vmatprep.subr.bf16.mxu1 %v24340_v9  ;;  %v656_v5 = vshll.u32 %v28198_v63, 16 }
  0x45   : > { %v653_v9 = vrot.slane %v651_v3, 1  ;;  %v24463_v3 = vld [vmem:[%s36349_s1 + $0x28] ss:$16 sps:$4 sm:$0xff]  }
  0x47   : > { %1349 = vmatpush1.bf16.msra.mxu0 %v24342_v10  ;;  %1451 = vmatpush1.bf16.msra.mxu1 %v24343_v11  ;;  %v28215_v10 = vrot.slane %v656_v5, 1  ;;  %v654_v11 = vor.u32 %v653_v9, %v649_v2  ;;  %v24460_v2 = vld [vmem:[%s36349_s1 + $0x20] ss:$16 sps:$4 sm:$0xff]   ;;  %v24471_v5 = vld [vmem:[%s36349_s1 + $0x4c] ss:$16 sps:$4 sm:$0xff]  }
  0x48   : > { %1350 = vmatprep.subr.bf16.mxu0 %v24344_v12  ;;  %1452 = vmatprep.subr.bf16.mxu1 %v24346_v16  ;;  %v24402_v12 = vld [vmem:[%s36349_s1 + $0x700] ss:$16 sps:$4 sm:$0xff]   ;;  %v24469_v9 = vld [vmem:[%s36349_s1 + $0x48] ss:$16 sps:$4 sm:$0xff]  }
  0x49   : > { %v659_v16 = vsel %vm611_vm0, %v654_v11, %v28215_v10  ;;  %v24477_v11 = vld [vmem:[%s36349_s1 + $0x6c] ss:$16 sps:$4 sm:$0xff]  }
  0x4b   : > { %1351 = vmatpush1.bf16.msra.mxu0 %v24348_v17  ;;  %1453 = vmatpush1.bf16.msra.mxu1 %v24349_v18  ;;  %v24408_v17 = vld [vmem:[%s36349_s1 + $0x720] ss:$16 sps:$4 sm:$0xff]   ;;  %v24411_v18 = vld [vmem:[%s36349_s1 + $0x728] ss:$16 sps:$4 sm:$0xff]  }
  0x4c   : > { %1371 = vmatprep.subr.bf16.mxu0 %v24354_v19  ;;  %1473 = vmatprep.subr.bf16.mxu1 %v24357_v22  ;;  %v24416_v19 = vld [vmem:[%s36349_s1 + $0x744] ss:$16 sps:$4 sm:$0xff]   ;;  %v24417_v22 = vld [vmem:[%s36349_s1 + $0x748] ss:$16 sps:$4 sm:$0xff]  }
  0x4e   : > { %1353 = vmatmul.mubr.bf16.vlgmr.msra.gmra.mrb[0].mxu0 %v623_v26  ;;  %1455 = vmatmul.mubr.bf16.vlgmr.msra.gmra.mrb[0].mxu1 %v623_v26  ;;  %v24423_v26 = vld [vmem:[%s36349_s1 + $0x768] ss:$16 sps:$4 sm:$0xff]  }
  0x4f   : > { %1372 = vmatpush1.bf16.msra.mxu0 %v24352_v24  ;;  %1474 = vmatpush1.bf16.msra.mxu1 %v24355_v25  ;;  %v24425_v24 = vld [vmem:[%s36349_s1 + $0x76c] ss:$16 sps:$4 sm:$0xff]   ;;  %v24420_v25 = vld [vmem:[%s36349_s1 + $0x760] ss:$16 sps:$4 sm:$0xff]  }
  0x50   : > { %1373 = vmatprep.subr.bf16.mxu0 %v24362_v27  ;;  %1475 = vmatprep.subr.bf16.mxu1 %v24365_v28  ;;  %v24428_v27 = vld [vmem:[%s36349_s1 + $0x784] ss:$16 sps:$4 sm:$0xff]   ;;  %v24431_v28 = vld [vmem:[%s36349_s1 + $0x78c] ss:$16 sps:$4 sm:$0xff]  }
  0x51   : > { %1362 = vmatprep.mubr.bf16.mxu0 %v665_v29  ;;  %1464 = vmatprep.mubr.bf16.mxu1 %v665_v29  ;;  %v24426_v29 = vld [vmem:[%s36349_s1 + $0x780] ss:$16 sps:$4 sm:$0xff]  }
  0x53   : > { %1374 = vmatpush1.bf16.msra.mxu0 %v24360_v30  ;;  %1476 = vmatpush1.bf16.msra.mxu1 %v24363_v32  ;;  %v24429_v30 = vld [vmem:[%s36349_s1 + $0x788] ss:$16 sps:$4 sm:$0xff]   ;;  %v24434_v32 = vld [vmem:[%s36349_s1 + $0x7a4] ss:$16 sps:$4 sm:$0xff]  }
  0x54   : > { %1375 = vmatprep.subr.bf16.mxu0 %v24368_v33  ;;  %1477 = vmatprep.subr.bf16.mxu1 %v24371_v34  ;;  %v24437_v33 = vld [vmem:[%s36349_s1 + $0x7ac] ss:$16 sps:$4 sm:$0xff]   ;;  %v24432_v34 = vld [vmem:[%s36349_s1 + $0x7a0] ss:$16 sps:$4 sm:$0xff]  }
  0x56   : > { %1363 = vmatmul.mubr.bf16.gmra.mrb[4].mxu0 %v662_v36  ;;  %1465 = vmatmul.mubr.bf16.gmra.mrb[4].mxu1 %v662_v36  ;;  %v28290_v36 = vcombine.low %v28185_v59, %v28188_v60  ;;  %v24462_v59 = vld [vmem:[%s36349_s1 + $0x24] ss:$16 sps:$4 sm:$0xff]   ;;  %v24465_v60 = vld [vmem:[%s36349_s1 + $0x2c] ss:$16 sps:$4 sm:$0xff]  }
  0x57   : > { %1376 = vmatpush1.bf16.msra.mxu0 %v24366_v35  ;;  %1478 = vmatpush1.bf16.msra.mxu1 %v24369_v37  ;;  %v24435_v35 = vld [vmem:[%s36349_s1 + $0x7a8] ss:$16 sps:$4 sm:$0xff]   ;;  %v639_v37 = vshll.u32 %v28274_v31, 16 }
  0x58   : > { %1377 = vmatprep.subr.bf16.mxu0 %v24374_v38  ;;  %1479 = vmatprep.subr.bf16.mxu1 %v24377_v39  ;;  %v24440_v38 = vld [vmem:[%s36349_s1 + $0x7c4] ss:$16 sps:$4 sm:$0xff]   ;;  %v24443_v39 = vld [vmem:[%s36349_s1 + $0x7cc] ss:$16 sps:$4 sm:$0xff]  }
  0x59   : > { %1403 = vmatprep.mubr.bf16.mxu0 %v659_v16  ;;  %1505 = vmatprep.mubr.bf16.mxu1 %v659_v16  ;;  %v24478_v16 = vld [vmem:[%s36349_s1 + $0x80] ss:$16 sps:$4 sm:$0xff]  }
  0x5b   : > { %1378 = vmatpush1.bf16.msra.mxu0 %v24372_v40  ;;  %1480 = vmatpush1.bf16.msra.mxu1 %v24375_v41  ;;  %v24438_v40 = vld [vmem:[%s36349_s1 + $0x7c0] ss:$16 sps:$4 sm:$0xff]   ;;  %v24441_v41 = vld [vmem:[%s36349_s1 + $0x7c8] ss:$16 sps:$4 sm:$0xff]  }
  0x5c   : > { %1379 = vmatprep.subr.bf16.mxu0 %v24380_v42  ;;  %1481 = vmatprep.subr.bf16.mxu1 %v24383_v43  ;;  %v637_v42 = vshrl.u32 %v28274_v31, 16  ;;  %v641_v43 = vrot.slane %v639_v37, 1  ;;  %v24508_v37 = vld [vmem:[%s36349_s1 + $0x120] ss:$16 sps:$4 sm:$0xff]  }
  0x5f   : > { %1380 = vmatpush1.bf16.msra.mxu0 %v24378_v44  ;;  %1482 = vmatpush1.bf16.msra.mxu1 %v24381_v45  ;;  %v644_v44 = vshll.u32 %v28290_v36, 16  ;;  %v24446_v45 = vld [vmem:[%s36349_s1 + $0x7e4] ss:$16 sps:$4 sm:$0xff]  }
  0x60   : > { %1381 = vmatprep.subr.bf16.mxu0 %v24386_v46  ;;  %1483 = vmatprep.subr.bf16.mxu1 %v24389_v47  ;;  %v24449_v46 = vld [vmem:[%s36349_s1 + $0x7ec] ss:$16 sps:$4 sm:$0xff]   ;;  %v24444_v47 = vld [vmem:[%s36349_s1 + $0x7e0] ss:$16 sps:$4 sm:$0xff]  }
  0x63   : > { %1382 = vmatpush1.bf16.msra.mxu0 %v24384_v48  ;;  %1484 = vmatpush1.bf16.msra.mxu1 %v24387_v49  ;;  %v24447_v48 = vld [vmem:[%s36349_s1 + $0x7e8] ss:$16 sps:$4 sm:$0xff]   ;;  %v642_v49 = vor.u32 %v641_v43, %v637_v42  ;;  %v24522_v43 = vld [vmem:[%s36349_s1 + $0x164] ss:$16 sps:$4 sm:$0xff]  }
  0x64   : > { %1383 = vmatprep.subr.bf16.mxu0 %v24392_v50  ;;  %1485 = vmatprep.subr.bf16.mxu1 %v24395_v51  ;;  %v646_v50 = vrot.slane %v644_v44, 1  ;;  %v24456_v51 = vld [vmem:[%s36349_s1 + $0x4] ss:$16 sps:$4 sm:$0xff]   ;;  %v24517_v42 = vld [vmem:[%s36349_s1 + $0x148] ss:$16 sps:$4 sm:$0xff]  }
  0x65   : > { %v24525_v44 = vld [vmem:[%s36349_s1 + $0x16c] ss:$16 sps:$4 sm:$0xff]  }
  0x67   : > { %1384 = vmatpush1.bf16.msra.mxu0 %v24390_v52  ;;  %1486 = vmatpush1.bf16.msra.mxu1 %v24393_v55  ;;  %v24459_v52 = vld [vmem:[%s36349_s1 + $0xc] ss:$16 sps:$4 sm:$0xff]   ;;  %v669_v55 = vshrl.u32 %v28198_v63, 16 }
  0x68   : > { %1385 = vmatprep.subr.bf16.mxu0 %v24398_v56  ;;  %1487 = vmatprep.subr.bf16.mxu1 %v24401_v61  ;;  %v647_v56 = vsel %vm611_vm0, %v642_v49, %v646_v50  ;;  %v24526_v49 = vld [vmem:[%s36349_s1 + $0x180] ss:$16 sps:$4 sm:$0xff]  }
  0x69   : > { %v671_v61 = vor.u32 %v669_v55, %v28215_v10  ;;  %v24474_v10 = vld [vmem:[%s36349_s1 + $0x64] ss:$16 sps:$4 sm:$0xff]   ;;  %v24532_v55 = vld [vmem:[%s36349_s1 + $0x1a0] ss:$16 sps:$4 sm:$0xff]  }
  0x6b   : > { %1386 = vmatpush1.bf16.msra.mxu0 %v24396_v1  ;;  %1488 = vmatpush1.bf16.msra.mxu1 %v24399_v4  ;;  %v666_v1 = vshrl.u32 %v28290_v36, 16  ;;  %v24468_v4 = vld [vmem:[%s36349_s1 + $0x44] ss:$16 sps:$4 sm:$0xff]  }
  0x6c   : > { %1387 = vmatprep.subr.bf16.mxu0 %v24404_v6  ;;  %1489 = vmatprep.subr.bf16.mxu1 %v24407_v8  ;;  %v24466_v8 = vld [vmem:[%s36349_s1 + $0x40] ss:$16 sps:$4 sm:$0xff]  }
  0x6d   : > { %v668_v6 = vor.u32 %v666_v1, %v646_v50  ;;  %v24529_v50 = vld [vmem:[%s36349_s1 + $0x188] ss:$16 sps:$4 sm:$0xff]   ;;  %v24549_v1 = vld [vmem:[%s36349_s1 + $0x1ec] ss:$16 sps:$4 sm:$0xff]  }
  0x6f   : > { %1388 = vmatpush1.bf16.msra.mxu0 %v24402_v12  ;;  %1490 = vmatpush1.bf16.msra.mxu1 %v24405_v13  ;;  %v24472_v12 = vld [vmem:[%s36349_s1 + $0x60] ss:$16 sps:$4 sm:$0xff]   ;;  %v24475_v13 = vld [vmem:[%s36349_s1 + $0x68] ss:$16 sps:$4 sm:$0xff]  }
  0x70   : > { %1389 = vmatprep.subr.bf16.mxu0 %v24410_v14  ;;  %1491 = vmatprep.subr.bf16.mxu1 %v24413_v15  ;;  %v24480_v14 = vld [vmem:[%s36349_s1 + $0x84] ss:$16 sps:$4 sm:$0xff]   ;;  %v24483_v15 = vld [vmem:[%s36349_s1 + $0x8c] ss:$16 sps:$4 sm:$0xff]  }
  0x73   : > { %1390 = vmatpush1.bf16.msra.mxu0 %v24408_v17  ;;  %1492 = vmatpush1.bf16.msra.mxu1 %v24411_v18  ;;  %v24481_v17 = vld [vmem:[%s36349_s1 + $0x88] ss:$16 sps:$4 sm:$0xff]   ;;  %v24486_v18 = vld [vmem:[%s36349_s1 + $0xa4] ss:$16 sps:$4 sm:$0xff]  }
  0x74   : > { %1391 = vmatprep.subr.bf16.mxu0 %v24416_v19  ;;  %1493 = vmatprep.subr.bf16.mxu1 %v24419_v20  ;;  %v24484_v19 = vld [vmem:[%s36349_s1 + $0xa0] ss:$16 sps:$4 sm:$0xff]   ;;  %v24487_v20 = vld [vmem:[%s36349_s1 + $0xa8] ss:$16 sps:$4 sm:$0xff]  }
  0x77   : > { %1392 = vmatpush1.bf16.msra.mxu0 %v24414_v21  ;;  %1494 = vmatpush1.bf16.msra.mxu1 %v24417_v22  ;;  %v24492_v21 = vld [vmem:[%s36349_s1 + $0xc4] ss:$16 sps:$4 sm:$0xff]   ;;  %v24495_v22 = vld [vmem:[%s36349_s1 + $0xcc] ss:$16 sps:$4 sm:$0xff]  }
  0x78   : > { %1393 = vmatprep.subr.bf16.mxu0 %v24422_v23  ;;  %1495 = vmatprep.subr.bf16.mxu1 %v24425_v24  ;;  %v24490_v23 = vld [vmem:[%s36349_s1 + $0xc0] ss:$16 sps:$4 sm:$0xff]   ;;  %v24493_v24 = vld [vmem:[%s36349_s1 + $0xc8] ss:$16 sps:$4 sm:$0xff]  }
  0x7b   : > { %1394 = vmatpush1.bf16.msra.mxu0 %v24420_v25  ;;  %1496 = vmatpush1.bf16.msra.mxu1 %v24423_v26  ;;  %v24498_v25 = vld [vmem:[%s36349_s1 + $0xe4] ss:$16 sps:$4 sm:$0xff]   ;;  %v24501_v26 = vld [vmem:[%s36349_s1 + $0xec] ss:$16 sps:$4 sm:$0xff]  }
  0x7c   : > { %1395 = vmatprep.subr.bf16.mxu0 %v24428_v27  ;;  %1497 = vmatprep.subr.bf16.mxu1 %v24431_v28  ;;  %v24496_v27 = vld [vmem:[%s36349_s1 + $0xe0] ss:$16 sps:$4 sm:$0xff]   ;;  %v24499_v28 = vld [vmem:[%s36349_s1 + $0xe8] ss:$16 sps:$4 sm:$0xff]  }
  0x7f   : > { %1396 = vmatpush1.bf16.msra.mxu0 %v24426_v29  ;;  %1498 = vmatpush1.bf16.msra.mxu1 %v24429_v30  ;;  %v24504_v29 = vld [vmem:[%s36349_s1 + $0x104] ss:$16 sps:$4 sm:$0xff]   ;;  %v24507_v30 = vld [vmem:[%s36349_s1 + $0x10c] ss:$16 sps:$4 sm:$0xff]  }
  0x80   : > { %1397 = vmatprep.subr.bf16.mxu0 %v24434_v32  ;;  %1499 = vmatprep.subr.bf16.mxu1 %v24437_v33  ;;  %v24502_v32 = vld [vmem:[%s36349_s1 + $0x100] ss:$16 sps:$4 sm:$0xff]   ;;  %v24505_v33 = vld [vmem:[%s36349_s1 + $0x108] ss:$16 sps:$4 sm:$0xff]  }
  0x83   : > { %1398 = vmatpush1.bf16.msra.mxu0 %v24432_v34  ;;  %1500 = vmatpush1.bf16.msra.mxu1 %v24435_v35  ;;  %v24510_v34 = vld [vmem:[%s36349_s1 + $0x124] ss:$16 sps:$4 sm:$0xff]   ;;  %v24513_v35 = vld [vmem:[%s36349_s1 + $0x12c] ss:$16 sps:$4 sm:$0xff]  }
  0x84   : > { %1399 = vmatprep.subr.bf16.mxu0 %v24440_v38  ;;  %1501 = vmatprep.subr.bf16.mxu1 %v24443_v39  ;;  %v24511_v38 = vld [vmem:[%s36349_s1 + $0x128] ss:$16 sps:$4 sm:$0xff]   ;;  %v24516_v39 = vld [vmem:[%s36349_s1 + $0x144] ss:$16 sps:$4 sm:$0xff]  }
  0x87   : > { %1400 = vmatpush1.bf16.msra.mxu0 %v24438_v40  ;;  %1502 = vmatpush1.bf16.msra.mxu1 %v24441_v41  ;;  %v24519_v40 = vld [vmem:[%s36349_s1 + $0x14c] ss:$16 sps:$4 sm:$0xff]   ;;  %v24514_v41 = vld [vmem:[%s36349_s1 + $0x140] ss:$16 sps:$4 sm:$0xff]  }
  0x88   : > { %1401 = vmatprep.subr.bf16.mxu0 %v24446_v45  ;;  %1503 = vmatprep.subr.bf16.mxu1 %v24449_v46  ;;  %v24520_v45 = vld [vmem:[%s36349_s1 + $0x160] ss:$16 sps:$4 sm:$0xff]   ;;  %v24523_v46 = vld [vmem:[%s36349_s1 + $0x168] ss:$16 sps:$4 sm:$0xff]  }
  0x8b   : > { %1402 = vmatpush1.bf16.msra.mxu0 %v24444_v47  ;;  %1504 = vmatpush1.bf16.msra.mxu1 %v24447_v48  ;;  %v24528_v47 = vld [vmem:[%s36349_s1 + $0x184] ss:$16 sps:$4 sm:$0xff]   ;;  %v24531_v48 = vld [vmem:[%s36349_s1 + $0x18c] ss:$16 sps:$4 sm:$0xff]  }
  0x8c   : > { %2176 = vmatprep.subr.bf16.mxu0 %v24456_v51  ;;  %2278 = vmatprep.subr.bf16.mxu1 %v24459_v52  ;;  %v24534_v51 = vld [vmem:[%s36349_s1 + $0x1a4] ss:$16 sps:$4 sm:$0xff]   ;;  %v24537_v52 = vld [vmem:[%s36349_s1 + $0x1ac] ss:$16 sps:$4 sm:$0xff]  }
  0x8e   : > { %1404 = vmatmul.mubr.bf16.vlgmr.msra.gmra.mrb[0].mxu0 %v647_v56  ;;  %1506 = vmatmul.mubr.bf16.vlgmr.msra.gmra.mrb[0].mxu1 %v647_v56  ;;  %v24535_v56 = vld [vmem:[%s36349_s1 + $0x1a8] ss:$16 sps:$4 sm:$0xff]  }
  0x8f   : > { %2177 = vmatpush1.bf16.msra.mxu0 %v24454_v57  ;;  %2279 = vmatpush1.bf16.msra.mxu1 %v24457_v58  ;;  %v24540_v57 = vld [vmem:[%s36349_s1 + $0x1c4] ss:$16 sps:$4 sm:$0xff]   ;;  %v24543_v58 = vld [vmem:[%s36349_s1 + $0x1cc] ss:$16 sps:$4 sm:$0xff]  }
  0x90   : > { %2178 = vmatprep.subr.bf16.mxu0 %v24462_v59  ;;  %2280 = vmatprep.subr.bf16.mxu1 %v24465_v60  ;;  %v24538_v59 = vld [vmem:[%s36349_s1 + $0x1c0] ss:$16 sps:$4 sm:$0xff]   ;;  %v24541_v60 = vld [vmem:[%s36349_s1 + $0x1c8] ss:$16 sps:$4 sm:$0xff]  }
  0x91   : > { %1413 = vmatprep.mubr.bf16.mxu0 %v671_v61  ;;  %1515 = vmatprep.mubr.bf16.mxu1 %v671_v61  ;;  %v24546_v61 = vld [vmem:[%s36349_s1 + $0x1e4] ss:$16 sps:$4 sm:$0xff]  }
  0x93   : > { %2179 = vmatpush1.bf16.msra.mxu0 %v24460_v2  ;;  %2281 = vmatpush1.bf16.msra.mxu1 %v24463_v3  ;;  %v24544_v2 = vld [vmem:[%s36349_s1 + $0x1e0] ss:$16 sps:$4 sm:$0xff]   ;;  %v24547_v3 = vld [vmem:[%s36349_s1 + $0x1e8] ss:$16 sps:$4 sm:$0xff]  }
  0x94   : > { %2180 = vmatprep.subr.bf16.mxu0 %v24468_v4  ;;  %2282 = vmatprep.subr.bf16.mxu1 %v24471_v5  ;;  %v24552_v4 = vld [vmem:[%s36349_s1 + $0x204] ss:$16 sps:$4 sm:$0xff]   ;;  %v24555_v5 = vld [vmem:[%s36349_s1 + $0x20c] ss:$16 sps:$4 sm:$0xff]  }
  0x96   : > { %1414 = vmatmul.mubr.bf16.gmra.mrb[8].mxu0 %v668_v6  ;;  %1516 = vmatmul.mubr.bf16.gmra.mrb[8].mxu1 %v668_v6  ;;  %v24550_v6 = vld [vmem:[%s36349_s1 + $0x200] ss:$16 sps:$4 sm:$0xff]  }
  0x97   : > { %2181 = vmatpush1.bf16.msra.mxu0 %v24466_v8  ;;  %2283 = vmatpush1.bf16.msra.mxu1 %v24469_v9  ;;  %v24553_v8 = vld [vmem:[%s36349_s1 + $0x208] ss:$16 sps:$4 sm:$0xff]   ;;  %v24558_v9 = vld [vmem:[%s36349_s1 + $0x224] ss:$16 sps:$4 sm:$0xff]  }
  0x98   : > { %2182 = vmatprep.subr.bf16.mxu0 %v24474_v10  ;;  %2284 = vmatprep.subr.bf16.mxu1 %v24477_v11  ;;  %v24561_v10 = vld [vmem:[%s36349_s1 + $0x22c] ss:$16 sps:$4 sm:$0xff]   ;;  %v27782_v11 = vld [vmem:[%s28009_s10 + $0x20] sm:$0xff] }
  0x99   : > { %2208 = vmatprep.mubr.bf16.mxu0 %v28030_v53  ;;  %2310 = vmatprep.mubr.bf16.mxu1 %v28030_v53  ;;  %v24489_v53 = vld [vmem:[%s36349_s1 + $0xac] ss:$16 sps:$4 sm:$0xff]  }
  0x9b   : > { %2183 = vmatpush1.bf16.msra.mxu0 %v24472_v12  ;;  %2285 = vmatpush1.bf16.msra.mxu1 %v24475_v13  ;;  %v19761_v12 = vcombine.high %v27782_v11, %v27782_v11  ;;  %v24556_v13 = vld [vmem:[%s36349_s1 + $0x220] ss:$16 sps:$4 sm:$0xff]  }
  0x9c   : > { %2184 = vmatprep.subr.bf16.mxu0 %v24480_v14  ;;  %2286 = vmatprep.subr.bf16.mxu1 %v24483_v15  ;;  %v24559_v14 = vld [vmem:[%s36349_s1 + $0x228] ss:$16 sps:$4 sm:$0xff]   ;;  %v24566_v15 = vld [vmem:[%s36349_s1 + $0x244] ss:$16 sps:$4 sm:$0xff]  }
  0x9f   : > { %2185 = vmatpush1.bf16.msra.mxu0 %v24478_v16  ;;  %2287 = vmatpush1.bf16.msra.mxu1 %v24481_v17  ;;  %v19760_v16 = vcombine.low %v27782_v11, %v27782_v11  ;;  %v24564_v17 = vld [vmem:[%s36349_s1 + $0x240] ss:$16 sps:$4 sm:$0xff]  }
  0xa0   : > { %2186 = vmatprep.subr.bf16.mxu0 %v24486_v18  ;;  %2288 = vmatprep.subr.bf16.mxu1 %v24489_v53  ;;  %v24567_v18 = vld [vmem:[%s36349_s1 + $0x248] ss:$16 sps:$4 sm:$0xff]   ;;  %v24572_v53 = vld [vmem:[%s36349_s1 + $0x264] ss:$16 sps:$4 sm:$0xff]   ;;  %v24642_v11 = vld [vmem:[%s36349_s1 + $0x3e0] ss:$16 sps:$4 sm:$0xff]  }
  0xa3   : > { %2187 = vmatpush1.bf16.msra.mxu0 %v24484_v19  ;;  %2289 = vmatpush1.bf16.msra.mxu1 %v24487_v20  ;;  %v24575_v19 = vld [vmem:[%s36349_s1 + $0x26c] ss:$16 sps:$4 sm:$0xff]   ;;  %v24570_v20 = vld [vmem:[%s36349_s1 + $0x260] ss:$16 sps:$4 sm:$0xff]  }
  0xa4   : > { %2188 = vmatprep.subr.bf16.mxu0 %v24492_v21  ;;  %2290 = vmatprep.subr.bf16.mxu1 %v24495_v22  ;;  %v24573_v21 = vld [vmem:[%s36349_s1 + $0x268] ss:$16 sps:$4 sm:$0xff]   ;;  %v24578_v22 = vld [vmem:[%s36349_s1 + $0x284] ss:$16 sps:$4 sm:$0xff]  }
  0xa7   : > { %2189 = vmatpush1.bf16.msra.mxu0 %v24490_v23  ;;  %2291 = vmatpush1.bf16.msra.mxu1 %v24493_v24  ;;  %v24581_v23 = vld [vmem:[%s36349_s1 + $0x28c] ss:$16 sps:$4 sm:$0xff]   ;;  %v24576_v24 = vld [vmem:[%s36349_s1 + $0x280] ss:$16 sps:$4 sm:$0xff]  }
  0xa8   : > { %2190 = vmatprep.subr.bf16.mxu0 %v24498_v25  ;;  %2292 = vmatprep.subr.bf16.mxu1 %v24501_v26  ;;  %v24579_v25 = vld [vmem:[%s36349_s1 + $0x288] ss:$16 sps:$4 sm:$0xff]   ;;  %v24584_v26 = vld [vmem:[%s36349_s1 + $0x2a4] ss:$16 sps:$4 sm:$0xff]  }
  0xab   : > { %2191 = vmatpush1.bf16.msra.mxu0 %v24496_v27  ;;  %2293 = vmatpush1.bf16.msra.mxu1 %v24499_v28  ;;  %v24582_v27 = vld [vmem:[%s36349_s1 + $0x2a0] ss:$16 sps:$4 sm:$0xff]   ;;  %v24585_v28 = vld [vmem:[%s36349_s1 + $0x2a8] ss:$16 sps:$4 sm:$0xff]  }
  0xac   : > { %2192 = vmatprep.subr.bf16.mxu0 %v24504_v29  ;;  %2294 = vmatprep.subr.bf16.mxu1 %v24507_v30  ;;  %v24590_v29 = vld [vmem:[%s36349_s1 + $0x2c4] ss:$16 sps:$4 sm:$0xff]   ;;  %v24593_v30 = vld [vmem:[%s36349_s1 + $0x2cc] ss:$16 sps:$4 sm:$0xff]  }
  0xaf   : > { %2193 = vmatpush1.bf16.msra.mxu0 %v24502_v32  ;;  %2295 = vmatpush1.bf16.msra.mxu1 %v24505_v33  ;;  %v24588_v32 = vld [vmem:[%s36349_s1 + $0x2c0] ss:$16 sps:$4 sm:$0xff]   ;;  %v24591_v33 = vld [vmem:[%s36349_s1 + $0x2c8] ss:$16 sps:$4 sm:$0xff]  }
  0xb0   : > { %2194 = vmatprep.subr.bf16.mxu0 %v24510_v34  ;;  %2296 = vmatprep.subr.bf16.mxu1 %v24513_v35  ;;  %v24596_v34 = vld [vmem:[%s36349_s1 + $0x2e4] ss:$16 sps:$4 sm:$0xff]   ;;  %v24599_v35 = vld [vmem:[%s36349_s1 + $0x2ec] ss:$16 sps:$4 sm:$0xff]  }
  0xb3   : > { %2195 = vmatpush1.bf16.msra.mxu0 %v24508_v37  ;;  %2297 = vmatpush1.bf16.msra.mxu1 %v24511_v38  ;;  %v24594_v37 = vld [vmem:[%s36349_s1 + $0x2e0] ss:$16 sps:$4 sm:$0xff]   ;;  %v24597_v38 = vld [vmem:[%s36349_s1 + $0x2e8] ss:$16 sps:$4 sm:$0xff]  }
  0xb4   : > { %2196 = vmatprep.subr.bf16.mxu0 %v24516_v39  ;;  %2298 = vmatprep.subr.bf16.mxu1 %v24519_v40  ;;  %v24602_v39 = vld [vmem:[%s36349_s1 + $0x304] ss:$16 sps:$4 sm:$0xff]   ;;  %v24605_v40 = vld [vmem:[%s36349_s1 + $0x30c] ss:$16 sps:$4 sm:$0xff]  }
  0xb7   : > { %2197 = vmatpush1.bf16.msra.mxu0 %v24514_v41  ;;  %2299 = vmatpush1.bf16.msra.mxu1 %v24517_v42  ;;  %v24600_v41 = vld [vmem:[%s36349_s1 + $0x300] ss:$16 sps:$4 sm:$0xff]   ;;  %v24603_v42 = vld [vmem:[%s36349_s1 + $0x308] ss:$16 sps:$4 sm:$0xff]  }
  0xb8   : > { %2198 = vmatprep.subr.bf16.mxu0 %v24522_v43  ;;  %2300 = vmatprep.subr.bf16.mxu1 %v24525_v44  ;;  %v24608_v43 = vld [vmem:[%s36349_s1 + $0x324] ss:$16 sps:$4 sm:$0xff]   ;;  %v24611_v44 = vld [vmem:[%s36349_s1 + $0x32c] ss:$16 sps:$4 sm:$0xff]  }
  0xbb   : > { %2199 = vmatpush1.bf16.msra.mxu0 %v24520_v45  ;;  %2301 = vmatpush1.bf16.msra.mxu1 %v24523_v46  ;;  %v24606_v45 = vld [vmem:[%s36349_s1 + $0x320] ss:$16 sps:$4 sm:$0xff]   ;;  %v24609_v46 = vld [vmem:[%s36349_s1 + $0x328] ss:$16 sps:$4 sm:$0xff]  }
  0xbc   : > { %2200 = vmatprep.subr.bf16.mxu0 %v24528_v47  ;;  %2302 = vmatprep.subr.bf16.mxu1 %v24531_v48  ;;  %v24614_v47 = vld [vmem:[%s36349_s1 + $0x344] ss:$16 sps:$4 sm:$0xff]   ;;  %v24617_v48 = vld [vmem:[%s36349_s1 + $0x34c] ss:$16 sps:$4 sm:$0xff]  }
  0xbf   : > { %2201 = vmatpush1.bf16.msra.mxu0 %v24526_v49  ;;  %2303 = vmatpush1.bf16.msra.mxu1 %v24529_v50  ;;  %v24612_v49 = vld [vmem:[%s36349_s1 + $0x340] ss:$16 sps:$4 sm:$0xff]   ;;  %v24615_v50 = vld [vmem:[%s36349_s1 + $0x348] ss:$16 sps:$4 sm:$0xff]  }
  0xc0   : > { %2202 = vmatprep.subr.bf16.mxu0 %v24534_v51  ;;  %2304 = vmatprep.subr.bf16.mxu1 %v24537_v52  ;;  %v24620_v51 = vld [vmem:[%s36349_s1 + $0x364] ss:$16 sps:$4 sm:$0xff]   ;;  %v24623_v52 = vld [vmem:[%s36349_s1 + $0x36c] ss:$16 sps:$4 sm:$0xff]  }
  0xc3   : > { %2203 = vmatpush1.bf16.msra.mxu0 %v24532_v55  ;;  %2305 = vmatpush1.bf16.msra.mxu1 %v24535_v56  ;;  %v24618_v55 = vld [vmem:[%s36349_s1 + $0x360] ss:$16 sps:$4 sm:$0xff]   ;;  %v24621_v56 = vld [vmem:[%s36349_s1 + $0x368] ss:$16 sps:$4 sm:$0xff]  }
  0xc4   : > { %2204 = vmatprep.subr.bf16.mxu0 %v24540_v57  ;;  %2306 = vmatprep.subr.bf16.mxu1 %v24543_v58  ;;  %v24626_v57 = vld [vmem:[%s36349_s1 + $0x384] ss:$16 sps:$4 sm:$0xff]   ;;  %v24629_v58 = vld [vmem:[%s36349_s1 + $0x38c] ss:$16 sps:$4 sm:$0xff]  }
  0xc7   : > { %2205 = vmatpush1.bf16.msra.mxu0 %v24538_v59  ;;  %2307 = vmatpush1.bf16.msra.mxu1 %v24541_v60  ;;  %v24624_v59 = vld [vmem:[%s36349_s1 + $0x380] ss:$16 sps:$4 sm:$0xff]   ;;  %v24627_v60 = vld [vmem:[%s36349_s1 + $0x388] ss:$16 sps:$4 sm:$0xff]  }
  0xc8   : > { %2206 = vmatprep.subr.bf16.mxu0 %v24546_v61  ;;  %2308 = vmatprep.subr.bf16.mxu1 %v24549_v1  ;;  %v24632_v61 = vld [vmem:[%s36349_s1 + $0x3a4] ss:$16 sps:$4 sm:$0xff]   ;;  %v24635_v1 = vld [vmem:[%s36349_s1 + $0x3ac] ss:$16 sps:$4 sm:$0xff]  }
  0xcb   : > { %2207 = vmatpush1.bf16.msra.mxu0 %v24544_v2  ;;  %2309 = vmatpush1.bf16.msra.mxu1 %v24547_v3  ;;  %v24630_v2 = vld [vmem:[%s36349_s1 + $0x3a0] ss:$16 sps:$4 sm:$0xff]   ;;  %v24633_v3 = vld [vmem:[%s36349_s1 + $0x3a8] ss:$16 sps:$4 sm:$0xff]  }
  0xcc   : > { %2227 = vmatprep.subr.bf16.mxu0 %v24552_v4  ;;  %2329 = vmatprep.subr.bf16.mxu1 %v24555_v5  ;;  %v24638_v4 = vld [vmem:[%s36349_s1 + $0x3c4] ss:$16 sps:$4 sm:$0xff]   ;;  %v24641_v5 = vld [vmem:[%s36349_s1 + $0x3cc] ss:$16 sps:$4 sm:$0xff]  }
  0xce   : > { %2209 = vmatmul.mubr.bf16.vlgmr.msra.gmra.mrb[0].mxu0 %v28049_v0  ;;  %2311 = vmatmul.mubr.bf16.vlgmr.msra.gmra.mrb[0].mxu1 %v28049_v0  ;;  %v24569_v0 = vld [vmem:[%s36349_s1 + $0x24c] ss:$16 sps:$4 sm:$0xff]  }
  0xcf   : > { %2228 = vmatpush1.bf16.msra.mxu0 %v24550_v6  ;;  %2330 = vmatpush1.bf16.msra.mxu1 %v24553_v8  ;;  %v24636_v6 = vld [vmem:[%s36349_s1 + $0x3c0] ss:$16 sps:$4 sm:$0xff]   ;;  %v24639_v8 = vld [vmem:[%s36349_s1 + $0x3c8] ss:$16 sps:$4 sm:$0xff]  }
  0xd0   : > { %2229 = vmatprep.subr.bf16.mxu0 %v24558_v9  ;;  %2331 = vmatprep.subr.bf16.mxu1 %v24561_v10  ;;  %v24644_v9 = vld [vmem:[%s36349_s1 + $0x3e4] ss:$16 sps:$4 sm:$0xff]   ;;  %v24647_v10 = vld [vmem:[%s36349_s1 + $0x3ec] ss:$16 sps:$4 sm:$0xff]  }
  0xd1   : > { %2218 = vmatprep.mubr.bf16.mxu0 %v19761_v12  ;;  %2320 = vmatprep.mubr.bf16.mxu1 %v19761_v12  ;;  %v24645_v12 = vld [vmem:[%s36349_s1 + $0x3e8] ss:$16 sps:$4 sm:$0xff]  }
  0xd3   : > { %2230 = vmatpush1.bf16.msra.mxu0 %v24556_v13  ;;  %2332 = vmatpush1.bf16.msra.mxu1 %v24559_v14  ;;  %v24650_v13 = vld [vmem:[%s36349_s1 + $0x804] ss:$16 sps:$4 sm:$0xff]   ;;  %v24653_v14 = vld [vmem:[%s36349_s1 + $0x80c] ss:$16 sps:$4 sm:$0xff]  }
  0xd4   : > { %2231 = vmatprep.subr.bf16.mxu0 %v24566_v15  ;;  %2333 = vmatprep.subr.bf16.mxu1 %v24569_v0  ;;  %v24648_v15 = vld [vmem:[%s36349_s1 + $0x800] ss:$16 sps:$4 sm:$0xff]   ;;  %v24651_v0 = vld [vmem:[%s36349_s1 + $0x808] ss:$16 sps:$4 sm:$0xff]  }
  0xd6   : > { %2219 = vmatmul.mubr.bf16.gmra.mrb[12].mxu0 %v19760_v16  ;;  %2321 = vmatmul.mubr.bf16.gmra.mrb[12].mxu1 %v19760_v16  ;;  %v24656_v16 = vld [vmem:[%s36349_s1 + $0x824] ss:$16 sps:$4 sm:$0xff]  }
  0xd7   : > { %2232 = vmatpush1.bf16.msra.mxu0 %v24564_v17  ;;  %2334 = vmatpush1.bf16.msra.mxu1 %v24567_v18  ;;  %v28730_v17 = vld [vmem:[%s28009_s10] sm:$0xee]  ;;  %v24659_v18 = vld [vmem:[%s36349_s1 + $0x82c] ss:$16 sps:$4 sm:$0xff]  }
  0xd8   : > { %2233 = vmatprep.subr.bf16.mxu0 %v24572_v53  ;;  %2335 = vmatprep.subr.bf16.mxu1 %v24575_v19  ;;  %v27783_v53 = vld [vmem:[%s28009_s10 + $0x28] sm:$0xff] }
  0xd9   : > { %2259 = vmatprep.mubr.bf16.mxu0 %v28194_v62  ;;  %2361 = vmatprep.mubr.bf16.mxu1 %v28194_v62  ;;  %v24587_v62 = vld [vmem:[%s36349_s1 + $0x2ac] ss:$16 sps:$4 sm:$0xff]   ;;  %v19763_v19 = vcombine.high %v27783_v53, %v27783_v53 }
  0xdb   : > { %2234 = vmatpush1.bf16.msra.mxu0 %v24570_v20  ;;  %2336 = vmatpush1.bf16.msra.mxu1 %v24573_v21  ;;  %v24654_v20 = vld [vmem:[%s36349_s1 + $0x820] ss:$16 sps:$4 sm:$0xff]  }
  0xdc   : > { %2235 = vmatprep.subr.bf16.mxu0 %v24578_v22  ;;  %2337 = vmatprep.subr.bf16.mxu1 %v24581_v23  ;;  %v28742_v21 = vld [vmem:[%s28009_s10 + $0x10] sm:$0xff]  ;;  %v24657_v23 = vld [vmem:[%s36349_s1 + $0x828] ss:$16 sps:$4 sm:$0xff]  }
  0xdd   : > { %v20021_v22 = vcombine.high %v28730_v17, %v28742_v21 }
  0xdf   : > { %2236 = vmatpush1.bf16.msra.mxu0 %v24576_v24  ;;  %2338 = vmatpush1.bf16.msra.mxu1 %v24579_v25  ;;  %v24664_v24 = vld [vmem:[%s36349_s1 + $0x844] ss:$16 sps:$4 sm:$0xff]   ;;  %v24662_v25 = vld [vmem:[%s36349_s1 + $0x840] ss:$16 sps:$4 sm:$0xff]  }
  0xe0   : > { %2237 = vmatprep.subr.bf16.mxu0 %v24584_v26  ;;  %2339 = vmatprep.subr.bf16.mxu1 %v24587_v62  ;;  %v19762_v26 = vcombine.low %v27783_v53, %v27783_v53  ;;  %v24665_v62 = vld [vmem:[%s36349_s1 + $0x848] ss:$16 sps:$4 sm:$0xff]   ;;  %v24722_v53 = vld [vmem:[%s36349_s1 + $0x980] ss:$16 sps:$4 sm:$0xff]  }
  0xe3   : > { %2238 = vmatpush1.bf16.msra.mxu0 %v24582_v27  ;;  %2340 = vmatpush1.bf16.msra.mxu1 %v24585_v28  ;;  %v2525_v27 = vrot.slane %v20021_v22, 1  ;;  %v28762_v28 = vrot.slane %v28032_v54, 1  ;;  %v24668_v54 = vld [vmem:[%s36349_s1 + $0x860] ss:$16 sps:$4 sm:$0xff]   ;;  %v24733_v22 = vld [vmem:[%s36349_s1 + $0x9ac] ss:$16 sps:$4 sm:$0xff]  }
  0xe4   : > { %2239 = vmatprep.subr.bf16.mxu0 %v24590_v29  ;;  %2341 = vmatprep.subr.bf16.mxu1 %v24593_v30  ;;  %v24670_v29 = vld [vmem:[%s36349_s1 + $0x864] ss:$16 sps:$4 sm:$0xff]   ;;  %v24673_v30 = vld [vmem:[%s36349_s1 + $0x86c] ss:$16 sps:$4 sm:$0xff]  }
  0xe7   : > { %2240 = vmatpush1.bf16.msra.mxu0 %v24588_v32  ;;  %2342 = vmatpush1.bf16.msra.mxu1 %v24591_v33  ;;  %v24671_v32 = vld [vmem:[%s36349_s1 + $0x868] ss:$16 sps:$4 sm:$0xff]   ;;  %v2527_v33 = vsel %vm2521_vm1, %v2525_v27, %v28762_v28  ;;  %v20020_v27 = vcombine.low %v28730_v17, %v28742_v21 }
  0xe8   : > { %2241 = vmatprep.subr.bf16.mxu0 %v24596_v34  ;;  %2343 = vmatprep.subr.bf16.mxu1 %v24599_v35  ;;  %v24676_v34 = vld [vmem:[%s36349_s1 + $0x884] ss:$16 sps:$4 sm:$0xff]   ;;  %v24679_v35 = vld [vmem:[%s36349_s1 + $0x88c] ss:$16 sps:$4 sm:$0xff]   ;;  %v24743_v17 = vld [vmem:[%s36349_s1 + $0x9e8] ss:$16 sps:$4 sm:$0xff]  }
  0xe9   : > { %v2522_v21 = vrot.slane %v20020_v27, 1 }
  0xeb   : > { %2242 = vmatpush1.bf16.msra.mxu0 %v24594_v37  ;;  %2344 = vmatpush1.bf16.msra.mxu1 %v24597_v38  ;;  %v24674_v37 = vld [vmem:[%s36349_s1 + $0x880] ss:$16 sps:$4 sm:$0xff]   ;;  %v24677_v38 = vld [vmem:[%s36349_s1 + $0x888] ss:$16 sps:$4 sm:$0xff]  }
  0xec   : > { %2243 = vmatprep.subr.bf16.mxu0 %v24602_v39  ;;  %2345 = vmatprep.subr.bf16.mxu1 %v24605_v40  ;;  %v24682_v39 = vld [vmem:[%s36349_s1 + $0x8a4] ss:$16 sps:$4 sm:$0xff]   ;;  %v24685_v40 = vld [vmem:[%s36349_s1 + $0x8ac] ss:$16 sps:$4 sm:$0xff]  }
  0xef   : > { %2244 = vmatpush1.bf16.msra.mxu0 %v24600_v41  ;;  %2346 = vmatpush1.bf16.msra.mxu1 %v24603_v42  ;;  %v24680_v41 = vld [vmem:[%s36349_s1 + $0x8a0] ss:$16 sps:$4 sm:$0xff]   ;;  %v24683_v42 = vld [vmem:[%s36349_s1 + $0x8a8] ss:$16 sps:$4 sm:$0xff]  }
  0xf0   : > { %2245 = vmatprep.subr.bf16.mxu0 %v24608_v43  ;;  %2347 = vmatprep.subr.bf16.mxu1 %v24611_v44  ;;  %v24688_v43 = vld [vmem:[%s36349_s1 + $0x8c4] ss:$16 sps:$4 sm:$0xff]   ;;  %v24691_v44 = vld [vmem:[%s36349_s1 + $0x8cc] ss:$16 sps:$4 sm:$0xff]  }
  0xf3   : > { %2246 = vmatpush1.bf16.msra.mxu0 %v24606_v45  ;;  %2348 = vmatpush1.bf16.msra.mxu1 %v24609_v46  ;;  %v24686_v45 = vld [vmem:[%s36349_s1 + $0x8c0] ss:$16 sps:$4 sm:$0xff]   ;;  %v24689_v46 = vld [vmem:[%s36349_s1 + $0x8c8] ss:$16 sps:$4 sm:$0xff]  }
  0xf4   : > { %2247 = vmatprep.subr.bf16.mxu0 %v24614_v47  ;;  %2349 = vmatprep.subr.bf16.mxu1 %v24617_v48  ;;  %v24694_v47 = vld [vmem:[%s36349_s1 + $0x8e4] ss:$16 sps:$4 sm:$0xff]   ;;  %v24697_v48 = vld [vmem:[%s36349_s1 + $0x8ec] ss:$16 sps:$4 sm:$0xff]  }
  0xf7   : > { %2248 = vmatpush1.bf16.msra.mxu0 %v24612_v49  ;;  %2350 = vmatpush1.bf16.msra.mxu1 %v24615_v50  ;;  %v24692_v49 = vld [vmem:[%s36349_s1 + $0x8e0] ss:$16 sps:$4 sm:$0xff]   ;;  %v24695_v50 = vld [vmem:[%s36349_s1 + $0x8e8] ss:$16 sps:$4 sm:$0xff]  }
  0xf8   : > { %2249 = vmatprep.subr.bf16.mxu0 %v24620_v51  ;;  %2351 = vmatprep.subr.bf16.mxu1 %v24623_v52  ;;  %v24700_v51 = vld [vmem:[%s36349_s1 + $0x904] ss:$16 sps:$4 sm:$0xff]   ;;  %v24703_v52 = vld [vmem:[%s36349_s1 + $0x90c] ss:$16 sps:$4 sm:$0xff]  }
  0xfb   : > { %2250 = vmatpush1.bf16.msra.mxu0 %v24618_v55  ;;  %2352 = vmatpush1.bf16.msra.mxu1 %v24621_v56 }
  0xfc   : > { %2251 = vmatprep.subr.bf16.mxu0 %v24626_v57  ;;  %2353 = vmatprep.subr.bf16.mxu1 %v24629_v58 }
  0xff   : > { %2252 = vmatpush1.bf16.msra.mxu0 %v24624_v59  ;;  %2354 = vmatpush1.bf16.msra.mxu1 %v24627_v60  ;;  %v24698_v59 = vld [vmem:[%s36349_s1 + $0x900] ss:$16 sps:$4 sm:$0xff]   ;;  %v24701_v60 = vld [vmem:[%s36349_s1 + $0x908] ss:$16 sps:$4 sm:$0xff]  }
 0x100   : > { %2253 = vmatprep.subr.bf16.mxu0 %v24632_v61  ;;  %2355 = vmatprep.subr.bf16.mxu1 %v24635_v1 }
 0x103   : > { %2254 = vmatpush1.bf16.msra.mxu0 %v24630_v2  ;;  %2356 = vmatpush1.bf16.msra.mxu1 %v24633_v3  ;;  %v24706_v2 = vld [vmem:[%s36349_s1 + $0x924] ss:$16 sps:$4 sm:$0xff]   ;;  %v24709_v3 = vld [vmem:[%s36349_s1 + $0x92c] ss:$16 sps:$4 sm:$0xff]  }
 0x104   : > { %2255 = vmatprep.subr.bf16.mxu0 %v24638_v4  ;;  %2357 = vmatprep.subr.bf16.mxu1 %v24641_v5 }
 0x107   : > { %2256 = vmatpush1.bf16.msra.mxu0 %v24636_v6  ;;  %2358 = vmatpush1.bf16.msra.mxu1 %v24639_v8  ;;  %v24704_v6 = vld [vmem:[%s36349_s1 + $0x920] ss:$16 sps:$4 sm:$0xff]   ;;  %v24707_v8 = vld [vmem:[%s36349_s1 + $0x928] ss:$16 sps:$4 sm:$0xff]  }
 0x108   : > { %2257 = vmatprep.subr.bf16.mxu0 %v24644_v9  ;;  %2359 = vmatprep.subr.bf16.mxu1 %v24647_v10  ;;  %v24712_v9 = vld [vmem:[%s36349_s1 + $0x944] ss:$16 sps:$4 sm:$0xff]   ;;  %v24715_v10 = vld [vmem:[%s36349_s1 + $0x94c] ss:$16 sps:$4 sm:$0xff]  }
 0x10b   : > { %2258 = vmatpush1.bf16.msra.mxu0 %v24642_v11  ;;  %2360 = vmatpush1.bf16.msra.mxu1 %v24645_v12  ;;  %v24710_v11 = vld [vmem:[%s36349_s1 + $0x940] ss:$16 sps:$4 sm:$0xff]   ;;  %v24713_v12 = vld [vmem:[%s36349_s1 + $0x948] ss:$16 sps:$4 sm:$0xff]  }
 0x10c   : > { %3182 = vmatprep.subr.bf16.mxu0 %v24650_v13  ;;  %3284 = vmatprep.subr.bf16.mxu1 %v24653_v14  ;;  %v24718_v13 = vld [vmem:[%s36349_s1 + $0x964] ss:$16 sps:$4 sm:$0xff]   ;;  %v24721_v14 = vld [vmem:[%s36349_s1 + $0x96c] ss:$16 sps:$4 sm:$0xff]  }
 0x10e   : > { %2260 = vmatmul.mubr.bf16.vlgmr.msra.gmra.mrb[0].mxu0 %v28274_v31  ;;  %2362 = vmatmul.mubr.bf16.vlgmr.msra.gmra.mrb[0].mxu1 %v28274_v31  ;;  %v24667_v31 = vld [vmem:[%s36349_s1 + $0x84c] ss:$16 sps:$4 sm:$0xff]  }
 0x10f   : > { %3183 = vmatpush1.bf16.msra.mxu0 %v24648_v15  ;;  %3285 = vmatpush1.bf16.msra.mxu1 %v24651_v0  ;;  %v24716_v15 = vld [vmem:[%s36349_s1 + $0x960] ss:$16 sps:$4 sm:$0xff]   ;;  %v24719_v0 = vld [vmem:[%s36349_s1 + $0x968] ss:$16 sps:$4 sm:$0xff]  }
 0x110   : > { %3184 = vmatprep.subr.bf16.mxu0 %v24656_v16  ;;  %3286 = vmatprep.subr.bf16.mxu1 %v24659_v18  ;;  %v24724_v16 = vld [vmem:[%s36349_s1 + $0x984] ss:$16 sps:$4 sm:$0xff]   ;;  %v24727_v18 = vld [vmem:[%s36349_s1 + $0x98c] ss:$16 sps:$4 sm:$0xff]  }
 0x111   : > { %2269 = vmatprep.mubr.bf16.mxu0 %v19763_v19  ;;  %2371 = vmatprep.mubr.bf16.mxu1 %v19763_v19  ;;  %v24725_v19 = vld [vmem:[%s36349_s1 + $0x988] ss:$16 sps:$4 sm:$0xff]  }
 0x113   : > { %3185 = vmatpush1.bf16.msra.mxu0 %v24654_v20  ;;  %3287 = vmatpush1.bf16.msra.mxu1 %v24657_v23  ;;  %v24730_v20 = vld [vmem:[%s36349_s1 + $0x9a4] ss:$16 sps:$4 sm:$0xff]   ;;  %v24728_v23 = vld [vmem:[%s36349_s1 + $0x9a0] ss:$16 sps:$4 sm:$0xff]  }
 0x114   : > { %3186 = vmatprep.subr.bf16.mxu0 %v24664_v24  ;;  %3288 = vmatprep.subr.bf16.mxu1 %v24667_v31  ;;  %v24731_v24 = vld [vmem:[%s36349_s1 + $0x9a8] ss:$16 sps:$4 sm:$0xff]   ;;  %v24736_v31 = vld [vmem:[%s36349_s1 + $0x9c4] ss:$16 sps:$4 sm:$0xff]  }
 0x116   : > { %2270 = vmatmul.mubr.bf16.gmra.mrb[16].mxu0 %v19762_v26  ;;  %2372 = vmatmul.mubr.bf16.gmra.mrb[16].mxu1 %v19762_v26  ;;  %v24734_v26 = vld [vmem:[%s36349_s1 + $0x9c0] ss:$16 sps:$4 sm:$0xff]  }
 0x117   : > { %3187 = vmatpush1.bf16.msra.mxu0 %v24662_v25  ;;  %3289 = vmatpush1.bf16.msra.mxu1 %v24665_v62  ;;  %v24739_v25 = vld [vmem:[%s36349_s1 + $0x9cc] ss:$16 sps:$4 sm:$0xff]   ;;  %v24737_v62 = vld [vmem:[%s36349_s1 + $0x9c8] ss:$16 sps:$4 sm:$0xff]  }
 0x118   : > { %3188 = vmatprep.subr.bf16.mxu0 %v24670_v29  ;;  %3290 = vmatprep.subr.bf16.mxu1 %v24673_v30  ;;  %v24742_v29 = vld [vmem:[%s36349_s1 + $0x9e4] ss:$16 sps:$4 sm:$0xff]   ;;  %v24745_v30 = vld [vmem:[%s36349_s1 + $0x9ec] ss:$16 sps:$4 sm:$0xff]  }
 0x119   : > { %3214 = vmatprep.mubr.bf16.mxu0 %v2527_v33  ;;  %3316 = vmatprep.mubr.bf16.mxu1 %v2527_v33  ;;  %v24750_v33 = vld [vmem:[%s36349_s1 + $0xa04] ss:$16 sps:$4 sm:$0xff]  }
 0x11b   : > { %3189 = vmatpush1.bf16.msra.mxu0 %v24668_v54  ;;  %3291 = vmatpush1.bf16.msra.mxu1 %v24671_v32  ;;  %v2523_v54 = vrot.slane %v28064_v7, 1  ;;  %v24740_v32 = vld [vmem:[%s36349_s1 + $0x9e0] ss:$16 sps:$4 sm:$0xff]   ;;  %v24753_v7 = vld [vmem:[%s36349_s1 + $0xa0c] ss:$16 sps:$4 sm:$0xff]  }
 0x11c   : > { %3190 = vmatprep.subr.bf16.mxu0 %v24676_v34  ;;  %3292 = vmatprep.subr.bf16.mxu1 %v24679_v35  ;;  %v24748_v34 = vld [vmem:[%s36349_s1 + $0xa00] ss:$16 sps:$4 sm:$0xff]   ;;  %v24751_v35 = vld [vmem:[%s36349_s1 + $0xa08] ss:$16 sps:$4 sm:$0xff]  }
 0x11f   : > { %3191 = vmatpush1.bf16.msra.mxu0 %v24674_v37  ;;  %3293 = vmatpush1.bf16.msra.mxu1 %v24677_v38  ;;  %v2524_v37 = vsel %vm2521_vm1, %v2522_v21, %v2523_v54  ;;  %v28947_v38 = vld [vmem:[%s28009_s10 + $0x8] sm:$0xee] }
 0x120   : > { %3192 = vmatprep.subr.bf16.mxu0 %v24682_v39  ;;  %3294 = vmatprep.subr.bf16.mxu1 %v24685_v40  ;;  %v24756_v39 = vld [vmem:[%s36349_s1 + $0xa24] ss:$16 sps:$4 sm:$0xff]   ;;  %v24759_v40 = vld [vmem:[%s36349_s1 + $0xa2c] ss:$16 sps:$4 sm:$0xff]   ;;  %v24811_v21 = vld [vmem:[%s36349_s1 + $0xb48] ss:$16 sps:$4 sm:$0xff]  }
 0x123   : > { %3193 = vmatpush1.bf16.msra.mxu0 %v24680_v41  ;;  %3295 = vmatpush1.bf16.msra.mxu1 %v24683_v42  ;;  %v28956_v41 = vld [vmem:[%s28009_s10 + $0x18] sm:$0xff] }
 0x124   : > { %3194 = vmatprep.subr.bf16.mxu0 %v24688_v43  ;;  %3296 = vmatprep.subr.bf16.mxu1 %v24691_v44  ;;  %v20023_v42 = vcombine.high %v28947_v38, %v28956_v41  ;;  %v24754_v43 = vld [vmem:[%s36349_s1 + $0xa20] ss:$16 sps:$4 sm:$0xff]   ;;  %v24757_v44 = vld [vmem:[%s36349_s1 + $0xa28] ss:$16 sps:$4 sm:$0xff]  }
 0x127   : > { %3195 = vmatpush1.bf16.msra.mxu0 %v24686_v45  ;;  %3297 = vmatpush1.bf16.msra.mxu1 %v24689_v46  ;;  %v24762_v45 = vld [vmem:[%s36349_s1 + $0xa44] ss:$16 sps:$4 sm:$0xff]   ;;  %v24765_v46 = vld [vmem:[%s36349_s1 + $0xa4c] ss:$16 sps:$4 sm:$0xff]  }
 0x128   : > { %3196 = vmatprep.subr.bf16.mxu0 %v24694_v47  ;;  %3298 = vmatprep.subr.bf16.mxu1 %v24697_v48  ;;  %v2531_v47 = vrot.slane %v20023_v42, 1  ;;  %v28975_v48 = vrot.slane %v28198_v63, 1  ;;  %v24771_v63 = vld [vmem:[%s36349_s1 + $0xa6c] ss:$16 sps:$4 sm:$0xff]   ;;  %v24823_v42 = vld [vmem:[%s36349_s1 + $0xb88] ss:$16 sps:$4 sm:$0xff]  }
 0x129   : > { %v28832_v55 = vpop.f32.mrb[4].mxu0  ;;  %v28834_v56 = vpop.f32.mrb[4].mxu1 }
 0x12a   : > { %v28836_v57 = vpop.f32.mrb[5].mxu0  ;;  %v28838_v58 = vpop.f32.mrb[5].mxu1 }
 0x12b   : > { %3197 = vmatpush1.bf16.msra.mxu0 %v24692_v49  ;;  %3299 = vmatpush1.bf16.msra.mxu1 %v24695_v50  ;;  %v1368_v61 = vpop.f32.mrb[6].mxu0  ;;  %v1470_v1 = vpop.f32.mrb[6].mxu1  ;;  %v24760_v49 = vld [vmem:[%s36349_s1 + $0xa40] ss:$16 sps:$4 sm:$0xff]   ;;  %v24763_v50 = vld [vmem:[%s36349_s1 + $0xa48] ss:$16 sps:$4 sm:$0xff]  }
 0x12c   : > { %3198 = vmatprep.subr.bf16.mxu0 %v24700_v51  ;;  %3300 = vmatprep.subr.bf16.mxu1 %v24703_v52  ;;  %v1369_v4 = vpop.f32.mrb[7].mxu0  ;;  %v1471_v5 = vpop.f32.mrb[7].mxu1  ;;  %v2533_v51 = vsel %vm2521_vm1, %v2531_v47, %v28975_v48  ;;  %v24766_v52 = vld [vmem:[%s36349_s1 + $0xa60] ss:$16 sps:$4 sm:$0xff]   ;;  %v24777_v61 = vld [vmem:[%s36349_s1 + $0xa8c] ss:$16 sps:$4 sm:$0xff]  }
 0x12d   : > { %v24772_v1 = vld [vmem:[%s36349_s1 + $0xa80] ss:$16 sps:$4 sm:$0xff]   ;;  %v24783_v4 = vld [vmem:[%s36349_s1 + $0xaac] ss:$16 sps:$4 sm:$0xff]   ;;  %v24834_v47 = vld [vmem:[%s36349_s1 + $0xbc4] ss:$16 sps:$4 sm:$0xff]  }
 0x12e   : > { %v24778_v5 = vld [vmem:[%s36349_s1 + $0xaa0] ss:$16 sps:$4 sm:$0xff]  }
 0x12f   : > { %3199 = vmatpush1.bf16.msra.mxu0 %v24698_v59  ;;  %3301 = vmatpush1.bf16.msra.mxu1 %v24701_v60  ;;  %v24769_v59 = vld [vmem:[%s36349_s1 + $0xa68] ss:$16 sps:$4 sm:$0xff]   ;;  %v24774_v60 = vld [vmem:[%s36349_s1 + $0xa84] ss:$16 sps:$4 sm:$0xff]  }
 0x130   : > { %3200 = vmatprep.subr.bf16.mxu0 %v24706_v2  ;;  %3302 = vmatprep.subr.bf16.mxu1 %v24709_v3  ;;  %v24775_v2 = vld [vmem:[%s36349_s1 + $0xa88] ss:$16 sps:$4 sm:$0xff]   ;;  %v24780_v3 = vld [vmem:[%s36349_s1 + $0xaa4] ss:$16 sps:$4 sm:$0xff]  }
 0x133   : > { %3201 = vmatpush1.bf16.msra.mxu0 %v24704_v6  ;;  %3303 = vmatpush1.bf16.msra.mxu1 %v24707_v8  ;;  %v24781_v6 = vld [vmem:[%s36349_s1 + $0xaa8] ss:$16 sps:$4 sm:$0xff]   ;;  %v24786_v8 = vld [vmem:[%s36349_s1 + $0xac4] ss:$16 sps:$4 sm:$0xff]  }
 0x134   : > { %3202 = vmatprep.subr.bf16.mxu0 %v24712_v9  ;;  %3304 = vmatprep.subr.bf16.mxu1 %v24715_v10  ;;  %v24789_v9 = vld [vmem:[%s36349_s1 + $0xacc] ss:$16 sps:$4 sm:$0xff]   ;;  %v24784_v10 = vld [vmem:[%s36349_s1 + $0xac0] ss:$16 sps:$4 sm:$0xff]  }
 0x137   : > { %3203 = vmatpush1.bf16.msra.mxu0 %v24710_v11  ;;  %3305 = vmatpush1.bf16.msra.mxu1 %v24713_v12  ;;  %v24787_v11 = vld [vmem:[%s36349_s1 + $0xac8] ss:$16 sps:$4 sm:$0xff]   ;;  %v24792_v12 = vld [vmem:[%s36349_s1 + $0xae4] ss:$16 sps:$4 sm:$0xff]  }
 0x138   : > { %3204 = vmatprep.subr.bf16.mxu0 %v24718_v13  ;;  %3306 = vmatprep.subr.bf16.mxu1 %v24721_v14  ;;  %v24795_v13 = vld [vmem:[%s36349_s1 + $0xaec] ss:$16 sps:$4 sm:$0xff]   ;;  %v24790_v14 = vld [vmem:[%s36349_s1 + $0xae0] ss:$16 sps:$4 sm:$0xff]  }
 0x13b   : > { %3205 = vmatpush1.bf16.msra.mxu0 %v24716_v15  ;;  %3307 = vmatpush1.bf16.msra.mxu1 %v24719_v0  ;;  %v24793_v15 = vld [vmem:[%s36349_s1 + $0xae8] ss:$16 sps:$4 sm:$0xff]   ;;  %v24798_v0 = vld [vmem:[%s36349_s1 + $0xb04] ss:$16 sps:$4 sm:$0xff]  }
 0x13c   : > { %3206 = vmatprep.subr.bf16.mxu0 %v24724_v16  ;;  %3308 = vmatprep.subr.bf16.mxu1 %v24727_v18  ;;  %v24801_v16 = vld [vmem:[%s36349_s1 + $0xb0c] ss:$16 sps:$4 sm:$0xff]  }
 0x13f   : > { %3207 = vmatpush1.bf16.msra.mxu0 %v24722_v53  ;;  %3309 = vmatpush1.bf16.msra.mxu1 %v24725_v19 }
 0x140   : > { %3208 = vmatprep.subr.bf16.mxu0 %v24730_v20  ;;  %3310 = vmatprep.subr.bf16.mxu1 %v24733_v22 }
 0x143   : > { %3209 = vmatpush1.bf16.msra.mxu0 %v24728_v23  ;;  %3311 = vmatpush1.bf16.msra.mxu1 %v24731_v24 }
 0x144   : > { %3210 = vmatprep.subr.bf16.mxu0 %v24736_v31  ;;  %3312 = vmatprep.subr.bf16.mxu1 %v24739_v25  ;;  %v24796_v31 = vld [vmem:[%s36349_s1 + $0xb00] ss:$16 sps:$4 sm:$0xff]   ;;  %v24799_v25 = vld [vmem:[%s36349_s1 + $0xb08] ss:$16 sps:$4 sm:$0xff]  }
 0x147   : > { %3211 = vmatpush1.bf16.msra.mxu0 %v24734_v26  ;;  %3313 = vmatpush1.bf16.msra.mxu1 %v24737_v62  ;;  %v24807_v62 = vld [vmem:[%s36349_s1 + $0xb2c] ss:$16 sps:$4 sm:$0xff]  }
 0x148   : > { %3212 = vmatprep.subr.bf16.mxu0 %v24742_v29  ;;  %3314 = vmatprep.subr.bf16.mxu1 %v24745_v30  ;;  %v24805_v30 = vld [vmem:[%s36349_s1 + $0xb28] ss:$16 sps:$4 sm:$0xff]  }
 0x14b   : > { %3213 = vmatpush1.bf16.msra.mxu0 %v24740_v32  ;;  %3315 = vmatpush1.bf16.msra.mxu1 %v24743_v17  ;;  %v24813_v32 = vld [vmem:[%s36349_s1 + $0xb4c] ss:$16 sps:$4 sm:$0xff]   ;;  %v24808_v17 = vld [vmem:[%s36349_s1 + $0xb40] ss:$16 sps:$4 sm:$0xff]  }
 0x14c   : > { %3233 = vmatprep.subr.bf16.mxu0 %v24750_v33  ;;  %3335 = vmatprep.subr.bf16.mxu1 %v24753_v7  ;;  %v24816_v33 = vld [vmem:[%s36349_s1 + $0xb64] ss:$16 sps:$4 sm:$0xff]   ;;  %v24819_v7 = vld [vmem:[%s36349_s1 + $0xb6c] ss:$16 sps:$4 sm:$0xff]  }
 0x14e   : > { %3215 = vmatmul.mubr.bf16.vlgmr.msra.gmra.mrb[0].mxu0 %v2524_v37  ;;  %3317 = vmatmul.mubr.bf16.vlgmr.msra.gmra.mrb[0].mxu1 %v2524_v37  ;;  %v24822_v37 = vld [vmem:[%s36349_s1 + $0xb84] ss:$16 sps:$4 sm:$0xff]  }
 0x14f   : > { %3234 = vmatpush1.bf16.msra.mxu0 %v24748_v34  ;;  %3336 = vmatpush1.bf16.msra.mxu1 %v24751_v35  ;;  %v24814_v34 = vld [vmem:[%s36349_s1 + $0xb60] ss:$16 sps:$4 sm:$0xff]   ;;  %v24817_v35 = vld [vmem:[%s36349_s1 + $0xb68] ss:$16 sps:$4 sm:$0xff]  }
 0x150   : > { %3235 = vmatprep.subr.bf16.mxu0 %v24756_v39  ;;  %3337 = vmatprep.subr.bf16.mxu1 %v24759_v40  ;;  %v24825_v39 = vld [vmem:[%s36349_s1 + $0xb8c] ss:$16 sps:$4 sm:$0xff]   ;;  %v24820_v40 = vld [vmem:[%s36349_s1 + $0xb80] ss:$16 sps:$4 sm:$0xff]  }
 0x151   : > { %3224 = vmatprep.mubr.bf16.mxu0 %v28762_v28  ;;  %3326 = vmatprep.mubr.bf16.mxu1 %v28762_v28  ;;  %v24768_v28 = vld [vmem:[%s36349_s1 + $0xa64] ss:$16 sps:$4 sm:$0xff]  }
 0x153   : > { %3236 = vmatpush1.bf16.msra.mxu0 %v24754_v43  ;;  %3338 = vmatpush1.bf16.msra.mxu1 %v24757_v44  ;;  %v24828_v43 = vld [vmem:[%s36349_s1 + $0xba4] ss:$16 sps:$4 sm:$0xff]   ;;  %v24831_v44 = vld [vmem:[%s36349_s1 + $0xbac] ss:$16 sps:$4 sm:$0xff]  }
 0x154   : > { %3237 = vmatprep.subr.bf16.mxu0 %v24762_v45  ;;  %3339 = vmatprep.subr.bf16.mxu1 %v24765_v46  ;;  %v24826_v45 = vld [vmem:[%s36349_s1 + $0xba0] ss:$16 sps:$4 sm:$0xff]   ;;  %v24829_v46 = vld [vmem:[%s36349_s1 + $0xba8] ss:$16 sps:$4 sm:$0xff]  }
 0x156   : > { %3225 = vmatmul.mubr.bf16.gmra.mrb[20].mxu0 %v2523_v54  ;;  %3327 = vmatmul.mubr.bf16.gmra.mrb[20].mxu1 %v2523_v54  ;;  %v24810_v54 = vld [vmem:[%s36349_s1 + $0xb44] ss:$16 sps:$4 sm:$0xff]  }
 0x157   : > { %3238 = vmatpush1.bf16.msra.mxu0 %v24760_v49  ;;  %3340 = vmatpush1.bf16.msra.mxu1 %v24763_v50  ;;  %v24837_v49 = vld [vmem:[%s36349_s1 + $0xbcc] ss:$16 sps:$4 sm:$0xff]   ;;  %v24832_v50 = vld [vmem:[%s36349_s1 + $0xbc0] ss:$16 sps:$4 sm:$0xff]  }
 0x158   : > { %3239 = vmatprep.subr.bf16.mxu0 %v24768_v28  ;;  %3341 = vmatprep.subr.bf16.mxu1 %v24771_v63  ;;  %v24835_v28 = vld [vmem:[%s36349_s1 + $0xbc8] ss:$16 sps:$4 sm:$0xff]   ;;  %v20022_v63 = vcombine.low %v28947_v38, %v28956_v41 }
 0x159   : > { %3265 = vmatprep.mubr.bf16.mxu0 %v2533_v51  ;;  %3367 = vmatprep.mubr.bf16.mxu1 %v2533_v51  ;;  %v24840_v51 = vld [vmem:[%s36349_s1 + $0xbe4] ss:$16 sps:$4 sm:$0xff]   ;;  %v24841_v38 = vld [vmem:[%s36349_s1 + $0xbe8] ss:$16 sps:$4 sm:$0xff]  }
 0x15a   : > { %v2528_v41 = vrot.slane %v20022_v63, 1 }
 0x15b   : > { %3240 = vmatpush1.bf16.msra.mxu0 %v24766_v52  ;;  %3342 = vmatpush1.bf16.msra.mxu1 %v24769_v59  ;;  %v24843_v52 = vld [vmem:[%s36349_s1 + $0xbec] ss:$16 sps:$4 sm:$0xff]   ;;  %v24838_v59 = vld [vmem:[%s36349_s1 + $0xbe0] ss:$16 sps:$4 sm:$0xff]  }
 0x15c   : > { %3241 = vmatprep.subr.bf16.mxu0 %v24774_v60  ;;  %3343 = vmatprep.subr.bf16.mxu1 %v24777_v61  ;;  %v2529_v60 = vrot.slane %v28290_v36, 1  ;;  %v24848_v61 = vld [vmem:[%s36349_s1 + $0xc04] ss:$16 sps:$4 sm:$0xff]   ;;  %v24849_v36 = vld [vmem:[%s36349_s1 + $0xc08] ss:$16 sps:$4 sm:$0xff]  }
 0x15f   : > { %3242 = vmatpush1.bf16.msra.mxu0 %v24772_v1  ;;  %3344 = vmatpush1.bf16.msra.mxu1 %v24775_v2  ;;  %v24851_v1 = vld [vmem:[%s36349_s1 + $0xc0c] ss:$16 sps:$4 sm:$0xff]   ;;  %v24846_v2 = vld [vmem:[%s36349_s1 + $0xc00] ss:$16 sps:$4 sm:$0xff]  }
 0x160   : > { %3243 = vmatprep.subr.bf16.mxu0 %v24780_v3  ;;  %3345 = vmatprep.subr.bf16.mxu1 %v24783_v4  ;;  %v29169_v3 = vld [vmem:[%s28009_s10] sm:$0x88]  ;;  %v29172_v4 = vld [vmem:[%s28009_s10 + $0x30] sm:$0x77] }
 0x163   : > { %3244 = vmatpush1.bf16.msra.mxu0 %v24778_v5  ;;  %3346 = vmatpush1.bf16.msra.mxu1 %v24781_v6  ;;  %v2530_v5 = vsel %vm2521_vm1, %v2528_v41, %v2529_v60  ;;  %v24854_v6 = vld [vmem:[%s36349_s1 + $0xc24] ss:$16 sps:$4 sm:$0xff]  }
 0x164   : > { %3245 = vmatprep.subr.bf16.mxu0 %v24786_v8  ;;  %3347 = vmatprep.subr.bf16.mxu1 %v24789_v9  ;;  %v24857_v8 = vld [vmem:[%s36349_s1 + $0xc2c] ss:$16 sps:$4 sm:$0xff]   ;;  %v29182_v9 = vld [vmem:[%s28009_s10 + $0x10] sm:$0xff] }
 0x165   : > { %v24908_v41 = vld [vmem:[%s36349_s1 + $0xd44] ss:$16 sps:$4 sm:$0xff]  }
 0x167   : > { %3246 = vmatpush1.bf16.msra.mxu0 %v24784_v10  ;;  %3348 = vmatpush1.bf16.msra.mxu1 %v24787_v11  ;;  %v29186_v10 = vcombine.high %v29169_v3, %v29182_v9  ;;  %v29189_v11 = vld [vmem:[%s28009_s10 + $0x20] sm:$0xff] }
 0x168   : > { %3247 = vmatprep.subr.bf16.mxu0 %v24792_v12  ;;  %3349 = vmatprep.subr.bf16.mxu1 %v24795_v13  ;;  %v20285_v12 = vcombine.high %v29189_v11, %v29172_v4  ;;  %v24852_v13 = vld [vmem:[%s36349_s1 + $0xc20] ss:$16 sps:$4 sm:$0xff]  }
 0x169   : > { %v1415_v18 = vpop.f32.mrb[8].mxu0  ;;  %v1517_v53 = vpop.f32.mrb[8].mxu1 }
 0x16a   : > { %v29052_v19 = vadd.f32 %v1415_v18, %v28832_v55  ;;  %v1417_v20 = vpop.f32.mrb[9].mxu0  ;;  %v29055_v22 = vadd.f32 %v1517_v53, %v28834_v56  ;;  %v1519_v23 = vpop.f32.mrb[9].mxu1  ;;  %v24861_v18 = vld [vmem:[%s36349_s1 + $0xc48] ss:$16 sps:$4 sm:$0xff]   ;;  %v3555_v53 = vrot.slane %v29186_v10, 3 }
 0x16b   : > { %v29058_v24 = vadd.f32 %v1417_v20, %v28836_v57  ;;  %3248 = vmatpush1.bf16.msra.mxu0 %v24790_v14  ;;  %3350 = vmatpush1.bf16.msra.mxu1 %v24793_v15  ;;  %v1419_v55 = vpop.f32.mrb[10].mxu0  ;;  %v29067_v26 = vadd.f32 %v1519_v23, %v28838_v58  ;;  %v1521_v56 = vpop.f32.mrb[10].mxu1  ;;  %v24804_v57 = vld [vmem:[%s36349_s1 + $0xb24] ss:$16 sps:$4 sm:$0xff]   ;;  %v24802_v58 = vld [vmem:[%s36349_s1 + $0xb20] ss:$16 sps:$4 sm:$0xff]  }
 0x16c   : > { %3249 = vmatprep.subr.bf16.mxu0 %v24798_v0  ;;  %3351 = vmatprep.subr.bf16.mxu1 %v24801_v16  ;;  %v1420_v27 = vpop.f32.mrb[11].mxu0  ;;  %v1522_v29 = vpop.f32.mrb[11].mxu1  ;;  %v24855_v14 = vld [vmem:[%s36349_s1 + $0xc28] ss:$16 sps:$4 sm:$0xff]   ;;  %v24860_v15 = vld [vmem:[%s36349_s1 + $0xc44] ss:$16 sps:$4 sm:$0xff]  }
 0x16d   : > { %v24863_v0 = vld [vmem:[%s36349_s1 + $0xc4c] ss:$16 sps:$4 sm:$0xff]   ;;  %v24858_v16 = vld [vmem:[%s36349_s1 + $0xc40] ss:$16 sps:$4 sm:$0xff]   ;;  %v29214_v20 = vrot.slane %v20285_v12, 3 }
 0x16e   : > { %v24869_v23 = vld [vmem:[%s36349_s1 + $0xc6c] ss:$16 sps:$4 sm:$0xff]   ;;  %v24867_v55 = vld [vmem:[%s36349_s1 + $0xc68] ss:$16 sps:$4 sm:$0xff]   ;;  %v24872_v56 = vld [vmem:[%s36349_s1 + $0xc84] ss:$16 sps:$4 sm:$0xff]  }
 0x16f   : > { %3250 = vmatpush1.bf16.msra.mxu0 %v24796_v31  ;;  %3352 = vmatpush1.bf16.msra.mxu1 %v24799_v25  ;;  %v3557_v31 = vsel %vm3551_vm2, %v3555_v53, %v29214_v20  ;;  %v24864_v25 = vld [vmem:[%s36349_s1 + $0xc60] ss:$16 sps:$4 sm:$0xff]   ;;  %v24873_v27 = vld [vmem:[%s36349_s1 + $0xc88] ss:$16 sps:$4 sm:$0xff]   ;;  %v24878_v29 = vld [vmem:[%s36349_s1 + $0xca4] ss:$16 sps:$4 sm:$0xff]  }
 0x170   : > { %3251 = vmatprep.subr.bf16.mxu0 %v24804_v57  ;;  %3353 = vmatprep.subr.bf16.mxu1 %v24807_v62  ;;  %v24875_v57 = vld [vmem:[%s36349_s1 + $0xc8c] ss:$16 sps:$4 sm:$0xff]   ;;  %v24870_v62 = vld [vmem:[%s36349_s1 + $0xc80] ss:$16 sps:$4 sm:$0xff]   ;;  %v24932_v53 = vld [vmem:[%s36349_s1 + $0xdc4] ss:$16 sps:$4 sm:$0xff]  }
 0x171   : > { %v24923_v12 = vld [vmem:[%s36349_s1 + $0xd8c] ss:$16 sps:$4 sm:$0xff]  }
 0x173   : > { %3252 = vmatpush1.bf16.msra.mxu0 %v24802_v58  ;;  %3354 = vmatpush1.bf16.msra.mxu1 %v24805_v30  ;;  %v24881_v58 = vld [vmem:[%s36349_s1 + $0xcac] ss:$16 sps:$4 sm:$0xff]   ;;  %v24876_v30 = vld [vmem:[%s36349_s1 + $0xca0] ss:$16 sps:$4 sm:$0xff]  }
 0x174   : > { %3253 = vmatprep.subr.bf16.mxu0 %v24810_v54  ;;  %3355 = vmatprep.subr.bf16.mxu1 %v24813_v32  ;;  %v24879_v54 = vld [vmem:[%s36349_s1 + $0xca8] ss:$16 sps:$4 sm:$0xff]   ;;  %v24884_v32 = vld [vmem:[%s36349_s1 + $0xcc4] ss:$16 sps:$4 sm:$0xff]  }
 0x177   : > { %3254 = vmatpush1.bf16.msra.mxu0 %v24808_v17  ;;  %3356 = vmatpush1.bf16.msra.mxu1 %v24811_v21  ;;  %v24887_v17 = vld [vmem:[%s36349_s1 + $0xccc] ss:$16 sps:$4 sm:$0xff]   ;;  %v24882_v21 = vld [vmem:[%s36349_s1 + $0xcc0] ss:$16 sps:$4 sm:$0xff]  }
 0x178   : > { %3255 = vmatprep.subr.bf16.mxu0 %v24816_v33  ;;  %3357 = vmatprep.subr.bf16.mxu1 %v24819_v7  ;;  %v24885_v33 = vld [vmem:[%s36349_s1 + $0xcc8] ss:$16 sps:$4 sm:$0xff]   ;;  %v24890_v7 = vld [vmem:[%s36349_s1 + $0xce4] ss:$16 sps:$4 sm:$0xff]  }
 0x17b   : > { %3256 = vmatpush1.bf16.msra.mxu0 %v24814_v34  ;;  %3358 = vmatpush1.bf16.msra.mxu1 %v24817_v35  ;;  %v24893_v34 = vld [vmem:[%s36349_s1 + $0xcec] ss:$16 sps:$4 sm:$0xff]   ;;  %v24888_v35 = vld [vmem:[%s36349_s1 + $0xce0] ss:$16 sps:$4 sm:$0xff]  }
 0x17c   : > { %3257 = vmatprep.subr.bf16.mxu0 %v24822_v37  ;;  %3359 = vmatprep.subr.bf16.mxu1 %v24825_v39  ;;  %v24891_v37 = vld [vmem:[%s36349_s1 + $0xce8] ss:$16 sps:$4 sm:$0xff]   ;;  %v24896_v39 = vld [vmem:[%s36349_s1 + $0xd04] ss:$16 sps:$4 sm:$0xff]  }
 0x17f   : > { %3258 = vmatpush1.bf16.msra.mxu0 %v24820_v40  ;;  %3360 = vmatpush1.bf16.msra.mxu1 %v24823_v42  ;;  %v24899_v40 = vld [vmem:[%s36349_s1 + $0xd0c] ss:$16 sps:$4 sm:$0xff]  }
 0x180   : > { %3259 = vmatprep.subr.bf16.mxu0 %v24828_v43  ;;  %3361 = vmatprep.subr.bf16.mxu1 %v24831_v44 }
 0x183   : > { %3260 = vmatpush1.bf16.msra.mxu0 %v24826_v45  ;;  %3362 = vmatpush1.bf16.msra.mxu1 %v24829_v46 }
 0x184   : > { %3261 = vmatprep.subr.bf16.mxu0 %v24834_v47  ;;  %3363 = vmatprep.subr.bf16.mxu1 %v24837_v49 }
 0x187   : > { %3262 = vmatpush1.bf16.msra.mxu0 %v24832_v50  ;;  %3364 = vmatpush1.bf16.msra.mxu1 %v24835_v28  ;;  %v24894_v28 = vld [vmem:[%s36349_s1 + $0xd00] ss:$16 sps:$4 sm:$0xff]  }
 0x188   : > { %3263 = vmatprep.subr.bf16.mxu0 %v24840_v51  ;;  %3365 = vmatprep.subr.bf16.mxu1 %v24843_v52 }
 0x18b   : > { %3264 = vmatpush1.bf16.msra.mxu0 %v24838_v59  ;;  %3366 = vmatpush1.bf16.msra.mxu1 %v24841_v38  ;;  %v24900_v59 = vld [vmem:[%s36349_s1 + $0xd20] ss:$16 sps:$4 sm:$0xff]   ;;  %v24903_v38 = vld [vmem:[%s36349_s1 + $0xd28] ss:$16 sps:$4 sm:$0xff]  }
 0x18c   : > { %4212 = vmatprep.subr.bf16.mxu0 %v24848_v61  ;;  %4314 = vmatprep.subr.bf16.mxu1 %v24851_v1  ;;  %v24906_v61 = vld [vmem:[%s36349_s1 + $0xd40] ss:$16 sps:$4 sm:$0xff]   ;;  %v24909_v1 = vld [vmem:[%s36349_s1 + $0xd48] ss:$16 sps:$4 sm:$0xff]  }
 0x18e   : > { %3266 = vmatmul.mubr.bf16.vlgmr.msra.gmra.mrb[0].mxu0 %v2530_v5  ;;  %3368 = vmatmul.mubr.bf16.vlgmr.msra.gmra.mrb[0].mxu1 %v2530_v5  ;;  %v24912_v5 = vld [vmem:[%s36349_s1 + $0xd60] ss:$16 sps:$4 sm:$0xff]  }
 0x18f   : > { %4213 = vmatpush1.bf16.msra.mxu0 %v24846_v2  ;;  %4315 = vmatpush1.bf16.msra.mxu1 %v24849_v36  ;;  %v24914_v2 = vld [vmem:[%s36349_s1 + $0xd64] ss:$16 sps:$4 sm:$0xff]   ;;  %v24917_v36 = vld [vmem:[%s36349_s1 + $0xd6c] ss:$16 sps:$4 sm:$0xff]  }
 0x190   : > { %4214 = vmatprep.subr.bf16.mxu0 %v24854_v6  ;;  %4316 = vmatprep.subr.bf16.mxu1 %v24857_v8  ;;  %v24915_v6 = vld [vmem:[%s36349_s1 + $0xd68] ss:$16 sps:$4 sm:$0xff]   ;;  %v24920_v8 = vld [vmem:[%s36349_s1 + $0xd84] ss:$16 sps:$4 sm:$0xff]  }
 0x191   : > { %3275 = vmatprep.mubr.bf16.mxu0 %v28975_v48  ;;  %3377 = vmatprep.mubr.bf16.mxu1 %v28975_v48  ;;  %v24866_v48 = vld [vmem:[%s36349_s1 + $0xc64] ss:$16 sps:$4 sm:$0xff]  }
 0x193   : > { %4215 = vmatpush1.bf16.msra.mxu0 %v24852_v13  ;;  %4317 = vmatpush1.bf16.msra.mxu1 %v24855_v14  ;;  %v24918_v13 = vld [vmem:[%s36349_s1 + $0xd80] ss:$16 sps:$4 sm:$0xff]   ;;  %v24921_v14 = vld [vmem:[%s36349_s1 + $0xd88] ss:$16 sps:$4 sm:$0xff]  }
 0x194   : > { %4216 = vmatprep.subr.bf16.mxu0 %v24860_v15  ;;  %4318 = vmatprep.subr.bf16.mxu1 %v24863_v0  ;;  %v24926_v15 = vld [vmem:[%s36349_s1 + $0xda4] ss:$16 sps:$4 sm:$0xff]   ;;  %v24929_v0 = vld [vmem:[%s36349_s1 + $0xdac] ss:$16 sps:$4 sm:$0xff]  }
 0x196   : > { %3276 = vmatmul.mubr.bf16.gmra.mrb[24].mxu0 %v2529_v60  ;;  %3378 = vmatmul.mubr.bf16.gmra.mrb[24].mxu1 %v2529_v60  ;;  %v24911_v60 = vld [vmem:[%s36349_s1 + $0xd4c] ss:$16 sps:$4 sm:$0xff]  }
 0x197   : > { %4217 = vmatpush1.bf16.msra.mxu0 %v24858_v16  ;;  %4319 = vmatpush1.bf16.msra.mxu1 %v24861_v18  ;;  %v24924_v16 = vld [vmem:[%s36349_s1 + $0xda0] ss:$16 sps:$4 sm:$0xff]   ;;  %v24927_v18 = vld [vmem:[%s36349_s1 + $0xda8] ss:$16 sps:$4 sm:$0xff]  }
 0x198   : > { %4218 = vmatprep.subr.bf16.mxu0 %v24866_v48  ;;  %4320 = vmatprep.subr.bf16.mxu1 %v24869_v23  ;;  %v24935_v48 = vld [vmem:[%s36349_s1 + $0xdcc] ss:$16 sps:$4 sm:$0xff]   ;;  %v24930_v23 = vld [vmem:[%s36349_s1 + $0xdc0] ss:$16 sps:$4 sm:$0xff]  }
 0x199   : > { %4244 = vmatprep.mubr.bf16.mxu0 %v3557_v31  ;;  %4346 = vmatprep.mubr.bf16.mxu1 %v3557_v31  ;;  %v24933_v31 = vld [vmem:[%s36349_s1 + $0xdc8] ss:$16 sps:$4 sm:$0xff]  }
 0x19b   : > { %4219 = vmatpush1.bf16.msra.mxu0 %v24864_v25  ;;  %4321 = vmatpush1.bf16.msra.mxu1 %v24867_v55  ;;  %v29376_v25 = vcombine.low %v29169_v3, %v29182_v9  ;;  %v20284_v55 = vcombine.low %v29189_v11, %v29172_v4  ;;  %v24936_v3 = vld [vmem:[%s36349_s1 + $0xde0] ss:$16 sps:$4 sm:$0xff]   ;;  %v24939_v4 = vld [vmem:[%s36349_s1 + $0xde8] ss:$16 sps:$4 sm:$0xff]  }
 0x19c   : > { %4220 = vmatprep.subr.bf16.mxu0 %v24872_v56  ;;  %4322 = vmatprep.subr.bf16.mxu1 %v24875_v57  ;;  %v24938_v56 = vld [vmem:[%s36349_s1 + $0xde4] ss:$16 sps:$4 sm:$0xff]   ;;  %v24941_v57 = vld [vmem:[%s36349_s1 + $0xdec] ss:$16 sps:$4 sm:$0xff]  }
 0x19d   : > { %v3553_v9 = vrot.slane %v20284_v55, 3  ;;  %v3552_v11 = vrot.slane %v29376_v25, 3 }
 0x19f   : > { %4221 = vmatpush1.bf16.msra.mxu0 %v24870_v62  ;;  %4323 = vmatpush1.bf16.msra.mxu1 %v24873_v27  ;;  %v24948_v62 = vld [vmem:[%s36349_s1 + $0xe04] ss:$16 sps:$4 sm:$0xff]   ;;  %v24951_v27 = vld [vmem:[%s36349_s1 + $0xe0c] ss:$16 sps:$4 sm:$0xff]  }
 0x1a0   : > { %4222 = vmatprep.subr.bf16.mxu0 %v24878_v29  ;;  %4324 = vmatprep.subr.bf16.mxu1 %v24881_v58  ;;  %v24946_v29 = vld [vmem:[%s36349_s1 + $0xe00] ss:$16 sps:$4 sm:$0xff]   ;;  %v24949_v58 = vld [vmem:[%s36349_s1 + $0xe08] ss:$16 sps:$4 sm:$0xff]  }
 0x1a3   : > { %4223 = vmatpush1.bf16.msra.mxu0 %v24876_v30  ;;  %4325 = vmatpush1.bf16.msra.mxu1 %v24879_v54  ;;  %v3554_v30 = vsel %vm3551_vm2, %v3552_v11, %v3553_v9  ;;  %v29407_v54 = vld [vmem:[%s28009_s10 + $0x8] sm:$0x88] }
 0x1a4   : > { %4224 = vmatprep.subr.bf16.mxu0 %v24884_v32  ;;  %4326 = vmatprep.subr.bf16.mxu1 %v24887_v17  ;;  %v29410_v32 = vld [vmem:[%s28009_s10 + $0x38] sm:$0x77]  ;;  %v24954_v17 = vld [vmem:[%s36349_s1 + $0xe24] ss:$16 sps:$4 sm:$0xff]  }
 0x1a5   : > { %v25003_v11 = vld [vmem:[%s36349_s1 + $0xf28] ss:$16 sps:$4 sm:$0xff]  }
 0x1a7   : > { %4225 = vmatpush1.bf16.msra.mxu0 %v24882_v21  ;;  %4327 = vmatpush1.bf16.msra.mxu1 %v24885_v33  ;;  %v24957_v21 = vld [vmem:[%s36349_s1 + $0xe2c] ss:$16 sps:$4 sm:$0xff]  }
 0x1a8   : > { %4226 = vmatprep.subr.bf16.mxu0 %v24890_v7  ;;  %4328 = vmatprep.subr.bf16.mxu1 %v24893_v34  ;;  %v29419_v33 = vld [vmem:[%s28009_s10 + $0x18] sm:$0xff]  ;;  %v29426_v34 = vld [vmem:[%s28009_s10 + $0x28] sm:$0xff] }
 0x1a9   : > { %v2220_v42 = vpop.f32.mrb[12].mxu0  ;;  %v2322_v43 = vpop.f32.mrb[12].mxu1  ;;  %v29423_v7 = vcombine.high %v29407_v54, %v29419_v33 }
 0x1aa   : > { %v29285_v44 = vadd.f32 %v2220_v42, %v29052_v19  ;;  %v29288_v45 = vadd.f32 %v2322_v43, %v29055_v22  ;;  %v2222_v46 = vpop.f32.mrb[13].mxu0  ;;  %v2324_v47 = vpop.f32.mrb[13].mxu1  ;;  %v24897_v19 = vld [vmem:[%s36349_s1 + $0xd08] ss:$16 sps:$4 sm:$0xff]   ;;  %v24963_v42 = vld [vmem:[%s36349_s1 + $0xe4c] ss:$16 sps:$4 sm:$0xff]  }
 0x1ab   : > { %v29291_v49 = vadd.f32 %v2222_v46, %v29058_v24  ;;  %v29294_v50 = vadd.f32 %v2324_v47, %v29067_v26  ;;  %4227 = vmatpush1.bf16.msra.mxu0 %v24888_v35  ;;  %4329 = vmatpush1.bf16.msra.mxu1 %v24891_v37  ;;  %v2224_v22 = vpop.f32.mrb[14].mxu0  ;;  %v2326_v63 = vpop.f32.mrb[14].mxu1  ;;  %v24902_v24 = vld [vmem:[%s36349_s1 + $0xd24] ss:$16 sps:$4 sm:$0xff]   ;;  %v24905_v26 = vld [vmem:[%s36349_s1 + $0xd2c] ss:$16 sps:$4 sm:$0xff]   ;;  %v20287_v35 = vcombine.high %v29426_v34, %v29410_v32 }
 0x1ac   : > { %4228 = vmatprep.subr.bf16.mxu0 %v24896_v39  ;;  %4330 = vmatprep.subr.bf16.mxu1 %v24899_v40  ;;  %v2225_v51 = vpop.f32.mrb[15].mxu0  ;;  %v2327_v52 = vpop.f32.mrb[15].mxu1  ;;  %v24952_v37 = vld [vmem:[%s36349_s1 + $0xe20] ss:$16 sps:$4 sm:$0xff]   ;;  %v24955_v39 = vld [vmem:[%s36349_s1 + $0xe28] ss:$16 sps:$4 sm:$0xff]  }
 0x1ad   : > { %v24960_v40 = vld [vmem:[%s36349_s1 + $0xe44] ss:$16 sps:$4 sm:$0xff]   ;;  %v3561_v43 = vrot.slane %v29423_v7, 3  ;;  %v29445_v46 = vrot.slane %v20287_v35, 3  ;;  %v24958_v47 = vld [vmem:[%s36349_s1 + $0xe40] ss:$16 sps:$4 sm:$0xff]  }
 0x1ae   : > { %v24964_v63 = vld [vmem:[%s36349_s1 + $0xe60] ss:$16 sps:$4 sm:$0xff]   ;;  %v24975_v51 = vld [vmem:[%s36349_s1 + $0xe8c] ss:$16 sps:$4 sm:$0xff]   ;;  %v25015_v35 = vld [vmem:[%s36349_s1 + $0xf68] ss:$16 sps:$4 sm:$0xff]  }
 0x1af   : > { %4229 = vmatpush1.bf16.msra.mxu0 %v24894_v28  ;;  %4331 = vmatpush1.bf16.msra.mxu1 %v24897_v19  ;;  %v24961_v28 = vld [vmem:[%s36349_s1 + $0xe48] ss:$16 sps:$4 sm:$0xff]   ;;  %v24969_v19 = vld [vmem:[%s36349_s1 + $0xe6c] ss:$16 sps:$4 sm:$0xff]   ;;  %v3563_v22 = vsel %vm3551_vm2, %v3561_v43, %v29445_v46  ;;  %v24970_v52 = vld [vmem:[%s36349_s1 + $0xe80] ss:$16 sps:$4 sm:$0xff]  }
 0x1b0   : > { %4230 = vmatprep.subr.bf16.mxu0 %v24902_v24  ;;  %4332 = vmatprep.subr.bf16.mxu1 %v24905_v26  ;;  %v24967_v24 = vld [vmem:[%s36349_s1 + $0xe68] ss:$16 sps:$4 sm:$0xff]   ;;  %v24972_v26 = vld [vmem:[%s36349_s1 + $0xe84] ss:$16 sps:$4 sm:$0xff]  }
 0x1b1   : > { %v25026_v43 = vld [vmem:[%s36349_s1 + $0xfa4] ss:$16 sps:$4 sm:$0xff]  }
 0x1b3   : > { %4231 = vmatpush1.bf16.msra.mxu0 %v24900_v59  ;;  %4333 = vmatpush1.bf16.msra.mxu1 %v24903_v38  ;;  %v24973_v59 = vld [vmem:[%s36349_s1 + $0xe88] ss:$16 sps:$4 sm:$0xff]   ;;  %v24978_v38 = vld [vmem:[%s36349_s1 + $0xea4] ss:$16 sps:$4 sm:$0xff]  }
 0x1b4   : > { %4232 = vmatprep.subr.bf16.mxu0 %v24908_v41  ;;  %4334 = vmatprep.subr.bf16.mxu1 %v24911_v60  ;;  %v24981_v41 = vld [vmem:[%s36349_s1 + $0xeac] ss:$16 sps:$4 sm:$0xff]   ;;  %v24976_v60 = vld [vmem:[%s36349_s1 + $0xea0] ss:$16 sps:$4 sm:$0xff]  }
 0x1b7   : > { %4233 = vmatpush1.bf16.msra.mxu0 %v24906_v61  ;;  %4335 = vmatpush1.bf16.msra.mxu1 %v24909_v1  ;;  %v24979_v61 = vld [vmem:[%s36349_s1 + $0xea8] ss:$16 sps:$4 sm:$0xff]   ;;  %v24984_v1 = vld [vmem:[%s36349_s1 + $0xec4] ss:$16 sps:$4 sm:$0xff]  }
 0x1b8   : > { %4234 = vmatprep.subr.bf16.mxu0 %v24914_v2  ;;  %4336 = vmatprep.subr.bf16.mxu1 %v24917_v36  ;;  %v24987_v2 = vld [vmem:[%s36349_s1 + $0xecc] ss:$16 sps:$4 sm:$0xff]   ;;  %v24982_v36 = vld [vmem:[%s36349_s1 + $0xec0] ss:$16 sps:$4 sm:$0xff]  }
 0x1bb   : > { %4235 = vmatpush1.bf16.msra.mxu0 %v24912_v5  ;;  %4337 = vmatpush1.bf16.msra.mxu1 %v24915_v6  ;;  %v24985_v5 = vld [vmem:[%s36349_s1 + $0xec8] ss:$16 sps:$4 sm:$0xff]   ;;  %v24990_v6 = vld [vmem:[%s36349_s1 + $0xee4] ss:$16 sps:$4 sm:$0xff]  }
 0x1bc   : > { %4236 = vmatprep.subr.bf16.mxu0 %v24920_v8  ;;  %4338 = vmatprep.subr.bf16.mxu1 %v24923_v12  ;;  %v24993_v8 = vld [vmem:[%s36349_s1 + $0xeec] ss:$16 sps:$4 sm:$0xff]   ;;  %v24988_v12 = vld [vmem:[%s36349_s1 + $0xee0] ss:$16 sps:$4 sm:$0xff]  }
 0x1bf   : > { %4237 = vmatpush1.bf16.msra.mxu0 %v24918_v13  ;;  %4339 = vmatpush1.bf16.msra.mxu1 %v24921_v14  ;;  %v24991_v13 = vld [vmem:[%s36349_s1 + $0xee8] ss:$16 sps:$4 sm:$0xff]   ;;  %v24996_v14 = vld [vmem:[%s36349_s1 + $0xf04] ss:$16 sps:$4 sm:$0xff]  }
 0x1c0   : > { %4238 = vmatprep.subr.bf16.mxu0 %v24926_v15  ;;  %4340 = vmatprep.subr.bf16.mxu1 %v24929_v0  ;;  %v24999_v15 = vld [vmem:[%s36349_s1 + $0xf0c] ss:$16 sps:$4 sm:$0xff]  }
 0x1c3   : > { %4239 = vmatpush1.bf16.msra.mxu0 %v24924_v16  ;;  %4341 = vmatpush1.bf16.msra.mxu1 %v24927_v18  ;;  %v24994_v18 = vld [vmem:[%s36349_s1 + $0xf00] ss:$16 sps:$4 sm:$0xff]  }
 0x1c4   : > { %4240 = vmatprep.subr.bf16.mxu0 %v24932_v53  ;;  %4342 = vmatprep.subr.bf16.mxu1 %v24935_v48  ;;  %v24997_v53 = vld [vmem:[%s36349_s1 + $0xf08] ss:$16 sps:$4 sm:$0xff]  }
 0x1c7   : > { %4241 = vmatpush1.bf16.msra.mxu0 %v24930_v23  ;;  %4343 = vmatpush1.bf16.msra.mxu1 %v24933_v31 }
 0x1c8   : > { %4242 = vmatprep.subr.bf16.mxu0 %v24938_v56  ;;  %4344 = vmatprep.subr.bf16.mxu1 %v24941_v57 }
 0x1cb   : > { %4243 = vmatpush1.bf16.msra.mxu0 %v24936_v3  ;;  %4345 = vmatpush1.bf16.msra.mxu1 %v24939_v4 }
 0x1cc   : > { %4263 = vmatprep.subr.bf16.mxu0 %v24948_v62  ;;  %4365 = vmatprep.subr.bf16.mxu1 %v24951_v27  ;;  %v25008_v62 = vld [vmem:[%s36349_s1 + $0xf44] ss:$16 sps:$4 sm:$0xff]   ;;  %v25011_v27 = vld [vmem:[%s36349_s1 + $0xf4c] ss:$16 sps:$4 sm:$0xff]  }
 0x1ce   : > { %4245 = vmatmul.mubr.bf16.vlgmr.msra.gmra.mrb[0].mxu0 %v3554_v30  ;;  %4347 = vmatmul.mubr.bf16.vlgmr.msra.gmra.mrb[0].mxu1 %v3554_v30  ;;  %v25014_v30 = vld [vmem:[%s36349_s1 + $0xf64] ss:$16 sps:$4 sm:$0xff]  }
 0x1cf   : > { %4264 = vmatpush1.bf16.msra.mxu0 %v24946_v29  ;;  %4366 = vmatpush1.bf16.msra.mxu1 %v24949_v58  ;;  %v25006_v29 = vld [vmem:[%s36349_s1 + $0xf40] ss:$16 sps:$4 sm:$0xff]   ;;  %v25009_v58 = vld [vmem:[%s36349_s1 + $0xf48] ss:$16 sps:$4 sm:$0xff]  }
 0x1d0   : > { %4265 = vmatprep.subr.bf16.mxu0 %v24954_v17  ;;  %4367 = vmatprep.subr.bf16.mxu1 %v24957_v21  ;;  %v25017_v17 = vld [vmem:[%s36349_s1 + $0xf6c] ss:$16 sps:$4 sm:$0xff]   ;;  %v25012_v21 = vld [vmem:[%s36349_s1 + $0xf60] ss:$16 sps:$4 sm:$0xff]  }
 0x1d1   : > { %4254 = vmatprep.mubr.bf16.mxu0 %v29214_v20  ;;  %4356 = vmatprep.mubr.bf16.mxu1 %v29214_v20  ;;  %v24966_v20 = vld [vmem:[%s36349_s1 + $0xe64] ss:$16 sps:$4 sm:$0xff]  }
 0x1d3   : > { %4266 = vmatpush1.bf16.msra.mxu0 %v24952_v37  ;;  %4368 = vmatpush1.bf16.msra.mxu1 %v24955_v39  ;;  %v25020_v37 = vld [vmem:[%s36349_s1 + $0xf84] ss:$16 sps:$4 sm:$0xff]   ;;  %v25023_v39 = vld [vmem:[%s36349_s1 + $0xf8c] ss:$16 sps:$4 sm:$0xff]  }
 0x1d4   : > { %4267 = vmatprep.subr.bf16.mxu0 %v24960_v40  ;;  %4369 = vmatprep.subr.bf16.mxu1 %v24963_v42  ;;  %v25018_v40 = vld [vmem:[%s36349_s1 + $0xf80] ss:$16 sps:$4 sm:$0xff]   ;;  %v25021_v42 = vld [vmem:[%s36349_s1 + $0xf88] ss:$16 sps:$4 sm:$0xff]  }
 0x1d6   : > { %4255 = vmatmul.mubr.bf16.gmra.mrb[28].mxu0 %v3553_v9  ;;  %4357 = vmatmul.mubr.bf16.gmra.mrb[28].mxu1 %v3553_v9 }
 0x1d7   : > { %4268 = vmatpush1.bf16.msra.mxu0 %v24958_v47  ;;  %4370 = vmatpush1.bf16.msra.mxu1 %v24961_v28  ;;  %v25029_v47 = vld [vmem:[%s36349_s1 + $0xfac] ss:$16 sps:$4 sm:$0xff]   ;;  %v25024_v28 = vld [vmem:[%s36349_s1 + $0xfa0] ss:$16 sps:$4 sm:$0xff]  }
 0x1d8   : > { %4269 = vmatprep.subr.bf16.mxu0 %v24966_v20  ;;  %4371 = vmatprep.subr.bf16.mxu1 %v24969_v19  ;;  %v25027_v20 = vld [vmem:[%s36349_s1 + $0xfa8] ss:$16 sps:$4 sm:$0xff]   ;;  %v25032_v19 = vld [vmem:[%s36349_s1 + $0xfc4] ss:$16 sps:$4 sm:$0xff]  }
 0x1d9   : > { %4295 = vmatprep.mubr.bf16.mxu0 %v3563_v22  ;;  %4397 = vmatprep.mubr.bf16.mxu1 %v3563_v22  ;;  %v25035_v22 = vld [vmem:[%s36349_s1 + $0xfcc] ss:$16 sps:$4 sm:$0xff]  }
 0x1db   : > { %4270 = vmatpush1.bf16.msra.mxu0 %v24964_v63  ;;  %4372 = vmatpush1.bf16.msra.mxu1 %v24967_v24  ;;  %v25030_v63 = vld [vmem:[%s36349_s1 + $0xfc0] ss:$16 sps:$4 sm:$0xff]   ;;  %v25033_v24 = vld [vmem:[%s36349_s1 + $0xfc8] ss:$16 sps:$4 sm:$0xff]  }
 0x1dc   : > { %4271 = vmatprep.subr.bf16.mxu0 %v24972_v26  ;;  %4373 = vmatprep.subr.bf16.mxu1 %v24975_v51  ;;  %v29613_v26 = vcombine.low %v29407_v54, %v29419_v33  ;;  %v20286_v51 = vcombine.low %v29426_v34, %v29410_v32  ;;  %v25036_v32 = vld [vmem:[%s36349_s1 + $0xfe0] ss:$16 sps:$4 sm:$0xff]   ;;  %v25039_v33 = vld [vmem:[%s36349_s1 + $0xfe8] ss:$16 sps:$4 sm:$0xff]  }
 0x1de   : > { %v3559_v34 = vrot.slane %v20286_v51, 3 }
 0x1df   : > { %4272 = vmatpush1.bf16.msra.mxu0 %v24970_v52  ;;  %4374 = vmatpush1.bf16.msra.mxu1 %v24973_v59  ;;  %v29618_v52 = vld [vmem:[%s28009_s10 + $0x30] sm:$0xff] }
 0x1e0   : > { %4273 = vmatprep.subr.bf16.mxu0 %v24978_v38  ;;  %4375 = vmatprep.subr.bf16.mxu1 %v24981_v41  ;;  %v25038_v59 = vld [vmem:[%s36349_s1 + $0xfe4] ss:$16 sps:$4 sm:$0xff]   ;;  %v25041_v38 = vld [vmem:[%s36349_s1 + $0xfec] ss:$16 sps:$4 sm:$0xff]  }
 0x1e1   : > { %v29627_v41 = vld [vmem:[%s28009_s10 + $0x20] sm:$0xff] }
 0x1e2   : > { %v20545_v54 = vcombine.high %v29627_v41, %v29618_v52 }
 0x1e3   : > { %4274 = vmatpush1.bf16.msra.mxu0 %v24976_v60  ;;  %4376 = vmatpush1.bf16.msra.mxu1 %v24979_v61  ;;  %v3558_v60 = vrot.slane %v29613_v26, 3  ;;  %v25048_v61 = vld [vmem:[%s36349_s1 + $0x1004] ss:$16 sps:$4 sm:$0xff]  }
 0x1e4   : > { %4275 = vmatprep.subr.bf16.mxu0 %v24984_v1  ;;  %4377 = vmatprep.subr.bf16.mxu1 %v24987_v2  ;;  %v25051_v1 = vld [vmem:[%s36349_s1 + $0x100c] ss:$16 sps:$4 sm:$0xff]   ;;  %v25046_v2 = vld [vmem:[%s36349_s1 + $0x1000] ss:$16 sps:$4 sm:$0xff]  }
 0x1e7   : > { %4276 = vmatpush1.bf16.msra.mxu0 %v24982_v36  ;;  %4378 = vmatpush1.bf16.msra.mxu1 %v24985_v5  ;;  %v25049_v36 = vld [vmem:[%s36349_s1 + $0x1008] ss:$16 sps:$4 sm:$0xff]   ;;  %v4588_v5 = vshrl.u32 %v29186_v10, 16 }
 0x1e8   : > { %4277 = vmatprep.subr.bf16.mxu0 %v24990_v6  ;;  %4379 = vmatprep.subr.bf16.mxu1 %v24993_v8  ;;  %v4591_v6 = vshll.u32 %v29186_v10, 16  ;;  %v4596_v8 = vshrl.u32 %v20545_v54, 16 }
 0x1e9   : > { %v2271_v0 = vpop.f32.mrb[16].mxu0  ;;  %v2373_v16 = vpop.f32.mrb[16].mxu1 }
 0x1ea   : > { %v29528_v48 = vadd.f32 %v2271_v0, %v29285_v44  ;;  %v29531_v23 = vadd.f32 %v2373_v16, %v29288_v45  ;;  %v2273_v31 = vpop.f32.mrb[17].mxu0  ;;  %v2375_v55 = vpop.f32.mrb[17].mxu1  ;;  %v25002_v44 = vld [vmem:[%s36349_s1 + $0xf24] ss:$16 sps:$4 sm:$0xff]   ;;  %v25005_v45 = vld [vmem:[%s36349_s1 + $0xf2c] ss:$16 sps:$4 sm:$0xff]  }
 0x1eb   : > { %v29534_v56 = vadd.f32 %v2273_v31, %v29291_v49  ;;  %v29537_v57 = vadd.f32 %v2375_v55, %v29294_v50  ;;  %4278 = vmatpush1.bf16.msra.mxu0 %v24988_v12  ;;  %4380 = vmatpush1.bf16.msra.mxu1 %v24991_v13  ;;  %v2275_v3 = vpop.f32.mrb[18].mxu0  ;;  %v2377_v4 = vpop.f32.mrb[18].mxu1  ;;  %v25000_v50 = vld [vmem:[%s36349_s1 + $0xf20] ss:$16 sps:$4 sm:$0xff]   ;;  %v4599_v12 = vshll.u32 %v20545_v54, 16  ;;  %v3560_v13 = vsel %vm3551_vm2, %v3558_v60, %v3559_v34 }
 0x1ec   : > { %4279 = vmatprep.subr.bf16.mxu0 %v24996_v14  ;;  %4381 = vmatprep.subr.bf16.mxu1 %v24999_v15  ;;  %v2276_v9 = vpop.f32.mrb[19].mxu0  ;;  %v2378_v49 = vpop.f32.mrb[19].mxu1  ;;  %v25054_v14 = vld [vmem:[%s36349_s1 + $0x1024] ss:$16 sps:$4 sm:$0xff]   ;;  %v25057_v15 = vld [vmem:[%s36349_s1 + $0x102c] ss:$16 sps:$4 sm:$0xff]  }
 0x1ed   : > { %v4590_v0 = vrot.slane %v4588_v5, 3  ;;  %v4593_v10 = vrot.slane %v4591_v6, 4  ;;  %v4598_v16 = vrot.slane %v4596_v8, 3  ;;  %v25055_v31 = vld [vmem:[%s36349_s1 + $0x1028] ss:$16 sps:$4 sm:$0xff]  }
 0x1ee   : > { %v25060_v55 = vld [vmem:[%s36349_s1 + $0x1044] ss:$16 sps:$4 sm:$0xff]   ;;  %v25063_v3 = vld [vmem:[%s36349_s1 + $0x104c] ss:$16 sps:$4 sm:$0xff]   ;;  %v25058_v4 = vld [vmem:[%s36349_s1 + $0x1040] ss:$16 sps:$4 sm:$0xff]  }
 0x1ef   : > { %4280 = vmatpush1.bf16.msra.mxu0 %v24994_v18  ;;  %4382 = vmatpush1.bf16.msra.mxu1 %v24997_v53  ;;  %v4601_v18 = vrot.slane %v4599_v12, 4  ;;  %v25052_v53 = vld [vmem:[%s36349_s1 + $0x1020] ss:$16 sps:$4 sm:$0xff]   ;;  %v25069_v49 = vld [vmem:[%s36349_s1 + $0x106c] ss:$16 sps:$4 sm:$0xff]  }
 0x1f0   : > { %4281 = vmatprep.subr.bf16.mxu0 %v25002_v44  ;;  %4383 = vmatprep.subr.bf16.mxu1 %v25005_v45  ;;  %v25061_v44 = vld [vmem:[%s36349_s1 + $0x1048] ss:$16 sps:$4 sm:$0xff]   ;;  %v4594_v45 = vor.u32 %v4593_v10, %v4590_v0  ;;  %v25094_v54 = vld [vmem:[%s36349_s1 + $0x1100] ss:$16 sps:$4 sm:$0xff]   ;;  %v25102_v60 = vld [vmem:[%s36349_s1 + $0x1124] ss:$16 sps:$4 sm:$0xff]  }
 0x1f1   : > { %v29679_v9 = vor.u32 %v4601_v18, %v4598_v16  ;;  %v25103_v5 = vld [vmem:[%s36349_s1 + $0x1128] ss:$16 sps:$4 sm:$0xff]   ;;  %v25108_v6 = vld [vmem:[%s36349_s1 + $0x1144] ss:$16 sps:$4 sm:$0xff]   ;;  %v25111_v8 = vld [vmem:[%s36349_s1 + $0x114c] ss:$16 sps:$4 sm:$0xff]  }
 0x1f2   : > { %v25106_v12 = vld [vmem:[%s36349_s1 + $0x1140] ss:$16 sps:$4 sm:$0xff]   ;;  %v25115_v10 = vld [vmem:[%s36349_s1 + $0x1168] ss:$16 sps:$4 sm:$0xff]   ;;  %v25120_v16 = vld [vmem:[%s36349_s1 + $0x1184] ss:$16 sps:$4 sm:$0xff]  }
 0x1f3   : > { %4282 = vmatpush1.bf16.msra.mxu0 %v25000_v50  ;;  %4384 = vmatpush1.bf16.msra.mxu1 %v25003_v11  ;;  %v4603_v50 = vsel %vm4569_vm3, %v4594_v45, %v29679_v9  ;;  %v25064_v11 = vld [vmem:[%s36349_s1 + $0x1060] ss:$16 sps:$4 sm:$0xff]   ;;  %v25123_v18 = vld [vmem:[%s36349_s1 + $0x118c] ss:$16 sps:$4 sm:$0xff]   ;;  %v25127_v45 = vld [vmem:[%s36349_s1 + $0x11a8] ss:$16 sps:$4 sm:$0xff]  }
 0x1f4   : > { %4283 = vmatprep.subr.bf16.mxu0 %v25008_v62  ;;  %4385 = vmatprep.subr.bf16.mxu1 %v25011_v27  ;;  %v25067_v62 = vld [vmem:[%s36349_s1 + $0x1068] ss:$16 sps:$4 sm:$0xff]   ;;  %v25072_v27 = vld [vmem:[%s36349_s1 + $0x1084] ss:$16 sps:$4 sm:$0xff]   ;;  %v25112_v0 = vld [vmem:[%s36349_s1 + $0x1160] ss:$16 sps:$4 sm:$0xff]  }
 0x1f7   : > { %4284 = vmatpush1.bf16.msra.mxu0 %v25006_v29  ;;  %4386 = vmatpush1.bf16.msra.mxu1 %v25009_v58  ;;  %v25075_v29 = vld [vmem:[%s36349_s1 + $0x108c] ss:$16 sps:$4 sm:$0xff]   ;;  %v25070_v58 = vld [vmem:[%s36349_s1 + $0x1080] ss:$16 sps:$4 sm:$0xff]  }
 0x1f8   : > { %4285 = vmatprep.subr.bf16.mxu0 %v25014_v30  ;;  %4387 = vmatprep.subr.bf16.mxu1 %v25017_v17  ;;  %v25073_v30 = vld [vmem:[%s36349_s1 + $0x1088] ss:$16 sps:$4 sm:$0xff]   ;;  %v25078_v17 = vld [vmem:[%s36349_s1 + $0x10a4] ss:$16 sps:$4 sm:$0xff]  }
 0x1fb   : > { %4286 = vmatpush1.bf16.msra.mxu0 %v25012_v21  ;;  %4388 = vmatpush1.bf16.msra.mxu1 %v25015_v35  ;;  %v25081_v21 = vld [vmem:[%s36349_s1 + $0x10ac] ss:$16 sps:$4 sm:$0xff]   ;;  %v25076_v35 = vld [vmem:[%s36349_s1 + $0x10a0] ss:$16 sps:$4 sm:$0xff]  }
 0x1fc   : > { %4287 = vmatprep.subr.bf16.mxu0 %v25020_v37  ;;  %4389 = vmatprep.subr.bf16.mxu1 %v25023_v39  ;;  %v25079_v37 = vld [vmem:[%s36349_s1 + $0x10a8] ss:$16 sps:$4 sm:$0xff]   ;;  %v25084_v39 = vld [vmem:[%s36349_s1 + $0x10c4] ss:$16 sps:$4 sm:$0xff]  }
 0x1ff   : > { %4288 = vmatpush1.bf16.msra.mxu0 %v25018_v40  ;;  %4390 = vmatpush1.bf16.msra.mxu1 %v25021_v42  ;;  %v25087_v40 = vld [vmem:[%s36349_s1 + $0x10cc] ss:$16 sps:$4 sm:$0xff]   ;;  %v25082_v42 = vld [vmem:[%s36349_s1 + $0x10c0] ss:$16 sps:$4 sm:$0xff]  }
 0x200   : > { %4289 = vmatprep.subr.bf16.mxu0 %v25026_v43  ;;  %4391 = vmatprep.subr.bf16.mxu1 %v25029_v47  ;;  %v25085_v43 = vld [vmem:[%s36349_s1 + $0x10c8] ss:$16 sps:$4 sm:$0xff]   ;;  %v25090_v47 = vld [vmem:[%s36349_s1 + $0x10e4] ss:$16 sps:$4 sm:$0xff]  }
 0x203   : > { %4290 = vmatpush1.bf16.msra.mxu0 %v25024_v28  ;;  %4392 = vmatpush1.bf16.msra.mxu1 %v25027_v20  ;;  %v25093_v28 = vld [vmem:[%s36349_s1 + $0x10ec] ss:$16 sps:$4 sm:$0xff]   ;;  %v25088_v20 = vld [vmem:[%s36349_s1 + $0x10e0] ss:$16 sps:$4 sm:$0xff]  }
 0x204   : > { %4291 = vmatprep.subr.bf16.mxu0 %v25032_v19  ;;  %4393 = vmatprep.subr.bf16.mxu1 %v25035_v22  ;;  %v25091_v19 = vld [vmem:[%s36349_s1 + $0x10e8] ss:$16 sps:$4 sm:$0xff]   ;;  %v25096_v22 = vld [vmem:[%s36349_s1 + $0x1104] ss:$16 sps:$4 sm:$0xff]  }
 0x207   : > { %4292 = vmatpush1.bf16.msra.mxu0 %v25030_v63  ;;  %4394 = vmatpush1.bf16.msra.mxu1 %v25033_v24  ;;  %v25099_v63 = vld [vmem:[%s36349_s1 + $0x110c] ss:$16 sps:$4 sm:$0xff]  }
 0x208   : > { %4293 = vmatprep.subr.bf16.mxu0 %v25038_v59  ;;  %4395 = vmatprep.subr.bf16.mxu1 %v25041_v38 }
 0x20b   : > { %4294 = vmatpush1.bf16.msra.mxu0 %v25036_v32  ;;  %4396 = vmatpush1.bf16.msra.mxu1 %v25039_v33  ;;  %v25097_v32 = vld [vmem:[%s36349_s1 + $0x1108] ss:$16 sps:$4 sm:$0xff]  }
 0x20c   : > { %5286 = vmatprep.subr.bf16.mxu0 %v25048_v61  ;;  %5388 = vmatprep.subr.bf16.mxu1 %v25051_v1  ;;  %v25105_v61 = vld [vmem:[%s36349_s1 + $0x112c] ss:$16 sps:$4 sm:$0xff]  }
 0x20e   : > { %4296 = vmatmul.mubr.bf16.vlgmr.msra.gmra.mrb[0].mxu0 %v3560_v13  ;;  %4398 = vmatmul.mubr.bf16.vlgmr.msra.gmra.mrb[0].mxu1 %v3560_v13  ;;  %v25109_v13 = vld [vmem:[%s36349_s1 + $0x1148] ss:$16 sps:$4 sm:$0xff]  }
 0x20f   : > { %5287 = vmatpush1.bf16.msra.mxu0 %v25046_v2  ;;  %5389 = vmatpush1.bf16.msra.mxu1 %v25049_v36  ;;  %v25100_v36 = vld [vmem:[%s36349_s1 + $0x1120] ss:$16 sps:$4 sm:$0xff]  }
 0x210   : > { %5288 = vmatprep.subr.bf16.mxu0 %v25054_v14  ;;  %5390 = vmatprep.subr.bf16.mxu1 %v25057_v15  ;;  %v25114_v14 = vld [vmem:[%s36349_s1 + $0x1164] ss:$16 sps:$4 sm:$0xff]   ;;  %v25117_v15 = vld [vmem:[%s36349_s1 + $0x116c] ss:$16 sps:$4 sm:$0xff]  }
 0x211   : > { %4305 = vmatprep.mubr.bf16.mxu0 %v29445_v46  ;;  %4407 = vmatprep.mubr.bf16.mxu1 %v29445_v46  ;;  %v25066_v46 = vld [vmem:[%s36349_s1 + $0x1064] ss:$16 sps:$4 sm:$0xff]  }
 0x213   : > { %5289 = vmatpush1.bf16.msra.mxu0 %v25052_v53  ;;  %5391 = vmatpush1.bf16.msra.mxu1 %v25055_v31  ;;  %v25118_v53 = vld [vmem:[%s36349_s1 + $0x1180] ss:$16 sps:$4 sm:$0xff]   ;;  %v25121_v31 = vld [vmem:[%s36349_s1 + $0x1188] ss:$16 sps:$4 sm:$0xff]  }
 0x214   : > { %5290 = vmatprep.subr.bf16.mxu0 %v25060_v55  ;;  %5392 = vmatprep.subr.bf16.mxu1 %v25063_v3  ;;  %v20544_v55 = vcombine.low %v29627_v41, %v29618_v52  ;;  %v25126_v3 = vld [vmem:[%s36349_s1 + $0x11a4] ss:$16 sps:$4 sm:$0xff]   ;;  %v4571_v52 = vshrl.u32 %v29376_v25, 16  ;;  %v4574_v41 = vshll.u32 %v29376_v25, 16  ;;  %v25133_v25 = vld [vmem:[%s36349_s1 + $0x11c8] ss:$16 sps:$4 sm:$0xff]  }
 0x216   : > { %4306 = vmatmul.mubr.bf16.gmra.mrb[32].mxu0 %v3559_v34  ;;  %4408 = vmatmul.mubr.bf16.gmra.mrb[32].mxu1 %v3559_v34 }
 0x217   : > { %5291 = vmatpush1.bf16.msra.mxu0 %v25058_v4  ;;  %5393 = vmatpush1.bf16.msra.mxu1 %v25061_v44  ;;  %v25129_v4 = vld [vmem:[%s36349_s1 + $0x11ac] ss:$16 sps:$4 sm:$0xff]   ;;  %v25124_v44 = vld [vmem:[%s36349_s1 + $0x11a0] ss:$16 sps:$4 sm:$0xff]  }
 0x218   : > { %5292 = vmatprep.subr.bf16.mxu0 %v25066_v46  ;;  %5394 = vmatprep.subr.bf16.mxu1 %v25069_v49  ;;  %v4579_v46 = vshrl.u32 %v20544_v55, 16  ;;  %v4582_v49 = vshll.u32 %v20544_v55, 16  ;;  %v25173_v55 = vld [vmem:[%s36349_s1 + $0x128c] ss:$16 sps:$4 sm:$0xff]  }
 0x219   : > { %5318 = vmatprep.mubr.bf16.mxu0 %v4603_v50  ;;  %5420 = vmatprep.mubr.bf16.mxu1 %v4603_v50  ;;  %v25132_v50 = vld [vmem:[%s36349_s1 + $0x11c4] ss:$16 sps:$4 sm:$0xff]  }
 0x21b   : > { %5293 = vmatpush1.bf16.msra.mxu0 %v25064_v11  ;;  %5395 = vmatpush1.bf16.msra.mxu1 %v25067_v62  ;;  %v25135_v11 = vld [vmem:[%s36349_s1 + $0x11cc] ss:$16 sps:$4 sm:$0xff]   ;;  %v25130_v62 = vld [vmem:[%s36349_s1 + $0x11c0] ss:$16 sps:$4 sm:$0xff]  }
 0x21c   : > { %5294 = vmatprep.subr.bf16.mxu0 %v25072_v27  ;;  %5396 = vmatprep.subr.bf16.mxu1 %v25075_v29  ;;  %v4573_v27 = vrot.slane %v4571_v52, 3  ;;  %v4576_v29 = vrot.slane %v4574_v41, 4  ;;  %v25174_v52 = vld [vmem:[%s36349_s1 + $0x12a0] ss:$16 sps:$4 sm:$0xff]   ;;  %v25177_v41 = vld [vmem:[%s36349_s1 + $0x12a8] ss:$16 sps:$4 sm:$0xff]  }
 0x21f   : > { %5295 = vmatpush1.bf16.msra.mxu0 %v25070_v58  ;;  %5397 = vmatpush1.bf16.msra.mxu1 %v25073_v30  ;;  %v4581_v58 = vrot.slane %v4579_v46, 3  ;;  %v4584_v30 = vrot.slane %v4582_v49, 4  ;;  %v25182_v46 = vld [vmem:[%s36349_s1 + $0x12c4] ss:$16 sps:$4 sm:$0xff]   ;;  %v25185_v49 = vld [vmem:[%s36349_s1 + $0x12cc] ss:$16 sps:$4 sm:$0xff]  }
 0x220   : > { %5296 = vmatprep.subr.bf16.mxu0 %v25078_v17  ;;  %5398 = vmatprep.subr.bf16.mxu1 %v25081_v21  ;;  %v29840_v17 = vld [vmem:[%s28009_s10 + $0x38] sm:$0xff]  ;;  %v25138_v21 = vld [vmem:[%s36349_s1 + $0x11e4] ss:$16 sps:$4 sm:$0xff]  }
 0x223   : > { %5297 = vmatpush1.bf16.msra.mxu0 %v25076_v35  ;;  %5399 = vmatpush1.bf16.msra.mxu1 %v25079_v37  ;;  %v25141_v35 = vld [vmem:[%s36349_s1 + $0x11ec] ss:$16 sps:$4 sm:$0xff]  }
 0x224   : > { %5298 = vmatprep.subr.bf16.mxu0 %v25084_v39  ;;  %5400 = vmatprep.subr.bf16.mxu1 %v25087_v40  ;;  %v29849_v37 = vld [vmem:[%s28009_s10 + $0x28] sm:$0xff]  ;;  %v25136_v40 = vld [vmem:[%s36349_s1 + $0x11e0] ss:$16 sps:$4 sm:$0xff]  }
 0x225   : > { %v20547_v39 = vcombine.high %v29849_v37, %v29840_v17 }
 0x227   : > { %5299 = vmatpush1.bf16.msra.mxu0 %v25082_v42  ;;  %5401 = vmatpush1.bf16.msra.mxu1 %v25085_v43  ;;  %v25139_v42 = vld [vmem:[%s36349_s1 + $0x11e8] ss:$16 sps:$4 sm:$0xff]   ;;  %v4577_v43 = vor.u32 %v4576_v29, %v4573_v27  ;;  %v25186_v27 = vld [vmem:[%s36349_s1 + $0x12e0] ss:$16 sps:$4 sm:$0xff]  }
 0x228   : > { %5300 = vmatprep.subr.bf16.mxu0 %v25090_v47  ;;  %5402 = vmatprep.subr.bf16.mxu1 %v25093_v28  ;;  %v4585_v47 = vor.u32 %v4584_v30, %v4581_v58  ;;  %v25145_v28 = vld [vmem:[%s36349_s1 + $0x1204] ss:$16 sps:$4 sm:$0xff]   ;;  %v25189_v29 = vld [vmem:[%s36349_s1 + $0x12e8] ss:$16 sps:$4 sm:$0xff]   ;;  %v25197_v30 = vld [vmem:[%s36349_s1 + $0x130c] ss:$16 sps:$4 sm:$0xff]  }
 0x229   : > { %v29749_v24 = vpop.f32.mrb[20].mxu0  ;;  %v29751_v51 = vpop.f32.mrb[20].mxu1  ;;  %v25194_v58 = vld [vmem:[%s36349_s1 + $0x1304] ss:$16 sps:$4 sm:$0xff]  }
 0x22a   : > { %v29753_v59 = vpop.f32.mrb[21].mxu0  ;;  %v29755_v38 = vpop.f32.mrb[21].mxu1 }
 0x22b   : > { %5301 = vmatpush1.bf16.msra.mxu0 %v25088_v20  ;;  %5403 = vmatpush1.bf16.msra.mxu1 %v25091_v19  ;;  %v3230_v33 = vpop.f32.mrb[22].mxu0  ;;  %v3332_v34 = vpop.f32.mrb[22].mxu1  ;;  %v25148_v20 = vld [vmem:[%s36349_s1 + $0x120c] ss:$16 sps:$4 sm:$0xff]   ;;  %v4622_v19 = vshrl.u32 %v29423_v7, 16 }
 0x22c   : > { %5302 = vmatprep.subr.bf16.mxu0 %v25096_v22  ;;  %5404 = vmatprep.subr.bf16.mxu1 %v25099_v63  ;;  %v3231_v1 = vpop.f32.mrb[23].mxu0  ;;  %v3333_v2 = vpop.f32.mrb[23].mxu1  ;;  %v4625_v22 = vshll.u32 %v29423_v7, 16  ;;  %v4630_v63 = vshrl.u32 %v20547_v39, 16  ;;  %v25146_v33 = vld [vmem:[%s36349_s1 + $0x1208] ss:$16 sps:$4 sm:$0xff]   ;;  %v4586_v34 = vsel %vm4569_vm3, %v4577_v43, %v4585_v47 }
 0x22d   : > { %v25152_v7 = vld [vmem:[%s36349_s1 + $0x1224] ss:$16 sps:$4 sm:$0xff]  }
 0x22e   : > { %v4627_v1 = vrot.slane %v4625_v22, 4  ;;  %v4632_v2 = vrot.slane %v4630_v63, 3 }
 0x22f   : > { %5303 = vmatpush1.bf16.msra.mxu0 %v25094_v54  ;;  %5405 = vmatpush1.bf16.msra.mxu1 %v25097_v32  ;;  %v4633_v54 = vshll.u32 %v20547_v39, 16  ;;  %v25143_v32 = vld [vmem:[%s36349_s1 + $0x1200] ss:$16 sps:$4 sm:$0xff]  }
 0x230   : > { %5304 = vmatprep.subr.bf16.mxu0 %v25102_v60  ;;  %5406 = vmatprep.subr.bf16.mxu1 %v25105_v61  ;;  %v25155_v60 = vld [vmem:[%s36349_s1 + $0x122c] ss:$16 sps:$4 sm:$0xff]   ;;  %v4624_v61 = vrot.slane %v4622_v19, 3  ;;  %v25192_v39 = vld [vmem:[%s36349_s1 + $0x1300] ss:$16 sps:$4 sm:$0xff]  }
 0x233   : > { %5305 = vmatpush1.bf16.msra.mxu0 %v25100_v36  ;;  %5407 = vmatpush1.bf16.msra.mxu1 %v25103_v5  ;;  %v4635_v36 = vrot.slane %v4633_v54, 4  ;;  %v25150_v5 = vld [vmem:[%s36349_s1 + $0x1220] ss:$16 sps:$4 sm:$0xff]  }
 0x234   : > { %5306 = vmatprep.subr.bf16.mxu0 %v25108_v6  ;;  %5408 = vmatprep.subr.bf16.mxu1 %v25111_v8  ;;  %v25153_v6 = vld [vmem:[%s36349_s1 + $0x1228] ss:$16 sps:$4 sm:$0xff]   ;;  %v25158_v8 = vld [vmem:[%s36349_s1 + $0x1244] ss:$16 sps:$4 sm:$0xff]  }
 0x237   : > { %5307 = vmatpush1.bf16.msra.mxu0 %v25106_v12  ;;  %5409 = vmatpush1.bf16.msra.mxu1 %v25109_v13  ;;  %v25161_v12 = vld [vmem:[%s36349_s1 + $0x124c] ss:$16 sps:$4 sm:$0xff]   ;;  %v4628_v13 = vor.u32 %v4627_v1, %v4624_v61  ;;  %v25212_v61 = vld [vmem:[%s36349_s1 + $0x1364] ss:$16 sps:$4 sm:$0xff]  }
 0x238   : > { %5308 = vmatprep.subr.bf16.mxu0 %v25114_v14  ;;  %5410 = vmatprep.subr.bf16.mxu1 %v25117_v15  ;;  %v29894_v14 = vor.u32 %v4635_v36, %v4632_v2  ;;  %v25156_v15 = vld [vmem:[%s36349_s1 + $0x1240] ss:$16 sps:$4 sm:$0xff]   ;;  %v25215_v1 = vld [vmem:[%s36349_s1 + $0x136c] ss:$16 sps:$4 sm:$0xff]   ;;  %v25213_v36 = vld [vmem:[%s36349_s1 + $0x1368] ss:$16 sps:$4 sm:$0xff]  }
 0x239   : > { %v25210_v2 = vld [vmem:[%s36349_s1 + $0x1360] ss:$16 sps:$4 sm:$0xff]  }
 0x23b   : > { %5309 = vmatpush1.bf16.msra.mxu0 %v25112_v0  ;;  %5411 = vmatpush1.bf16.msra.mxu1 %v25115_v10  ;;  %v25159_v0 = vld [vmem:[%s36349_s1 + $0x1248] ss:$16 sps:$4 sm:$0xff]   ;;  %v25164_v10 = vld [vmem:[%s36349_s1 + $0x1264] ss:$16 sps:$4 sm:$0xff]  }
 0x23c   : > { %5310 = vmatprep.subr.bf16.mxu0 %v25120_v16  ;;  %5412 = vmatprep.subr.bf16.mxu1 %v25123_v18  ;;  %v4637_v16 = vsel %vm4569_vm3, %v4628_v13, %v29894_v14  ;;  %v25162_v18 = vld [vmem:[%s36349_s1 + $0x1260] ss:$16 sps:$4 sm:$0xff]   ;;  %v20546_v13 = vcombine.low %v29849_v37, %v29840_v17  ;;  %v4605_v17 = vshrl.u32 %v29613_v26, 16  ;;  %v4608_v37 = vshll.u32 %v29613_v26, 16  ;;  %v25231_v26 = vld [vmem:[%s36349_s1 + $0x13c8] ss:$16 sps:$4 sm:$0xff]  }
 0x23f   : > { %5311 = vmatpush1.bf16.msra.mxu0 %v25118_v53  ;;  %5413 = vmatpush1.bf16.msra.mxu1 %v25121_v31  ;;  %v25165_v53 = vld [vmem:[%s36349_s1 + $0x1268] ss:$16 sps:$4 sm:$0xff]   ;;  %v25170_v31 = vld [vmem:[%s36349_s1 + $0x1284] ss:$16 sps:$4 sm:$0xff]  }
 0x240   : > { %5312 = vmatprep.subr.bf16.mxu0 %v25126_v3  ;;  %5414 = vmatprep.subr.bf16.mxu1 %v25129_v4  ;;  %v25168_v3 = vld [vmem:[%s36349_s1 + $0x1280] ss:$16 sps:$4 sm:$0xff]   ;;  %v25171_v4 = vld [vmem:[%s36349_s1 + $0x1288] ss:$16 sps:$4 sm:$0xff]  }
 0x243   : > { %5313 = vmatpush1.bf16.msra.mxu0 %v25124_v44  ;;  %5415 = vmatpush1.bf16.msra.mxu1 %v25127_v45  ;;  %v25176_v44 = vld [vmem:[%s36349_s1 + $0x12a4] ss:$16 sps:$4 sm:$0xff]   ;;  %v25179_v45 = vld [vmem:[%s36349_s1 + $0x12ac] ss:$16 sps:$4 sm:$0xff]  }
 0x244   : > { %5314 = vmatprep.subr.bf16.mxu0 %v25132_v50  ;;  %5416 = vmatprep.subr.bf16.mxu1 %v25135_v11  ;;  %v25180_v50 = vld [vmem:[%s36349_s1 + $0x12c0] ss:$16 sps:$4 sm:$0xff]   ;;  %v25183_v11 = vld [vmem:[%s36349_s1 + $0x12c8] ss:$16 sps:$4 sm:$0xff]  }
 0x247   : > { %5315 = vmatpush1.bf16.msra.mxu0 %v25130_v62  ;;  %5417 = vmatpush1.bf16.msra.mxu1 %v25133_v25  ;;  %v25188_v62 = vld [vmem:[%s36349_s1 + $0x12e4] ss:$16 sps:$4 sm:$0xff]   ;;  %v25191_v25 = vld [vmem:[%s36349_s1 + $0x12ec] ss:$16 sps:$4 sm:$0xff]  }
 0x248   : > { %5316 = vmatprep.subr.bf16.mxu0 %v25138_v21  ;;  %5418 = vmatprep.subr.bf16.mxu1 %v25141_v35 }
 0x24b   : > { %5317 = vmatpush1.bf16.msra.mxu0 %v25136_v40  ;;  %5419 = vmatpush1.bf16.msra.mxu1 %v25139_v42  ;;  %v25195_v40 = vld [vmem:[%s36349_s1 + $0x1308] ss:$16 sps:$4 sm:$0xff]  }
 0x24c   : > { %5337 = vmatprep.subr.bf16.mxu0 %v25145_v28  ;;  %5439 = vmatprep.subr.bf16.mxu1 %v25148_v20 }
 0x24e   : > { %5319 = vmatmul.mubr.bf16.vlgmr.msra.gmra.mrb[0].mxu0 %v4586_v34  ;;  %5421 = vmatmul.mubr.bf16.vlgmr.msra.gmra.mrb[0].mxu1 %v4586_v34  ;;  %v25201_v34 = vld [vmem:[%s36349_s1 + $0x1328] ss:$16 sps:$4 sm:$0xff]  }
 0x24f   : > { %5338 = vmatpush1.bf16.msra.mxu0 %v25143_v32  ;;  %5440 = vmatpush1.bf16.msra.mxu1 %v25146_v33 }
 0x250   : > { %5339 = vmatprep.subr.bf16.mxu0 %v25152_v7  ;;  %5441 = vmatprep.subr.bf16.mxu1 %v25155_v60  ;;  %v25204_v7 = vld [vmem:[%s36349_s1 + $0x1340] ss:$16 sps:$4 sm:$0xff]   ;;  %v25207_v60 = vld [vmem:[%s36349_s1 + $0x1348] ss:$16 sps:$4 sm:$0xff]  }
 0x251   : > { %5328 = vmatprep.mubr.bf16.mxu0 %v29679_v9  ;;  %5430 = vmatprep.mubr.bf16.mxu1 %v29679_v9  ;;  %v25167_v9 = vld [vmem:[%s36349_s1 + $0x126c] ss:$16 sps:$4 sm:$0xff]  }
 0x253   : > { %5340 = vmatpush1.bf16.msra.mxu0 %v25150_v5  ;;  %5442 = vmatpush1.bf16.msra.mxu1 %v25153_v6  ;;  %v25218_v5 = vld [vmem:[%s36349_s1 + $0x1384] ss:$16 sps:$4 sm:$0xff]   ;;  %v25221_v6 = vld [vmem:[%s36349_s1 + $0x138c] ss:$16 sps:$4 sm:$0xff]  }
 0x254   : > { %5341 = vmatprep.subr.bf16.mxu0 %v25158_v8  ;;  %5443 = vmatprep.subr.bf16.mxu1 %v25161_v12  ;;  %v25216_v8 = vld [vmem:[%s36349_s1 + $0x1380] ss:$16 sps:$4 sm:$0xff]   ;;  %v25219_v12 = vld [vmem:[%s36349_s1 + $0x1388] ss:$16 sps:$4 sm:$0xff]  }
 0x256   : > { %5329 = vmatmul.mubr.bf16.gmra.mrb[36].mxu0 %v4585_v47  ;;  %5431 = vmatmul.mubr.bf16.gmra.mrb[36].mxu1 %v4585_v47 }
 0x257   : > { %5342 = vmatpush1.bf16.msra.mxu0 %v25156_v15  ;;  %5444 = vmatpush1.bf16.msra.mxu1 %v25159_v0  ;;  %v25224_v15 = vld [vmem:[%s36349_s1 + $0x13a4] ss:$16 sps:$4 sm:$0xff]   ;;  %v25227_v0 = vld [vmem:[%s36349_s1 + $0x13ac] ss:$16 sps:$4 sm:$0xff]  }
 0x258   : > { %5343 = vmatprep.subr.bf16.mxu0 %v25164_v10  ;;  %5445 = vmatprep.subr.bf16.mxu1 %v25167_v9  ;;  %v25222_v10 = vld [vmem:[%s36349_s1 + $0x13a0] ss:$16 sps:$4 sm:$0xff]   ;;  %v25225_v9 = vld [vmem:[%s36349_s1 + $0x13a8] ss:$16 sps:$4 sm:$0xff]  }
 0x259   : > { %5369 = vmatprep.mubr.bf16.mxu0 %v4637_v16  ;;  %5471 = vmatprep.mubr.bf16.mxu1 %v4637_v16  ;;  %v4613_v16 = vshrl.u32 %v20546_v13, 16 }
 0x25b   : > { %5344 = vmatpush1.bf16.msra.mxu0 %v25162_v18  ;;  %5446 = vmatpush1.bf16.msra.mxu1 %v25165_v53  ;;  %v4616_v18 = vshll.u32 %v20546_v13, 16  ;;  %v25230_v53 = vld [vmem:[%s36349_s1 + $0x13c4] ss:$16 sps:$4 sm:$0xff]   ;;  %v25295_v13 = vld [vmem:[%s36349_s1 + $0x150c] ss:$16 sps:$4 sm:$0xff]  }
 0x25c   : > { %5345 = vmatprep.subr.bf16.mxu0 %v25170_v31  ;;  %5447 = vmatprep.subr.bf16.mxu1 %v25173_v55  ;;  %v25233_v31 = vld [vmem:[%s36349_s1 + $0x13cc] ss:$16 sps:$4 sm:$0xff]   ;;  %v25228_v55 = vld [vmem:[%s36349_s1 + $0x13c0] ss:$16 sps:$4 sm:$0xff]  }
 0x25f   : > { %5346 = vmatpush1.bf16.msra.mxu0 %v25168_v3  ;;  %5448 = vmatpush1.bf16.msra.mxu1 %v25171_v4  ;;  %v4607_v3 = vrot.slane %v4605_v17, 3  ;;  %v4610_v4 = vrot.slane %v4608_v37, 4  ;;  %v25290_v17 = vld [vmem:[%s36349_s1 + $0x1500] ss:$16 sps:$4 sm:$0xff]   ;;  %v25293_v37 = vld [vmem:[%s36349_s1 + $0x1508] ss:$16 sps:$4 sm:$0xff]  }
 0x260   : > { %5347 = vmatprep.subr.bf16.mxu0 %v25176_v44  ;;  %5449 = vmatprep.subr.bf16.mxu1 %v25179_v45  ;;  %v4615_v44 = vrot.slane %v4613_v16, 3  ;;  %v4618_v45 = vrot.slane %v4616_v18, 4 }
 0x263   : > { %5348 = vmatpush1.bf16.msra.mxu0 %v25174_v52  ;;  %5450 = vmatpush1.bf16.msra.mxu1 %v25177_v41  ;;  %v25236_v52 = vld [vmem:[%s36349_s1 + $0x13e4] ss:$16 sps:$4 sm:$0xff]   ;;  %v25239_v41 = vld [vmem:[%s36349_s1 + $0x13ec] ss:$16 sps:$4 sm:$0xff]  }
 0x264   : > { %5349 = vmatprep.subr.bf16.mxu0 %v25182_v46  ;;  %5451 = vmatprep.subr.bf16.mxu1 %v25185_v49  ;;  %v25234_v46 = vld [vmem:[%s36349_s1 + $0x13e0] ss:$16 sps:$4 sm:$0xff]   ;;  %v25237_v49 = vld [vmem:[%s36349_s1 + $0x13e8] ss:$16 sps:$4 sm:$0xff]  }
 0x267   : > { %5350 = vmatpush1.bf16.msra.mxu0 %v25180_v50  ;;  %5452 = vmatpush1.bf16.msra.mxu1 %v25183_v11  ;;  %v4611_v50 = vor.u32 %v4610_v4, %v4607_v3  ;;  %v4619_v11 = vor.u32 %v4618_v45, %v4615_v44  ;;  %v25296_v3 = vld [vmem:[%s36349_s1 + $0x1520] ss:$16 sps:$4 sm:$0xff]   ;;  %v25299_v4 = vld [vmem:[%s36349_s1 + $0x1528] ss:$16 sps:$4 sm:$0xff]   ;;  %v25304_v44 = vld [vmem:[%s36349_s1 + $0x1544] ss:$16 sps:$4 sm:$0xff]  }
 0x268   : > { %5351 = vmatprep.subr.bf16.mxu0 %v25188_v62  ;;  %5453 = vmatprep.subr.bf16.mxu1 %v25191_v25  ;;  %v25244_v62 = vld [vmem:[%s36349_s1 + $0x1404] ss:$16 sps:$4 sm:$0xff]   ;;  %v25247_v25 = vld [vmem:[%s36349_s1 + $0x140c] ss:$16 sps:$4 sm:$0xff]  }
 0x269   : > { %v3277_v21 = vpop.f32.mrb[24].mxu0  ;;  %v3379_v35 = vpop.f32.mrb[24].mxu1  ;;  %v25307_v45 = vld [vmem:[%s36349_s1 + $0x154c] ss:$16 sps:$4 sm:$0xff]  }
 0x26a   : > { %v3278_v42 = vadd.f32 %v3277_v21, %v29749_v24  ;;  %v3380_v43 = vadd.f32 %v3379_v35, %v29751_v51  ;;  %v3279_v47 = vpop.f32.mrb[25].mxu0  ;;  %v3381_v28 = vpop.f32.mrb[25].mxu1  ;;  %v25200_v24 = vld [vmem:[%s36349_s1 + $0x1324] ss:$16 sps:$4 sm:$0xff]   ;;  %v25203_v51 = vld [vmem:[%s36349_s1 + $0x132c] ss:$16 sps:$4 sm:$0xff]  }
 0x26b   : > { %v3280_v20 = vadd.f32 %v3279_v47, %v29753_v59  ;;  %v3382_v19 = vadd.f32 %v3381_v28, %v29755_v38  ;;  %5352 = vmatpush1.bf16.msra.mxu0 %v25186_v27  ;;  %5454 = vmatpush1.bf16.msra.mxu1 %v25189_v29  ;;  %v3281_v22 = vpop.f32.mrb[26].mxu0  ;;  %v3383_v63 = vpop.f32.mrb[26].mxu1  ;;  %v25242_v27 = vld [vmem:[%s36349_s1 + $0x1400] ss:$16 sps:$4 sm:$0xff]   ;;  %v25245_v29 = vld [vmem:[%s36349_s1 + $0x1408] ss:$16 sps:$4 sm:$0xff]  }
 0x26c   : > { %v29981_v54 = vadd.f32 %v3278_v42, %v29528_v48  ;;  %v29984_v32 = vadd.f32 %v3380_v43, %v29531_v23  ;;  %5353 = vmatprep.subr.bf16.mxu0 %v25194_v58  ;;  %5455 = vmatprep.subr.bf16.mxu1 %v25197_v30  ;;  %v3282_v59 = vpop.f32.mrb[27].mxu0  ;;  %v3384_v38 = vpop.f32.mrb[27].mxu1  ;;  %v25198_v23 = vld [vmem:[%s36349_s1 + $0x1320] ss:$16 sps:$4 sm:$0xff]   ;;  %v4620_v58 = vsel %vm4569_vm3, %v4611_v50, %v4619_v11  ;;  %v25250_v30 = vld [vmem:[%s36349_s1 + $0x1424] ss:$16 sps:$4 sm:$0xff]  }
 0x26d   : > { %v29993_v33 = vadd.f32 %v3280_v20, %v29534_v56  ;;  %v29996_v48 = vadd.f32 %v3382_v19, %v29537_v57  ;;  %v25206_v56 = vld [vmem:[%s36349_s1 + $0x1344] ss:$16 sps:$4 sm:$0xff]   ;;  %v25209_v57 = vld [vmem:[%s36349_s1 + $0x134c] ss:$16 sps:$4 sm:$0xff]   ;;  %v25248_v35 = vld [vmem:[%s36349_s1 + $0x1420] ss:$16 sps:$4 sm:$0xff]  }
 0x26e   : > { %v25253_v21 = vld [vmem:[%s36349_s1 + $0x142c] ss:$16 sps:$4 sm:$0xff]   ;;  %v25254_v43 = vld [vmem:[%s36349_s1 + $0x1440] ss:$16 sps:$4 sm:$0xff]   ;;  %v25257_v47 = vld [vmem:[%s36349_s1 + $0x1448] ss:$16 sps:$4 sm:$0xff]  }
 0x26f   : > { %5354 = vmatpush1.bf16.msra.mxu0 %v25192_v39  ;;  %5456 = vmatpush1.bf16.msra.mxu1 %v25195_v40  ;;  %v25251_v39 = vld [vmem:[%s36349_s1 + $0x1428] ss:$16 sps:$4 sm:$0xff]   ;;  %v25256_v40 = vld [vmem:[%s36349_s1 + $0x1444] ss:$16 sps:$4 sm:$0xff]   ;;  %v25259_v42 = vld [vmem:[%s36349_s1 + $0x144c] ss:$16 sps:$4 sm:$0xff]  }
 0x270   : > { %5355 = vmatprep.subr.bf16.mxu0 %v25200_v24  ;;  %5457 = vmatprep.subr.bf16.mxu1 %v25203_v51  ;;  %v25262_v28 = vld [vmem:[%s36349_s1 + $0x1464] ss:$16 sps:$4 sm:$0xff]   ;;  %v25260_v63 = vld [vmem:[%s36349_s1 + $0x1460] ss:$16 sps:$4 sm:$0xff]   ;;  %v25263_v24 = vld [vmem:[%s36349_s1 + $0x1468] ss:$16 sps:$4 sm:$0xff]  }
 0x271   : > { %v30126_v20 = vld [vmem:[%s28009_s10 + $0x10] sm:$0xff]  ;;  %v30129_v19 = vld [vmem:[%s28009_s10 + $0x20] sm:$0xff]  ;;  %v25271_v59 = vld [vmem:[%s36349_s1 + $0x148c] ss:$16 sps:$4 sm:$0xff]  }
 0x272   : > { %v20805_v22 = vcombine.high %v30126_v20, %v30129_v19  ;;  %v25268_v51 = vld [vmem:[%s36349_s1 + $0x1484] ss:$16 sps:$4 sm:$0xff]   ;;  %v25266_v38 = vld [vmem:[%s36349_s1 + $0x1480] ss:$16 sps:$4 sm:$0xff]  }
 0x273   : > { %5356 = vmatpush1.bf16.msra.mxu0 %v25198_v23  ;;  %5458 = vmatpush1.bf16.msra.mxu1 %v25201_v34  ;;  %v25269_v23 = vld [vmem:[%s36349_s1 + $0x1488] ss:$16 sps:$4 sm:$0xff]   ;;  %v25274_v34 = vld [vmem:[%s36349_s1 + $0x14a4] ss:$16 sps:$4 sm:$0xff]   ;;  %v25308_v50 = vld [vmem:[%s36349_s1 + $0x1560] ss:$16 sps:$4 sm:$0xff]  }
 0x274   : > { %5357 = vmatprep.subr.bf16.mxu0 %v25206_v56  ;;  %5459 = vmatprep.subr.bf16.mxu1 %v25209_v57  ;;  %v25277_v56 = vld [vmem:[%s36349_s1 + $0x14ac] ss:$16 sps:$4 sm:$0xff]   ;;  %v25272_v57 = vld [vmem:[%s36349_s1 + $0x14a0] ss:$16 sps:$4 sm:$0xff]  }
 0x277   : > { %5358 = vmatpush1.bf16.msra.mxu0 %v25204_v7  ;;  %5460 = vmatpush1.bf16.msra.mxu1 %v25207_v60  ;;  %v25275_v7 = vld [vmem:[%s36349_s1 + $0x14a8] ss:$16 sps:$4 sm:$0xff]   ;;  %v25280_v60 = vld [vmem:[%s36349_s1 + $0x14c4] ss:$16 sps:$4 sm:$0xff]  }
 0x278   : > { %5359 = vmatprep.subr.bf16.mxu0 %v25212_v61  ;;  %5461 = vmatprep.subr.bf16.mxu1 %v25215_v1  ;;  %v25283_v61 = vld [vmem:[%s36349_s1 + $0x14cc] ss:$16 sps:$4 sm:$0xff]   ;;  %v25278_v1 = vld [vmem:[%s36349_s1 + $0x14c0] ss:$16 sps:$4 sm:$0xff]  }
 0x27b   : > { %5360 = vmatpush1.bf16.msra.mxu0 %v25210_v2  ;;  %5462 = vmatpush1.bf16.msra.mxu1 %v25213_v36  ;;  %v25281_v2 = vld [vmem:[%s36349_s1 + $0x14c8] ss:$16 sps:$4 sm:$0xff]   ;;  %v25286_v36 = vld [vmem:[%s36349_s1 + $0x14e4] ss:$16 sps:$4 sm:$0xff]  }
 0x27c   : > { %5361 = vmatprep.subr.bf16.mxu0 %v25218_v5  ;;  %5463 = vmatprep.subr.bf16.mxu1 %v25221_v6  ;;  %v25289_v5 = vld [vmem:[%s36349_s1 + $0x14ec] ss:$16 sps:$4 sm:$0xff]   ;;  %v25284_v6 = vld [vmem:[%s36349_s1 + $0x14e0] ss:$16 sps:$4 sm:$0xff]  }
 0x27f   : > { %5362 = vmatpush1.bf16.msra.mxu0 %v25216_v8  ;;  %5464 = vmatpush1.bf16.msra.mxu1 %v25219_v12  ;;  %v25287_v8 = vld [vmem:[%s36349_s1 + $0x14e8] ss:$16 sps:$4 sm:$0xff]   ;;  %v25292_v12 = vld [vmem:[%s36349_s1 + $0x1504] ss:$16 sps:$4 sm:$0xff]  }
 0x280   : > { %5363 = vmatprep.subr.bf16.mxu0 %v25224_v15  ;;  %5465 = vmatprep.subr.bf16.mxu1 %v25227_v0 }
 0x283   : > { %5364 = vmatpush1.bf16.msra.mxu0 %v25222_v10  ;;  %5466 = vmatpush1.bf16.msra.mxu1 %v25225_v9 }
 0x284   : > { %5365 = vmatprep.subr.bf16.mxu0 %v25230_v53  ;;  %5467 = vmatprep.subr.bf16.mxu1 %v25233_v31  ;;  %v25298_v53 = vld [vmem:[%s36349_s1 + $0x1524] ss:$16 sps:$4 sm:$0xff]   ;;  %v25301_v31 = vld [vmem:[%s36349_s1 + $0x152c] ss:$16 sps:$4 sm:$0xff]  }
 0x287   : > { %5366 = vmatpush1.bf16.msra.mxu0 %v25228_v55  ;;  %5468 = vmatpush1.bf16.msra.mxu1 %v25231_v26 }
 0x288   : > { %5367 = vmatprep.subr.bf16.mxu0 %v25236_v52  ;;  %5469 = vmatprep.subr.bf16.mxu1 %v25239_v41  ;;  %v25302_v52 = vld [vmem:[%s36349_s1 + $0x1540] ss:$16 sps:$4 sm:$0xff]   ;;  %v25305_v41 = vld [vmem:[%s36349_s1 + $0x1548] ss:$16 sps:$4 sm:$0xff]  }
 0x28b   : > { %5368 = vmatpush1.bf16.msra.mxu0 %v25234_v46  ;;  %5470 = vmatpush1.bf16.msra.mxu1 %v25237_v49  ;;  %v25310_v46 = vld [vmem:[%s36349_s1 + $0x1564] ss:$16 sps:$4 sm:$0xff]   ;;  %v25313_v49 = vld [vmem:[%s36349_s1 + $0x156c] ss:$16 sps:$4 sm:$0xff]  }
 0x28c   : > { %6287 = vmatprep.subr.bf16.mxu0 %v25244_v62  ;;  %6389 = vmatprep.subr.bf16.mxu1 %v25247_v25  ;;  %v25316_v62 = vld [vmem:[%s36349_s1 + $0x1584] ss:$16 sps:$4 sm:$0xff]   ;;  %v25319_v25 = vld [vmem:[%s36349_s1 + $0x158c] ss:$16 sps:$4 sm:$0xff]  }
 0x28e   : > { %5370 = vmatmul.mubr.bf16.vlgmr.msra.gmra.mrb[0].mxu0 %v4620_v58  ;;  %5472 = vmatmul.mubr.bf16.vlgmr.msra.gmra.mrb[0].mxu1 %v4620_v58  ;;  %v25322_v58 = vld [vmem:[%s36349_s1 + $0x15a4] ss:$16 sps:$4 sm:$0xff]  }
 0x28f   : > { %6288 = vmatpush1.bf16.msra.mxu0 %v25242_v27  ;;  %6390 = vmatpush1.bf16.msra.mxu1 %v25245_v29  ;;  %v25314_v27 = vld [vmem:[%s36349_s1 + $0x1580] ss:$16 sps:$4 sm:$0xff]   ;;  %v25317_v29 = vld [vmem:[%s36349_s1 + $0x1588] ss:$16 sps:$4 sm:$0xff]  }
 0x290   : > { %6289 = vmatprep.subr.bf16.mxu0 %v25250_v30  ;;  %6391 = vmatprep.subr.bf16.mxu1 %v25253_v21  ;;  %v25325_v30 = vld [vmem:[%s36349_s1 + $0x15ac] ss:$16 sps:$4 sm:$0xff]   ;;  %v25320_v21 = vld [vmem:[%s36349_s1 + $0x15a0] ss:$16 sps:$4 sm:$0xff]  }
 0x291   : > { %5379 = vmatprep.mubr.bf16.mxu0 %v29894_v14  ;;  %5481 = vmatprep.mubr.bf16.mxu1 %v29894_v14  ;;  %v25265_v14 = vld [vmem:[%s36349_s1 + $0x146c] ss:$16 sps:$4 sm:$0xff]  }
 0x293   : > { %6290 = vmatpush1.bf16.msra.mxu0 %v25248_v35  ;;  %6392 = vmatpush1.bf16.msra.mxu1 %v25251_v39  ;;  %v25323_v35 = vld [vmem:[%s36349_s1 + $0x15a8] ss:$16 sps:$4 sm:$0xff]   ;;  %v25328_v39 = vld [vmem:[%s36349_s1 + $0x15c4] ss:$16 sps:$4 sm:$0xff]  }
 0x294   : > { %6291 = vmatprep.subr.bf16.mxu0 %v25256_v40  ;;  %6393 = vmatprep.subr.bf16.mxu1 %v25259_v42  ;;  %v25331_v40 = vld [vmem:[%s36349_s1 + $0x15cc] ss:$16 sps:$4 sm:$0xff]   ;;  %v25326_v42 = vld [vmem:[%s36349_s1 + $0x15c0] ss:$16 sps:$4 sm:$0xff]  }
 0x296   : > { %5380 = vmatmul.mubr.bf16.gmra.mrb[40].mxu0 %v4619_v11  ;;  %5482 = vmatmul.mubr.bf16.gmra.mrb[40].mxu1 %v4619_v11  ;;  %v25311_v11 = vld [vmem:[%s36349_s1 + $0x1568] ss:$16 sps:$4 sm:$0xff]  }
 0x297   : > { %6292 = vmatpush1.bf16.msra.mxu0 %v25254_v43  ;;  %6394 = vmatpush1.bf16.msra.mxu1 %v25257_v47  ;;  %v25329_v43 = vld [vmem:[%s36349_s1 + $0x15c8] ss:$16 sps:$4 sm:$0xff]   ;;  %v25334_v47 = vld [vmem:[%s36349_s1 + $0x15e4] ss:$16 sps:$4 sm:$0xff]  }
 0x298   : > { %6293 = vmatprep.subr.bf16.mxu0 %v25262_v28  ;;  %6395 = vmatprep.subr.bf16.mxu1 %v25265_v14  ;;  %v25337_v28 = vld [vmem:[%s36349_s1 + $0x15ec] ss:$16 sps:$4 sm:$0xff]   ;;  %v25332_v14 = vld [vmem:[%s36349_s1 + $0x15e0] ss:$16 sps:$4 sm:$0xff]  }
 0x299   : > { %6319 = vmatprep.mubr.bf16.mxu0 %v20805_v22  ;;  %6421 = vmatprep.mubr.bf16.mxu1 %v20805_v22  ;;  %v25335_v22 = vld [vmem:[%s36349_s1 + $0x15e8] ss:$16 sps:$4 sm:$0xff]  }
 0x29b   : > { %6294 = vmatpush1.bf16.msra.mxu0 %v25260_v63  ;;  %6396 = vmatpush1.bf16.msra.mxu1 %v25263_v24  ;;  %v25341_v63 = vld [vmem:[%s36349_s1 + $0x1604] ss:$16 sps:$4 sm:$0xff]   ;;  %v25344_v24 = vld [vmem:[%s36349_s1 + $0x160c] ss:$16 sps:$4 sm:$0xff]  }
 0x29c   : > { %6295 = vmatprep.subr.bf16.mxu0 %v25268_v51  ;;  %6397 = vmatprep.subr.bf16.mxu1 %v25271_v59  ;;  %v20804_v51 = vcombine.low %v30126_v20, %v30129_v19  ;;  %v25339_v59 = vld [vmem:[%s36349_s1 + $0x1600] ss:$16 sps:$4 sm:$0xff]   ;;  %v25351_v20 = vld [vmem:[%s36349_s1 + $0x162c] ss:$16 sps:$4 sm:$0xff]  }
 0x29d   : > { %v27794_v19 = vld [vmem:[%s28009_s10 + $0x30] sm:$0xff] }
 0x29f   : > { %6296 = vmatpush1.bf16.msra.mxu0 %v25266_v38  ;;  %6398 = vmatpush1.bf16.msra.mxu1 %v25269_v23  ;;  %v25342_v38 = vld [vmem:[%s36349_s1 + $0x1608] ss:$16 sps:$4 sm:$0xff]   ;;  %v25348_v23 = vld [vmem:[%s36349_s1 + $0x1624] ss:$16 sps:$4 sm:$0xff]  }
 0x2a0   : > { %6297 = vmatprep.subr.bf16.mxu0 %v25274_v34  ;;  %6399 = vmatprep.subr.bf16.mxu1 %v25277_v56  ;;  %v20809_v34 = vcombine.high %v27794_v19, %v27794_v19  ;;  %v25346_v56 = vld [vmem:[%s36349_s1 + $0x1620] ss:$16 sps:$4 sm:$0xff]  }
 0x2a3   : > { %6298 = vmatpush1.bf16.msra.mxu0 %v25272_v57  ;;  %6400 = vmatpush1.bf16.msra.mxu1 %v25275_v7  ;;  %v25349_v57 = vld [vmem:[%s36349_s1 + $0x1628] ss:$16 sps:$4 sm:$0xff]   ;;  %v25354_v7 = vld [vmem:[%s36349_s1 + $0x1644] ss:$16 sps:$4 sm:$0xff]  }
 0x2a4   : > { %6299 = vmatprep.subr.bf16.mxu0 %v25280_v60  ;;  %6401 = vmatprep.subr.bf16.mxu1 %v25283_v61  ;;  %v25357_v60 = vld [vmem:[%s36349_s1 + $0x164c] ss:$16 sps:$4 sm:$0xff]   ;;  %v20808_v61 = vcombine.low %v27794_v19, %v27794_v19  ;;  %v25414_v19 = vld [vmem:[%s36349_s1 + $0x1784] ss:$16 sps:$4 sm:$0xff]  }
 0x2a7   : > { %6300 = vmatpush1.bf16.msra.mxu0 %v25278_v1  ;;  %6402 = vmatpush1.bf16.msra.mxu1 %v25281_v2  ;;  %v25352_v1 = vld [vmem:[%s36349_s1 + $0x1640] ss:$16 sps:$4 sm:$0xff]   ;;  %v25355_v2 = vld [vmem:[%s36349_s1 + $0x1648] ss:$16 sps:$4 sm:$0xff]  }
 0x2a8   : > { %6301 = vmatprep.subr.bf16.mxu0 %v25286_v36  ;;  %6403 = vmatprep.subr.bf16.mxu1 %v25289_v5  ;;  %v25360_v36 = vld [vmem:[%s36349_s1 + $0x1664] ss:$16 sps:$4 sm:$0xff]   ;;  %v25363_v5 = vld [vmem:[%s36349_s1 + $0x166c] ss:$16 sps:$4 sm:$0xff]  }
 0x2a9   : > { %v30193_v15 = vpop.f32.mrb[28].mxu0  ;;  %v30195_v0 = vpop.f32.mrb[28].mxu1 }
 0x2aa   : > { %v30197_v10 = vpop.f32.mrb[29].mxu0  ;;  %v30199_v9 = vpop.f32.mrb[29].mxu1 }
 0x2ab   : > { %6302 = vmatpush1.bf16.msra.mxu0 %v25284_v6  ;;  %6404 = vmatpush1.bf16.msra.mxu1 %v25287_v8  ;;  %v4260_v16 = vpop.f32.mrb[30].mxu0  ;;  %v4362_v18 = vpop.f32.mrb[30].mxu1  ;;  %v30337_v6 = vld [vmem:[%s28009_s10 + $0x18] sm:$0xff]  ;;  %v30340_v8 = vld [vmem:[%s28009_s10 + $0x28] sm:$0xff] }
 0x2ac   : > { %6303 = vmatprep.subr.bf16.mxu0 %v25292_v12  ;;  %6405 = vmatprep.subr.bf16.mxu1 %v25295_v13  ;;  %v4261_v55 = vpop.f32.mrb[31].mxu0  ;;  %v4363_v26 = vpop.f32.mrb[31].mxu1  ;;  %v20807_v12 = vcombine.high %v30337_v6, %v30340_v8  ;;  %v25358_v13 = vld [vmem:[%s36349_s1 + $0x1660] ss:$16 sps:$4 sm:$0xff]   ;;  %v25369_v16 = vld [vmem:[%s36349_s1 + $0x168c] ss:$16 sps:$4 sm:$0xff]  }
 0x2ad   : > { %v25364_v18 = vld [vmem:[%s36349_s1 + $0x1680] ss:$16 sps:$4 sm:$0xff]   ;;  %v25375_v55 = vld [vmem:[%s36349_s1 + $0x16ac] ss:$16 sps:$4 sm:$0xff]  }
 0x2ae   : > { %v25370_v26 = vld [vmem:[%s36349_s1 + $0x16a0] ss:$16 sps:$4 sm:$0xff]  }
 0x2af   : > { %6304 = vmatpush1.bf16.msra.mxu0 %v25290_v17  ;;  %6406 = vmatpush1.bf16.msra.mxu1 %v25293_v37  ;;  %v25361_v17 = vld [vmem:[%s36349_s1 + $0x1668] ss:$16 sps:$4 sm:$0xff]   ;;  %v25366_v37 = vld [vmem:[%s36349_s1 + $0x1684] ss:$16 sps:$4 sm:$0xff]  }
 0x2b0   : > { %6305 = vmatprep.subr.bf16.mxu0 %v25298_v53  ;;  %6407 = vmatprep.subr.bf16.mxu1 %v25301_v31  ;;  %v25367_v53 = vld [vmem:[%s36349_s1 + $0x1688] ss:$16 sps:$4 sm:$0xff]   ;;  %v25372_v31 = vld [vmem:[%s36349_s1 + $0x16a4] ss:$16 sps:$4 sm:$0xff]  }
 0x2b3   : > { %6306 = vmatpush1.bf16.msra.mxu0 %v25296_v3  ;;  %6408 = vmatpush1.bf16.msra.mxu1 %v25299_v4  ;;  %v25373_v3 = vld [vmem:[%s36349_s1 + $0x16a8] ss:$16 sps:$4 sm:$0xff]   ;;  %v25378_v4 = vld [vmem:[%s36349_s1 + $0x16c4] ss:$16 sps:$4 sm:$0xff]  }
 0x2b4   : > { %6307 = vmatprep.subr.bf16.mxu0 %v25304_v44  ;;  %6409 = vmatprep.subr.bf16.mxu1 %v25307_v45  ;;  %v25381_v44 = vld [vmem:[%s36349_s1 + $0x16cc] ss:$16 sps:$4 sm:$0xff]   ;;  %v25376_v45 = vld [vmem:[%s36349_s1 + $0x16c0] ss:$16 sps:$4 sm:$0xff]  }
 0x2b7   : > { %6308 = vmatpush1.bf16.msra.mxu0 %v25302_v52  ;;  %6410 = vmatpush1.bf16.msra.mxu1 %v25305_v41  ;;  %v25379_v52 = vld [vmem:[%s36349_s1 + $0x16c8] ss:$16 sps:$4 sm:$0xff]   ;;  %v25384_v41 = vld [vmem:[%s36349_s1 + $0x16e4] ss:$16 sps:$4 sm:$0xff]  }
 0x2b8   : > { %6309 = vmatprep.subr.bf16.mxu0 %v25310_v46  ;;  %6411 = vmatprep.subr.bf16.mxu1 %v25313_v49  ;;  %v25387_v46 = vld [vmem:[%s36349_s1 + $0x16ec] ss:$16 sps:$4 sm:$0xff]   ;;  %v25382_v49 = vld [vmem:[%s36349_s1 + $0x16e0] ss:$16 sps:$4 sm:$0xff]  }
 0x2bb   : > { %6310 = vmatpush1.bf16.msra.mxu0 %v25308_v50  ;;  %6412 = vmatpush1.bf16.msra.mxu1 %v25311_v11  ;;  %v25385_v50 = vld [vmem:[%s36349_s1 + $0x16e8] ss:$16 sps:$4 sm:$0xff]   ;;  %v25390_v11 = vld [vmem:[%s36349_s1 + $0x1704] ss:$16 sps:$4 sm:$0xff]  }
 0x2bc   : > { %6311 = vmatprep.subr.bf16.mxu0 %v25316_v62  ;;  %6413 = vmatprep.subr.bf16.mxu1 %v25319_v25  ;;  %v25393_v62 = vld [vmem:[%s36349_s1 + $0x170c] ss:$16 sps:$4 sm:$0xff]  }
 0x2bf   : > { %6312 = vmatpush1.bf16.msra.mxu0 %v25314_v27  ;;  %6414 = vmatpush1.bf16.msra.mxu1 %v25317_v29  ;;  %v25388_v29 = vld [vmem:[%s36349_s1 + $0x1700] ss:$16 sps:$4 sm:$0xff]  }
 0x2c0   : > { %6313 = vmatprep.subr.bf16.mxu0 %v25322_v58  ;;  %6415 = vmatprep.subr.bf16.mxu1 %v25325_v30  ;;  %v25391_v58 = vld [vmem:[%s36349_s1 + $0x1708] ss:$16 sps:$4 sm:$0xff]  }
 0x2c3   : > { %6314 = vmatpush1.bf16.msra.mxu0 %v25320_v21  ;;  %6416 = vmatpush1.bf16.msra.mxu1 %v25323_v35 }
 0x2c4   : > { %6315 = vmatprep.subr.bf16.mxu0 %v25328_v39  ;;  %6417 = vmatprep.subr.bf16.mxu1 %v25331_v40 }
 0x2c7   : > { %6316 = vmatpush1.bf16.msra.mxu0 %v25326_v42  ;;  %6418 = vmatpush1.bf16.msra.mxu1 %v25329_v43 }
 0x2c8   : > { %6317 = vmatprep.subr.bf16.mxu0 %v25334_v47  ;;  %6419 = vmatprep.subr.bf16.mxu1 %v25337_v28 }
 0x2cb   : > { %6318 = vmatpush1.bf16.msra.mxu0 %v25332_v14  ;;  %6420 = vmatpush1.bf16.msra.mxu1 %v25335_v22 }
 0x2cc   : > { %6338 = vmatprep.subr.bf16.mxu0 %v25341_v63  ;;  %6440 = vmatprep.subr.bf16.mxu1 %v25344_v24  ;;  %v25397_v63 = vld [vmem:[%s36349_s1 + $0x1728] ss:$16 sps:$4 sm:$0xff]   ;;  %v25400_v24 = vld [vmem:[%s36349_s1 + $0x1740] ss:$16 sps:$4 sm:$0xff]  }
 0x2ce   : > { %6320 = vmatmul.mubr.bf16.vlgmr.msra.gmra.mrb[0].mxu0 %v20804_v51  ;;  %6422 = vmatmul.mubr.bf16.vlgmr.msra.gmra.mrb[0].mxu1 %v20804_v51  ;;  %v25403_v51 = vld [vmem:[%s36349_s1 + $0x1748] ss:$16 sps:$4 sm:$0xff]  }
 0x2cf   : > { %6339 = vmatpush1.bf16.msra.mxu0 %v25339_v59  ;;  %6441 = vmatpush1.bf16.msra.mxu1 %v25342_v38  ;;  %v25408_v59 = vld [vmem:[%s36349_s1 + $0x1764] ss:$16 sps:$4 sm:$0xff]   ;;  %v25411_v38 = vld [vmem:[%s36349_s1 + $0x176c] ss:$16 sps:$4 sm:$0xff]  }
 0x2d0   : > { %6340 = vmatprep.subr.bf16.mxu0 %v25348_v23  ;;  %6442 = vmatprep.subr.bf16.mxu1 %v25351_v20  ;;  %v25406_v23 = vld [vmem:[%s36349_s1 + $0x1760] ss:$16 sps:$4 sm:$0xff]   ;;  %v25409_v20 = vld [vmem:[%s36349_s1 + $0x1768] ss:$16 sps:$4 sm:$0xff]  }
 0x2d1   : > { %6329 = vmatprep.mubr.bf16.mxu0 %v20809_v34  ;;  %6431 = vmatprep.mubr.bf16.mxu1 %v20809_v34  ;;  %v25417_v34 = vld [vmem:[%s36349_s1 + $0x178c] ss:$16 sps:$4 sm:$0xff]  }
 0x2d3   : > { %6341 = vmatpush1.bf16.msra.mxu0 %v25346_v56  ;;  %6443 = vmatpush1.bf16.msra.mxu1 %v25349_v57  ;;  %v25412_v56 = vld [vmem:[%s36349_s1 + $0x1780] ss:$16 sps:$4 sm:$0xff]   ;;  %v25415_v57 = vld [vmem:[%s36349_s1 + $0x1788] ss:$16 sps:$4 sm:$0xff]  }
 0x2d4   : > { %6342 = vmatprep.subr.bf16.mxu0 %v25354_v7  ;;  %6444 = vmatprep.subr.bf16.mxu1 %v25357_v60  ;;  %v25420_v7 = vld [vmem:[%s36349_s1 + $0x17a4] ss:$16 sps:$4 sm:$0xff]   ;;  %v25423_v60 = vld [vmem:[%s36349_s1 + $0x17ac] ss:$16 sps:$4 sm:$0xff]  }
 0x2d6   : > { %6330 = vmatmul.mubr.bf16.gmra.mrb[44].mxu0 %v20808_v61  ;;  %6432 = vmatmul.mubr.bf16.gmra.mrb[44].mxu1 %v20808_v61  ;;  %v25418_v61 = vld [vmem:[%s36349_s1 + $0x17a0] ss:$16 sps:$4 sm:$0xff]  }
 0x2d7   : > { %6343 = vmatpush1.bf16.msra.mxu0 %v25352_v1  ;;  %6445 = vmatpush1.bf16.msra.mxu1 %v25355_v2  ;;  %v25421_v1 = vld [vmem:[%s36349_s1 + $0x17a8] ss:$16 sps:$4 sm:$0xff]   ;;  %v25428_v2 = vld [vmem:[%s36349_s1 + $0x17c4] ss:$16 sps:$4 sm:$0xff]  }
 0x2d8   : > { %6344 = vmatprep.subr.bf16.mxu0 %v25360_v36  ;;  %6446 = vmatprep.subr.bf16.mxu1 %v25363_v5  ;;  %v25431_v36 = vld [vmem:[%s36349_s1 + $0x17cc] ss:$16 sps:$4 sm:$0xff]   ;;  %v25426_v5 = vld [vmem:[%s36349_s1 + $0x17c0] ss:$16 sps:$4 sm:$0xff]  }
 0x2d9   : > { %6370 = vmatprep.mubr.bf16.mxu0 %v20807_v12  ;;  %6472 = vmatprep.mubr.bf16.mxu1 %v20807_v12  ;;  %v25429_v12 = vld [vmem:[%s36349_s1 + $0x17c8] ss:$16 sps:$4 sm:$0xff]  }
 0x2db   : > { %6345 = vmatpush1.bf16.msra.mxu0 %v25358_v13  ;;  %6447 = vmatpush1.bf16.msra.mxu1 %v25361_v17  ;;  %v25434_v13 = vld [vmem:[%s36349_s1 + $0x17e4] ss:$16 sps:$4 sm:$0xff]   ;;  %v25437_v17 = vld [vmem:[%s36349_s1 + $0x17ec] ss:$16 sps:$4 sm:$0xff]  }
 0x2dc   : > { %6346 = vmatprep.subr.bf16.mxu0 %v25366_v37  ;;  %6448 = vmatprep.subr.bf16.mxu1 %v25369_v16  ;;  %v25432_v37 = vld [vmem:[%s36349_s1 + $0x17e0] ss:$16 sps:$4 sm:$0xff]   ;;  %v25435_v16 = vld [vmem:[%s36349_s1 + $0x17e8] ss:$16 sps:$4 sm:$0xff]  }
 0x2df   : > { %6347 = vmatpush1.bf16.msra.mxu0 %v25364_v18  ;;  %6449 = vmatpush1.bf16.msra.mxu1 %v25367_v53  ;;  %v25442_v18 = vld [vmem:[%s36349_s1 + $0x1804] ss:$16 sps:$4 sm:$0xff]   ;;  %v25445_v53 = vld [vmem:[%s36349_s1 + $0x180c] ss:$16 sps:$4 sm:$0xff]  }
 0x2e0   : > { %6348 = vmatprep.subr.bf16.mxu0 %v25372_v31  ;;  %6450 = vmatprep.subr.bf16.mxu1 %v25375_v55  ;;  %v25440_v31 = vld [vmem:[%s36349_s1 + $0x1800] ss:$16 sps:$4 sm:$0xff]   ;;  %v25443_v55 = vld [vmem:[%s36349_s1 + $0x1808] ss:$16 sps:$4 sm:$0xff]  }
 0x2e3   : > { %6349 = vmatpush1.bf16.msra.mxu0 %v25370_v26  ;;  %6451 = vmatpush1.bf16.msra.mxu1 %v25373_v3  ;;  %v30523_v26 = vld [vmem:[%s28009_s10 + $0x10] sm:$0xcc]  ;;  %v30526_v3 = vld [vmem:[%s28009_s10 + $0x20] sm:$0xff] }
 0x2e4   : > { %6350 = vmatprep.subr.bf16.mxu0 %v25378_v4  ;;  %6452 = vmatprep.subr.bf16.mxu1 %v25381_v44  ;;  %v30529_v4 = vld [vmem:[%s28009_s10 + $0x30] sm:$0xff]  ;;  %v30532_v44 = vld [vmem:[%s28009_s10 + $0x40] sm:$0x33] }
 0x2e7   : > { %6351 = vmatpush1.bf16.msra.mxu0 %v25376_v45  ;;  %6453 = vmatpush1.bf16.msra.mxu1 %v25379_v52  ;;  %v20806_v45 = vcombine.low %v30337_v6, %v30340_v8  ;;  %v25448_v52 = vld [vmem:[%s36349_s1 + $0x1824] ss:$16 sps:$4 sm:$0xff]   ;;  %v21073_v6 = vcombine.high %v30529_v4, %v30532_v44  ;;  %v25446_v8 = vld [vmem:[%s36349_s1 + $0x1820] ss:$16 sps:$4 sm:$0xff]  }
 0x2e8   : > { %6352 = vmatprep.subr.bf16.mxu0 %v25384_v41  ;;  %6454 = vmatprep.subr.bf16.mxu1 %v25387_v46  ;;  %v25451_v41 = vld [vmem:[%s36349_s1 + $0x182c] ss:$16 sps:$4 sm:$0xff]  }
 0x2e9   : > { %v4307_v25 = vpop.f32.mrb[32].mxu0  ;;  %v4409_v27 = vpop.f32.mrb[32].mxu1  ;;  %v27797_v46 = vld [vmem:[%s28009_s10 + $0x38] sm:$0xff] }
 0x2ea   : > { %v4308_v30 = vadd.f32 %v4307_v25, %v30193_v15  ;;  %v4410_v21 = vadd.f32 %v4409_v27, %v30195_v0  ;;  %v4309_v35 = vpop.f32.mrb[33].mxu0  ;;  %v4411_v39 = vpop.f32.mrb[33].mxu1  ;;  %v25396_v15 = vld [vmem:[%s36349_s1 + $0x1724] ss:$16 sps:$4 sm:$0xff]   ;;  %v25399_v0 = vld [vmem:[%s36349_s1 + $0x172c] ss:$16 sps:$4 sm:$0xff]  }
 0x2eb   : > { %v4310_v40 = vadd.f32 %v4309_v35, %v30197_v10  ;;  %v4412_v42 = vadd.f32 %v4411_v39, %v30199_v9  ;;  %6353 = vmatpush1.bf16.msra.mxu0 %v25382_v49  ;;  %6455 = vmatpush1.bf16.msra.mxu1 %v25385_v50  ;;  %v4311_v43 = vpop.f32.mrb[34].mxu0  ;;  %v4413_v47 = vpop.f32.mrb[34].mxu1  ;;  %v20811_v49 = vcombine.high %v27797_v46, %v27797_v46  ;;  %v25459_v25 = vld [vmem:[%s36349_s1 + $0x184c] ss:$16 sps:$4 sm:$0xff]   ;;  %v25454_v27 = vld [vmem:[%s36349_s1 + $0x1840] ss:$16 sps:$4 sm:$0xff]  }
 0x2ec   : > { %v30415_v28 = vadd.f32 %v4308_v30, %v29981_v54  ;;  %v30418_v14 = vadd.f32 %v4410_v21, %v29984_v32  ;;  %6354 = vmatprep.subr.bf16.mxu0 %v25390_v11  ;;  %6456 = vmatprep.subr.bf16.mxu1 %v25393_v62  ;;  %v4312_v10 = vpop.f32.mrb[35].mxu0  ;;  %v4414_v9 = vpop.f32.mrb[35].mxu1  ;;  %v25394_v32 = vld [vmem:[%s36349_s1 + $0x1720] ss:$16 sps:$4 sm:$0xff]   ;;  %v30545_v50 = vcombine.high %v30523_v26, %v30526_v3  ;;  %v25449_v11 = vld [vmem:[%s36349_s1 + $0x1828] ss:$16 sps:$4 sm:$0xff]  }
 0x2ed   : > { %v30427_v22 = vadd.f32 %v4310_v40, %v29993_v33  ;;  %v30430_v54 = vadd.f32 %v4412_v42, %v29996_v48  ;;  %v25402_v33 = vld [vmem:[%s36349_s1 + $0x1744] ss:$16 sps:$4 sm:$0xff]   ;;  %v25405_v48 = vld [vmem:[%s36349_s1 + $0x174c] ss:$16 sps:$4 sm:$0xff]   ;;  %v30568_v21 = vrot.slane %v21073_v6, 2 }
 0x2ee   : > { %v25456_v62 = vld [vmem:[%s36349_s1 + $0x1844] ss:$16 sps:$4 sm:$0xff]   ;;  %v6676_v30 = vrot.slane %v30545_v50, 2  ;;  %v25465_v39 = vld [vmem:[%s36349_s1 + $0x186c] ss:$16 sps:$4 sm:$0xff]  }
 0x2ef   : > { %6355 = vmatpush1.bf16.msra.mxu0 %v25388_v29  ;;  %6457 = vmatpush1.bf16.msra.mxu1 %v25391_v58  ;;  %v25457_v29 = vld [vmem:[%s36349_s1 + $0x1848] ss:$16 sps:$4 sm:$0xff]   ;;  %v20810_v58 = vcombine.low %v27797_v46, %v27797_v46  ;;  %v25462_v35 = vld [vmem:[%s36349_s1 + $0x1864] ss:$16 sps:$4 sm:$0xff]   ;;  %v25460_v42 = vld [vmem:[%s36349_s1 + $0x1860] ss:$16 sps:$4 sm:$0xff]  }
 0x2f0   : > { %6356 = vmatprep.subr.bf16.mxu0 %v25396_v15  ;;  %6458 = vmatprep.subr.bf16.mxu1 %v25399_v0  ;;  %v6678_v40 = vsel %vm36356_vm4, %v6676_v30, %v30568_v21  ;;  %v25463_v43 = vld [vmem:[%s36349_s1 + $0x1868] ss:$16 sps:$4 sm:$0xff]   ;;  %v25468_v47 = vld [vmem:[%s36349_s1 + $0x1884] ss:$16 sps:$4 sm:$0xff]   ;;  %v25471_v15 = vld [vmem:[%s36349_s1 + $0x188c] ss:$16 sps:$4 sm:$0xff]  }
 0x2f1   : > { %v25466_v0 = vld [vmem:[%s36349_s1 + $0x1880] ss:$16 sps:$4 sm:$0xff]   ;;  %v25469_v10 = vld [vmem:[%s36349_s1 + $0x1888] ss:$16 sps:$4 sm:$0xff]   ;;  %v25474_v9 = vld [vmem:[%s36349_s1 + $0x18a4] ss:$16 sps:$4 sm:$0xff]  }
 0x2f2   : > { %v25508_v46 = vld [vmem:[%s36349_s1 + $0x1960] ss:$16 sps:$4 sm:$0xff]   ;;  %v25516_v6 = vld [vmem:[%s36349_s1 + $0x1984] ss:$16 sps:$4 sm:$0xff]  }
 0x2f3   : > { %6357 = vmatpush1.bf16.msra.mxu0 %v25394_v32  ;;  %6459 = vmatpush1.bf16.msra.mxu1 %v25397_v63  ;;  %v25477_v32 = vld [vmem:[%s36349_s1 + $0x18ac] ss:$16 sps:$4 sm:$0xff]   ;;  %v25472_v63 = vld [vmem:[%s36349_s1 + $0x18a0] ss:$16 sps:$4 sm:$0xff]   ;;  %v25528_v30 = vld [vmem:[%s36349_s1 + $0x19c4] ss:$16 sps:$4 sm:$0xff]  }
 0x2f4   : > { %6358 = vmatprep.subr.bf16.mxu0 %v25402_v33  ;;  %6460 = vmatprep.subr.bf16.mxu1 %v25405_v48  ;;  %v25475_v33 = vld [vmem:[%s36349_s1 + $0x18a8] ss:$16 sps:$4 sm:$0xff]   ;;  %v25480_v48 = vld [vmem:[%s36349_s1 + $0x18c4] ss:$16 sps:$4 sm:$0xff]  }
 0x2f7   : > { %6359 = vmatpush1.bf16.msra.mxu0 %v25400_v24  ;;  %6461 = vmatpush1.bf16.msra.mxu1 %v25403_v51  ;;  %v25483_v24 = vld [vmem:[%s36349_s1 + $0x18cc] ss:$16 sps:$4 sm:$0xff]   ;;  %v25478_v51 = vld [vmem:[%s36349_s1 + $0x18c0] ss:$16 sps:$4 sm:$0xff]  }
 0x2f8   : > { %6360 = vmatprep.subr.bf16.mxu0 %v25408_v59  ;;  %6462 = vmatprep.subr.bf16.mxu1 %v25411_v38  ;;  %v25481_v59 = vld [vmem:[%s36349_s1 + $0x18c8] ss:$16 sps:$4 sm:$0xff]   ;;  %v25486_v38 = vld [vmem:[%s36349_s1 + $0x18e4] ss:$16 sps:$4 sm:$0xff]  }
 0x2fb   : > { %6361 = vmatpush1.bf16.msra.mxu0 %v25406_v23  ;;  %6463 = vmatpush1.bf16.msra.mxu1 %v25409_v20  ;;  %v25489_v23 = vld [vmem:[%s36349_s1 + $0x18ec] ss:$16 sps:$4 sm:$0xff]   ;;  %v25484_v20 = vld [vmem:[%s36349_s1 + $0x18e0] ss:$16 sps:$4 sm:$0xff]  }
 0x2fc   : > { %6362 = vmatprep.subr.bf16.mxu0 %v25414_v19  ;;  %6464 = vmatprep.subr.bf16.mxu1 %v25417_v34  ;;  %v25487_v19 = vld [vmem:[%s36349_s1 + $0x18e8] ss:$16 sps:$4 sm:$0xff]   ;;  %v25492_v34 = vld [vmem:[%s36349_s1 + $0x1904] ss:$16 sps:$4 sm:$0xff]  }
 0x2ff   : > { %6363 = vmatpush1.bf16.msra.mxu0 %v25412_v56  ;;  %6465 = vmatpush1.bf16.msra.mxu1 %v25415_v57  ;;  %v25495_v56 = vld [vmem:[%s36349_s1 + $0x190c] ss:$16 sps:$4 sm:$0xff]  }
 0x300   : > { %6364 = vmatprep.subr.bf16.mxu0 %v25420_v7  ;;  %6466 = vmatprep.subr.bf16.mxu1 %v25423_v60 }
 0x303   : > { %6365 = vmatpush1.bf16.msra.mxu0 %v25418_v61  ;;  %6467 = vmatpush1.bf16.msra.mxu1 %v25421_v1  ;;  %v25490_v1 = vld [vmem:[%s36349_s1 + $0x1900] ss:$16 sps:$4 sm:$0xff]  }
 0x304   : > { %6366 = vmatprep.subr.bf16.mxu0 %v25428_v2  ;;  %6468 = vmatprep.subr.bf16.mxu1 %v25431_v36  ;;  %v25493_v2 = vld [vmem:[%s36349_s1 + $0x1908] ss:$16 sps:$4 sm:$0xff]  }
 0x307   : > { %6367 = vmatpush1.bf16.msra.mxu0 %v25426_v5  ;;  %6469 = vmatpush1.bf16.msra.mxu1 %v25429_v12  ;;  %v25498_v12 = vld [vmem:[%s36349_s1 + $0x1924] ss:$16 sps:$4 sm:$0xff]  }
 0x308   : > { %6368 = vmatprep.subr.bf16.mxu0 %v25434_v13  ;;  %6470 = vmatprep.subr.bf16.mxu1 %v25437_v17  ;;  %v25501_v13 = vld [vmem:[%s36349_s1 + $0x192c] ss:$16 sps:$4 sm:$0xff]  }
 0x30b   : > { %6369 = vmatpush1.bf16.msra.mxu0 %v25432_v37  ;;  %6471 = vmatpush1.bf16.msra.mxu1 %v25435_v16  ;;  %v25496_v16 = vld [vmem:[%s36349_s1 + $0x1920] ss:$16 sps:$4 sm:$0xff]  }
 0x30c   : > { %7333 = vmatprep.subr.bf16.mxu0 %v25442_v18  ;;  %7435 = vmatprep.subr.bf16.mxu1 %v25445_v53  ;;  %v25499_v18 = vld [vmem:[%s36349_s1 + $0x1928] ss:$16 sps:$4 sm:$0xff]   ;;  %v25504_v53 = vld [vmem:[%s36349_s1 + $0x1944] ss:$16 sps:$4 sm:$0xff]  }
 0x30e   : > { %6371 = vmatmul.mubr.bf16.vlgmr.msra.gmra.mrb[0].mxu0 %v20806_v45  ;;  %6473 = vmatmul.mubr.bf16.vlgmr.msra.gmra.mrb[0].mxu1 %v20806_v45  ;;  %v25505_v45 = vld [vmem:[%s36349_s1 + $0x1948] ss:$16 sps:$4 sm:$0xff]  }
 0x30f   : > { %7334 = vmatpush1.bf16.msra.mxu0 %v25440_v31  ;;  %7436 = vmatpush1.bf16.msra.mxu1 %v25443_v55  ;;  %v25507_v31 = vld [vmem:[%s36349_s1 + $0x194c] ss:$16 sps:$4 sm:$0xff]   ;;  %v25502_v55 = vld [vmem:[%s36349_s1 + $0x1940] ss:$16 sps:$4 sm:$0xff]  }
 0x310   : > { %7335 = vmatprep.subr.bf16.mxu0 %v25448_v52  ;;  %7437 = vmatprep.subr.bf16.mxu1 %v25451_v41  ;;  %v25510_v52 = vld [vmem:[%s36349_s1 + $0x1964] ss:$16 sps:$4 sm:$0xff]   ;;  %v25513_v41 = vld [vmem:[%s36349_s1 + $0x196c] ss:$16 sps:$4 sm:$0xff]  }
 0x311   : > { %6380 = vmatprep.mubr.bf16.mxu0 %v20811_v49  ;;  %6482 = vmatprep.mubr.bf16.mxu1 %v20811_v49  ;;  %v25511_v49 = vld [vmem:[%s36349_s1 + $0x1968] ss:$16 sps:$4 sm:$0xff]  }
 0x313   : > { %7336 = vmatpush1.bf16.msra.mxu0 %v25446_v8  ;;  %7438 = vmatpush1.bf16.msra.mxu1 %v25449_v11  ;;  %v25519_v8 = vld [vmem:[%s36349_s1 + $0x198c] ss:$16 sps:$4 sm:$0xff]   ;;  %v25514_v11 = vld [vmem:[%s36349_s1 + $0x1980] ss:$16 sps:$4 sm:$0xff]  }
 0x314   : > { %7337 = vmatprep.subr.bf16.mxu0 %v25456_v62  ;;  %7439 = vmatprep.subr.bf16.mxu1 %v25459_v25  ;;  %v25517_v62 = vld [vmem:[%s36349_s1 + $0x1988] ss:$16 sps:$4 sm:$0xff]   ;;  %v25522_v25 = vld [vmem:[%s36349_s1 + $0x19a4] ss:$16 sps:$4 sm:$0xff]  }
 0x316   : > { %6381 = vmatmul.mubr.bf16.gmra.mrb[48].mxu0 %v20810_v58  ;;  %6483 = vmatmul.mubr.bf16.gmra.mrb[48].mxu1 %v20810_v58  ;;  %v25523_v58 = vld [vmem:[%s36349_s1 + $0x19a8] ss:$16 sps:$4 sm:$0xff]  }
 0x317   : > { %7338 = vmatpush1.bf16.msra.mxu0 %v25454_v27  ;;  %7440 = vmatpush1.bf16.msra.mxu1 %v25457_v29  ;;  %v25525_v27 = vld [vmem:[%s36349_s1 + $0x19ac] ss:$16 sps:$4 sm:$0xff]   ;;  %v25520_v29 = vld [vmem:[%s36349_s1 + $0x19a0] ss:$16 sps:$4 sm:$0xff]  }
 0x318   : > { %7339 = vmatprep.subr.bf16.mxu0 %v25462_v35  ;;  %7441 = vmatprep.subr.bf16.mxu1 %v25465_v39  ;;  %v25531_v35 = vld [vmem:[%s36349_s1 + $0x19cc] ss:$16 sps:$4 sm:$0xff]   ;;  %v25526_v39 = vld [vmem:[%s36349_s1 + $0x19c0] ss:$16 sps:$4 sm:$0xff]  }
 0x319   : > { %7365 = vmatprep.mubr.bf16.mxu0 %v6678_v40  ;;  %7467 = vmatprep.mubr.bf16.mxu1 %v6678_v40  ;;  %v25529_v40 = vld [vmem:[%s36349_s1 + $0x19c8] ss:$16 sps:$4 sm:$0xff]  }
 0x31b   : > { %7340 = vmatpush1.bf16.msra.mxu0 %v25460_v42  ;;  %7442 = vmatpush1.bf16.msra.mxu1 %v25463_v43  ;;  %v30726_v42 = vcombine.low %v30523_v26, %v30526_v3  ;;  %v21072_v43 = vcombine.low %v30529_v4, %v30532_v44  ;;  %v25532_v26 = vld [vmem:[%s36349_s1 + $0x19e0] ss:$16 sps:$4 sm:$0xff]   ;;  %v25535_v3 = vld [vmem:[%s36349_s1 + $0x19e8] ss:$16 sps:$4 sm:$0xff]  }
 0x31c   : > { %7341 = vmatprep.subr.bf16.mxu0 %v25468_v47  ;;  %7443 = vmatprep.subr.bf16.mxu1 %v25471_v15  ;;  %v25534_v47 = vld [vmem:[%s36349_s1 + $0x19e4] ss:$16 sps:$4 sm:$0xff]   ;;  %v25537_v15 = vld [vmem:[%s36349_s1 + $0x19ec] ss:$16 sps:$4 sm:$0xff]  }
 0x31d   : > { %v6674_v4 = vrot.slane %v21072_v43, 2  ;;  %v6673_v44 = vrot.slane %v30726_v42, 2  ;;  %v25593_v43 = vld [vmem:[%s36349_s1 + $0x1b08] ss:$16 sps:$4 sm:$0xff]  }
 0x31f   : > { %7342 = vmatpush1.bf16.msra.mxu0 %v25466_v0  ;;  %7444 = vmatpush1.bf16.msra.mxu1 %v25469_v10  ;;  %v25544_v0 = vld [vmem:[%s36349_s1 + $0x1a04] ss:$16 sps:$4 sm:$0xff]   ;;  %v25547_v10 = vld [vmem:[%s36349_s1 + $0x1a0c] ss:$16 sps:$4 sm:$0xff]  }
 0x320   : > { %7343 = vmatprep.subr.bf16.mxu0 %v25474_v9  ;;  %7445 = vmatprep.subr.bf16.mxu1 %v25477_v32  ;;  %v25542_v9 = vld [vmem:[%s36349_s1 + $0x1a00] ss:$16 sps:$4 sm:$0xff]   ;;  %v25545_v32 = vld [vmem:[%s36349_s1 + $0x1a08] ss:$16 sps:$4 sm:$0xff]  }
 0x323   : > { %7344 = vmatpush1.bf16.msra.mxu0 %v25472_v63  ;;  %7446 = vmatpush1.bf16.msra.mxu1 %v25475_v33  ;;  %v30756_v63 = vld [vmem:[%s28009_s10 + $0x18] sm:$0xcc]  ;;  %v6675_v33 = vsel %vm36356_vm4, %v6673_v44, %v6674_v4 }
 0x324   : > { %7345 = vmatprep.subr.bf16.mxu0 %v25480_v48  ;;  %7447 = vmatprep.subr.bf16.mxu1 %v25483_v24  ;;  %v30760_v48 = vld [vmem:[%s28009_s10 + $0x28] sm:$0xff]  ;;  %v30763_v24 = vld [vmem:[%s28009_s10 + $0x38] sm:$0xff] }
 0x327   : > { %7346 = vmatpush1.bf16.msra.mxu0 %v25478_v51  ;;  %7448 = vmatpush1.bf16.msra.mxu1 %v25481_v59  ;;  %v30766_v51 = vld [vmem:[%s28009_s10 + $0x48] sm:$0x33]  ;;  %v25550_v59 = vld [vmem:[%s36349_s1 + $0x1a24] ss:$16 sps:$4 sm:$0xff]  }
 0x328   : > { %7347 = vmatprep.subr.bf16.mxu0 %v25486_v38  ;;  %7449 = vmatprep.subr.bf16.mxu1 %v25489_v23  ;;  %v25553_v38 = vld [vmem:[%s36349_s1 + $0x1a2c] ss:$16 sps:$4 sm:$0xff]   ;;  %v30776_v23 = vcombine.high %v30756_v63, %v30760_v48 }
 0x329   : > { %v30638_v57 = vpop.f32.mrb[36].mxu0  ;;  %v30640_v7 = vpop.f32.mrb[36].mxu1 }
 0x32a   : > { %v30642_v60 = vpop.f32.mrb[37].mxu0  ;;  %v30644_v61 = vpop.f32.mrb[37].mxu1 }
 0x32b   : > { %7348 = vmatpush1.bf16.msra.mxu0 %v25484_v20  ;;  %7450 = vmatpush1.bf16.msra.mxu1 %v25487_v19  ;;  %v5334_v36 = vpop.f32.mrb[38].mxu0  ;;  %v5436_v5 = vpop.f32.mrb[38].mxu1  ;;  %v21075_v20 = vcombine.high %v30763_v24, %v30766_v51  ;;  %v25548_v19 = vld [vmem:[%s36349_s1 + $0x1a20] ss:$16 sps:$4 sm:$0xff]  }
 0x32c   : > { %7349 = vmatprep.subr.bf16.mxu0 %v25492_v34  ;;  %7451 = vmatprep.subr.bf16.mxu1 %v25495_v56  ;;  %v5335_v17 = vpop.f32.mrb[39].mxu0  ;;  %v5437_v37 = vpop.f32.mrb[39].mxu1  ;;  %v25551_v34 = vld [vmem:[%s36349_s1 + $0x1a28] ss:$16 sps:$4 sm:$0xff]   ;;  %v25556_v56 = vld [vmem:[%s36349_s1 + $0x1a44] ss:$16 sps:$4 sm:$0xff]  }
 0x32d   : > { %v30795_v36 = vrot.slane %v21075_v20, 2  ;;  %v25554_v5 = vld [vmem:[%s36349_s1 + $0x1a40] ss:$16 sps:$4 sm:$0xff]   ;;  %v25605_v20 = vld [vmem:[%s36349_s1 + $0x1b48] ss:$16 sps:$4 sm:$0xff]  }
 0x32e   : > { %v25560_v37 = vld [vmem:[%s36349_s1 + $0x1a60] ss:$16 sps:$4 sm:$0xff]  }
 0x32f   : > { %7350 = vmatpush1.bf16.msra.mxu0 %v25490_v1  ;;  %7452 = vmatpush1.bf16.msra.mxu1 %v25493_v2  ;;  %v25559_v1 = vld [vmem:[%s36349_s1 + $0x1a4c] ss:$16 sps:$4 sm:$0xff]   ;;  %v6682_v2 = vrot.slane %v30776_v23, 2 }
 0x330   : > { %7351 = vmatprep.subr.bf16.mxu0 %v25498_v12  ;;  %7453 = vmatprep.subr.bf16.mxu1 %v25501_v13  ;;  %v25557_v12 = vld [vmem:[%s36349_s1 + $0x1a48] ss:$16 sps:$4 sm:$0xff]   ;;  %v25565_v13 = vld [vmem:[%s36349_s1 + $0x1a6c] ss:$16 sps:$4 sm:$0xff]  }
 0x331   : > { %v6684_v17 = vsel %vm36356_vm4, %v6682_v2, %v30795_v36  ;;  %v25616_v2 = vld [vmem:[%s36349_s1 + $0x1b84] ss:$16 sps:$4 sm:$0xff]  }
 0x333   : > { %7352 = vmatpush1.bf16.msra.mxu0 %v25496_v16  ;;  %7454 = vmatpush1.bf16.msra.mxu1 %v25499_v18  ;;  %v25563_v16 = vld [vmem:[%s36349_s1 + $0x1a68] ss:$16 sps:$4 sm:$0xff]   ;;  %v25568_v18 = vld [vmem:[%s36349_s1 + $0x1a84] ss:$16 sps:$4 sm:$0xff]  }
 0x334   : > { %7353 = vmatprep.subr.bf16.mxu0 %v25504_v53  ;;  %7455 = vmatprep.subr.bf16.mxu1 %v25507_v31  ;;  %v25571_v53 = vld [vmem:[%s36349_s1 + $0x1a8c] ss:$16 sps:$4 sm:$0xff]   ;;  %v25566_v31 = vld [vmem:[%s36349_s1 + $0x1a80] ss:$16 sps:$4 sm:$0xff]  }
 0x337   : > { %7354 = vmatpush1.bf16.msra.mxu0 %v25502_v55  ;;  %7456 = vmatpush1.bf16.msra.mxu1 %v25505_v45  ;;  %v25569_v55 = vld [vmem:[%s36349_s1 + $0x1a88] ss:$16 sps:$4 sm:$0xff]   ;;  %v25574_v45 = vld [vmem:[%s36349_s1 + $0x1aa4] ss:$16 sps:$4 sm:$0xff]  }
 0x338   : > { %7355 = vmatprep.subr.bf16.mxu0 %v25510_v52  ;;  %7457 = vmatprep.subr.bf16.mxu1 %v25513_v41  ;;  %v25577_v52 = vld [vmem:[%s36349_s1 + $0x1aac] ss:$16 sps:$4 sm:$0xff]   ;;  %v25572_v41 = vld [vmem:[%s36349_s1 + $0x1aa0] ss:$16 sps:$4 sm:$0xff]  }
 0x33b   : > { %7356 = vmatpush1.bf16.msra.mxu0 %v25508_v46  ;;  %7458 = vmatpush1.bf16.msra.mxu1 %v25511_v49  ;;  %v25575_v46 = vld [vmem:[%s36349_s1 + $0x1aa8] ss:$16 sps:$4 sm:$0xff]   ;;  %v25580_v49 = vld [vmem:[%s36349_s1 + $0x1ac4] ss:$16 sps:$4 sm:$0xff]  }
 0x33c   : > { %7357 = vmatprep.subr.bf16.mxu0 %v25516_v6  ;;  %7459 = vmatprep.subr.bf16.mxu1 %v25519_v8  ;;  %v25583_v6 = vld [vmem:[%s36349_s1 + $0x1acc] ss:$16 sps:$4 sm:$0xff]   ;;  %v25578_v8 = vld [vmem:[%s36349_s1 + $0x1ac0] ss:$16 sps:$4 sm:$0xff]  }
 0x33f   : > { %7358 = vmatpush1.bf16.msra.mxu0 %v25514_v11  ;;  %7460 = vmatpush1.bf16.msra.mxu1 %v25517_v62  ;;  %v25581_v11 = vld [vmem:[%s36349_s1 + $0x1ac8] ss:$16 sps:$4 sm:$0xff]   ;;  %v25586_v62 = vld [vmem:[%s36349_s1 + $0x1ae4] ss:$16 sps:$4 sm:$0xff]  }
 0x340   : > { %7359 = vmatprep.subr.bf16.mxu0 %v25522_v25  ;;  %7461 = vmatprep.subr.bf16.mxu1 %v25525_v27  ;;  %v25589_v25 = vld [vmem:[%s36349_s1 + $0x1aec] ss:$16 sps:$4 sm:$0xff]   ;;  %v25584_v27 = vld [vmem:[%s36349_s1 + $0x1ae0] ss:$16 sps:$4 sm:$0xff]  }
 0x343   : > { %7360 = vmatpush1.bf16.msra.mxu0 %v25520_v29  ;;  %7462 = vmatpush1.bf16.msra.mxu1 %v25523_v58  ;;  %v25587_v29 = vld [vmem:[%s36349_s1 + $0x1ae8] ss:$16 sps:$4 sm:$0xff]   ;;  %v25592_v58 = vld [vmem:[%s36349_s1 + $0x1b04] ss:$16 sps:$4 sm:$0xff]  }
 0x344   : > { %7361 = vmatprep.subr.bf16.mxu0 %v25528_v30  ;;  %7463 = vmatprep.subr.bf16.mxu1 %v25531_v35  ;;  %v25595_v30 = vld [vmem:[%s36349_s1 + $0x1b0c] ss:$16 sps:$4 sm:$0xff]  }
 0x347   : > { %7362 = vmatpush1.bf16.msra.mxu0 %v25526_v39  ;;  %7464 = vmatpush1.bf16.msra.mxu1 %v25529_v40  ;;  %v25590_v40 = vld [vmem:[%s36349_s1 + $0x1b00] ss:$16 sps:$4 sm:$0xff]  }
 0x348   : > { %7363 = vmatprep.subr.bf16.mxu0 %v25534_v47  ;;  %7465 = vmatprep.subr.bf16.mxu1 %v25537_v15 }
 0x34b   : > { %7364 = vmatpush1.bf16.msra.mxu0 %v25532_v26  ;;  %7466 = vmatpush1.bf16.msra.mxu1 %v25535_v3 }
 0x34c   : > { %7384 = vmatprep.subr.bf16.mxu0 %v25544_v0  ;;  %7486 = vmatprep.subr.bf16.mxu1 %v25547_v10 }
 0x34e   : > { %7366 = vmatmul.mubr.bf16.vlgmr.msra.gmra.mrb[0].mxu0 %v6675_v33  ;;  %7468 = vmatmul.mubr.bf16.vlgmr.msra.gmra.mrb[0].mxu1 %v6675_v33 }
 0x34f   : > { %7385 = vmatpush1.bf16.msra.mxu0 %v25542_v9  ;;  %7487 = vmatpush1.bf16.msra.mxu1 %v25545_v32 }
 0x350   : > { %7386 = vmatprep.subr.bf16.mxu0 %v25550_v59  ;;  %7488 = vmatprep.subr.bf16.mxu1 %v25553_v38  ;;  %v25599_v59 = vld [vmem:[%s36349_s1 + $0x1b28] ss:$16 sps:$4 sm:$0xff]   ;;  %v25602_v38 = vld [vmem:[%s36349_s1 + $0x1b40] ss:$16 sps:$4 sm:$0xff]  }
 0x351   : > { %7375 = vmatprep.mubr.bf16.mxu0 %v30568_v21  ;;  %7477 = vmatprep.mubr.bf16.mxu1 %v30568_v21  ;;  %v25562_v21 = vld [vmem:[%s36349_s1 + $0x1a64] ss:$16 sps:$4 sm:$0xff]  }
 0x353   : > { %7387 = vmatpush1.bf16.msra.mxu0 %v25548_v19  ;;  %7489 = vmatpush1.bf16.msra.mxu1 %v25551_v34  ;;  %v25610_v19 = vld [vmem:[%s36349_s1 + $0x1b64] ss:$16 sps:$4 sm:$0xff]   ;;  %v25613_v34 = vld [vmem:[%s36349_s1 + $0x1b6c] ss:$16 sps:$4 sm:$0xff]  }
 0x354   : > { %7388 = vmatprep.subr.bf16.mxu0 %v25556_v56  ;;  %7490 = vmatprep.subr.bf16.mxu1 %v25559_v1  ;;  %v25608_v56 = vld [vmem:[%s36349_s1 + $0x1b60] ss:$16 sps:$4 sm:$0xff]   ;;  %v25611_v1 = vld [vmem:[%s36349_s1 + $0x1b68] ss:$16 sps:$4 sm:$0xff]  }
 0x356   : > { %7376 = vmatmul.mubr.bf16.gmra.mrb[52].mxu0 %v6674_v4  ;;  %7478 = vmatmul.mubr.bf16.gmra.mrb[52].mxu1 %v6674_v4 }
 0x357   : > { %7389 = vmatpush1.bf16.msra.mxu0 %v25554_v5  ;;  %7491 = vmatpush1.bf16.msra.mxu1 %v25557_v12  ;;  %v25619_v5 = vld [vmem:[%s36349_s1 + $0x1b8c] ss:$16 sps:$4 sm:$0xff]   ;;  %v25614_v12 = vld [vmem:[%s36349_s1 + $0x1b80] ss:$16 sps:$4 sm:$0xff]  }
 0x358   : > { %7390 = vmatprep.subr.bf16.mxu0 %v25562_v21  ;;  %7492 = vmatprep.subr.bf16.mxu1 %v25565_v13  ;;  %v25617_v21 = vld [vmem:[%s36349_s1 + $0x1b88] ss:$16 sps:$4 sm:$0xff]   ;;  %v25622_v13 = vld [vmem:[%s36349_s1 + $0x1ba4] ss:$16 sps:$4 sm:$0xff]  }
 0x359   : > { %7416 = vmatprep.mubr.bf16.mxu0 %v6684_v17  ;;  %7518 = vmatprep.mubr.bf16.mxu1 %v6684_v17  ;;  %v25625_v17 = vld [vmem:[%s36349_s1 + $0x1bac] ss:$16 sps:$4 sm:$0xff]  }
 0x35b   : > { %7391 = vmatpush1.bf16.msra.mxu0 %v25560_v37  ;;  %7493 = vmatpush1.bf16.msra.mxu1 %v25563_v16  ;;  %v25620_v37 = vld [vmem:[%s36349_s1 + $0x1ba0] ss:$16 sps:$4 sm:$0xff]   ;;  %v25623_v16 = vld [vmem:[%s36349_s1 + $0x1ba8] ss:$16 sps:$4 sm:$0xff]  }
 0x35c   : > { %7392 = vmatprep.subr.bf16.mxu0 %v25568_v18  ;;  %7494 = vmatprep.subr.bf16.mxu1 %v25571_v53  ;;  %v25628_v18 = vld [vmem:[%s36349_s1 + $0x1bc4] ss:$16 sps:$4 sm:$0xff]   ;;  %v25631_v53 = vld [vmem:[%s36349_s1 + $0x1bcc] ss:$16 sps:$4 sm:$0xff]  }
 0x35f   : > { %7393 = vmatpush1.bf16.msra.mxu0 %v25566_v31  ;;  %7495 = vmatpush1.bf16.msra.mxu1 %v25569_v55  ;;  %v25626_v31 = vld [vmem:[%s36349_s1 + $0x1bc0] ss:$16 sps:$4 sm:$0xff]   ;;  %v25629_v55 = vld [vmem:[%s36349_s1 + $0x1bc8] ss:$16 sps:$4 sm:$0xff]  }
 0x360   : > { %7394 = vmatprep.subr.bf16.mxu0 %v25574_v45  ;;  %7496 = vmatprep.subr.bf16.mxu1 %v25577_v52  ;;  %v30967_v45 = vcombine.low %v30756_v63, %v30760_v48  ;;  %v21074_v52 = vcombine.low %v30763_v24, %v30766_v51  ;;  %v25632_v48 = vld [vmem:[%s36349_s1 + $0x1be0] ss:$16 sps:$4 sm:$0xff]   ;;  %v25635_v24 = vld [vmem:[%s36349_s1 + $0x1be8] ss:$16 sps:$4 sm:$0xff]  }
 0x362   : > { %v6680_v51 = vrot.slane %v21074_v52, 2 }
 0x363   : > { %7395 = vmatpush1.bf16.msra.mxu0 %v25572_v41  ;;  %7497 = vmatpush1.bf16.msra.mxu1 %v25575_v46  ;;  %v30972_v41 = vld [vmem:[%s28009_s10 + $0x40] sm:$0x77] }
 0x364   : > { %7396 = vmatprep.subr.bf16.mxu0 %v25580_v49  ;;  %7498 = vmatprep.subr.bf16.mxu1 %v25583_v6  ;;  %v25634_v46 = vld [vmem:[%s36349_s1 + $0x1be4] ss:$16 sps:$4 sm:$0xff]   ;;  %v25637_v49 = vld [vmem:[%s36349_s1 + $0x1bec] ss:$16 sps:$4 sm:$0xff]  }
 0x365   : > { %v30981_v6 = vld [vmem:[%s28009_s10 + $0x30] sm:$0xff] }
 0x366   : > { %v30985_v63 = vcombine.high %v30981_v6, %v30972_v41 }
 0x367   : > { %7397 = vmatpush1.bf16.msra.mxu0 %v25578_v8  ;;  %7499 = vmatpush1.bf16.msra.mxu1 %v25581_v11  ;;  %v6679_v8 = vrot.slane %v30967_v45, 2  ;;  %v25644_v11 = vld [vmem:[%s36349_s1 + $0x1c04] ss:$16 sps:$4 sm:$0xff]  }
 0x368   : > { %7398 = vmatprep.subr.bf16.mxu0 %v25586_v62  ;;  %7500 = vmatprep.subr.bf16.mxu1 %v25589_v25  ;;  %v25647_v62 = vld [vmem:[%s36349_s1 + $0x1c0c] ss:$16 sps:$4 sm:$0xff]   ;;  %v25642_v25 = vld [vmem:[%s36349_s1 + $0x1c00] ss:$16 sps:$4 sm:$0xff]  }
 0x369   : > { %v5381_v35 = vpop.f32.mrb[40].mxu0  ;;  %v5483_v39 = vpop.f32.mrb[40].mxu1 }
 0x36a   : > { %v5382_v47 = vadd.f32 %v5381_v35, %v30638_v57  ;;  %v5484_v15 = vadd.f32 %v5483_v39, %v30640_v7  ;;  %v5383_v26 = vpop.f32.mrb[41].mxu0  ;;  %v5485_v3 = vpop.f32.mrb[41].mxu1  ;;  %v25598_v57 = vld [vmem:[%s36349_s1 + $0x1b24] ss:$16 sps:$4 sm:$0xff]   ;;  %v25601_v7 = vld [vmem:[%s36349_s1 + $0x1b2c] ss:$16 sps:$4 sm:$0xff]   ;;  %v6681_v39 = vsel %vm36356_vm4, %v6679_v8, %v6680_v51 }
 0x36b   : > { %v5384_v4 = vadd.f32 %v5383_v26, %v30642_v60  ;;  %v5486_v44 = vadd.f32 %v5485_v3, %v30644_v61  ;;  %7399 = vmatpush1.bf16.msra.mxu0 %v25584_v27  ;;  %7501 = vmatpush1.bf16.msra.mxu1 %v25587_v29  ;;  %v5385_v0 = vpop.f32.mrb[42].mxu0  ;;  %v5487_v10 = vpop.f32.mrb[42].mxu1  ;;  %v25645_v27 = vld [vmem:[%s36349_s1 + $0x1c08] ss:$16 sps:$4 sm:$0xff]   ;;  %v7709_v29 = vshrl.u32 %v30545_v50, 16  ;;  %v7720_v35 = vshll.u32 %v30985_v63, 16 }
 0x36c   : > { %v30882_v9 = vadd.f32 %v5382_v47, %v30415_v28  ;;  %v30885_v32 = vadd.f32 %v5484_v15, %v30418_v14  ;;  %7400 = vmatprep.subr.bf16.mxu0 %v25592_v58  ;;  %7502 = vmatprep.subr.bf16.mxu1 %v25595_v30  ;;  %v5386_v60 = vpop.f32.mrb[43].mxu0  ;;  %v5488_v61 = vpop.f32.mrb[43].mxu1  ;;  %v25596_v14 = vld [vmem:[%s36349_s1 + $0x1b20] ss:$16 sps:$4 sm:$0xff]   ;;  %v7712_v58 = vshll.u32 %v30545_v50, 16  ;;  %v7717_v30 = vshrl.u32 %v30985_v63, 16 }
 0x36d   : > { %v30894_v33 = vadd.f32 %v5384_v4, %v30427_v22  ;;  %v30897_v28 = vadd.f32 %v5486_v44, %v30430_v54  ;;  %v25604_v22 = vld [vmem:[%s36349_s1 + $0x1b44] ss:$16 sps:$4 sm:$0xff]   ;;  %v25607_v54 = vld [vmem:[%s36349_s1 + $0x1b4c] ss:$16 sps:$4 sm:$0xff]   ;;  %v7711_v47 = vrot.slane %v7709_v29, 2  ;;  %v7722_v26 = vrot.slane %v7720_v35, 3 }
 0x36e   : > { %v7714_v50 = vrot.slane %v7712_v58, 3  ;;  %v7719_v15 = vrot.slane %v7717_v30, 2  ;;  %v25648_v3 = vld [vmem:[%s36349_s1 + $0x1c20] ss:$16 sps:$4 sm:$0xff]   ;;  %v25651_v4 = vld [vmem:[%s36349_s1 + $0x1c28] ss:$16 sps:$4 sm:$0xff]  }
 0x36f   : > { %7401 = vmatpush1.bf16.msra.mxu0 %v25590_v40  ;;  %7503 = vmatpush1.bf16.msra.mxu1 %v25593_v43  ;;  %v25650_v40 = vld [vmem:[%s36349_s1 + $0x1c24] ss:$16 sps:$4 sm:$0xff]   ;;  %v25653_v43 = vld [vmem:[%s36349_s1 + $0x1c2c] ss:$16 sps:$4 sm:$0xff]   ;;  %v25654_v10 = vld [vmem:[%s36349_s1 + $0x1c40] ss:$16 sps:$4 sm:$0xff]  }
 0x370   : > { %7402 = vmatprep.subr.bf16.mxu0 %v25598_v57  ;;  %7504 = vmatprep.subr.bf16.mxu1 %v25601_v7  ;;  %v25656_v44 = vld [vmem:[%s36349_s1 + $0x1c44] ss:$16 sps:$4 sm:$0xff]   ;;  %v25659_v0 = vld [vmem:[%s36349_s1 + $0x1c4c] ss:$16 sps:$4 sm:$0xff]   ;;  %v25657_v57 = vld [vmem:[%s36349_s1 + $0x1c48] ss:$16 sps:$4 sm:$0xff]   ;;  %v7715_v7 = vor.u32 %v7714_v50, %v7711_v47  ;;  %v31037_v60 = vor.u32 %v7722_v26, %v7719_v15 }
 0x371   : > { %v25665_v61 = vld [vmem:[%s36349_s1 + $0x1c6c] ss:$16 sps:$4 sm:$0xff]   ;;  %v25696_v29 = vld [vmem:[%s36349_s1 + $0x1d20] ss:$16 sps:$4 sm:$0xff]   ;;  %v25699_v58 = vld [vmem:[%s36349_s1 + $0x1d28] ss:$16 sps:$4 sm:$0xff]  }
 0x372   : > { %v25704_v30 = vld [vmem:[%s36349_s1 + $0x1d44] ss:$16 sps:$4 sm:$0xff]   ;;  %v25707_v35 = vld [vmem:[%s36349_s1 + $0x1d4c] ss:$16 sps:$4 sm:$0xff]   ;;  %v25708_v50 = vld [vmem:[%s36349_s1 + $0x1d60] ss:$16 sps:$4 sm:$0xff]  }
 0x373   : > { %7403 = vmatpush1.bf16.msra.mxu0 %v25596_v14  ;;  %7505 = vmatpush1.bf16.msra.mxu1 %v25599_v59  ;;  %v7724_v14 = vsel %vm36357_vm5, %v7715_v7, %v31037_v60  ;;  %v25660_v59 = vld [vmem:[%s36349_s1 + $0x1c60] ss:$16 sps:$4 sm:$0xff]   ;;  %v25713_v47 = vld [vmem:[%s36349_s1 + $0x1d6c] ss:$16 sps:$4 sm:$0xff]   ;;  %v25711_v15 = vld [vmem:[%s36349_s1 + $0x1d68] ss:$16 sps:$4 sm:$0xff]  }
 0x374   : > { %7404 = vmatprep.subr.bf16.mxu0 %v25604_v22  ;;  %7506 = vmatprep.subr.bf16.mxu1 %v25607_v54  ;;  %v25663_v22 = vld [vmem:[%s36349_s1 + $0x1c68] ss:$16 sps:$4 sm:$0xff]   ;;  %v25668_v54 = vld [vmem:[%s36349_s1 + $0x1c84] ss:$16 sps:$4 sm:$0xff]   ;;  %v25720_v7 = vld [vmem:[%s36349_s1 + $0x1da0] ss:$16 sps:$4 sm:$0xff]  }
 0x375   : > { %v25716_v26 = vld [vmem:[%s36349_s1 + $0x1d84] ss:$16 sps:$4 sm:$0xff]  }
 0x377   : > { %7405 = vmatpush1.bf16.msra.mxu0 %v25602_v38  ;;  %7507 = vmatpush1.bf16.msra.mxu1 %v25605_v20  ;;  %v25671_v38 = vld [vmem:[%s36349_s1 + $0x1c8c] ss:$16 sps:$4 sm:$0xff]   ;;  %v25666_v20 = vld [vmem:[%s36349_s1 + $0x1c80] ss:$16 sps:$4 sm:$0xff]  }
 0x378   : > { %7406 = vmatprep.subr.bf16.mxu0 %v25610_v19  ;;  %7508 = vmatprep.subr.bf16.mxu1 %v25613_v34  ;;  %v25669_v19 = vld [vmem:[%s36349_s1 + $0x1c88] ss:$16 sps:$4 sm:$0xff]   ;;  %v25674_v34 = vld [vmem:[%s36349_s1 + $0x1ca4] ss:$16 sps:$4 sm:$0xff]  }
 0x37b   : > { %7407 = vmatpush1.bf16.msra.mxu0 %v25608_v56  ;;  %7509 = vmatpush1.bf16.msra.mxu1 %v25611_v1  ;;  %v25677_v56 = vld [vmem:[%s36349_s1 + $0x1cac] ss:$16 sps:$4 sm:$0xff]   ;;  %v25672_v1 = vld [vmem:[%s36349_s1 + $0x1ca0] ss:$16 sps:$4 sm:$0xff]  }
 0x37c   : > { %7408 = vmatprep.subr.bf16.mxu0 %v25616_v2  ;;  %7510 = vmatprep.subr.bf16.mxu1 %v25619_v5  ;;  %v25675_v2 = vld [vmem:[%s36349_s1 + $0x1ca8] ss:$16 sps:$4 sm:$0xff]   ;;  %v25680_v5 = vld [vmem:[%s36349_s1 + $0x1cc4] ss:$16 sps:$4 sm:$0xff]  }
 0x37f   : > { %7409 = vmatpush1.bf16.msra.mxu0 %v25614_v12  ;;  %7511 = vmatpush1.bf16.msra.mxu1 %v25617_v21  ;;  %v25683_v12 = vld [vmem:[%s36349_s1 + $0x1ccc] ss:$16 sps:$4 sm:$0xff]   ;;  %v25678_v21 = vld [vmem:[%s36349_s1 + $0x1cc0] ss:$16 sps:$4 sm:$0xff]  }
 0x380   : > { %7410 = vmatprep.subr.bf16.mxu0 %v25622_v13  ;;  %7512 = vmatprep.subr.bf16.mxu1 %v25625_v17  ;;  %v25681_v13 = vld [vmem:[%s36349_s1 + $0x1cc8] ss:$16 sps:$4 sm:$0xff]   ;;  %v25686_v17 = vld [vmem:[%s36349_s1 + $0x1ce4] ss:$16 sps:$4 sm:$0xff]  }
 0x383   : > { %7411 = vmatpush1.bf16.msra.mxu0 %v25620_v37  ;;  %7513 = vmatpush1.bf16.msra.mxu1 %v25623_v16  ;;  %v25689_v37 = vld [vmem:[%s36349_s1 + $0x1cec] ss:$16 sps:$4 sm:$0xff]   ;;  %v25684_v16 = vld [vmem:[%s36349_s1 + $0x1ce0] ss:$16 sps:$4 sm:$0xff]  }
 0x384   : > { %7412 = vmatprep.subr.bf16.mxu0 %v25628_v18  ;;  %7514 = vmatprep.subr.bf16.mxu1 %v25631_v53  ;;  %v25687_v18 = vld [vmem:[%s36349_s1 + $0x1ce8] ss:$16 sps:$4 sm:$0xff]   ;;  %v25692_v53 = vld [vmem:[%s36349_s1 + $0x1d04] ss:$16 sps:$4 sm:$0xff]  }
 0x387   : > { %7413 = vmatpush1.bf16.msra.mxu0 %v25626_v31  ;;  %7515 = vmatpush1.bf16.msra.mxu1 %v25629_v55  ;;  %v25695_v31 = vld [vmem:[%s36349_s1 + $0x1d0c] ss:$16 sps:$4 sm:$0xff]  }
 0x388   : > { %7414 = vmatprep.subr.bf16.mxu0 %v25634_v46  ;;  %7516 = vmatprep.subr.bf16.mxu1 %v25637_v49 }
 0x38b   : > { %7415 = vmatpush1.bf16.msra.mxu0 %v25632_v48  ;;  %7517 = vmatpush1.bf16.msra.mxu1 %v25635_v24  ;;  %v25690_v48 = vld [vmem:[%s36349_s1 + $0x1d00] ss:$16 sps:$4 sm:$0xff]   ;;  %v25693_v24 = vld [vmem:[%s36349_s1 + $0x1d08] ss:$16 sps:$4 sm:$0xff]  }
 0x38c   : > { %8407 = vmatprep.subr.bf16.mxu0 %v25644_v11  ;;  %8509 = vmatprep.subr.bf16.mxu1 %v25647_v62  ;;  %v25698_v11 = vld [vmem:[%s36349_s1 + $0x1d24] ss:$16 sps:$4 sm:$0xff]   ;;  %v25701_v62 = vld [vmem:[%s36349_s1 + $0x1d2c] ss:$16 sps:$4 sm:$0xff]  }
 0x38e   : > { %7417 = vmatmul.mubr.bf16.vlgmr.msra.gmra.mrb[0].mxu0 %v6681_v39  ;;  %7519 = vmatmul.mubr.bf16.vlgmr.msra.gmra.mrb[0].mxu1 %v6681_v39  ;;  %v25702_v39 = vld [vmem:[%s36349_s1 + $0x1d40] ss:$16 sps:$4 sm:$0xff]  }
 0x38f   : > { %8408 = vmatpush1.bf16.msra.mxu0 %v25642_v25  ;;  %8510 = vmatpush1.bf16.msra.mxu1 %v25645_v27 }
 0x390   : > { %8409 = vmatprep.subr.bf16.mxu0 %v25650_v40  ;;  %8511 = vmatprep.subr.bf16.mxu1 %v25653_v43  ;;  %v25705_v40 = vld [vmem:[%s36349_s1 + $0x1d48] ss:$16 sps:$4 sm:$0xff]   ;;  %v25710_v43 = vld [vmem:[%s36349_s1 + $0x1d64] ss:$16 sps:$4 sm:$0xff]  }
 0x391   : > { %7426 = vmatprep.mubr.bf16.mxu0 %v30795_v36  ;;  %7528 = vmatprep.mubr.bf16.mxu1 %v30795_v36  ;;  %v25662_v36 = vld [vmem:[%s36349_s1 + $0x1c64] ss:$16 sps:$4 sm:$0xff]  }
 0x393   : > { %8410 = vmatpush1.bf16.msra.mxu0 %v25648_v3  ;;  %8512 = vmatpush1.bf16.msra.mxu1 %v25651_v4  ;;  %v25719_v3 = vld [vmem:[%s36349_s1 + $0x1d8c] ss:$16 sps:$4 sm:$0xff]   ;;  %v25714_v4 = vld [vmem:[%s36349_s1 + $0x1d80] ss:$16 sps:$4 sm:$0xff]  }
 0x394   : > { %8411 = vmatprep.subr.bf16.mxu0 %v25656_v44  ;;  %8513 = vmatprep.subr.bf16.mxu1 %v25659_v0  ;;  %v25717_v44 = vld [vmem:[%s36349_s1 + $0x1d88] ss:$16 sps:$4 sm:$0xff]   ;;  %v31171_v0 = vcombine.low %v30981_v6, %v30972_v41  ;;  %v7695_v6 = vshll.u32 %v30726_v42, 16 }
 0x395   : > { %v25723_v41 = vld [vmem:[%s36349_s1 + $0x1da8] ss:$16 sps:$4 sm:$0xff]  }
 0x396   : > { %7427 = vmatmul.mubr.bf16.gmra.mrb[56].mxu0 %v6680_v51  ;;  %7529 = vmatmul.mubr.bf16.gmra.mrb[56].mxu1 %v6680_v51 }
 0x397   : > { %8412 = vmatpush1.bf16.msra.mxu0 %v25654_v10  ;;  %8514 = vmatpush1.bf16.msra.mxu1 %v25657_v57  ;;  %v25722_v10 = vld [vmem:[%s36349_s1 + $0x1da4] ss:$16 sps:$4 sm:$0xff]   ;;  %v25725_v57 = vld [vmem:[%s36349_s1 + $0x1dac] ss:$16 sps:$4 sm:$0xff]  }
 0x398   : > { %8413 = vmatprep.subr.bf16.mxu0 %v25662_v36  ;;  %8515 = vmatprep.subr.bf16.mxu1 %v25665_v61  ;;  %v7692_v36 = vshrl.u32 %v30726_v42, 16  ;;  %v7700_v61 = vshrl.u32 %v31171_v0, 16  ;;  %v25729_v42 = vld [vmem:[%s36349_s1 + $0x1dc8] ss:$16 sps:$4 sm:$0xff]  }
 0x399   : > { %8439 = vmatprep.mubr.bf16.mxu0 %v7724_v14  ;;  %8541 = vmatprep.mubr.bf16.mxu1 %v7724_v14  ;;  %v7703_v14 = vshll.u32 %v31171_v0, 16 }
 0x39b   : > { %8414 = vmatpush1.bf16.msra.mxu0 %v25660_v59  ;;  %8516 = vmatpush1.bf16.msra.mxu1 %v25663_v22  ;;  %v25728_v59 = vld [vmem:[%s36349_s1 + $0x1dc4] ss:$16 sps:$4 sm:$0xff]   ;;  %v25731_v22 = vld [vmem:[%s36349_s1 + $0x1dcc] ss:$16 sps:$4 sm:$0xff]  }
 0x39c   : > { %8415 = vmatprep.subr.bf16.mxu0 %v25668_v54  ;;  %8517 = vmatprep.subr.bf16.mxu1 %v25671_v38  ;;  %v25726_v54 = vld [vmem:[%s36349_s1 + $0x1dc0] ss:$16 sps:$4 sm:$0xff]   ;;  %v7694_v38 = vrot.slane %v7692_v36, 2  ;;  %v25767_v36 = vld [vmem:[%s36349_s1 + $0x1e88] ss:$16 sps:$4 sm:$0xff]  }
 0x39f   : > { %8416 = vmatpush1.bf16.msra.mxu0 %v25666_v20  ;;  %8518 = vmatpush1.bf16.msra.mxu1 %v25669_v19  ;;  %v7697_v20 = vrot.slane %v7695_v6, 3  ;;  %v7702_v19 = vrot.slane %v7700_v61, 2  ;;  %v25775_v6 = vld [vmem:[%s36349_s1 + $0x1eac] ss:$16 sps:$4 sm:$0xff]   ;;  %v25770_v61 = vld [vmem:[%s36349_s1 + $0x1ea0] ss:$16 sps:$4 sm:$0xff]  }
 0x3a0   : > { %8417 = vmatprep.subr.bf16.mxu0 %v25674_v34  ;;  %8519 = vmatprep.subr.bf16.mxu1 %v25677_v56  ;;  %v7705_v34 = vrot.slane %v7703_v14, 3  ;;  %v31202_v56 = vld [vmem:[%s28009_s10 + $0x48] sm:$0x77] }
 0x3a1   : > { %v25773_v14 = vld [vmem:[%s36349_s1 + $0x1ea8] ss:$16 sps:$4 sm:$0xff]  }
 0x3a3   : > { %8418 = vmatpush1.bf16.msra.mxu0 %v25672_v1  ;;  %8520 = vmatpush1.bf16.msra.mxu1 %v25675_v2  ;;  %v25734_v1 = vld [vmem:[%s36349_s1 + $0x1de4] ss:$16 sps:$4 sm:$0xff]   ;;  %v25737_v2 = vld [vmem:[%s36349_s1 + $0x1dec] ss:$16 sps:$4 sm:$0xff]  }
 0x3a4   : > { %8419 = vmatprep.subr.bf16.mxu0 %v25680_v5  ;;  %8521 = vmatprep.subr.bf16.mxu1 %v25683_v12  ;;  %v31211_v5 = vld [vmem:[%s28009_s10 + $0x38] sm:$0xff] }
 0x3a5   : > { %v31215_v12 = vcombine.high %v31211_v5, %v31202_v56 }
 0x3a7   : > { %8420 = vmatpush1.bf16.msra.mxu0 %v25678_v21  ;;  %8522 = vmatpush1.bf16.msra.mxu1 %v25681_v13  ;;  %v25732_v21 = vld [vmem:[%s36349_s1 + $0x1de0] ss:$16 sps:$4 sm:$0xff]   ;;  %v25735_v13 = vld [vmem:[%s36349_s1 + $0x1de8] ss:$16 sps:$4 sm:$0xff]  }
 0x3a8   : > { %8421 = vmatprep.subr.bf16.mxu0 %v25686_v17  ;;  %8523 = vmatprep.subr.bf16.mxu1 %v25689_v37  ;;  %v7698_v17 = vor.u32 %v7697_v20, %v7694_v38  ;;  %v7706_v37 = vor.u32 %v7705_v34, %v7702_v19  ;;  %v25784_v38 = vld [vmem:[%s36349_s1 + $0x1ee4] ss:$16 sps:$4 sm:$0xff]   ;;  %v25787_v20 = vld [vmem:[%s36349_s1 + $0x1eec] ss:$16 sps:$4 sm:$0xff]   ;;  %v25782_v19 = vld [vmem:[%s36349_s1 + $0x1ee0] ss:$16 sps:$4 sm:$0xff]  }
 0x3a9   : > { %v31107_v55 = vpop.f32.mrb[44].mxu0  ;;  %v31109_v52 = vpop.f32.mrb[44].mxu1  ;;  %v25785_v34 = vld [vmem:[%s36349_s1 + $0x1ee8] ss:$16 sps:$4 sm:$0xff]  }
 0x3aa   : > { %v31111_v46 = vpop.f32.mrb[45].mxu0  ;;  %v31113_v49 = vpop.f32.mrb[45].mxu1 }
 0x3ab   : > { %8422 = vmatpush1.bf16.msra.mxu0 %v25684_v16  ;;  %8524 = vmatpush1.bf16.msra.mxu1 %v25687_v18  ;;  %v6335_v51 = vpop.f32.mrb[46].mxu0  ;;  %v6437_v8 = vpop.f32.mrb[46].mxu1  ;;  %v25742_v16 = vld [vmem:[%s36349_s1 + $0x1e04] ss:$16 sps:$4 sm:$0xff]   ;;  %v25745_v18 = vld [vmem:[%s36349_s1 + $0x1e0c] ss:$16 sps:$4 sm:$0xff]  }
 0x3ac   : > { %8423 = vmatprep.subr.bf16.mxu0 %v25692_v53  ;;  %8525 = vmatprep.subr.bf16.mxu1 %v25695_v31  ;;  %v6336_v25 = vpop.f32.mrb[47].mxu0  ;;  %v6438_v27 = vpop.f32.mrb[47].mxu1  ;;  %v7743_v53 = vshrl.u32 %v30776_v23, 16  ;;  %v7746_v31 = vshll.u32 %v30776_v23, 16  ;;  %v25740_v51 = vld [vmem:[%s36349_s1 + $0x1e00] ss:$16 sps:$4 sm:$0xff]  }
 0x3ad   : > { %v25743_v8 = vld [vmem:[%s36349_s1 + $0x1e08] ss:$16 sps:$4 sm:$0xff]   ;;  %v25748_v23 = vld [vmem:[%s36349_s1 + $0x1e24] ss:$16 sps:$4 sm:$0xff]  }
 0x3ae   : > { %v7745_v25 = vrot.slane %v7743_v53, 2  ;;  %v7748_v27 = vrot.slane %v7746_v31, 3 }
 0x3af   : > { %8424 = vmatpush1.bf16.msra.mxu0 %v25690_v48  ;;  %8526 = vmatpush1.bf16.msra.mxu1 %v25693_v24  ;;  %v7751_v48 = vshrl.u32 %v31215_v12, 16  ;;  %v7754_v24 = vshll.u32 %v31215_v12, 16 }
 0x3b0   : > { %8425 = vmatprep.subr.bf16.mxu0 %v25698_v11  ;;  %8527 = vmatprep.subr.bf16.mxu1 %v25701_v62  ;;  %v7707_v11 = vsel %vm36357_vm5, %v7698_v17, %v7706_v37  ;;  %v25751_v62 = vld [vmem:[%s36349_s1 + $0x1e2c] ss:$16 sps:$4 sm:$0xff]   ;;  %v25788_v17 = vld [vmem:[%s36349_s1 + $0x1f00] ss:$16 sps:$4 sm:$0xff]  }
 0x3b3   : > { %8426 = vmatpush1.bf16.msra.mxu0 %v25696_v29  ;;  %8528 = vmatpush1.bf16.msra.mxu1 %v25699_v58  ;;  %v7753_v29 = vrot.slane %v7751_v48, 2  ;;  %v7756_v58 = vrot.slane %v7754_v24, 3 }
 0x3b4   : > { %8427 = vmatprep.subr.bf16.mxu0 %v25704_v30  ;;  %8529 = vmatprep.subr.bf16.mxu1 %v25707_v35  ;;  %v25746_v30 = vld [vmem:[%s36349_s1 + $0x1e20] ss:$16 sps:$4 sm:$0xff]   ;;  %v25749_v35 = vld [vmem:[%s36349_s1 + $0x1e28] ss:$16 sps:$4 sm:$0xff]  }
 0x3b7   : > { %8428 = vmatpush1.bf16.msra.mxu0 %v25702_v39  ;;  %8530 = vmatpush1.bf16.msra.mxu1 %v25705_v40  ;;  %v25754_v39 = vld [vmem:[%s36349_s1 + $0x1e44] ss:$16 sps:$4 sm:$0xff]   ;;  %v25757_v40 = vld [vmem:[%s36349_s1 + $0x1e4c] ss:$16 sps:$4 sm:$0xff]  }
 0x3b8   : > { %8429 = vmatprep.subr.bf16.mxu0 %v25710_v43  ;;  %8531 = vmatprep.subr.bf16.mxu1 %v25713_v47  ;;  %v7749_v43 = vor.u32 %v7748_v27, %v7745_v25  ;;  %v31260_v47 = vor.u32 %v7756_v58, %v7753_v29  ;;  %v25797_v25 = vld [vmem:[%s36349_s1 + $0x1f28] ss:$16 sps:$4 sm:$0xff]   ;;  %v25800_v27 = vld [vmem:[%s36349_s1 + $0x1f40] ss:$16 sps:$4 sm:$0xff]   ;;  %v25808_v58 = vld [vmem:[%s36349_s1 + $0x1f64] ss:$16 sps:$4 sm:$0xff]  }
 0x3b9   : > { %v25803_v29 = vld [vmem:[%s36349_s1 + $0x1f48] ss:$16 sps:$4 sm:$0xff]  }
 0x3bb   : > { %8430 = vmatpush1.bf16.msra.mxu0 %v25708_v50  ;;  %8532 = vmatpush1.bf16.msra.mxu1 %v25711_v15  ;;  %v25752_v50 = vld [vmem:[%s36349_s1 + $0x1e40] ss:$16 sps:$4 sm:$0xff]   ;;  %v25755_v15 = vld [vmem:[%s36349_s1 + $0x1e48] ss:$16 sps:$4 sm:$0xff]  }
 0x3bc   : > { %8431 = vmatprep.subr.bf16.mxu0 %v25716_v26  ;;  %8533 = vmatprep.subr.bf16.mxu1 %v25719_v3  ;;  %v25760_v26 = vld [vmem:[%s36349_s1 + $0x1e64] ss:$16 sps:$4 sm:$0xff]   ;;  %v7758_v3 = vsel %vm36357_vm5, %v7749_v43, %v31260_v47  ;;  %v25817_v43 = vld [vmem:[%s36349_s1 + $0x1f8c] ss:$16 sps:$4 sm:$0xff]  }
 0x3bf   : > { %8432 = vmatpush1.bf16.msra.mxu0 %v25714_v4  ;;  %8534 = vmatpush1.bf16.msra.mxu1 %v25717_v44  ;;  %v25758_v4 = vld [vmem:[%s36349_s1 + $0x1e60] ss:$16 sps:$4 sm:$0xff]   ;;  %v25761_v44 = vld [vmem:[%s36349_s1 + $0x1e68] ss:$16 sps:$4 sm:$0xff]  }
 0x3c0   : > { %8433 = vmatprep.subr.bf16.mxu0 %v25722_v10  ;;  %8535 = vmatprep.subr.bf16.mxu1 %v25725_v57  ;;  %v25766_v10 = vld [vmem:[%s36349_s1 + $0x1e84] ss:$16 sps:$4 sm:$0xff]   ;;  %v25769_v57 = vld [vmem:[%s36349_s1 + $0x1e8c] ss:$16 sps:$4 sm:$0xff]  }
 0x3c3   : > { %8434 = vmatpush1.bf16.msra.mxu0 %v25720_v7  ;;  %8536 = vmatpush1.bf16.msra.mxu1 %v25723_v41  ;;  %v25764_v7 = vld [vmem:[%s36349_s1 + $0x1e80] ss:$16 sps:$4 sm:$0xff]   ;;  %v25772_v41 = vld [vmem:[%s36349_s1 + $0x1ea4] ss:$16 sps:$4 sm:$0xff]  }
 0x3c4   : > { %8435 = vmatprep.subr.bf16.mxu0 %v25728_v59  ;;  %8537 = vmatprep.subr.bf16.mxu1 %v25731_v22  ;;  %v25778_v59 = vld [vmem:[%s36349_s1 + $0x1ec4] ss:$16 sps:$4 sm:$0xff]   ;;  %v25781_v22 = vld [vmem:[%s36349_s1 + $0x1ecc] ss:$16 sps:$4 sm:$0xff]  }
 0x3c7   : > { %8436 = vmatpush1.bf16.msra.mxu0 %v25726_v54  ;;  %8538 = vmatpush1.bf16.msra.mxu1 %v25729_v42  ;;  %v25776_v54 = vld [vmem:[%s36349_s1 + $0x1ec0] ss:$16 sps:$4 sm:$0xff]   ;;  %v25779_v42 = vld [vmem:[%s36349_s1 + $0x1ec8] ss:$16 sps:$4 sm:$0xff]  }
 0x3c8   : > { %8437 = vmatprep.subr.bf16.mxu0 %v25734_v1  ;;  %8539 = vmatprep.subr.bf16.mxu1 %v25737_v2  ;;  %v25790_v1 = vld [vmem:[%s36349_s1 + $0x1f04] ss:$16 sps:$4 sm:$0xff]   ;;  %v25793_v2 = vld [vmem:[%s36349_s1 + $0x1f0c] ss:$16 sps:$4 sm:$0xff]  }
 0x3cb   : > { %8438 = vmatpush1.bf16.msra.mxu0 %v25732_v21  ;;  %8540 = vmatpush1.bf16.msra.mxu1 %v25735_v13 }
 0x3cc   : > { %8458 = vmatprep.subr.bf16.mxu0 %v25742_v16  ;;  %8560 = vmatprep.subr.bf16.mxu1 %v25745_v18 }
 0x3ce   : > { %8440 = vmatmul.mubr.bf16.vlgmr.msra.gmra.mrb[0].mxu0 %v7707_v11  ;;  %8542 = vmatmul.mubr.bf16.vlgmr.msra.gmra.mrb[0].mxu1 %v7707_v11 }
 0x3cf   : > { %8459 = vmatpush1.bf16.msra.mxu0 %v25740_v51  ;;  %8561 = vmatpush1.bf16.msra.mxu1 %v25743_v8 }
 0x3d0   : > { %8460 = vmatprep.subr.bf16.mxu0 %v25748_v23  ;;  %8562 = vmatprep.subr.bf16.mxu1 %v25751_v62 }
 0x3d1   : > { %8449 = vmatprep.mubr.bf16.mxu0 %v31037_v60  ;;  %8551 = vmatprep.mubr.bf16.mxu1 %v31037_v60  ;;  %v25763_v60 = vld [vmem:[%s36349_s1 + $0x1e6c] ss:$16 sps:$4 sm:$0xff]  }
 0x3d3   : > { %8461 = vmatpush1.bf16.msra.mxu0 %v25746_v30  ;;  %8563 = vmatpush1.bf16.msra.mxu1 %v25749_v35  ;;  %v25811_v30 = vld [vmem:[%s36349_s1 + $0x1f6c] ss:$16 sps:$4 sm:$0xff]   ;;  %v25806_v35 = vld [vmem:[%s36349_s1 + $0x1f60] ss:$16 sps:$4 sm:$0xff]  }
 0x3d4   : > { %8462 = vmatprep.subr.bf16.mxu0 %v25754_v39  ;;  %8564 = vmatprep.subr.bf16.mxu1 %v25757_v40  ;;  %v25809_v39 = vld [vmem:[%s36349_s1 + $0x1f68] ss:$16 sps:$4 sm:$0xff]   ;;  %v25814_v40 = vld [vmem:[%s36349_s1 + $0x1f84] ss:$16 sps:$4 sm:$0xff]  }
 0x3d6   : > { %8450 = vmatmul.mubr.bf16.gmra.mrb[60].mxu0 %v7706_v37  ;;  %8552 = vmatmul.mubr.bf16.gmra.mrb[60].mxu1 %v7706_v37  ;;  %v25791_v37 = vld [vmem:[%s36349_s1 + $0x1f08] ss:$16 sps:$4 sm:$0xff]  }
 0x3d7   : > { %8463 = vmatpush1.bf16.msra.mxu0 %v25752_v50  ;;  %8565 = vmatpush1.bf16.msra.mxu1 %v25755_v15  ;;  %v25812_v50 = vld [vmem:[%s36349_s1 + $0x1f80] ss:$16 sps:$4 sm:$0xff]   ;;  %v25815_v15 = vld [vmem:[%s36349_s1 + $0x1f88] ss:$16 sps:$4 sm:$0xff]  }
 0x3d8   : > { %8464 = vmatprep.subr.bf16.mxu0 %v25760_v26  ;;  %8566 = vmatprep.subr.bf16.mxu1 %v25763_v60  ;;  %v31408_v26 = vcombine.low %v31211_v5, %v31202_v56  ;;  %v25820_v60 = vld [vmem:[%s36349_s1 + $0x1fa4] ss:$16 sps:$4 sm:$0xff]   ;;  %v7726_v56 = vshrl.u32 %v30967_v45, 16  ;;  %v7729_v5 = vshll.u32 %v30967_v45, 16  ;;  %v25827_v45 = vld [vmem:[%s36349_s1 + $0x1fc8] ss:$16 sps:$4 sm:$0xff]  }
 0x3d9   : > { %8490 = vmatprep.mubr.bf16.mxu0 %v7758_v3  ;;  %8592 = vmatprep.mubr.bf16.mxu1 %v7758_v3  ;;  %v25823_v3 = vld [vmem:[%s36349_s1 + $0x1fac] ss:$16 sps:$4 sm:$0xff]  }
 0x3db   : > { %8465 = vmatpush1.bf16.msra.mxu0 %v25758_v4  ;;  %8567 = vmatpush1.bf16.msra.mxu1 %v25761_v44  ;;  %v25818_v4 = vld [vmem:[%s36349_s1 + $0x1fa0] ss:$16 sps:$4 sm:$0xff]   ;;  %v25821_v44 = vld [vmem:[%s36349_s1 + $0x1fa8] ss:$16 sps:$4 sm:$0xff]  }
 0x3dc   : > { %8466 = vmatprep.subr.bf16.mxu0 %v25766_v10  ;;  %8568 = vmatprep.subr.bf16.mxu1 %v25769_v57  ;;  %v7734_v10 = vshrl.u32 %v31408_v26, 16  ;;  %v7737_v57 = vshll.u32 %v31408_v26, 16 }
 0x3df   : > { %8467 = vmatpush1.bf16.msra.mxu0 %v25764_v7  ;;  %8569 = vmatpush1.bf16.msra.mxu1 %v25767_v36  ;;  %v25826_v7 = vld [vmem:[%s36349_s1 + $0x1fc4] ss:$16 sps:$4 sm:$0xff]   ;;  %v25829_v36 = vld [vmem:[%s36349_s1 + $0x1fcc] ss:$16 sps:$4 sm:$0xff]  }
 0x3e0   : > { %8468 = vmatprep.subr.bf16.mxu0 %v25772_v41  ;;  %8570 = vmatprep.subr.bf16.mxu1 %v25775_v6  ;;  %v25824_v41 = vld [vmem:[%s36349_s1 + $0x1fc0] ss:$16 sps:$4 sm:$0xff]   ;;  %v7728_v6 = vrot.slane %v7726_v56, 2  ;;  %v25888_v56 = vld [vmem:[%s36349_s1 + $0x2104] ss:$16 sps:$4 sm:$0xff]  }
 0x3e3   : > { %8469 = vmatpush1.bf16.msra.mxu0 %v25770_v61  ;;  %8571 = vmatpush1.bf16.msra.mxu1 %v25773_v14  ;;  %v7731_v61 = vrot.slane %v7729_v5, 3  ;;  %v7736_v14 = vrot.slane %v7734_v10, 2  ;;  %v25891_v5 = vld [vmem:[%s36349_s1 + $0x210c] ss:$16 sps:$4 sm:$0xff]   ;;  %v25886_v10 = vld [vmem:[%s36349_s1 + $0x2100] ss:$16 sps:$4 sm:$0xff]  }
 0x3e4   : > { %8470 = vmatprep.subr.bf16.mxu0 %v25778_v59  ;;  %8572 = vmatprep.subr.bf16.mxu1 %v25781_v22  ;;  %v7739_v59 = vrot.slane %v7737_v57, 3  ;;  %v25832_v22 = vld [vmem:[%s36349_s1 + $0x1fe4] ss:$16 sps:$4 sm:$0xff]   ;;  %v25889_v57 = vld [vmem:[%s36349_s1 + $0x2108] ss:$16 sps:$4 sm:$0xff]  }
 0x3e7   : > { %8471 = vmatpush1.bf16.msra.mxu0 %v25776_v54  ;;  %8573 = vmatpush1.bf16.msra.mxu1 %v25779_v42  ;;  %v25835_v54 = vld [vmem:[%s36349_s1 + $0x1fec] ss:$16 sps:$4 sm:$0xff]   ;;  %v25830_v42 = vld [vmem:[%s36349_s1 + $0x1fe0] ss:$16 sps:$4 sm:$0xff]  }
 0x3e8   : > { %8472 = vmatprep.subr.bf16.mxu0 %v25784_v38  ;;  %8574 = vmatprep.subr.bf16.mxu1 %v25787_v20  ;;  %v25833_v38 = vld [vmem:[%s36349_s1 + $0x1fe8] ss:$16 sps:$4 sm:$0xff]   ;;  %v7732_v20 = vor.u32 %v7731_v61, %v7728_v6 }
 0x3e9   : > { %v6382_v21 = vpop.f32.mrb[48].mxu0  ;;  %v6484_v13 = vpop.f32.mrb[48].mxu1 }
 0x3ea   : > { %v6383_v16 = vadd.f32 %v6382_v21, %v31107_v55  ;;  %v6485_v18 = vadd.f32 %v6484_v13, %v31109_v52  ;;  %v6384_v53 = vpop.f32.mrb[49].mxu0  ;;  %v6486_v31 = vpop.f32.mrb[49].mxu1  ;;  %v25796_v55 = vld [vmem:[%s36349_s1 + $0x1f24] ss:$16 sps:$4 sm:$0xff]   ;;  %v25799_v52 = vld [vmem:[%s36349_s1 + $0x1f2c] ss:$16 sps:$4 sm:$0xff]  }
 0x3eb   : > { %v6385_v48 = vadd.f32 %v6384_v53, %v31111_v46  ;;  %v6487_v24 = vadd.f32 %v6486_v31, %v31113_v49  ;;  %8473 = vmatpush1.bf16.msra.mxu0 %v25782_v19  ;;  %8575 = vmatpush1.bf16.msra.mxu1 %v25785_v34  ;;  %v6386_v51 = vpop.f32.mrb[50].mxu0  ;;  %v6488_v8 = vpop.f32.mrb[50].mxu1  ;;  %v7740_v19 = vor.u32 %v7739_v59, %v7736_v14  ;;  %v25840_v34 = vld [vmem:[%s36349_s1 + $0x2004] ss:$16 sps:$4 sm:$0xff]   ;;  %v25841_v21 = vld [vmem:[%s36349_s1 + $0x2008] ss:$16 sps:$4 sm:$0xff]  }
 0x3ec   : > { %v31347_v11 = vadd.f32 %v6383_v16, %v30882_v9  ;;  %v31350_v23 = vadd.f32 %v6485_v18, %v30885_v32  ;;  %8474 = vmatprep.subr.bf16.mxu0 %v25790_v1  ;;  %8576 = vmatprep.subr.bf16.mxu1 %v25793_v2  ;;  %v6387_v46 = vpop.f32.mrb[51].mxu0  ;;  %v6489_v49 = vpop.f32.mrb[51].mxu1  ;;  %v25794_v32 = vld [vmem:[%s36349_s1 + $0x1f20] ss:$16 sps:$4 sm:$0xff]   ;;  %v25843_v1 = vld [vmem:[%s36349_s1 + $0x200c] ss:$16 sps:$4 sm:$0xff]  }
 0x3ed   : > { %v31359_v62 = vadd.f32 %v6385_v48, %v30894_v33  ;;  %v31362_v9 = vadd.f32 %v6487_v24, %v30897_v28  ;;  %v25802_v33 = vld [vmem:[%s36349_s1 + $0x1f44] ss:$16 sps:$4 sm:$0xff]   ;;  %v25805_v28 = vld [vmem:[%s36349_s1 + $0x1f4c] ss:$16 sps:$4 sm:$0xff]   ;;  %v25838_v2 = vld [vmem:[%s36349_s1 + $0x2000] ss:$16 sps:$4 sm:$0xff]   ;;  %v7741_v16 = vsel %vm36357_vm5, %v7732_v20, %v7740_v19 }
 0x3ee   : > { %v31463_v13 = vld [vmem:[%s28009_s10 + $0x10] sm:$0x88]  ;;  %v25847_v53 = vld [vmem:[%s36349_s1 + $0x2028] ss:$16 sps:$4 sm:$0xff]   ;;  %v25855_v48 = vld [vmem:[%s36349_s1 + $0x204c] ss:$16 sps:$4 sm:$0xff]  }
 0x3ef   : > { %8475 = vmatpush1.bf16.msra.mxu0 %v25788_v17  ;;  %8577 = vmatpush1.bf16.msra.mxu1 %v25791_v37  ;;  %v25846_v17 = vld [vmem:[%s36349_s1 + $0x2024] ss:$16 sps:$4 sm:$0xff]   ;;  %v25849_v37 = vld [vmem:[%s36349_s1 + $0x202c] ss:$16 sps:$4 sm:$0xff]   ;;  %v25844_v18 = vld [vmem:[%s36349_s1 + $0x2020] ss:$16 sps:$4 sm:$0xff]  }
 0x3f0   : > { %8476 = vmatprep.subr.bf16.mxu0 %v25796_v55  ;;  %8578 = vmatprep.subr.bf16.mxu1 %v25799_v52  ;;  %v25852_v31 = vld [vmem:[%s36349_s1 + $0x2044] ss:$16 sps:$4 sm:$0xff]   ;;  %v25850_v8 = vld [vmem:[%s36349_s1 + $0x2040] ss:$16 sps:$4 sm:$0xff]   ;;  %v25853_v55 = vld [vmem:[%s36349_s1 + $0x2048] ss:$16 sps:$4 sm:$0xff]  }
 0x3f1   : > { %v31485_v24 = vld [vmem:[%s28009_s10 + $0x20] sm:$0xff]  ;;  %v25861_v46 = vld [vmem:[%s36349_s1 + $0x206c] ss:$16 sps:$4 sm:$0xff]  }
 0x3f2   : > { %v21593_v51 = vcombine.high %v31463_v13, %v31485_v24  ;;  %v25858_v52 = vld [vmem:[%s36349_s1 + $0x2064] ss:$16 sps:$4 sm:$0xff]  }
 0x3f3   : > { %8477 = vmatpush1.bf16.msra.mxu0 %v25794_v32  ;;  %8579 = vmatpush1.bf16.msra.mxu1 %v25797_v25  ;;  %v31504_v32 = vrot.slane %v30985_v63, 3  ;;  %v25859_v25 = vld [vmem:[%s36349_s1 + $0x2068] ss:$16 sps:$4 sm:$0xff]   ;;  %v25867_v63 = vld [vmem:[%s36349_s1 + $0x208c] ss:$16 sps:$4 sm:$0xff]  }
 0x3f4   : > { %8478 = vmatprep.subr.bf16.mxu0 %v25802_v33  ;;  %8580 = vmatprep.subr.bf16.mxu1 %v25805_v28  ;;  %v8767_v49 = vrot.slane %v21593_v51, 3  ;;  %v25864_v33 = vld [vmem:[%s36349_s1 + $0x2084] ss:$16 sps:$4 sm:$0xff]   ;;  %v25921_v51 = vld [vmem:[%s36349_s1 + $0x21ac] ss:$16 sps:$4 sm:$0xff]  }
 0x3f5   : > { %v25900_v20 = vld [vmem:[%s36349_s1 + $0x2144] ss:$16 sps:$4 sm:$0xff]  }
 0x3f6   : > { %v8769_v28 = vsel %vm3551_vm2, %v8767_v49, %v31504_v32  ;;  %v25922_v49 = vld [vmem:[%s36349_s1 + $0x21c0] ss:$16 sps:$4 sm:$0xff]  }
 0x3f7   : > { %8479 = vmatpush1.bf16.msra.mxu0 %v25800_v27  ;;  %8581 = vmatpush1.bf16.msra.mxu1 %v25803_v29  ;;  %v25862_v27 = vld [vmem:[%s36349_s1 + $0x2080] ss:$16 sps:$4 sm:$0xff]   ;;  %v25865_v29 = vld [vmem:[%s36349_s1 + $0x2088] ss:$16 sps:$4 sm:$0xff]  }
 0x3f8   : > { %8480 = vmatprep.subr.bf16.mxu0 %v25808_v58  ;;  %8582 = vmatprep.subr.bf16.mxu1 %v25811_v30  ;;  %v25870_v58 = vld [vmem:[%s36349_s1 + $0x20a4] ss:$16 sps:$4 sm:$0xff]   ;;  %v25873_v30 = vld [vmem:[%s36349_s1 + $0x20ac] ss:$16 sps:$4 sm:$0xff]  }
 0x3fb   : > { %8481 = vmatpush1.bf16.msra.mxu0 %v25806_v35  ;;  %8583 = vmatpush1.bf16.msra.mxu1 %v25809_v39  ;;  %v25868_v35 = vld [vmem:[%s36349_s1 + $0x20a0] ss:$16 sps:$4 sm:$0xff]   ;;  %v25871_v39 = vld [vmem:[%s36349_s1 + $0x20a8] ss:$16 sps:$4 sm:$0xff]  }
 0x3fc   : > { %8482 = vmatprep.subr.bf16.mxu0 %v25814_v40  ;;  %8584 = vmatprep.subr.bf16.mxu1 %v25817_v43  ;;  %v25876_v40 = vld [vmem:[%s36349_s1 + $0x20c4] ss:$16 sps:$4 sm:$0xff]   ;;  %v25879_v43 = vld [vmem:[%s36349_s1 + $0x20cc] ss:$16 sps:$4 sm:$0xff]  }
 0x3ff   : > { %8483 = vmatpush1.bf16.msra.mxu0 %v25812_v50  ;;  %8585 = vmatpush1.bf16.msra.mxu1 %v25815_v15  ;;  %v25874_v50 = vld [vmem:[%s36349_s1 + $0x20c0] ss:$16 sps:$4 sm:$0xff]   ;;  %v25877_v15 = vld [vmem:[%s36349_s1 + $0x20c8] ss:$16 sps:$4 sm:$0xff]  }
 0x400   : > { %8484 = vmatprep.subr.bf16.mxu0 %v25820_v60  ;;  %8586 = vmatprep.subr.bf16.mxu1 %v25823_v3  ;;  %v25882_v60 = vld [vmem:[%s36349_s1 + $0x20e4] ss:$16 sps:$4 sm:$0xff]   ;;  %v25885_v3 = vld [vmem:[%s36349_s1 + $0x20ec] ss:$16 sps:$4 sm:$0xff]  }
 0x403   : > { %8485 = vmatpush1.bf16.msra.mxu0 %v25818_v4  ;;  %8587 = vmatpush1.bf16.msra.mxu1 %v25821_v44  ;;  %v25880_v4 = vld [vmem:[%s36349_s1 + $0x20e0] ss:$16 sps:$4 sm:$0xff]   ;;  %v25883_v44 = vld [vmem:[%s36349_s1 + $0x20e8] ss:$16 sps:$4 sm:$0xff]  }
 0x404   : > { %8486 = vmatprep.subr.bf16.mxu0 %v25826_v7  ;;  %8588 = vmatprep.subr.bf16.mxu1 %v25829_v36 }
 0x407   : > { %8487 = vmatpush1.bf16.msra.mxu0 %v25824_v41  ;;  %8589 = vmatpush1.bf16.msra.mxu1 %v25827_v45  ;;  %v25894_v41 = vld [vmem:[%s36349_s1 + $0x2124] ss:$16 sps:$4 sm:$0xff]   ;;  %v25897_v45 = vld [vmem:[%s36349_s1 + $0x212c] ss:$16 sps:$4 sm:$0xff]  }
 0x408   : > { %8488 = vmatprep.subr.bf16.mxu0 %v25832_v22  ;;  %8590 = vmatprep.subr.bf16.mxu1 %v25835_v54 }
 0x40b   : > { %8489 = vmatpush1.bf16.msra.mxu0 %v25830_v42  ;;  %8591 = vmatpush1.bf16.msra.mxu1 %v25833_v38  ;;  %v25892_v42 = vld [vmem:[%s36349_s1 + $0x2120] ss:$16 sps:$4 sm:$0xff]   ;;  %v25895_v38 = vld [vmem:[%s36349_s1 + $0x2128] ss:$16 sps:$4 sm:$0xff]  }
 0x40c   : > { %9424 = vmatprep.subr.bf16.mxu0 %v25840_v34  ;;  %9526 = vmatprep.subr.bf16.mxu1 %v25843_v1  ;;  %v25898_v34 = vld [vmem:[%s36349_s1 + $0x2140] ss:$16 sps:$4 sm:$0xff]   ;;  %v25901_v1 = vld [vmem:[%s36349_s1 + $0x2148] ss:$16 sps:$4 sm:$0xff]  }
 0x40e   : > { %8491 = vmatmul.mubr.bf16.vlgmr.msra.gmra.mrb[0].mxu0 %v7741_v16  ;;  %8593 = vmatmul.mubr.bf16.vlgmr.msra.gmra.mrb[0].mxu1 %v7741_v16  ;;  %v25912_v16 = vld [vmem:[%s36349_s1 + $0x2184] ss:$16 sps:$4 sm:$0xff]  }
 0x40f   : > { %9425 = vmatpush1.bf16.msra.mxu0 %v25838_v2  ;;  %9527 = vmatpush1.bf16.msra.mxu1 %v25841_v21  ;;  %v25906_v2 = vld [vmem:[%s36349_s1 + $0x2164] ss:$16 sps:$4 sm:$0xff]   ;;  %v25909_v21 = vld [vmem:[%s36349_s1 + $0x216c] ss:$16 sps:$4 sm:$0xff]  }
 0x410   : > { %9426 = vmatprep.subr.bf16.mxu0 %v25846_v17  ;;  %9528 = vmatprep.subr.bf16.mxu1 %v25849_v37  ;;  %v25904_v17 = vld [vmem:[%s36349_s1 + $0x2160] ss:$16 sps:$4 sm:$0xff]   ;;  %v25907_v37 = vld [vmem:[%s36349_s1 + $0x2168] ss:$16 sps:$4 sm:$0xff]  }
 0x411   : > { %8500 = vmatprep.mubr.bf16.mxu0 %v31260_v47  ;;  %8602 = vmatprep.mubr.bf16.mxu1 %v31260_v47  ;;  %v25856_v47 = vld [vmem:[%s36349_s1 + $0x2060] ss:$16 sps:$4 sm:$0xff]  }
 0x413   : > { %9427 = vmatpush1.bf16.msra.mxu0 %v25844_v18  ;;  %9529 = vmatpush1.bf16.msra.mxu1 %v25847_v53  ;;  %v25915_v18 = vld [vmem:[%s36349_s1 + $0x218c] ss:$16 sps:$4 sm:$0xff]   ;;  %v25910_v53 = vld [vmem:[%s36349_s1 + $0x2180] ss:$16 sps:$4 sm:$0xff]  }
 0x414   : > { %9428 = vmatprep.subr.bf16.mxu0 %v25852_v31  ;;  %9530 = vmatprep.subr.bf16.mxu1 %v25855_v48  ;;  %v25913_v31 = vld [vmem:[%s36349_s1 + $0x2188] ss:$16 sps:$4 sm:$0xff]   ;;  %v25918_v48 = vld [vmem:[%s36349_s1 + $0x21a4] ss:$16 sps:$4 sm:$0xff]  }
 0x416   : > { %8501 = vmatmul.mubr.bf16.gmra.mrb[64].mxu0 %v7740_v19  ;;  %8603 = vmatmul.mubr.bf16.gmra.mrb[64].mxu1 %v7740_v19  ;;  %v25903_v19 = vld [vmem:[%s36349_s1 + $0x214c] ss:$16 sps:$4 sm:$0xff]  }
 0x417   : > { %9429 = vmatpush1.bf16.msra.mxu0 %v25850_v8  ;;  %9531 = vmatpush1.bf16.msra.mxu1 %v25853_v55  ;;  %v25916_v8 = vld [vmem:[%s36349_s1 + $0x21a0] ss:$16 sps:$4 sm:$0xff]   ;;  %v25919_v55 = vld [vmem:[%s36349_s1 + $0x21a8] ss:$16 sps:$4 sm:$0xff]  }
 0x418   : > { %9430 = vmatprep.subr.bf16.mxu0 %v25858_v52  ;;  %9532 = vmatprep.subr.bf16.mxu1 %v25861_v46  ;;  %v25924_v52 = vld [vmem:[%s36349_s1 + $0x21c4] ss:$16 sps:$4 sm:$0xff]   ;;  %v25927_v46 = vld [vmem:[%s36349_s1 + $0x21cc] ss:$16 sps:$4 sm:$0xff]  }
 0x419   : > { %9456 = vmatprep.mubr.bf16.mxu0 %v8769_v28  ;;  %9558 = vmatprep.mubr.bf16.mxu1 %v8769_v28  ;;  %v25928_v28 = vld [vmem:[%s36349_s1 + $0x21e0] ss:$16 sps:$4 sm:$0xff]  }
 0x41b   : > { %9431 = vmatpush1.bf16.msra.mxu0 %v25856_v47  ;;  %9533 = vmatpush1.bf16.msra.mxu1 %v25859_v25  ;;  %v25925_v47 = vld [vmem:[%s36349_s1 + $0x21c8] ss:$16 sps:$4 sm:$0xff]   ;;  %v25930_v25 = vld [vmem:[%s36349_s1 + $0x21e4] ss:$16 sps:$4 sm:$0xff]  }
 0x41c   : > { %9432 = vmatprep.subr.bf16.mxu0 %v25864_v33  ;;  %9534 = vmatprep.subr.bf16.mxu1 %v25867_v63  ;;  %v25933_v33 = vld [vmem:[%s36349_s1 + $0x21ec] ss:$16 sps:$4 sm:$0xff]   ;;  %v21592_v63 = vcombine.low %v31463_v13, %v31485_v24  ;;  %v8765_v24 = vrot.slane %v31171_v0, 3 }
 0x41d   : > { %v25947_v0 = vld [vmem:[%s36349_s1 + $0x222c] ss:$16 sps:$4 sm:$0xff]  }
 0x41e   : > { %v8764_v13 = vrot.slane %v21592_v63, 3  ;;  %v25995_v63 = vld [vmem:[%s36349_s1 + $0x232c] ss:$16 sps:$4 sm:$0xff]  }
 0x41f   : > { %9433 = vmatpush1.bf16.msra.mxu0 %v25862_v27  ;;  %9535 = vmatpush1.bf16.msra.mxu1 %v25865_v29  ;;  %v25931_v27 = vld [vmem:[%s36349_s1 + $0x21e8] ss:$16 sps:$4 sm:$0xff]   ;;  %v25938_v29 = vld [vmem:[%s36349_s1 + $0x2204] ss:$16 sps:$4 sm:$0xff]  }
 0x420   : > { %9434 = vmatprep.subr.bf16.mxu0 %v25870_v58  ;;  %9536 = vmatprep.subr.bf16.mxu1 %v25873_v30  ;;  %v25941_v58 = vld [vmem:[%s36349_s1 + $0x220c] ss:$16 sps:$4 sm:$0xff]   ;;  %v25936_v30 = vld [vmem:[%s36349_s1 + $0x2200] ss:$16 sps:$4 sm:$0xff]  }
 0x423   : > { %9435 = vmatpush1.bf16.msra.mxu0 %v25868_v35  ;;  %9537 = vmatpush1.bf16.msra.mxu1 %v25871_v39  ;;  %v25939_v35 = vld [vmem:[%s36349_s1 + $0x2208] ss:$16 sps:$4 sm:$0xff]  }
 0x424   : > { %9436 = vmatprep.subr.bf16.mxu0 %v25876_v40  ;;  %9538 = vmatprep.subr.bf16.mxu1 %v25879_v43  ;;  %v31682_v39 = vld [vmem:[%s28009_s10 + $0x18] sm:$0x88]  ;;  %v25944_v40 = vld [vmem:[%s36349_s1 + $0x2224] ss:$16 sps:$4 sm:$0xff]   ;;  %v8766_v43 = vsel %vm3551_vm2, %v8764_v13, %v8765_v24 }
 0x427   : > { %9437 = vmatpush1.bf16.msra.mxu0 %v25874_v50  ;;  %9539 = vmatpush1.bf16.msra.mxu1 %v25877_v15  ;;  %v25942_v50 = vld [vmem:[%s36349_s1 + $0x2220] ss:$16 sps:$4 sm:$0xff]   ;;  %v25945_v15 = vld [vmem:[%s36349_s1 + $0x2228] ss:$16 sps:$4 sm:$0xff]  }
 0x428   : > { %9438 = vmatprep.subr.bf16.mxu0 %v25882_v60  ;;  %9540 = vmatprep.subr.bf16.mxu1 %v25885_v3  ;;  %v25950_v60 = vld [vmem:[%s36349_s1 + $0x2244] ss:$16 sps:$4 sm:$0xff]   ;;  %v25953_v3 = vld [vmem:[%s36349_s1 + $0x224c] ss:$16 sps:$4 sm:$0xff]  }
 0x429   : > { %v31574_v7 = vpop.f32.mrb[52].mxu0  ;;  %v31576_v36 = vpop.f32.mrb[52].mxu1 }
 0x42a   : > { %v31584_v6 = vpop.f32.mrb[53].mxu0  ;;  %v31586_v61 = vpop.f32.mrb[53].mxu1 }
 0x42b   : > { %9439 = vmatpush1.bf16.msra.mxu0 %v25880_v4  ;;  %9541 = vmatpush1.bf16.msra.mxu1 %v25883_v44  ;;  %v7381_v14 = vpop.f32.mrb[54].mxu0  ;;  %v7483_v59 = vpop.f32.mrb[54].mxu1  ;;  %v31704_v4 = vld [vmem:[%s28009_s10 + $0x28] sm:$0xff] }
 0x42c   : > { %9440 = vmatprep.subr.bf16.mxu0 %v25888_v56  ;;  %9542 = vmatprep.subr.bf16.mxu1 %v25891_v5  ;;  %v7382_v22 = vpop.f32.mrb[55].mxu0  ;;  %v7484_v54 = vpop.f32.mrb[55].mxu1  ;;  %v21595_v44 = vcombine.high %v31682_v39, %v31704_v4  ;;  %v25948_v56 = vld [vmem:[%s36349_s1 + $0x2240] ss:$16 sps:$4 sm:$0xff]   ;;  %v25951_v5 = vld [vmem:[%s36349_s1 + $0x2248] ss:$16 sps:$4 sm:$0xff]  }
 0x42d   : > { %v25957_v14 = vld [vmem:[%s36349_s1 + $0x2268] ss:$16 sps:$4 sm:$0xff]   ;;  %v25962_v59 = vld [vmem:[%s36349_s1 + $0x2284] ss:$16 sps:$4 sm:$0xff]   ;;  %v25960_v54 = vld [vmem:[%s36349_s1 + $0x2280] ss:$16 sps:$4 sm:$0xff]  }
 0x42f   : > { %9441 = vmatpush1.bf16.msra.mxu0 %v25886_v10  ;;  %9543 = vmatpush1.bf16.msra.mxu1 %v25889_v57  ;;  %v25956_v10 = vld [vmem:[%s36349_s1 + $0x2264] ss:$16 sps:$4 sm:$0xff]   ;;  %v25959_v57 = vld [vmem:[%s36349_s1 + $0x226c] ss:$16 sps:$4 sm:$0xff]  }
 0x430   : > { %9442 = vmatprep.subr.bf16.mxu0 %v25894_v41  ;;  %9544 = vmatprep.subr.bf16.mxu1 %v25897_v45  ;;  %v8773_v41 = vrot.slane %v21595_v44, 3  ;;  %v31723_v45 = vrot.slane %v31215_v12, 3  ;;  %v25965_v12 = vld [vmem:[%s36349_s1 + $0x228c] ss:$16 sps:$4 sm:$0xff]   ;;  %v26011_v44 = vld [vmem:[%s36349_s1 + $0x2388] ss:$16 sps:$4 sm:$0xff]  }
 0x432   : > { %v8775_v22 = vsel %vm3551_vm2, %v8773_v41, %v31723_v45  ;;  %v26022_v41 = vld [vmem:[%s36349_s1 + $0x23c4] ss:$16 sps:$4 sm:$0xff]  }
 0x433   : > { %9443 = vmatpush1.bf16.msra.mxu0 %v25892_v42  ;;  %9545 = vmatpush1.bf16.msra.mxu1 %v25895_v38  ;;  %v25963_v42 = vld [vmem:[%s36349_s1 + $0x2288] ss:$16 sps:$4 sm:$0xff]   ;;  %v25968_v38 = vld [vmem:[%s36349_s1 + $0x22a4] ss:$16 sps:$4 sm:$0xff]  }
 0x434   : > { %9444 = vmatprep.subr.bf16.mxu0 %v25900_v20  ;;  %9546 = vmatprep.subr.bf16.mxu1 %v25903_v19  ;;  %v25971_v20 = vld [vmem:[%s36349_s1 + $0x22ac] ss:$16 sps:$4 sm:$0xff]   ;;  %v25966_v19 = vld [vmem:[%s36349_s1 + $0x22a0] ss:$16 sps:$4 sm:$0xff]  }
 0x437   : > { %9445 = vmatpush1.bf16.msra.mxu0 %v25898_v34  ;;  %9547 = vmatpush1.bf16.msra.mxu1 %v25901_v1  ;;  %v25969_v34 = vld [vmem:[%s36349_s1 + $0x22a8] ss:$16 sps:$4 sm:$0xff]   ;;  %v25974_v1 = vld [vmem:[%s36349_s1 + $0x22c4] ss:$16 sps:$4 sm:$0xff]  }
 0x438   : > { %9446 = vmatprep.subr.bf16.mxu0 %v25906_v2  ;;  %9548 = vmatprep.subr.bf16.mxu1 %v25909_v21  ;;  %v25977_v2 = vld [vmem:[%s36349_s1 + $0x22cc] ss:$16 sps:$4 sm:$0xff]   ;;  %v25972_v21 = vld [vmem:[%s36349_s1 + $0x22c0] ss:$16 sps:$4 sm:$0xff]  }
 0x43b   : > { %9447 = vmatpush1.bf16.msra.mxu0 %v25904_v17  ;;  %9549 = vmatpush1.bf16.msra.mxu1 %v25907_v37  ;;  %v25975_v17 = vld [vmem:[%s36349_s1 + $0x22c8] ss:$16 sps:$4 sm:$0xff]   ;;  %v25980_v37 = vld [vmem:[%s36349_s1 + $0x22e4] ss:$16 sps:$4 sm:$0xff]  }
 0x43c   : > { %9448 = vmatprep.subr.bf16.mxu0 %v25912_v16  ;;  %9550 = vmatprep.subr.bf16.mxu1 %v25915_v18  ;;  %v25983_v16 = vld [vmem:[%s36349_s1 + $0x22ec] ss:$16 sps:$4 sm:$0xff]   ;;  %v25978_v18 = vld [vmem:[%s36349_s1 + $0x22e0] ss:$16 sps:$4 sm:$0xff]  }
 0x43f   : > { %9449 = vmatpush1.bf16.msra.mxu0 %v25910_v53  ;;  %9551 = vmatpush1.bf16.msra.mxu1 %v25913_v31  ;;  %v25981_v53 = vld [vmem:[%s36349_s1 + $0x22e8] ss:$16 sps:$4 sm:$0xff]   ;;  %v25986_v31 = vld [vmem:[%s36349_s1 + $0x2304] ss:$16 sps:$4 sm:$0xff]  }
 0x440   : > { %9450 = vmatprep.subr.bf16.mxu0 %v25918_v48  ;;  %9552 = vmatprep.subr.bf16.mxu1 %v25921_v51  ;;  %v25989_v48 = vld [vmem:[%s36349_s1 + $0x230c] ss:$16 sps:$4 sm:$0xff]  }
 0x443   : > { %9451 = vmatpush1.bf16.msra.mxu0 %v25916_v8  ;;  %9553 = vmatpush1.bf16.msra.mxu1 %v25919_v55  ;;  %v25984_v55 = vld [vmem:[%s36349_s1 + $0x2300] ss:$16 sps:$4 sm:$0xff]  }
 0x444   : > { %9452 = vmatprep.subr.bf16.mxu0 %v25924_v52  ;;  %9554 = vmatprep.subr.bf16.mxu1 %v25927_v46  ;;  %v25987_v52 = vld [vmem:[%s36349_s1 + $0x2308] ss:$16 sps:$4 sm:$0xff]  }
 0x447   : > { %9453 = vmatpush1.bf16.msra.mxu0 %v25922_v49  ;;  %9555 = vmatpush1.bf16.msra.mxu1 %v25925_v47 }
 0x448   : > { %9454 = vmatprep.subr.bf16.mxu0 %v25930_v25  ;;  %9556 = vmatprep.subr.bf16.mxu1 %v25933_v33  ;;  %v25992_v33 = vld [vmem:[%s36349_s1 + $0x2324] ss:$16 sps:$4 sm:$0xff]  }
 0x44b   : > { %9455 = vmatpush1.bf16.msra.mxu0 %v25928_v28  ;;  %9557 = vmatpush1.bf16.msra.mxu1 %v25931_v27 }
 0x44c   : > { %9475 = vmatprep.subr.bf16.mxu0 %v25938_v29  ;;  %9577 = vmatprep.subr.bf16.mxu1 %v25941_v58 }
 0x44e   : > { %9457 = vmatmul.mubr.bf16.vlgmr.msra.gmra.mrb[0].mxu0 %v8766_v43  ;;  %9559 = vmatmul.mubr.bf16.vlgmr.msra.gmra.mrb[0].mxu1 %v8766_v43  ;;  %v26002_v43 = vld [vmem:[%s36349_s1 + $0x2360] ss:$16 sps:$4 sm:$0xff]  }
 0x44f   : > { %9476 = vmatpush1.bf16.msra.mxu0 %v25936_v30  ;;  %9578 = vmatpush1.bf16.msra.mxu1 %v25939_v35  ;;  %v25999_v35 = vld [vmem:[%s36349_s1 + $0x2348] ss:$16 sps:$4 sm:$0xff]  }
 0x450   : > { %9477 = vmatprep.subr.bf16.mxu0 %v25944_v40  ;;  %9579 = vmatprep.subr.bf16.mxu1 %v25947_v0  ;;  %v26004_v40 = vld [vmem:[%s36349_s1 + $0x2364] ss:$16 sps:$4 sm:$0xff]   ;;  %v26007_v0 = vld [vmem:[%s36349_s1 + $0x236c] ss:$16 sps:$4 sm:$0xff]  }
 0x451   : > { %9466 = vmatprep.mubr.bf16.mxu0 %v31504_v32  ;;  %9568 = vmatprep.mubr.bf16.mxu1 %v31504_v32  ;;  %v25954_v32 = vld [vmem:[%s36349_s1 + $0x2260] ss:$16 sps:$4 sm:$0xff]  }
 0x453   : > { %9478 = vmatpush1.bf16.msra.mxu0 %v25942_v50  ;;  %9580 = vmatpush1.bf16.msra.mxu1 %v25945_v15  ;;  %v26005_v50 = vld [vmem:[%s36349_s1 + $0x2368] ss:$16 sps:$4 sm:$0xff]   ;;  %v26010_v15 = vld [vmem:[%s36349_s1 + $0x2384] ss:$16 sps:$4 sm:$0xff]  }
 0x454   : > { %9479 = vmatprep.subr.bf16.mxu0 %v25950_v60  ;;  %9581 = vmatprep.subr.bf16.mxu1 %v25953_v3  ;;  %v26013_v60 = vld [vmem:[%s36349_s1 + $0x238c] ss:$16 sps:$4 sm:$0xff]   ;;  %v26008_v3 = vld [vmem:[%s36349_s1 + $0x2380] ss:$16 sps:$4 sm:$0xff]  }
 0x456   : > { %9467 = vmatmul.mubr.bf16.gmra.mrb[68].mxu0 %v8765_v24  ;;  %9569 = vmatmul.mubr.bf16.gmra.mrb[68].mxu1 %v8765_v24 }
 0x457   : > { %9480 = vmatpush1.bf16.msra.mxu0 %v25948_v56  ;;  %9582 = vmatpush1.bf16.msra.mxu1 %v25951_v5  ;;  %v26016_v56 = vld [vmem:[%s36349_s1 + $0x23a4] ss:$16 sps:$4 sm:$0xff]   ;;  %v26019_v5 = vld [vmem:[%s36349_s1 + $0x23ac] ss:$16 sps:$4 sm:$0xff]  }
 0x458   : > { %9481 = vmatprep.subr.bf16.mxu0 %v25956_v10  ;;  %9583 = vmatprep.subr.bf16.mxu1 %v25959_v57  ;;  %v26014_v10 = vld [vmem:[%s36349_s1 + $0x23a0] ss:$16 sps:$4 sm:$0xff]   ;;  %v26017_v57 = vld [vmem:[%s36349_s1 + $0x23a8] ss:$16 sps:$4 sm:$0xff]  }
 0x459   : > { %9507 = vmatprep.mubr.bf16.mxu0 %v8775_v22  ;;  %9609 = vmatprep.mubr.bf16.mxu1 %v8775_v22  ;;  %v26031_v22 = vld [vmem:[%s36349_s1 + $0x23ec] ss:$16 sps:$4 sm:$0xff]  }
 0x45b   : > { %9482 = vmatpush1.bf16.msra.mxu0 %v25954_v32  ;;  %9584 = vmatpush1.bf16.msra.mxu1 %v25957_v14  ;;  %v26025_v32 = vld [vmem:[%s36349_s1 + $0x23cc] ss:$16 sps:$4 sm:$0xff]   ;;  %v26020_v14 = vld [vmem:[%s36349_s1 + $0x23c0] ss:$16 sps:$4 sm:$0xff]  }
 0x45c   : > { %9483 = vmatprep.subr.bf16.mxu0 %v25962_v59  ;;  %9585 = vmatprep.subr.bf16.mxu1 %v25965_v12  ;;  %v26023_v59 = vld [vmem:[%s36349_s1 + $0x23c8] ss:$16 sps:$4 sm:$0xff]   ;;  %v26028_v12 = vld [vmem:[%s36349_s1 + $0x23e4] ss:$16 sps:$4 sm:$0xff]  }
 0x45f   : > { %9484 = vmatpush1.bf16.msra.mxu0 %v25960_v54  ;;  %9586 = vmatpush1.bf16.msra.mxu1 %v25963_v42  ;;  %v21594_v54 = vcombine.low %v31682_v39, %v31704_v4  ;;  %v26026_v42 = vld [vmem:[%s36349_s1 + $0x23e0] ss:$16 sps:$4 sm:$0xff]   ;;  %v8771_v4 = vrot.slane %v31408_v26, 3  ;;  %v26045_v26 = vld [vmem:[%s36351_s3 + $0x42c] ss:$16 sps:$4 sm:$0xff]  }
 0x460   : > { %9485 = vmatprep.subr.bf16.mxu0 %v25968_v38  ;;  %9587 = vmatprep.subr.bf16.mxu1 %v25971_v20  ;;  %v26029_v38 = vld [vmem:[%s36349_s1 + $0x23e8] ss:$16 sps:$4 sm:$0xff]   ;;  %v26036_v20 = vld [vmem:[%s36351_s3 + $0x404] ss:$16 sps:$4 sm:$0xff]  }
 0x461   : > { %v8770_v39 = vrot.slane %v21594_v54, 3  ;;  %v26087_v54 = vld [vmem:[%s36351_s3 + $0x50c] ss:$16 sps:$4 sm:$0xff]  }
 0x463   : > { %9486 = vmatpush1.bf16.msra.mxu0 %v25966_v19  ;;  %9588 = vmatpush1.bf16.msra.mxu1 %v25969_v34  ;;  %v26039_v19 = vld [vmem:[%s36351_s3 + $0x40c] ss:$16 sps:$4 sm:$0xff]   ;;  %v26034_v34 = vld [vmem:[%s36351_s3 + $0x400] ss:$16 sps:$4 sm:$0xff]  }
 0x464   : > { %9487 = vmatprep.subr.bf16.mxu0 %v25974_v1  ;;  %9589 = vmatprep.subr.bf16.mxu1 %v25977_v2  ;;  %v26037_v1 = vld [vmem:[%s36351_s3 + $0x408] ss:$16 sps:$4 sm:$0xff]   ;;  %v8772_v2 = vsel %vm3551_vm2, %v8770_v39, %v8771_v4  ;;  %v26088_v39 = vld [vmem:[%s36351_s3 + $0x520] ss:$16 sps:$4 sm:$0xff]  }
 0x467   : > { %9488 = vmatpush1.bf16.msra.mxu0 %v25972_v21  ;;  %9590 = vmatpush1.bf16.msra.mxu1 %v25975_v17  ;;  %v26042_v21 = vld [vmem:[%s36351_s3 + $0x424] ss:$16 sps:$4 sm:$0xff]   ;;  %v26040_v17 = vld [vmem:[%s36351_s3 + $0x420] ss:$16 sps:$4 sm:$0xff]  }
 0x468   : > { %9489 = vmatprep.subr.bf16.mxu0 %v25980_v37  ;;  %9591 = vmatprep.subr.bf16.mxu1 %v25983_v16  ;;  %v26043_v37 = vld [vmem:[%s36351_s3 + $0x428] ss:$16 sps:$4 sm:$0xff]  }
 0x469   : > { %v7428_v51 = vpop.f32.mrb[56].mxu0  ;;  %v7530_v8 = vpop.f32.mrb[56].mxu1 }
 0x46a   : > { %v7429_v46 = vadd.f32 %v7428_v51, %v31574_v7  ;;  %v7531_v49 = vadd.f32 %v7530_v8, %v31576_v36  ;;  %v7430_v47 = vpop.f32.mrb[57].mxu0  ;;  %v7532_v25 = vpop.f32.mrb[57].mxu1 }
 0x46b   : > { %v7431_v28 = vadd.f32 %v7430_v47, %v31584_v6  ;;  %v7533_v27 = vadd.f32 %v7532_v25, %v31586_v61  ;;  %9490 = vmatpush1.bf16.msra.mxu0 %v25978_v18  ;;  %9592 = vmatpush1.bf16.msra.mxu1 %v25981_v53  ;;  %v7432_v29 = vpop.f32.mrb[58].mxu0  ;;  %v7534_v7 = vpop.f32.mrb[58].mxu1  ;;  %v25990_v61 = vld [vmem:[%s36349_s1 + $0x2320] ss:$16 sps:$4 sm:$0xff]   ;;  %v26054_v47 = vld [vmem:[%s36351_s3 + $0x464] ss:$16 sps:$4 sm:$0xff]  }
 0x46c   : > { %v31804_v36 = vadd.f32 %v7429_v46, %v31347_v11  ;;  %v31807_v58 = vadd.f32 %v7531_v49, %v31350_v23  ;;  %9491 = vmatprep.subr.bf16.mxu0 %v25986_v31  ;;  %9593 = vmatprep.subr.bf16.mxu1 %v25989_v48  ;;  %v7433_v13 = vpop.f32.mrb[59].mxu0  ;;  %v7535_v24 = vpop.f32.mrb[59].mxu1  ;;  %v25993_v11 = vld [vmem:[%s36349_s1 + $0x2328] ss:$16 sps:$4 sm:$0xff]   ;;  %v25998_v23 = vld [vmem:[%s36349_s1 + $0x2344] ss:$16 sps:$4 sm:$0xff]  }
 0x46d   : > { %v31810_v30 = vadd.f32 %v7431_v28, %v31359_v62  ;;  %v31813_v6 = vadd.f32 %v7533_v27, %v31362_v9  ;;  %v26001_v62 = vld [vmem:[%s36349_s1 + $0x234c] ss:$16 sps:$4 sm:$0xff]   ;;  %v25996_v9 = vld [vmem:[%s36349_s1 + $0x2340] ss:$16 sps:$4 sm:$0xff]   ;;  %v26060_v28 = vld [vmem:[%s36351_s3 + $0x484] ss:$16 sps:$4 sm:$0xff]  }
 0x46e   : > { %v26046_v48 = vld [vmem:[%s36351_s3 + $0x440] ss:$16 sps:$4 sm:$0xff]   ;;  %v26063_v27 = vld [vmem:[%s36351_s3 + $0x48c] ss:$16 sps:$4 sm:$0xff]   ;;  %v26061_v7 = vld [vmem:[%s36351_s3 + $0x488] ss:$16 sps:$4 sm:$0xff]  }
 0x46f   : > { %9492 = vmatpush1.bf16.msra.mxu0 %v25984_v55  ;;  %9594 = vmatpush1.bf16.msra.mxu1 %v25987_v52  ;;  %v26049_v55 = vld [vmem:[%s36351_s3 + $0x448] ss:$16 sps:$4 sm:$0xff]   ;;  %v26051_v52 = vld [vmem:[%s36351_s3 + $0x44c] ss:$16 sps:$4 sm:$0xff]   ;;  %v26052_v25 = vld [vmem:[%s36351_s3 + $0x460] ss:$16 sps:$4 sm:$0xff]  }
 0x470   : > { %9493 = vmatprep.subr.bf16.mxu0 %v25992_v33  ;;  %9595 = vmatprep.subr.bf16.mxu1 %v25995_v63  ;;  %v26057_v33 = vld [vmem:[%s36351_s3 + $0x46c] ss:$16 sps:$4 sm:$0xff]   ;;  %v26055_v63 = vld [vmem:[%s36351_s3 + $0x468] ss:$16 sps:$4 sm:$0xff]   ;;  %v26058_v29 = vld [vmem:[%s36351_s3 + $0x480] ss:$16 sps:$4 sm:$0xff]  }
 0x471   : > { %v26066_v13 = vld [vmem:[%s36351_s3 + $0x4a4] ss:$16 sps:$4 sm:$0xff]   ;;  %v26069_v24 = vld [vmem:[%s36351_s3 + $0x4ac] ss:$16 sps:$4 sm:$0xff]  }
 0x473   : > { %9494 = vmatpush1.bf16.msra.mxu0 %v25990_v61  ;;  %9596 = vmatpush1.bf16.msra.mxu1 %v25993_v11  ;;  %v27816_v61 = vmov 0   ;;  %v26064_v11 = vld [vmem:[%s36351_s3 + $0x4a0] ss:$16 sps:$4 sm:$0xff]  }
 0x474   : > { %9495 = vmatprep.subr.bf16.mxu0 %v25998_v23  ;;  %9597 = vmatprep.subr.bf16.mxu1 %v26001_v62  ;;  %9783 = vst [vmem:[#allocation2] sm:$0xff] %v27816_v61  ;;  %9784 = vst [vmem:[#allocation2 + $0x8] sm:$0xff] %v27816_v61  ;;  %v26067_v23 = vld [vmem:[%s36351_s3 + $0x4a8] ss:$16 sps:$4 sm:$0xff]  }
 0x475   : > { %9791 = vst [vmem:[#allocation2 + $0x40] sm:$0xff] %v27816_v61  ;;  %9792 = vst [vmem:[#allocation2 + $0x48] sm:$0xff] %v27816_v61 }
 0x477   : > { %9496 = vmatpush1.bf16.msra.mxu0 %v25996_v9  ;;  %9598 = vmatpush1.bf16.msra.mxu1 %v25999_v35 }
 0x478   : > { %9497 = vmatprep.subr.bf16.mxu0 %v26004_v40  ;;  %9599 = vmatprep.subr.bf16.mxu1 %v26007_v0 }
 0x47b   : > { %9498 = vmatpush1.bf16.msra.mxu0 %v26002_v43  ;;  %9600 = vmatpush1.bf16.msra.mxu1 %v26005_v50 }
 0x47c   : > { %9499 = vmatprep.subr.bf16.mxu0 %v26010_v15  ;;  %9601 = vmatprep.subr.bf16.mxu1 %v26013_v60 }
 0x47f   : > { %9500 = vmatpush1.bf16.msra.mxu0 %v26008_v3  ;;  %9602 = vmatpush1.bf16.msra.mxu1 %v26011_v44 }
 0x480   : > { %9501 = vmatprep.subr.bf16.mxu0 %v26016_v56  ;;  %9603 = vmatprep.subr.bf16.mxu1 %v26019_v5 }
 0x483   : > { %9502 = vmatpush1.bf16.msra.mxu0 %v26014_v10  ;;  %9604 = vmatpush1.bf16.msra.mxu1 %v26017_v57 }
 0x484   : > { %9503 = vmatprep.subr.bf16.mxu0 %v26022_v41  ;;  %9605 = vmatprep.subr.bf16.mxu1 %v26025_v32  ;;  %v26070_v32 = vld [vmem:[%s36351_s3 + $0x4c0] ss:$16 sps:$4 sm:$0xff]  }
 0x487   : > { %9504 = vmatpush1.bf16.msra.mxu0 %v26020_v14  ;;  %9606 = vmatpush1.bf16.msra.mxu1 %v26023_v59  ;;  %v26081_v14 = vld [vmem:[%s36351_s3 + $0x4ec] ss:$16 sps:$4 sm:$0xff]   ;;  %v26076_v59 = vld [vmem:[%s36351_s3 + $0x4e0] ss:$16 sps:$4 sm:$0xff]  }
 0x488   : > { %9505 = vmatprep.subr.bf16.mxu0 %v26028_v12  ;;  %9607 = vmatprep.subr.bf16.mxu1 %v26031_v22  ;;  %v26079_v12 = vld [vmem:[%s36351_s3 + $0x4e8] ss:$16 sps:$4 sm:$0xff]   ;;  %v26084_v22 = vld [vmem:[%s36351_s3 + $0x504] ss:$16 sps:$4 sm:$0xff]  }
 0x48b   : > { %9506 = vmatpush1.bf16.msra.mxu0 %v26026_v42  ;;  %9608 = vmatpush1.bf16.msra.mxu1 %v26029_v38  ;;  %v26082_v42 = vld [vmem:[%s36351_s3 + $0x500] ss:$16 sps:$4 sm:$0xff]   ;;  %v26085_v38 = vld [vmem:[%s36351_s3 + $0x508] ss:$16 sps:$4 sm:$0xff]  }
 0x48c   : > { %10931 = vmatprep.subr.bf16.mxu0 %v26036_v20  ;;  %11033 = vmatprep.subr.bf16.mxu1 %v26039_v19  ;;  %v26090_v20 = vld [vmem:[%s36351_s3 + $0x524] ss:$16 sps:$4 sm:$0xff]   ;;  %v26093_v19 = vld [vmem:[%s36351_s3 + $0x52c] ss:$16 sps:$4 sm:$0xff]  }
 0x48e   : > { %9508 = vmatmul.mubr.bf16.vlgmr.msra.gmra.mrb[0].mxu0 %v8772_v2  ;;  %9610 = vmatmul.mubr.bf16.vlgmr.msra.gmra.mrb[0].mxu1 %v8772_v2  ;;  %v26094_v2 = vld [vmem:[%s36351_s3 + $0x540] ss:$16 sps:$4 sm:$0xff]  }
 0x48f   : > { %9517 = vmatprep.mubr.bf16.mxu0 %v31723_v45  ;;  %9619 = vmatprep.mubr.bf16.mxu1 %v31723_v45  ;;  %v26048_v45 = vld [vmem:[%s36351_s3 + $0x444] ss:$16 sps:$4 sm:$0xff]  }
 0x490   : > { %10932 = vmatpush1.bf16.msra.mxu0 %v26034_v34  ;;  %11034 = vmatpush1.bf16.msra.mxu1 %v26037_v1  ;;  %v26096_v34 = vld [vmem:[%s36351_s3 + $0x544] ss:$16 sps:$4 sm:$0xff]   ;;  %v26099_v1 = vld [vmem:[%s36351_s3 + $0x54c] ss:$16 sps:$4 sm:$0xff]  }
 0x491   : > { %10933 = vmatprep.subr.bf16.mxu0 %v26042_v21  ;;  %11035 = vmatprep.subr.bf16.mxu1 %v26045_v26  ;;  %v26097_v21 = vld [vmem:[%s36351_s3 + $0x548] ss:$16 sps:$4 sm:$0xff]   ;;  %v26102_v26 = vld [vmem:[%s36351_s3 + $0x564] ss:$16 sps:$4 sm:$0xff]  }
 0x494   : > { %10934 = vmatpush1.bf16.msra.mxu0 %v26040_v17  ;;  %11036 = vmatpush1.bf16.msra.mxu1 %v26043_v37  ;;  %v26105_v17 = vld [vmem:[%s36351_s3 + $0x56c] ss:$16 sps:$4 sm:$0xff]   ;;  %v26100_v37 = vld [vmem:[%s36351_s3 + $0x560] ss:$16 sps:$4 sm:$0xff]  }
 0x495   : > { %10935 = vmatprep.subr.bf16.mxu0 %v26048_v45  ;;  %11037 = vmatprep.subr.bf16.mxu1 %v26051_v52  ;;  %v26112_v45 = vld [vmem:[%s36351_s3 + $0x5a0] ss:$16 sps:$4 sm:$0xff]   ;;  %v26120_v52 = vld [vmem:[%s36351_s3 + $0x5c4] ss:$16 sps:$4 sm:$0xff]  }
 0x496   : > { %9518 = vmatmul.mubr.bf16.gmra.mrb[72].mxu0 %v8771_v4  ;;  %9620 = vmatmul.mubr.bf16.gmra.mrb[72].mxu1 %v8771_v4  ;;  %v26091_v4 = vld [vmem:[%s36351_s3 + $0x528] ss:$16 sps:$4 sm:$0xff]  }
 0x498   : > { %10936 = vmatpush1.bf16.msra.mxu0 %v26046_v48  ;;  %11038 = vmatpush1.bf16.msra.mxu1 %v26049_v55  ;;  %v26109_v48 = vld [vmem:[%s36351_s3 + $0x588] ss:$16 sps:$4 sm:$0xff]   ;;  %v26117_v55 = vld [vmem:[%s36351_s3 + $0x5ac] ss:$16 sps:$4 sm:$0xff]  }
 0x499   : > { %10937 = vmatprep.subr.bf16.mxu0 %v26054_v47  ;;  %11039 = vmatprep.subr.bf16.mxu1 %v26057_v33  ;;  %v26121_v47 = vld [vmem:[%s36351_s3 + $0x5c8] ss:$16 sps:$4 sm:$0xff]   ;;  %v26129_v33 = vld [vmem:[%s36351_s3 + $0x5ec] ss:$16 sps:$4 sm:$0xff]  }
 0x49c   : > { %10938 = vmatpush1.bf16.msra.mxu0 %v26052_v25  ;;  %11040 = vmatpush1.bf16.msra.mxu1 %v26055_v63  ;;  %v26126_v25 = vld [vmem:[%s36351_s3 + $0x5e4] ss:$16 sps:$4 sm:$0xff]   ;;  %v26124_v63 = vld [vmem:[%s36351_s3 + $0x5e0] ss:$16 sps:$4 sm:$0xff]  }
 0x49d   : > { %10939 = vmatprep.subr.bf16.mxu0 %v26060_v28  ;;  %11041 = vmatprep.subr.bf16.mxu1 %v26063_v27  ;;  %v26127_v28 = vld [vmem:[%s36351_s3 + $0x5e8] ss:$16 sps:$4 sm:$0xff]   ;;  %v26132_v27 = vld [vmem:[%s36351_s3 + $0x604] ss:$16 sps:$4 sm:$0xff]  }
 0x4a0   : > { %10940 = vmatpush1.bf16.msra.mxu0 %v26058_v29  ;;  %11042 = vmatpush1.bf16.msra.mxu1 %v26061_v7  ;;  %v26135_v29 = vld [vmem:[%s36351_s3 + $0x60c] ss:$16 sps:$4 sm:$0xff]  }
 0x4a1   : > { %10941 = vmatprep.subr.bf16.mxu0 %v26066_v13  ;;  %11043 = vmatprep.subr.bf16.mxu1 %v26069_v24 }
 0x4a4   : > { %10942 = vmatpush1.bf16.msra.mxu0 %v26064_v11  ;;  %11044 = vmatpush1.bf16.msra.mxu1 %v26067_v23 }
 0x4a9   : > { %v8451_v16 = vpop.f32.mrb[60].mxu0  ;;  %v8553_v18 = vpop.f32.mrb[60].mxu1 }
 0x4aa   : > { %v8453_v53 = vpop.f32.mrb[61].mxu0  ;;  %v8555_v31 = vpop.f32.mrb[61].mxu1 }
 0x4ab   : > { %v8455_v51 = vpop.f32.mrb[62].mxu0  ;;  %v8557_v8 = vpop.f32.mrb[62].mxu1 }
 0x4ac   : > { %v8456_v46 = vpop.f32.mrb[63].mxu0  ;;  %v8558_v49 = vpop.f32.mrb[63].mxu1  ;;  %v26114_v51 = vld [vmem:[%s36351_s3 + $0x5a4] ss:$16 sps:$4 sm:$0xff]   ;;  %v26115_v8 = vld [vmem:[%s36351_s3 + $0x5a8] ss:$16 sps:$4 sm:$0xff]  }
 0x4ad   : > { %v26123_v46 = vld [vmem:[%s36351_s3 + $0x5cc] ss:$16 sps:$4 sm:$0xff]   ;;  %v26118_v49 = vld [vmem:[%s36351_s3 + $0x5c0] ss:$16 sps:$4 sm:$0xff]  }
 0x4e9   : > { %v8502_v62 = vpop.f32.mrb[64].mxu0  ;;  %v8604_v9 = vpop.f32.mrb[64].mxu1 }
 0x4ea   : > { %v8503_v35 = vadd.f32 %v8502_v62, %v8451_v16  ;;  %v8605_v40 = vadd.f32 %v8604_v9, %v8553_v18  ;;  %v8504_v0 = vpop.f32.mrb[65].mxu0  ;;  %v8606_v43 = vpop.f32.mrb[65].mxu1  ;;  %v26103_v16 = vld [vmem:[%s36351_s3 + $0x568] ss:$16 sps:$4 sm:$0xff]   ;;  %v26108_v18 = vld [vmem:[%s36351_s3 + $0x584] ss:$16 sps:$4 sm:$0xff]  }
 0x4eb   : > { %v8505_v50 = vadd.f32 %v8504_v0, %v8453_v53  ;;  %v8607_v15 = vadd.f32 %v8606_v43, %v8555_v31  ;;  %v8506_v60 = vpop.f32.mrb[66].mxu0  ;;  %v8608_v3 = vpop.f32.mrb[66].mxu1  ;;  %v26111_v53 = vld [vmem:[%s36351_s3 + $0x58c] ss:$16 sps:$4 sm:$0xff]   ;;  %v26106_v31 = vld [vmem:[%s36351_s3 + $0x580] ss:$16 sps:$4 sm:$0xff]  }
 0x4ec   : > { %v31972_v44 = vadd.f32 %v8503_v35, %v31804_v36  ;;  %v31975_v56 = vadd.f32 %v8605_v40, %v31807_v58  ;;  %v8507_v5 = vpop.f32.mrb[67].mxu0  ;;  %v8609_v10 = vpop.f32.mrb[67].mxu1  ;;  %v26072_v36 = vld [vmem:[%s36351_s3 + $0x4c4] ss:$16 sps:$4 sm:$0xff]   ;;  %v26073_v58 = vld [vmem:[%s36351_s3 + $0x4c8] ss:$16 sps:$4 sm:$0xff]   ;;  %v9642_v35 = vlaneseq }
 0x4ed   : > { %v31978_v57 = vadd.f32 %v8505_v50, %v31810_v30  ;;  %v31981_v41 = vadd.f32 %v8607_v15, %v31813_v6  ;;  %v26075_v30 = vld [vmem:[%s36351_s3 + $0x4cc] ss:$16 sps:$4 sm:$0xff]   ;;  %10943 = vmatprep.subr.bf16.mxu0 %v26072_v36  ;;  %v26078_v6 = vld [vmem:[%s36351_s3 + $0x4e4] ss:$16 sps:$4 sm:$0xff]  }
 0x4ee   : > { %11045 = vmatprep.subr.bf16.mxu1 %v26075_v30  ;;  %10944 = vmatpush1.bf16.msra.mxu0 %v26070_v32  ;;  %v9643_v40 = vshrl.u32 %v9642_v35, 7 }
 0x4ef   : > { %11046 = vmatpush1.bf16.msra.mxu1 %v26073_v58  ;;  %10945 = vmatprep.subr.bf16.mxu0 %v26078_v6 }
 0x4f0   : > { %11047 = vmatprep.subr.bf16.mxu1 %v26081_v14  ;;  %v9712_v0 = vadd.s32 8, %v9643_v40  ;;  %v32117_v43 = vmul.u32.u64.low 2863311531, %v9643_v40  ;;  %v32118_v50 = vmul.u32.u64.high 2863311531, %v9643_v40, %v32117_v43  ;;  %v9713_v5 = vadd.s32 16, %v9643_v40 }
 0x4f2   : > { %10946 = vmatpush1.bf16.msra.mxu0 %v26076_v59  ;;  %v32120_v15 = vmul.u32.u64.low 2863311531, %v9712_v0  ;;  %v32121_v60 = vmul.u32.u64.high 2863311531, %v9712_v0, %v32120_v15  ;;  %v9720_v3 = vshrl.u32 %v32118_v50, 2 }
 0x4f3   : > { %11048 = vmatpush1.bf16.msra.mxu1 %v26079_v12  ;;  %10947 = vmatprep.subr.bf16.mxu0 %v26084_v22  ;;  %v32125_v36 = vmul.u32.u64.low 2863311531, %v9713_v5  ;;  %v32126_v58 = vmul.u32.u64.high 2863311531, %v9713_v5, %v32125_v36  ;;  %v32129_v12 = vsub.s32 0, %v9643_v40 }
 0x4f4   : > { %11049 = vmatprep.subr.bf16.mxu1 %v26087_v54  ;;  %v9731_v10 = vshrl.u32 %v32121_v60, 2  ;;  %v9721_v32 = vmul.u32 6, %v9720_v3 }
 0x4f5   : > { %v9742_v59 = vshrl.u32 %v32126_v58, 2  ;;  %36393 = vst [vmem:[#allocation3_spill] sm:$0xff] %v32129_v12 }
 0x4f6   : > { %10948 = vmatpush1.bf16.msra.mxu0 %v26082_v42  ;;  %v9732_v30 = vmul.u32 6, %v9731_v10  ;;  %v9722_v6 = vsub.s32 %v9643_v40, %v9721_v32  ;;  %v32135_v42 = vsub.s32 2, %v9643_v40 }
 0x4f7   : > { %11050 = vmatpush1.bf16.msra.mxu1 %v26085_v38  ;;  %10949 = vmatprep.subr.bf16.mxu0 %v26090_v20  ;;  %v9640_v20 = vld [vmem:[%s36350_s2] sm:$0xf] }
 0x4f8   : > { %11051 = vmatprep.subr.bf16.mxu1 %v26093_v19  ;;  %v9733_v14 = vsub.s32 %v9712_v0, %v9732_v30  ;;  %vm9747_vm6 = vcmp.ne.s32.totalorder %v9722_v6, 0  ;;  %vm9750_vm7 = vcmp.lt.s32.totalorder %v9722_v6, 0  ;;  %v9756_v54 = vadd.s32 6, %v9722_v6  ;;  %36396 = vst [vmem:[#allocation4_spill] sm:$0xff] %v32135_v42 }
 0x4f9   : > { %vm32131_vm10 = vmand %vm9750_vm7, %vm9747_vm6  ;;  %v32140_v19 = vsub.s32 1, %v9643_v40  ;;  %vm9901_vm6 = vcmask 1047559   ;;  %vm9902_vm7 = vsmask.f32 7966 }
 0x4fa   : > { %10950 = vmatpush1.bf16.msra.mxu0 %v26088_v39  ;;  %vm9748_vm8 = vcmp.ne.s32.totalorder %v9733_v14, 0  ;;  %vm9751_vm9 = vcmp.lt.s32.totalorder %v9733_v14, 0  ;;  %v9757_v38 = vadd.s32 6, %v9733_v14  ;;  %v32142_v39 = vsub.s32 3, %v9643_v40 }
 0x4fb   : > { %11052 = vmatpush1.bf16.msra.mxu1 %v26091_v4  ;;  %10951 = vmatprep.subr.bf16.mxu0 %v26096_v34  ;;  %36397 = vst [vmem:[#allocation5_spill] sm:$0xff] %v32140_v19  ;;  %vm9754_vm11 = vmand %vm9751_vm9, %vm9748_vm8  ;;  %v9743_v4 = vmul.u32 6, %v9742_v59  ;;  %v32145_v34 = vrot.slane %v9640_v20, %v32129_v12 }
 0x4fc   : > { %11053 = vmatprep.subr.bf16.mxu1 %v26099_v1  ;;  %36398 = vst [vmem:[#allocation6_spill] sm:$0xff] %v32142_v39  ;;  %v9759_v1 = vsel %vm32131_vm10, %v9756_v54, %v9722_v6  ;;  %v9905_v6 = vld [vmem:[#allocation2] sm:$0x88] }
 0x4fd   : > { %vm32160_vm12 = vcmp.lt.s32.totalorder %v9759_v1, 4 }
 0x4fe   : > { %10952 = vmatpush1.bf16.msra.mxu0 %v26094_v2  ;;  %v32150_v2 = vrot.slane %v9640_v20, %v32135_v42 }
 0x4ff   : > { %11054 = vmatpush1.bf16.msra.mxu1 %v26097_v21  ;;  %10953 = vmatprep.subr.bf16.mxu0 %v26102_v26  ;;  %v9760_v21 = vsel %vm9754_vm11, %v9757_v38, %v9733_v14  ;;  %v32153_v26 = vrot.slane %v9640_v20, %v32140_v19  ;;  %v9908_v14 = vld [vmem:[#allocation2 + $0x8] sm:$0x88] }
 0x500   : > { %11055 = vmatprep.subr.bf16.mxu1 %v26105_v17  ;;  %v32156_v17 = vrot.slane %v9640_v20, %v32142_v39  ;;  %vm32164_vm14 = vcmp.lt.s32.totalorder %v9760_v21, 4  ;;  %v26169_v19 = vld [vmem:[%s36351_s3 + $0x6c8] ss:$16 sps:$4 sm:$0xff]  }
 0x502   : > { %10954 = vmatpush1.bf16.msra.mxu0 %v26100_v37  ;;  %v32158_v37 = vsub.s32 %v9713_v5, %v9743_v4 }
 0x503   : > { %11056 = vmatpush1.bf16.msra.mxu1 %v26103_v16  ;;  %10955 = vmatprep.subr.bf16.mxu0 %v26108_v18 }
 0x504   : > { %11057 = vmatprep.subr.bf16.mxu1 %v26111_v53  ;;  %vm9749_vm4 = vcmp.ne.s32.totalorder %v32158_v37, 0  ;;  %vm9752_vm5 = vcmp.lt.s32.totalorder %v32158_v37, 0 }
 0x506   : > { %10956 = vmatpush1.bf16.msra.mxu0 %v26106_v31 }
 0x507   : > { %11058 = vmatpush1.bf16.msra.mxu1 %v26109_v48  ;;  %10957 = vmatprep.subr.bf16.mxu0 %v26114_v51 }
 0x508   : > { %11059 = vmatprep.subr.bf16.mxu1 %v26117_v55 }
 0x50a   : > { %10958 = vmatpush1.bf16.msra.mxu0 %v26112_v45 }
 0x50b   : > { %11060 = vmatpush1.bf16.msra.mxu1 %v26115_v8  ;;  %10959 = vmatprep.subr.bf16.mxu0 %v26120_v52 }
 0x50c   : > { %11061 = vmatprep.subr.bf16.mxu1 %v26123_v46 }
 0x50e   : > { %10960 = vmatpush1.bf16.msra.mxu0 %v26118_v49 }
 0x50f   : > { %11062 = vmatpush1.bf16.msra.mxu1 %v26121_v47  ;;  %10961 = vmatprep.subr.bf16.mxu0 %v26126_v25  ;;  %v32173_v47 = vadd.s32 6, %v32158_v37 }
 0x510   : > { %11063 = vmatprep.subr.bf16.mxu1 %v26129_v33 }
 0x512   : > { %10962 = vmatpush1.bf16.msra.mxu0 %v26124_v63 }
 0x513   : > { %11064 = vmatpush1.bf16.msra.mxu1 %v26127_v28  ;;  %10982 = vmatprep.subr.bf16.mxu0 %v26132_v27 }
 0x514   : > { %11084 = vmatprep.subr.bf16.mxu1 %v26135_v29 }
 0x529   : > { %v32109_v7 = vpop.f32.mrb[68].mxu0  ;;  %v32111_v13 = vpop.f32.mrb[68].mxu1 }
 0x52a   : > { %v32113_v24 = vpop.f32.mrb[69].mxu0  ;;  %v32115_v61 = vpop.f32.mrb[69].mxu1 }
 0x52b   : > { %v9472_v11 = vpop.f32.mrb[70].mxu0  ;;  %v9574_v23 = vpop.f32.mrb[70].mxu1 }
 0x52c   : > { %v9473_v62 = vpop.f32.mrb[71].mxu0  ;;  %v9575_v9 = vpop.f32.mrb[71].mxu1 }
 0x561   : > { %v9509_v16 = vpop.f32.mrb[0].mxu0  ;;  %v9611_v53 = vpop.f32.mrb[0].mxu1 }
 0x562   : > { %v9662_v48 = vadd.f32 %v32145_v34, %v9509_v16  ;;  %v9664_v45 = vadd.f32 %v32150_v2, %v9611_v53  ;;  %v9511_v51 = vpop.f32.mrb[1].mxu0  ;;  %v9613_v8 = vpop.f32.mrb[1].mxu1 }
 0x563   : > { %v9663_v55 = vadd.f32 %v32153_v26, %v9511_v51  ;;  %v9665_v52 = vadd.f32 %v32156_v17, %v9613_v8  ;;  %v9513_v46 = vpop.f32.mrb[2].mxu0  ;;  %v9615_v49 = vpop.f32.mrb[2].mxu1 }
 0x564   : > { %vm9674_vm8 = vcmp.gt.f32.partialorder %v9662_v48, 0.0  ;;  %v9686_v25 = vmul.f32 0.2, %v9662_v48  ;;  %vm9676_vm9 = vcmp.gt.f32.partialorder %v9664_v45, 0.0  ;;  %v9688_v33 = vmul.f32 0.2, %v9664_v45 }
 0x565   : > { %vm9675_vm10 = vcmp.gt.f32.partialorder %v9663_v55, 0.0  ;;  %v9687_v63 = vmul.f32 0.2, %v9663_v55  ;;  %vm9677_vm11 = vcmp.gt.f32.partialorder %v9665_v52, 0.0  ;;  %v9689_v28 = vmul.f32 0.2, %v9665_v52 }
 0x566   : > { %v32177_v27 = vsel %vm9674_vm8, %v9662_v48, %v9686_v25  ;;  %v32179_v29 = vsel %vm9676_vm9, %v9664_v45, %v9688_v33  ;;  %v9666_v11 = vadd.f32 %v32145_v34, %v9513_v46  ;;  %v9668_v23 = vadd.f32 %v32150_v2, %v9615_v49  ;;  %v9515_v62 = vpop.f32.mrb[3].mxu0  ;;  %v9617_v9 = vpop.f32.mrb[3].mxu1  ;;  %vm32198_vm8 = vmand %vm9898_vm13, %vm9899_vm15 }
 0x567   : > { %36403 = vst [vmem:[#allocation7_spill] sm:$0xff] %v32177_v27  ;;  %36404 = vst [vmem:[#allocation8_spill] sm:$0xff] %v32179_v29  ;;  %v9771_v35 = vsel %vm32160_vm12, %v32177_v27, 0.0  ;;  %v9773_v40 = vsel %vm32160_vm12, %v32179_v29, 0.0  ;;  %v32189_v0 = vsel %vm9675_vm10, %v9663_v55, %v9687_v63  ;;  %v32191_v43 = vsel %vm9677_vm11, %v9665_v52, %v9689_v28 }
 0x568   : > { %36405 = vst [vmem:[#allocation9_spill] sm:$0xff] %v32189_v0  ;;  %36406 = vst [vmem:[#allocation10_spill] sm:$0xff] %v32191_v43  ;;  %v9772_v50 = vsel %vm32160_vm12, %v32189_v0, 0.0  ;;  %v9774_v60 = vsel %vm32160_vm12, %v32191_v43, 0.0  ;;  %vm9678_vm9 = vcmp.gt.f32.partialorder %v9666_v11, 0.0  ;;  %vm9680_vm11 = vcmp.gt.f32.partialorder %v9668_v23, 0.0 }
 0x569   : > { %v9690_v3 = vmul.f32 0.2, %v9666_v11  ;;  %v23960_v5 = vpack.c.bf16 %v9772_v50, %v9771_v35  ;;  %vm32207_vm10 = vmand %vm9901_vm6, %vm9902_vm7  ;;  %v23961_v32 = vpack.c.bf16 %v9774_v60, %v9773_v40  ;;  %v9692_v36 = vmul.f32 0.2, %v9668_v23  ;;  %v9519_v58 = vpop.f32.mrb[72].mxu0  ;;  %v9621_v30 = vpop.f32.mrb[72].mxu1 }
 0x56a   : > { %v9667_v22 = vadd.f32 %v32153_v26, %v9515_v62  ;;  %v9669_v54 = vadd.f32 %v32156_v17, %v9617_v9  ;;  %v9520_v38 = vadd.f32 %v9519_v58, %v32109_v7  ;;  %v9521_v20 = vpop.f32.mrb[73].mxu0  ;;  %v9623_v4 = vpop.f32.mrb[73].mxu1  ;;  %vm9904_vm12 = vmor %vm32207_vm10, %vm32198_vm8  ;;  %v9622_v15 = vadd.f32 %v9621_v30, %v32111_v13 }
 0x56b   : > { %v32211_v59 = vsel %vm9678_vm9, %v9666_v11, %v9690_v3  ;;  %v9833_v1 = vshll.u32 %v23960_v5, 16  ;;  %v9840_v21 = vshrl.u32 %v23960_v5, 16  ;;  %v9837_v16 = vshll.u32 %v23961_v32, 16  ;;  %v9523_v53 = vpop.f32.mrb[74].mxu0  ;;  %v9625_v48 = vpop.f32.mrb[74].mxu1  ;;  %vm32251_vm6 = vmand %vm9752_vm5, %vm9749_vm4 }
 0x56c   : > { %36411 = vst [vmem:[#allocation11_spill] sm:$0xff] %v32211_v59  ;;  %v9850_v18 = vshrl.u32 %v23961_v32, 16  ;;  %v9775_v45 = vsel %vm32164_vm14, %v32211_v59, 0.0  ;;  %v32224_v51 = vsel %vm9680_vm11, %v9668_v23, %v9692_v36  ;;  %vm9679_vm13 = vcmp.gt.f32.partialorder %v9667_v22, 0.0  ;;  %v9524_v8 = vpop.f32.mrb[75].mxu0  ;;  %v9626_v55 = vpop.f32.mrb[75].mxu1 }
 0x56d   : > { %36412 = vst [vmem:[#allocation12_spill] sm:$0xff] %v32224_v51  ;;  %v9691_v7 = vmul.f32 0.2, %v9667_v22  ;;  %v9835_v52 = vrot.slane %v9833_v1, 5  ;;  %v9842_v46 = vrot.slane %v9840_v21, 4  ;;  %v9839_v49 = vrot.slane %v9837_v16, 5 }
 0x56e   : > { %v9852_v25 = vrot.slane %v9850_v18, 4  ;;  %v9777_v33 = vsel %vm32164_vm14, %v32224_v51, 0.0  ;;  %vm9681_vm15 = vcmp.gt.f32.partialorder %v9669_v54, 0.0  ;;  %v9693_v28 = vmul.f32 0.2, %v9669_v54 }
 0x56f   : > { %v32229_v63 = vsel %vm9679_vm13, %v9667_v22, %v9691_v7  ;;  %v9843_v11 = vor.u32 %v9842_v46, %v9835_v52  ;;  %v9906_v23 = vsel %vm9904_vm12, %v9835_v52, %v9905_v6  ;;  %v9909_v9 = vsel %vm9904_vm12, %v9839_v49, %v9908_v14 }
 0x570   : > { %36413 = vst [vmem:[#allocation13_spill] sm:$0xff] %v32229_v63  ;;  %v9853_v62 = vor.u32 %v9852_v25, %v9839_v49  ;;  %9907 = vst [vmem:[#allocation2] sm:$0x88] %v9906_v23  ;;  %v9776_v35 = vsel %vm32164_vm14, %v32229_v63, 0.0  ;;  %v32244_v40 = vsel %vm9681_vm15, %v9669_v54, %v9693_v28  ;;  %v9636_v50 = vadd.f32 %v9520_v38, %v31972_v44 }
 0x571   : > { %9910 = vst [vmem:[#allocation2 + $0x8] sm:$0x88] %v9909_v9  ;;  %36414 = vst [vmem:[#allocation14_spill] sm:$0xff] %v32244_v40  ;;  %v23962_v3 = vpack.c.bf16 %v9776_v35, %v9775_v45  ;;  %vm9829_vm7 = vsmask.f32 3328  ;;  %v9778_v5 = vsel %vm32164_vm14, %v32244_v40, 0.0  ;;  %v9638_v32 = vadd.f32 %v9622_v15, %v31975_v56 }
 0x572   : > { %vm9830_vm8 = vsmask.f32 7440  ;;  %v23963_v10 = vpack.c.bf16 %v9778_v5, %v9777_v33  ;;  %v9670_v44 = vadd.f32 %v32145_v34, %v9636_v50  ;;  %v9522_v36 = vadd.f32 %v9521_v20, %v32113_v24 }
 0x573   : > { %v9844_v58 = vrot.slane %v9843_v11, 4  ;;  %v9846_v6 = vshll.u32 %v23962_v3, 16  ;;  %v9761_v13 = vsel %vm32251_vm6, %v32173_v47, %v32158_v37  ;;  %v9624_v30 = vadd.f32 %v9623_v4, %v32115_v61  ;;  %vm32268_vm4 = vmor %vm9829_vm7, %vm9830_vm8 }
 0x574   : > { %v9854_v14 = vrot.slane %v9853_v62, 4  ;;  %v9860_v34 = vshrl.u32 %v23962_v3, 16  ;;  %v9856_v22 = vshll.u32 %v23963_v10, 16  ;;  %v9694_v56 = vmul.f32 0.2, %v9670_v44 }
 0x575   : > { %v9848_v54 = vrot.slane %v9846_v6, 5  ;;  %vm9682_vm5 = vcmp.gt.f32.partialorder %v9670_v44, 0.0  ;;  %v9672_v24 = vadd.f32 %v32150_v2, %v9638_v32  ;;  %v9637_v38 = vadd.f32 %v9522_v36, %v31978_v57 }
 0x576   : > { %v9858_v20 = vrot.slane %v9856_v22, 5  ;;  %v9639_v37 = vadd.f32 %v9624_v30, %v31981_v41  ;;  %v9870_v47 = vshrl.u32 %v23963_v10, 16  ;;  %vm32279_vm14 = vcmp.lt.s32.totalorder %v9761_v13, 4 }
 0x577   : > { %v32277_v61 = vsel %vm32268_vm4, %v9844_v58, %v9848_v54  ;;  %vm9684_vm9 = vcmp.gt.f32.partialorder %v9672_v24, 0.0  ;;  %v32288_v57 = vsel %vm9682_vm5, %v9670_v44, %v9694_v56  ;;  %v9696_v1 = vmul.f32 0.2, %v9672_v24  ;;  %v9926_v25 = vld [vmem:[#allocation2] sm:$0xff] }
 0x578   : > { %9911 = vst [vmem:[#allocation2 + $0x10] sm:$0xff] %v32277_v61  ;;  %v32286_v2 = vsel %vm32268_vm4, %v9854_v14, %v9858_v20  ;;  %36421 = vst [vmem:[#allocation15_spill] sm:$0xff] %v32288_v57  ;;  %v9671_v41 = vadd.f32 %v32153_v26, %v9637_v38  ;;  %v9862_v21 = vrot.slane %v9860_v34, 4  ;;  %v9673_v16 = vadd.f32 %v32156_v17, %v9639_v37  ;;  %v32311_v11 = vld [vmem:[#allocation2 + $0x8] sm:$0xff]  ;;  %v13008_v38 = vld [vmem:[#allocation2] sm:$0x88] }
 0x579   : > { %9912 = vst [vmem:[#allocation2 + $0x18] sm:$0xff] %v32286_v2  ;;  %v32293_v18 = vsel %vm9684_vm9, %v9672_v24, %v9696_v1  ;;  %v9872_v48 = vrot.slane %v9870_v47, 4  ;;  %v9779_v45 = vsel %vm32279_vm14, %v32288_v57, 0.0  ;;  %vm9915_vm12 = vcmask 1043456   ;;  %v11991_v37 = vld [vmem:[#allocation2] sm:$0xee] }
 0x57a   : > { %36422 = vst [vmem:[#allocation16_spill] sm:$0xff] %v32293_v18  ;;  %vm9683_vm10 = vcmp.gt.f32.partialorder %v9671_v41, 0.0  ;;  %v9695_v53 = vmul.f32 0.2, %v9671_v41  ;;  %vm9685_vm11 = vcmp.gt.f32.partialorder %v9673_v16, 0.0  ;;  %v9781_v26 = vsel %vm32279_vm14, %v32293_v18, 0.0  ;;  %vm32314_vm15 = vmand %vm9915_vm12, %vm9829_vm7 }
 0x57b   : > { %v9697_v7 = vmul.f32 0.2, %v9673_v16  ;;  %v9863_v55 = vor.u32 %v9862_v21, %v9848_v54  ;;  %vm9917_vm13 = vcmask 1047556   ;;  %v9873_v33 = vor.u32 %v9872_v48, %v9858_v20  ;;  %v11992_v4 = vld [vmem:[#allocation2 + $0x8] sm:$0xee] }
 0x57c   : > { %v32301_v8 = vsel %vm9683_vm10, %v9671_v41, %v9695_v53  ;;  %v32319_v15 = vcombine.high %v9926_v25, %v32277_v61  ;;  %vm32322_vm6 = vmand %vm9917_vm13, %vm611_vm0  ;;  %v32327_v44 = vcombine.low %v9926_v25, %v32277_v61  ;;  %v32331_v32 = vcombine.high %v32311_v11, %v32286_v2  ;;  %v13009_v53 = vld [vmem:[#allocation2 + $0x8] sm:$0x88] }
 0x57d   : > { %36423 = vst [vmem:[#allocation17_spill] sm:$0xff] %v32301_v8  ;;  %v9780_v17 = vsel %vm32279_vm14, %v32301_v8, 0.0  ;;  %v32306_v52 = vsel %vm9685_vm11, %v9673_v16, %v9697_v7  ;;  %v9864_v9 = vrot.slane %v9863_v55, 4  ;;  %v9874_v36 = vrot.slane %v9873_v33, 4  ;;  %vm9919_vm7 = vmor %vm32322_vm6, %vm32314_vm15 }
 0x57e   : > { %36424 = vst [vmem:[#allocation18_spill] sm:$0xff] %v32306_v52  ;;  %v23964_v46 = vpack.c.bf16 %v9780_v17, %v9779_v45  ;;  %v9782_v49 = vsel %vm32279_vm14, %v32306_v52, 0.0  ;;  %v10238_v22 = vshll.u32 %v32319_v15, 16  ;;  %v10226_v54 = vshll.u32 %v32327_v44, 16 }
 0x57f   : > { %v23965_v28 = vpack.c.bf16 %v9782_v49, %v9781_v26  ;;  %v10262_v24 = vshll.u32 %v32331_v32, 16  ;;  %v10236_v47 = vshrl.u32 %v32319_v15, 16  ;;  %v10224_v21 = vshrl.u32 %v32327_v44, 16 }
 0x580   : > { %v9866_v23 = vshll.u32 %v23964_v46, 16  ;;  %v9880_v62 = vshrl.u32 %v23964_v46, 16  ;;  %v10240_v41 = vrot.slane %v10238_v22, 1  ;;  %v32363_v16 = vcombine.high %v13008_v38, %v32277_v61 }
 0x581   : > { %v9876_v50 = vshll.u32 %v23965_v28, 16  ;;  %v9885_v60 = vshrl.u32 %v23965_v28, 16  ;;  %v10228_v48 = vrot.slane %v10226_v54, 1  ;;  %v10264_v45 = vrot.slane %v10262_v24, 1 }
 0x582   : > { %v9868_v5 = vrot.slane %v9866_v23, 5  ;;  %v9882_v10 = vrot.slane %v9880_v62, 4  ;;  %v22254_v7 = vcombine.low %v11991_v37, %v32277_v61  ;;  %v32367_v26 = vcombine.low %v13008_v38, %v32277_v61 }
 0x583   : > { %v9878_v58 = vrot.slane %v9876_v50, 5  ;;  %v9887_v6 = vrot.slane %v9885_v60, 4  ;;  %v22255_v55 = vcombine.high %v11991_v37, %v32277_v61  ;;  %v22256_v17 = vcombine.low %v11992_v4, %v32286_v2 }
 0x584   : > { %v32335_v13 = vsel %vm32268_vm4, %v9864_v9, %v9868_v5  ;;  %v9883_v30 = vor.u32 %v9882_v10, %v9868_v5  ;;  %v22257_v25 = vcombine.high %v11992_v4, %v32286_v2  ;;  %v32381_v33 = vcombine.low %v13009_v53, %v32286_v2 }
 0x585   : > { %9913 = vst [vmem:[#allocation2 + $0x20] sm:$0xff] %v32335_v13  ;;  %v32344_v14 = vsel %vm32268_vm4, %v9874_v36, %v9878_v58  ;;  %v9888_v34 = vor.u32 %v9887_v6, %v9878_v58  ;;  %v32373_v46 = vcombine.high %v32277_v61, %v32335_v13  ;;  %v32377_v49 = vcombine.low %v32277_v61, %v32335_v13 }
 0x586   : > { %v9884_v56 = vrot.slane %v9883_v30, 4  ;;  %9914 = vst [vmem:[#allocation2 + $0x28] sm:$0xff] %v32344_v14  ;;  %v32385_v28 = vcombine.high %v32286_v2, %v32344_v14  ;;  %v32389_v23 = vcombine.low %v32286_v2, %v32344_v14  ;;  %v10241_v62 = vor.u32 %v10240_v41, %v10236_v47 }
 0x587   : > { %v9889_v20 = vrot.slane %v9888_v34, 4  ;;  %36429 = vst [vmem:[#allocation19_spill] sm:$0xff] %v32373_v46  ;;  %36430 = vst [vmem:[#allocation20_spill] sm:$0xff] %v32377_v49  ;;  %v10260_v9 = vshrl.u32 %v32331_v32, 16  ;;  %v32393_v35 = vcombine.high %v13009_v53, %v32286_v2  ;;  %v14196_v61 = vshrl.u32 %v32363_v16, 16 }
 0x588   : > { %v9921_v31 = vsel %vm9919_vm7, %v9884_v56, 0  ;;  %36431 = vst [vmem:[#allocation21_spill] sm:$0xff] %v32385_v28  ;;  %36432 = vst [vmem:[#allocation22_spill] sm:$0xff] %v32389_v23  ;;  %v10229_v50 = vor.u32 %v10228_v48, %v10224_v21  ;;  %v14199_v60 = vshll.u32 %v32363_v16, 16  ;;  %v14179_v3 = vshrl.u32 %v32367_v26, 16 }
 0x589   : > { %9922 = vst [vmem:[#allocation2 + $0x30] sm:$0xff] %v9921_v31  ;;  %v9924_v1 = vsel %vm9919_vm7, %v9889_v20, 0  ;;  %v14182_v5 = vshll.u32 %v32367_v26, 16  ;;  %v32399_v10 = vor.u32 %v10264_v45, %v10260_v9  ;;  %v12132_v36 = vrot.slane %v22254_v7, 1 }
 0x58a   : > { %9925 = vst [vmem:[#allocation2 + $0x38] sm:$0xff] %v9924_v1  ;;  %v12135_v58 = vrot.slane %v22255_v55, 1  ;;  %v32401_v6 = vrot.slane %v22256_v17, 1  ;;  %v12141_v34 = vrot.slane %v22257_v25, 1  ;;  %v32409_v47 = vrot.slane %v14196_v61, 3 }
 0x58b   : > { %v32411_v4 = vrot.slane %v14199_v60, 4  ;;  %v32413_v1 = vrot.slane %v14179_v3, 3  ;;  %v32415_v41 = vrot.slane %v14182_v5, 4  ;;  %v14230_v21 = vshrl.u32 %v32393_v35, 16  ;;  %v26130_v3 = vld [vmem:[%s36351_s3 + $0x600] ss:$16 sps:$4 sm:$0xff]  }
 0x58c   : > { %v26133_v55 = vld [vmem:[%s36351_s3 + $0x608] ss:$16 sps:$4 sm:$0xff]   ;;  %v36435_v40 = vrot.slane %v32381_v33, 3  ;;  %v36437_v51 = vshll.u32 %v32393_v35, 16 }
 0x58e   : > { %v14235_v59 = vrot.slane %v36437_v51, 4  ;;  %v26153_v51 = vld [vmem:[%s36351_s3 + $0x66c] ss:$16 sps:$4 sm:$0xff]  }
 0x590   : > { %v10060_v30 = vld [vmem:[#allocation2 + $0x30] sm:$0x11] }
 0x591   : > { %v21862_v24 = vcombine.low %v32335_v13, %v10060_v30  ;;  %v21863_v38 = vcombine.high %v32335_v13, %v10060_v30  ;;  %v10061_v20 = vld [vmem:[#allocation2 + $0x38] sm:$0x11]  ;;  %v13010_v37 = vld [vmem:[#allocation2 + $0x30] sm:$0x77] }
 0x592   : > { %v13011_v45 = vld [vmem:[#allocation2 + $0x38] sm:$0x77]  ;;  %v32421_v17 = vcombine.low %v32344_v14, %v10061_v20  ;;  %v32424_v25 = vcombine.high %v32344_v14, %v10061_v20  ;;  %v22518_v9 = vcombine.low %v32335_v13, %v13010_v37  ;;  %v22519_v7 = vcombine.high %v32335_v13, %v13010_v37  ;;  %v26138_v37 = vld [vmem:[%s36351_s3 + $0x624] ss:$16 sps:$4 sm:$0xff]  }
 0x593   : > { %v10243_v53 = vshll.u32 %v21863_v38, 16  ;;  %v10231_v48 = vshll.u32 %v21862_v24, 16  ;;  %v10274_v30 = vshrl.u32 %v21863_v38, 16  ;;  %v10271_v31 = vshrl.u32 %v21862_v24, 16 }
 0x594   : > { %v32435_v20 = vrot.slane %v21863_v38, 1  ;;  %v32437_v54 = vrot.slane %v21862_v24, 1  ;;  %v22520_v61 = vcombine.low %v32344_v14, %v13011_v45  ;;  %v26141_v24 = vld [vmem:[%s36351_s3 + $0x62c] ss:$16 sps:$4 sm:$0xff]   ;;  %v10267_v38 = vshll.u32 %v32424_v25, 16 }
 0x595   : > { %v10245_v60 = vrot.slane %v10243_v53, 1  ;;  %v10233_v5 = vrot.slane %v10231_v48, 1  ;;  %v22521_v48 = vcombine.high %v32344_v14, %v13011_v45  ;;  %v32451_v52 = vrot.slane %v32424_v25, 1  ;;  %v26136_v45 = vld [vmem:[%s36351_s3 + $0x620] ss:$16 sps:$4 sm:$0xff]  }
 0x596   : > { %v32466_v8 = vsel %vm2521_vm1, %v12132_v36, %v32437_v54  ;;  %v32469_v18 = vrot.slane %v32421_v17, 1  ;;  %v14038_v36 = vld [vmem:[#allocation2 + $0x38] sm:$0xff] }
 0x597   : > { %v10246_v53 = vsel %vm611_vm0, %v10241_v62, %v10245_v60  ;;  %v10234_v56 = vsel %vm611_vm0, %v10229_v50, %v10233_v5  ;;  %v10276_v22 = vor.u32 %v10274_v30, %v10245_v60  ;;  %v14037_v62 = vld [vmem:[#allocation2 + $0x30] sm:$0xff]  ;;  %v32455_v60 = vrot.slane %v14230_v21, 3 }
 0x598   : > { %10963 = vmatprep.mubr.bf16.mxu0 %v10246_v53  ;;  %11065 = vmatprep.mubr.bf16.mxu1 %v10246_v53  ;;  %v10273_v30 = vor.u32 %v10271_v31, %v10233_v5  ;;  %v32462_v53 = vsel %vm2521_vm1, %v12135_v58, %v32435_v20  ;;  %v32476_v31 = vsel %vm2521_vm1, %v12141_v34, %v32451_v52  ;;  %v32478_v21 = vrot.slane %v22518_v9, 3 }
 0x599   : > { %10964 = vmatmul.mubr.bf16.vlgmr.msra.gmra.mrb[76].mxu0 %v10234_v56  ;;  %11066 = vmatmul.mubr.bf16.vlgmr.msra.gmra.mrb[76].mxu1 %v10234_v56  ;;  %v26139_v56 = vld [vmem:[%s36351_s3 + $0x628] ss:$16 sps:$4 sm:$0xff]   ;;  %v32480_v58 = vrot.slane %v22519_v7, 3  ;;  %v32482_v5 = vrot.slane %v22520_v61, 3  ;;  %v32493_v34 = vsel %vm2521_vm1, %v32401_v6, %v32469_v18  ;;  %v32495_v7 = vrot.slane %v22521_v48, 3 }
 0x59a   : > { %10983 = vmatpush1.bf16.msra.mxu0 %v26130_v3  ;;  %11085 = vmatpush1.bf16.msra.mxu1 %v26133_v55  ;;  %v26144_v55 = vld [vmem:[%s36351_s3 + $0x644] ss:$16 sps:$4 sm:$0xff]   ;;  %v26147_v3 = vld [vmem:[%s36351_s3 + $0x64c] ss:$16 sps:$4 sm:$0xff]   ;;  %v22779_v9 = vcombine.high %v32335_v13, %v14037_v62  ;;  %v22778_v61 = vcombine.low %v32335_v13, %v14037_v62  ;;  %v36433_v50 = vrot.slane %v32363_v16, 3  ;;  %v36434_v6 = vrot.slane %v32367_v26, 3 }
 0x59b   : > { %10973 = vmatprep.mubr.bf16.mxu0 %v10276_v22  ;;  %11075 = vmatprep.mubr.bf16.mxu1 %v10276_v22  ;;  %v32499_v22 = vrot.slane %v10267_v38, 1  ;;  %v36436_v16 = vrot.slane %v32393_v35, 3  ;;  %v22780_v43 = vcombine.low %v32344_v14, %v14038_v36  ;;  %vm36447_vm1 = vsmask.f32 5376 }
 0x59c   : > { %10984 = vmatprep.subr.bf16.mxu0 %v26138_v37  ;;  %11086 = vmatprep.subr.bf16.mxu1 %v26141_v24  ;;  %v32505_v57 = vsel %vm3551_vm2, %v36433_v50, %v32480_v58  ;;  %v32511_v48 = vsel %vm3551_vm2, %v36434_v6, %v32478_v21  ;;  %v32517_v37 = vsel %vm3551_vm2, %v36435_v40, %v32482_v5  ;;  %v26142_v24 = vld [vmem:[%s36351_s3 + $0x640] ss:$16 sps:$4 sm:$0xff]   ;;  %v14204_v26 = vshrl.u32 %v22779_v9, 16  ;;  %v26145_v40 = vld [vmem:[%s36351_s3 + $0x648] ss:$16 sps:$4 sm:$0xff]   ;;  %vm36451_vm8 = vmmov %vm36447_vm1 }
 0x59d   : > { %v32526_v38 = vsel %vm3551_vm2, %v36436_v16, %v32495_v7  ;;  %v14207_v62 = vshll.u32 %v22779_v9, 16  ;;  %v22781_v50 = vcombine.high %v32344_v14, %v14038_v36  ;;  %v14187_v6 = vshrl.u32 %v22778_v61, 16  ;;  %vm36452_vm4 = vmmov %vm36447_vm1 }
 0x59e   : > { %10985 = vmatpush1.bf16.msra.mxu0 %v26136_v45  ;;  %11087 = vmatpush1.bf16.msra.mxu1 %v26139_v56  ;;  %v14190_v63 = vshll.u32 %v22778_v61, 16  ;;  %v14206_v16 = vrot.slane %v14204_v26, 3  ;;  %v10270_v45 = vsel %vm611_vm0, %v32399_v10, %v32499_v22  ;;  %v26150_v56 = vld [vmem:[%s36351_s3 + $0x664] ss:$16 sps:$4 sm:$0xff]   ;;  %v14185_v14 = vor.u32 %v32415_v41, %v32413_v1  ;;  %v26151_v1 = vld [vmem:[%s36351_s3 + $0x668] ss:$16 sps:$4 sm:$0xff]  }
 0x59f   : > { %10986 = vmatprep.subr.bf16.mxu0 %v26144_v55  ;;  %11088 = vmatprep.subr.bf16.mxu1 %v26147_v3  ;;  %v14209_v0 = vrot.slane %v14207_v62, 4  ;;  %v14238_v9 = vshrl.u32 %v22781_v50, 16  ;;  %v14241_v29 = vshll.u32 %v22781_v50, 16  ;;  %v14189_v35 = vrot.slane %v14187_v6, 3  ;;  %v26148_v55 = vld [vmem:[%s36351_s3 + $0x660] ss:$16 sps:$4 sm:$0xff]  }
 0x5a0   : > { %v14192_v36 = vrot.slane %v14190_v63, 4  ;;  %v36438_v26 = vshrl.u32 %v32381_v33, 16  ;;  %v36439_v41 = vshll.u32 %v32381_v33, 16  ;;  %v14221_v50 = vshrl.u32 %v22780_v43, 16 }
 0x5a1   : > { %10974 = vmatmul.mubr.bf16.gmra.mrb[80].mxu0 %v10273_v30  ;;  %11076 = vmatmul.mubr.bf16.gmra.mrb[80].mxu1 %v10273_v30  ;;  %v32549_v10 = vor.u32 %v14209_v0, %v14206_v16  ;;  %v14240_v3 = vrot.slane %v14238_v9, 3  ;;  %v14243_v61 = vrot.slane %v14241_v29, 4  ;;  %v14224_v6 = vshll.u32 %v22780_v43, 16  ;;  %v26156_v29 = vld [vmem:[%s36351_s3 + $0x684] ss:$16 sps:$4 sm:$0xff]  }
 0x5a2   : > { %v14215_v62 = vrot.slane %v36438_v26, 3  ;;  %10987 = vmatpush1.bf16.msra.mxu0 %v26142_v24  ;;  %11089 = vmatpush1.bf16.msra.mxu1 %v26145_v40  ;;  %v32556_v63 = vor.u32 %v14192_v36, %v14189_v35  ;;  %v14218_v30 = vrot.slane %v36439_v41, 4  ;;  %v26159_v0 = vld [vmem:[%s36351_s3 + $0x68c] ss:$16 sps:$4 sm:$0xff]   ;;  %v36440_v24 = vor.u32 %v32411_v4, %v32409_v47  ;;  %v32576_v16 = vld [vmem:[#allocation2 + $0x20] sm:$0xff]  ;;  %v16115_v36 = vld [vmem:[#allocation2 + $0x30] sm:$0xff] }
 0x5a3   : > { %11014 = vmatprep.mubr.bf16.mxu0 %v10270_v45  ;;  %11116 = vmatprep.mubr.bf16.mxu1 %v10270_v45  ;;  %v14236_v33 = vor.u32 %v14235_v59, %v32455_v60  ;;  %v32574_v43 = vor.u32 %v14243_v61, %v14240_v3  ;;  %v14223_v45 = vrot.slane %v14221_v50, 3  ;;  %v14226_v35 = vrot.slane %v14224_v6, 4  ;;  %v16111_v4 = vld [vmem:[#allocation2 + $0x10] sm:$0xcc]  ;;  %v17156_v26 = vld [vmem:[#allocation2 + $0x40] sm:$0x77] }
 0x5a4   : > { %v32571_v40 = vsel %vm4569_vm3, %v36440_v24, %v32549_v10  ;;  %10988 = vmatprep.subr.bf16.mxu0 %v26150_v56  ;;  %11090 = vmatprep.subr.bf16.mxu1 %v26153_v51  ;;  %v32580_v9 = vsel %vm4569_vm3, %v14185_v14, %v32556_v63  ;;  %v26154_v59 = vld [vmem:[%s36351_s3 + $0x680] ss:$16 sps:$4 sm:$0xff]   ;;  %v26157_v60 = vld [vmem:[%s36351_s3 + $0x688] ss:$16 sps:$4 sm:$0xff]   ;;  %v14219_v56 = vor.u32 %v14218_v30, %v14215_v62  ;;  %v26165_v3 = vld [vmem:[%s36351_s3 + $0x6ac] ss:$16 sps:$4 sm:$0xff]  }
 0x5a5   : > { %v32584_v47 = vsel %vm4569_vm3, %v14236_v33, %v32574_v43  ;;  %v32592_v51 = vor.u32 %v14226_v35, %v14223_v45  ;;  %v32595_v14 = vcombine.high %v16111_v4, %v32576_v16  ;;  %v32604_v61 = vcombine.low %v16111_v4, %v32576_v16  ;;  %v26160_v62 = vld [vmem:[%s36351_s3 + $0x6a0] ss:$16 sps:$4 sm:$0xff]   ;;  %v32613_v41 = vld [vmem:[#allocation2 + $0x28] sm:$0xff]  ;;  %v16116_v6 = vld [vmem:[#allocation2 + $0x38] sm:$0xff] }
 0x5a6   : > { %10989 = vmatpush1.bf16.msra.mxu0 %v26148_v55  ;;  %11091 = vmatpush1.bf16.msra.mxu1 %v26151_v1  ;;  %v26162_v55 = vld [vmem:[%s36351_s3 + $0x6a4] ss:$16 sps:$4 sm:$0xff]   ;;  %v32615_v30 = vcombine.high %v16115_v36, %v17156_v26  ;;  %v26163_v50 = vld [vmem:[%s36351_s3 + $0x6a8] ss:$16 sps:$4 sm:$0xff]  }
 0x5a7   : > { %36441 = vst [vmem:[#allocation23_spill] sm:$0xff] %v32592_v51  ;;  %36442 = vst [vmem:[#allocation24_spill] sm:$0xff] %v32595_v14  ;;  %10990 = vmatprep.subr.bf16.mxu0 %v26156_v29  ;;  %11092 = vmatprep.subr.bf16.mxu1 %v26159_v0  ;;  %v32611_v1 = vsel %vm4569_vm3, %v14219_v56, %v32592_v51  ;;  %v32620_v29 = vcombine.low %v16115_v36, %v17156_v26  ;;  %v17157_v0 = vld [vmem:[#allocation2 + $0x48] sm:$0x77]  ;;  %v16112_v24 = vld [vmem:[#allocation2 + $0x18] sm:$0xcc] }
 0x5a8   : > { %36443 = vst [vmem:[#allocation25_spill] sm:$0xff] %v32604_v61  ;;  %v17315_v33 = vshrl.u32 %v32595_v14, 16  ;;  %v17318_v45 = vshll.u32 %v32595_v14, 16  ;;  %v17323_v35 = vshrl.u32 %v32615_v30, 16  ;;  %v17326_v4 = vshll.u32 %v32615_v30, 16  ;;  %vm36450_vm3 = vmmov %vm36447_vm1 }
 0x5a9   : > { %v26168_v56 = vld [vmem:[%s36351_s3 + $0x6c4] ss:$16 sps:$4 sm:$0xff]   ;;  %v26171_v36 = vld [vmem:[%s36351_s3 + $0x6cc] ss:$16 sps:$4 sm:$0xff]   ;;  %v32633_v26 = vcombine.high %v16112_v24, %v32613_v41  ;;  %v32643_v27 = vcombine.low %v16116_v6, %v17157_v0  ;;  %v32645_v39 = vcombine.high %v16116_v6, %v17157_v0  ;;  %v17306_v49 = vshrl.u32 %v32620_v29, 16 }
 0x5aa   : > { %10991 = vmatpush1.bf16.msra.mxu0 %v26154_v59  ;;  %11093 = vmatpush1.bf16.msra.mxu1 %v26157_v60  ;;  %v17298_v59 = vshrl.u32 %v32604_v61, 16  ;;  %v17301_v60 = vshll.u32 %v32604_v61, 16  ;;  %v17317_v42 = vrot.slane %v17315_v33, 2  ;;  %v17320_v12 = vrot.slane %v17318_v45, 3  ;;  %v26174_v61 = vld [vmem:[%s36351_s3 + $0x6e4] ss:$16 sps:$4 sm:$0xff]  }
 0x5ab   : > { %10992 = vmatprep.subr.bf16.mxu0 %v26162_v55  ;;  %11094 = vmatprep.subr.bf16.mxu1 %v26165_v3  ;;  %36444 = vst [vmem:[#allocation26_spill] sm:$0xff] %v32633_v26  ;;  %v26166_v55 = vld [vmem:[%s36351_s3 + $0x6c0] ss:$16 sps:$4 sm:$0xff]   ;;  %v32641_v3 = vcombine.low %v16112_v24, %v32613_v41  ;;  %v17325_v14 = vrot.slane %v17323_v35, 2  ;;  %v17328_v23 = vrot.slane %v17326_v4, 3  ;;  %v17309_v6 = vshll.u32 %v32620_v29, 16 }
 0x5ac   : > { %v17300_v24 = vrot.slane %v17298_v59, 2  ;;  %v17303_v28 = vrot.slane %v17301_v60, 3  ;;  %v26177_v0 = vld [vmem:[%s36351_s3 + $0x6ec] ss:$16 sps:$4 sm:$0xff]   ;;  %v17321_v33 = vor.u32 %v17320_v12, %v17317_v42  ;;  %v18229_v35 = vld [vmem:[#allocation2 + $0x10] sm:$0x88] }
 0x5ad   : > { %36445 = vst [vmem:[#allocation27_spill] sm:$0xff] %v32641_v3  ;;  %v32658_v45 = vor.u32 %v17328_v23, %v17325_v14  ;;  %v26172_v4 = vld [vmem:[%s36351_s3 + $0x6e0] ss:$16 sps:$4 sm:$0xff]   ;;  %v23826_v59 = vcombine.low %v18229_v35, %v32576_v16  ;;  %v23827_v12 = vcombine.high %v18229_v35, %v32576_v16  ;;  %v26180_v42 = vld [vmem:[%s36351_s3 + $0x704] ss:$16 sps:$4 sm:$0xff]   ;;  %v17308_v14 = vrot.slane %v17306_v49, 2 }
 0x5ae   : > { %10993 = vmatpush1.bf16.msra.mxu0 %v26160_v62  ;;  %11095 = vmatpush1.bf16.msra.mxu1 %v26163_v50  ;;  %v17349_v62 = vshrl.u32 %v32633_v26, 16  ;;  %v17352_v50 = vshll.u32 %v32633_v26, 16  ;;  %v17311_v60 = vrot.slane %v17309_v6, 3  ;;  %v17357_v16 = vshrl.u32 %v32645_v39, 16  ;;  %v18230_v6 = vld [vmem:[#allocation2 + $0x18] sm:$0x88] }
 0x5af   : > { %10994 = vmatprep.subr.bf16.mxu0 %v26168_v56  ;;  %11096 = vmatprep.subr.bf16.mxu1 %v26171_v36  ;;  %36446 = vst [vmem:[#allocation28_spill] sm:$0xff] %v32658_v45  ;;  %v26175_v56 = vld [vmem:[%s36351_s3 + $0x6e8] ss:$16 sps:$4 sm:$0xff]   ;;  %v17304_v36 = vor.u32 %v17303_v28, %v17300_v24  ;;  %v32675_v23 = vsel %vm36447_vm1, %v17321_v33, %v32658_v45  ;;  %v26183_v28 = vld [vmem:[%s36351_s3 + $0x70c] ss:$16 sps:$4 sm:$0xff]   ;;  %v17360_v35 = vshll.u32 %v32645_v39, 16 }
 0x5b0   : > { %36448 = vst [vmem:[#allocation29_spill] sm:$0xff] %v32675_v23  ;;  %v17351_v26 = vrot.slane %v17349_v62, 2  ;;  %v17354_v24 = vrot.slane %v17352_v50, 3  ;;  %v17332_v46 = vshrl.u32 %v32641_v3, 16  ;;  %v32683_v33 = vor.u32 %v17311_v60, %v17308_v14  ;;  %v26178_v62 = vld [vmem:[%s36351_s3 + $0x700] ss:$16 sps:$4 sm:$0xff]  }
 0x5b1   : > { %v17335_v49 = vshll.u32 %v32641_v3, 16  ;;  %v23828_v45 = vcombine.low %v18230_v6, %v32613_v41  ;;  %v23829_v23 = vcombine.high %v18230_v6, %v32613_v41  ;;  %v17359_v14 = vrot.slane %v17357_v16, 2 }
 0x5b2   : > { %10995 = vmatpush1.bf16.msra.mxu0 %v26166_v55  ;;  %11097 = vmatpush1.bf16.msra.mxu1 %v26169_v19  ;;  %36449 = vst [vmem:[#allocation30_spill] sm:$0xff] %v32683_v33  ;;  %v17340_v55 = vshrl.u32 %v32643_v27, 16  ;;  %v17343_v19 = vshll.u32 %v32643_v27, 16  ;;  %v17355_v50 = vor.u32 %v17354_v24, %v17351_v26  ;;  %v17362_v60 = vrot.slane %v17360_v35, 3  ;;  %v26186_v26 = vld [vmem:[%s36351_s3 + $0x724] ss:$16 sps:$4 sm:$0xff]  }
 0x5b3   : > { %10996 = vmatprep.subr.bf16.mxu0 %v26174_v61  ;;  %11098 = vmatprep.subr.bf16.mxu1 %v26177_v0  ;;  %v26181_v61 = vld [vmem:[%s36351_s3 + $0x708] ss:$16 sps:$4 sm:$0xff]   ;;  %v32698_v0 = vsel %vm36450_vm3, %v17304_v36, %v32683_v33  ;;  %v17334_v3 = vrot.slane %v17332_v46, 2  ;;  %v17337_v24 = vrot.slane %v17335_v49, 3  ;;  %v18370_v6 = vrot.slane %v23826_v59, 3 }
 0x5b4   : > { %v17342_v51 = vrot.slane %v17340_v55, 2  ;;  %v17345_v41 = vrot.slane %v17343_v19, 3  ;;  %v26189_v36 = vld [vmem:[%s36351_s3 + $0x72c] ss:$16 sps:$4 sm:$0xff]   ;;  %v32706_v33 = vor.u32 %v17362_v60, %v17359_v14  ;;  %v18373_v16 = vrot.slane %v23827_v12, 3 }
 0x5b5   : > { %v32709_v46 = vrot.slane %v32615_v30, 3  ;;  %v26184_v59 = vld [vmem:[%s36351_s3 + $0x720] ss:$16 sps:$4 sm:$0xff]   ;;  %v32739_v49 = vrot.slane %v32645_v39, 3  ;;  %v32742_v55 = vrot.slane %v32643_v27, 3 }
 0x5b6   : > { %10997 = vmatpush1.bf16.msra.mxu0 %v26172_v4  ;;  %11099 = vmatpush1.bf16.msra.mxu1 %v26175_v56  ;;  %v32712_v4 = vrot.slane %v32620_v29, 3  ;;  %v17338_v56 = vor.u32 %v17337_v24, %v17334_v3  ;;  %v32714_v35 = vor.u32 %v17345_v41, %v17342_v51  ;;  %v18376_v29 = vrot.slane %v23828_v45, 3  ;;  %v26187_v51 = vld [vmem:[%s36351_s3 + $0x728] ss:$16 sps:$4 sm:$0xff]   ;;  %v26192_v45 = vld [vmem:[%s36351_s3 + $0x744] ss:$16 sps:$4 sm:$0xff]  }
 0x5b7   : > { %10998 = vmatprep.subr.bf16.mxu0 %v26180_v42  ;;  %11100 = vmatprep.subr.bf16.mxu1 %v26183_v28  ;;  %v32721_v42 = vsel %vm36451_vm8, %v17355_v50, %v32706_v33  ;;  %v32725_v12 = vsel %vm3551_vm2, %v18373_v16, %v32709_v46  ;;  %v18379_v28 = vrot.slane %v23829_v23, 3  ;;  %v26195_v19 = vld [vmem:[%s36351_s3 + $0x74c] ss:$16 sps:$4 sm:$0xff]   ;;  %v26190_v27 = vld [vmem:[%s36351_s3 + $0x740] ss:$16 sps:$4 sm:$0xff]  }
 0x5b8   : > { %v32729_v30 = vsel %vm3551_vm2, %v18370_v6, %v32712_v4  ;;  %v32736_v3 = vsel %vm36452_vm4, %v17338_v56, %v32714_v35  ;;  %v32756_v39 = vsel %vm3551_vm2, %v18376_v29, %v32742_v55  ;;  %v26193_v23 = vld [vmem:[%s36351_s3 + $0x748] ss:$16 sps:$4 sm:$0xff]   ;;  %v26198_v50 = vld [vmem:[%s36351_s3 + $0x764] ss:$16 sps:$4 sm:$0xff]   ;;  %v26196_v14 = vld [vmem:[%s36351_s3 + $0x760] ss:$16 sps:$4 sm:$0xff]   ;;  %v32796_v56 = vcombine.low %v32311_v11, %v32286_v2 }
 0x5b9   : > { %v26199_v60 = vld [vmem:[%s36351_s3 + $0x768] ss:$16 sps:$4 sm:$0xff]   ;;  %v26207_v24 = vld [vmem:[%s36351_s3 + $0x78c] ss:$16 sps:$4 sm:$0xff]   ;;  %v26202_v41 = vld [vmem:[%s36351_s3 + $0x780] ss:$16 sps:$4 sm:$0xff]  }
 0x5ba   : > { %10999 = vmatpush1.bf16.msra.mxu0 %v26178_v62  ;;  %11101 = vmatpush1.bf16.msra.mxu1 %v26181_v61  ;;  %v32752_v62 = vsel %vm3551_vm2, %v18379_v28, %v32739_v49  ;;  %v26201_v61 = vld [vmem:[%s36351_s3 + $0x76c] ss:$16 sps:$4 sm:$0xff]   ;;  %v26205_v6 = vld [vmem:[%s36351_s3 + $0x788] ss:$16 sps:$4 sm:$0xff]   ;;  %v26214_v11 = vld [vmem:[%s36351_s3 + $0x7c0] ss:$16 sps:$4 sm:$0xff]  }
 0x5bb   : > { %11000 = vmatprep.subr.bf16.mxu0 %v26186_v26  ;;  %11102 = vmatprep.subr.bf16.mxu1 %v26189_v36  ;;  %v26204_v26 = vld [vmem:[%s36351_s3 + $0x784] ss:$16 sps:$4 sm:$0xff]   ;;  %v26213_v16 = vld [vmem:[%s36351_s3 + $0x7ac] ss:$16 sps:$4 sm:$0xff]   ;;  %v26211_v29 = vld [vmem:[%s36351_s3 + $0x7a8] ss:$16 sps:$4 sm:$0xff]  }
 0x5bc   : > { %v26210_v36 = vld [vmem:[%s36351_s3 + $0x7a4] ss:$16 sps:$4 sm:$0xff]   ;;  %v26219_v2 = vld [vmem:[%s36351_s3 + $0x7cc] ss:$16 sps:$4 sm:$0xff]   ;;  %v26217_v28 = vld [vmem:[%s36351_s3 + $0x7c8] ss:$16 sps:$4 sm:$0xff]  }
 0x5be   : > { %11001 = vmatpush1.bf16.msra.mxu0 %v26184_v59  ;;  %11103 = vmatpush1.bf16.msra.mxu1 %v26187_v51  ;;  %v26208_v59 = vld [vmem:[%s36351_s3 + $0x7a0] ss:$16 sps:$4 sm:$0xff]   ;;  %v26216_v51 = vld [vmem:[%s36351_s3 + $0x7c4] ss:$16 sps:$4 sm:$0xff]  }
 0x5bf   : > { %11002 = vmatprep.subr.bf16.mxu0 %v26192_v45  ;;  %11104 = vmatprep.subr.bf16.mxu1 %v26195_v19  ;;  %v10250_v45 = vshll.u32 %v32796_v56, 16  ;;  %v26222_v19 = vld [vmem:[%s36351_s3 + $0x7e4] ss:$16 sps:$4 sm:$0xff]  }
 0x5c2   : > { %11003 = vmatpush1.bf16.msra.mxu0 %v26190_v27  ;;  %11105 = vmatpush1.bf16.msra.mxu1 %v26193_v23  ;;  %v26225_v27 = vld [vmem:[%s36351_s3 + $0x7ec] ss:$16 sps:$4 sm:$0xff]   ;;  %v10255_v23 = vshll.u32 %v32421_v17, 16 }
 0x5c3   : > { %11004 = vmatprep.subr.bf16.mxu0 %v26198_v50  ;;  %11106 = vmatprep.subr.bf16.mxu1 %v26201_v61  ;;  %v26220_v50 = vld [vmem:[%s36351_s3 + $0x7e0] ss:$16 sps:$4 sm:$0xff]   ;;  %v26223_v61 = vld [vmem:[%s36351_s3 + $0x7e8] ss:$16 sps:$4 sm:$0xff]  }
 0x5c6   : > { %11005 = vmatpush1.bf16.msra.mxu0 %v26196_v14  ;;  %11107 = vmatpush1.bf16.msra.mxu1 %v26199_v60  ;;  %v10252_v14 = vrot.slane %v10250_v45, 1  ;;  %v26228_v60 = vld [vmem:[%s36351_s3 + $0x4] ss:$16 sps:$4 sm:$0xff]   ;;  %v26243_v45 = vld [vmem:[%s36351_s3 + $0x4c] ss:$16 sps:$4 sm:$0xff]  }
 0x5c7   : > { %11006 = vmatprep.subr.bf16.mxu0 %v26204_v26  ;;  %11108 = vmatprep.subr.bf16.mxu1 %v26207_v24  ;;  %v26231_v26 = vld [vmem:[%s36351_s3 + $0xc] ss:$16 sps:$4 sm:$0xff]   ;;  %v10248_v24 = vshrl.u32 %v32796_v56, 16 }
 0x5ca   : > { %11007 = vmatpush1.bf16.msra.mxu0 %v26202_v41  ;;  %11109 = vmatpush1.bf16.msra.mxu1 %v26205_v6  ;;  %v10257_v41 = vrot.slane %v10255_v23, 1  ;;  %v10253_v6 = vor.u32 %v10252_v14, %v10248_v24  ;;  %v26238_v23 = vld [vmem:[%s36351_s3 + $0x40] ss:$16 sps:$4 sm:$0xff]  }
 0x5cb   : > { %11008 = vmatprep.subr.bf16.mxu0 %v26210_v36  ;;  %11110 = vmatprep.subr.bf16.mxu1 %v26213_v16  ;;  %v10280_v36 = vshrl.u32 %v32424_v25, 16  ;;  %v26226_v16 = vld [vmem:[%s36351_s3] ss:$16 sps:$4 sm:$0xff]   ;;  %v26237_v25 = vld [vmem:[%s36351_s3 + $0x2c] ss:$16 sps:$4 sm:$0xff]  }
 0x5cc   : > { %v26244_v14 = vld [vmem:[%s36351_s3 + $0x60] ss:$16 sps:$4 sm:$0xff]  }
 0x5cd   : > { %v26250_v24 = vld [vmem:[%s36351_s3 + $0x80] ss:$16 sps:$4 sm:$0xff]  }
 0x5ce   : > { %11009 = vmatpush1.bf16.msra.mxu0 %v26208_v59  ;;  %11111 = vmatpush1.bf16.msra.mxu1 %v26211_v29  ;;  %v26229_v59 = vld [vmem:[%s36351_s3 + $0x8] ss:$16 sps:$4 sm:$0xff]   ;;  %v10258_v29 = vsel %vm611_vm0, %v10253_v6, %v10257_v41  ;;  %v26258_v6 = vld [vmem:[%s36351_s3 + $0xa4] ss:$16 sps:$4 sm:$0xff]   ;;  %vm36459_vm0 = vcmask 1045504  }
 0x5cf   : > { %11010 = vmatprep.subr.bf16.mxu0 %v26216_v51  ;;  %11112 = vmatprep.subr.bf16.mxu1 %v26219_v2  ;;  %v10282_v51 = vor.u32 %v10280_v36, %v32499_v22  ;;  %v26234_v2 = vld [vmem:[%s36351_s3 + $0x24] ss:$16 sps:$4 sm:$0xff]   ;;  %v26235_v22 = vld [vmem:[%s36351_s3 + $0x28] ss:$16 sps:$4 sm:$0xff]   ;;  %v26261_v36 = vld [vmem:[%s36351_s3 + $0xac] ss:$16 sps:$4 sm:$0xff]  }
 0x5d0   : > { %vm36461_vm2 = vmmov %vm36459_vm0 }
 0x5d1   : > { %vm36463_vm5 = vmmov %vm36459_vm0 }
 0x5d2   : > { %11011 = vmatpush1.bf16.msra.mxu0 %v26214_v11  ;;  %11113 = vmatpush1.bf16.msra.mxu1 %v26217_v28  ;;  %v26232_v11 = vld [vmem:[%s36351_s3 + $0x20] ss:$16 sps:$4 sm:$0xff]   ;;  %v26240_v28 = vld [vmem:[%s36351_s3 + $0x44] ss:$16 sps:$4 sm:$0xff]   ;;  %vm36465_vm14 = vmmov %vm36459_vm0 }
 0x5d3   : > { %11012 = vmatprep.subr.bf16.mxu0 %v26222_v19  ;;  %11114 = vmatprep.subr.bf16.mxu1 %v26225_v27  ;;  %v10277_v19 = vshrl.u32 %v32421_v17, 16  ;;  %v26249_v17 = vld [vmem:[%s36351_s3 + $0x6c] ss:$16 sps:$4 sm:$0xff]  }
 0x5d5   : > { %v10279_v27 = vor.u32 %v10277_v19, %v10257_v41  ;;  %v26253_v41 = vld [vmem:[%s36351_s3 + $0x88] ss:$16 sps:$4 sm:$0xff]   ;;  %v26276_v19 = vld [vmem:[%s36351_s3 + $0x104] ss:$16 sps:$4 sm:$0xff]  }
 0x5d6   : > { %11013 = vmatpush1.bf16.msra.mxu0 %v26220_v50  ;;  %11115 = vmatpush1.bf16.msra.mxu1 %v26223_v61  ;;  %v26241_v50 = vld [vmem:[%s36351_s3 + $0x48] ss:$16 sps:$4 sm:$0xff]   ;;  %v26246_v61 = vld [vmem:[%s36351_s3 + $0x64] ss:$16 sps:$4 sm:$0xff]  }
 0x5d7   : > { %11787 = vmatprep.subr.bf16.mxu0 %v26228_v60  ;;  %11889 = vmatprep.subr.bf16.mxu1 %v26231_v26  ;;  %v26247_v60 = vld [vmem:[%s36351_s3 + $0x68] ss:$16 sps:$4 sm:$0xff]   ;;  %v26252_v26 = vld [vmem:[%s36351_s3 + $0x84] ss:$16 sps:$4 sm:$0xff]  }
 0x5d9   : > { %11015 = vmatmul.mubr.bf16.vlgmr.msra.gmra.mrb[76].mxu0 %v10258_v29  ;;  %11117 = vmatmul.mubr.bf16.vlgmr.msra.gmra.mrb[76].mxu1 %v10258_v29  ;;  %v26264_v29 = vld [vmem:[%s36351_s3 + $0xc4] ss:$16 sps:$4 sm:$0xff]  }
 0x5da   : > { %11024 = vmatprep.mubr.bf16.mxu0 %v10282_v51  ;;  %11126 = vmatprep.mubr.bf16.mxu1 %v10282_v51  ;;  %v26267_v51 = vld [vmem:[%s36351_s3 + $0xcc] ss:$16 sps:$4 sm:$0xff]  }
 0x5db   : > { %11788 = vmatpush1.bf16.msra.mxu0 %v26226_v16  ;;  %11890 = vmatpush1.bf16.msra.mxu1 %v26229_v59  ;;  %v26256_v16 = vld [vmem:[%s36351_s3 + $0xa0] ss:$16 sps:$4 sm:$0xff]   ;;  %v26259_v59 = vld [vmem:[%s36351_s3 + $0xa8] ss:$16 sps:$4 sm:$0xff]  }
 0x5dc   : > { %11789 = vmatprep.subr.bf16.mxu0 %v26234_v2  ;;  %11891 = vmatprep.subr.bf16.mxu1 %v26237_v25  ;;  %v26262_v2 = vld [vmem:[%s36351_s3 + $0xc0] ss:$16 sps:$4 sm:$0xff]   ;;  %v26265_v25 = vld [vmem:[%s36351_s3 + $0xc8] ss:$16 sps:$4 sm:$0xff]  }
 0x5df   : > { %11790 = vmatpush1.bf16.msra.mxu0 %v26232_v11  ;;  %11892 = vmatpush1.bf16.msra.mxu1 %v26235_v22  ;;  %v26270_v11 = vld [vmem:[%s36351_s3 + $0xe4] ss:$16 sps:$4 sm:$0xff]   ;;  %v26273_v22 = vld [vmem:[%s36351_s3 + $0xec] ss:$16 sps:$4 sm:$0xff]  }
 0x5e0   : > { %11791 = vmatprep.subr.bf16.mxu0 %v26240_v28  ;;  %11893 = vmatprep.subr.bf16.mxu1 %v26243_v45  ;;  %v26268_v28 = vld [vmem:[%s36351_s3 + $0xe0] ss:$16 sps:$4 sm:$0xff]   ;;  %v26271_v45 = vld [vmem:[%s36351_s3 + $0xe8] ss:$16 sps:$4 sm:$0xff]  }
 0x5e1   : > { %11025 = vmatmul.mubr.bf16.gmra.mrb[84].mxu0 %v10279_v27  ;;  %11127 = vmatmul.mubr.bf16.gmra.mrb[84].mxu1 %v10279_v27  ;;  %v26279_v27 = vld [vmem:[%s36351_s3 + $0x10c] ss:$16 sps:$4 sm:$0xff]  }
 0x5e2   : > { %11819 = vmatprep.mubr.bf16.mxu0 %v32319_v15  ;;  %11921 = vmatprep.mubr.bf16.mxu1 %v32319_v15  ;;  %v26255_v15 = vld [vmem:[%s36351_s3 + $0x8c] ss:$16 sps:$4 sm:$0xff]  }
 0x5e3   : > { %11792 = vmatpush1.bf16.msra.mxu0 %v26238_v23  ;;  %11894 = vmatpush1.bf16.msra.mxu1 %v26241_v50  ;;  %v26274_v23 = vld [vmem:[%s36351_s3 + $0x100] ss:$16 sps:$4 sm:$0xff]   ;;  %v26277_v50 = vld [vmem:[%s36351_s3 + $0x108] ss:$16 sps:$4 sm:$0xff]  }
 0x5e4   : > { %11793 = vmatprep.subr.bf16.mxu0 %v26246_v61  ;;  %11895 = vmatprep.subr.bf16.mxu1 %v26249_v17  ;;  %v26282_v61 = vld [vmem:[%s36351_s3 + $0x124] ss:$16 sps:$4 sm:$0xff]   ;;  %v26285_v17 = vld [vmem:[%s36351_s3 + $0x12c] ss:$16 sps:$4 sm:$0xff]  }
 0x5e7   : > { %11794 = vmatpush1.bf16.msra.mxu0 %v26244_v14  ;;  %11896 = vmatpush1.bf16.msra.mxu1 %v26247_v60  ;;  %v26280_v14 = vld [vmem:[%s36351_s3 + $0x120] ss:$16 sps:$4 sm:$0xff]   ;;  %v26283_v60 = vld [vmem:[%s36351_s3 + $0x128] ss:$16 sps:$4 sm:$0xff]  }
 0x5e8   : > { %11795 = vmatprep.subr.bf16.mxu0 %v26252_v26  ;;  %11897 = vmatprep.subr.bf16.mxu1 %v26255_v15  ;;  %v26288_v26 = vld [vmem:[%s36351_s3 + $0x144] ss:$16 sps:$4 sm:$0xff]   ;;  %v26291_v15 = vld [vmem:[%s36351_s3 + $0x14c] ss:$16 sps:$4 sm:$0xff]  }
 0x5eb   : > { %11796 = vmatpush1.bf16.msra.mxu0 %v26250_v24  ;;  %11898 = vmatpush1.bf16.msra.mxu1 %v26253_v41  ;;  %v26286_v24 = vld [vmem:[%s36351_s3 + $0x140] ss:$16 sps:$4 sm:$0xff]   ;;  %v26289_v41 = vld [vmem:[%s36351_s3 + $0x148] ss:$16 sps:$4 sm:$0xff]  }
 0x5ec   : > { %11797 = vmatprep.subr.bf16.mxu0 %v26258_v6  ;;  %11899 = vmatprep.subr.bf16.mxu1 %v26261_v36  ;;  %v26294_v6 = vld [vmem:[%s36351_s3 + $0x164] ss:$16 sps:$4 sm:$0xff]   ;;  %v26297_v36 = vld [vmem:[%s36351_s3 + $0x16c] ss:$16 sps:$4 sm:$0xff]  }
 0x5ef   : > { %11798 = vmatpush1.bf16.msra.mxu0 %v26256_v16  ;;  %11900 = vmatpush1.bf16.msra.mxu1 %v26259_v59  ;;  %v26292_v16 = vld [vmem:[%s36351_s3 + $0x160] ss:$16 sps:$4 sm:$0xff]   ;;  %v26295_v59 = vld [vmem:[%s36351_s3 + $0x168] ss:$16 sps:$4 sm:$0xff]  }
 0x5f0   : > { %11799 = vmatprep.subr.bf16.mxu0 %v26264_v29  ;;  %11901 = vmatprep.subr.bf16.mxu1 %v26267_v51  ;;  %v26300_v29 = vld [vmem:[%s36351_s3 + $0x184] ss:$16 sps:$4 sm:$0xff]   ;;  %v26303_v51 = vld [vmem:[%s36351_s3 + $0x18c] ss:$16 sps:$4 sm:$0xff]  }
 0x5f3   : > { %11800 = vmatpush1.bf16.msra.mxu0 %v26262_v2  ;;  %11902 = vmatpush1.bf16.msra.mxu1 %v26265_v25  ;;  %v26298_v2 = vld [vmem:[%s36351_s3 + $0x180] ss:$16 sps:$4 sm:$0xff]   ;;  %v26301_v25 = vld [vmem:[%s36351_s3 + $0x188] ss:$16 sps:$4 sm:$0xff]  }
 0x5f4   : > { %11801 = vmatprep.subr.bf16.mxu0 %v26270_v11  ;;  %11903 = vmatprep.subr.bf16.mxu1 %v26273_v22  ;;  %v26306_v11 = vld [vmem:[%s36351_s3 + $0x1a4] ss:$16 sps:$4 sm:$0xff]   ;;  %v26309_v22 = vld [vmem:[%s36351_s3 + $0x1ac] ss:$16 sps:$4 sm:$0xff]  }
 0x5f7   : > { %11802 = vmatpush1.bf16.msra.mxu0 %v26268_v28  ;;  %11904 = vmatpush1.bf16.msra.mxu1 %v26271_v45  ;;  %v26304_v28 = vld [vmem:[%s36351_s3 + $0x1a0] ss:$16 sps:$4 sm:$0xff]   ;;  %v26307_v45 = vld [vmem:[%s36351_s3 + $0x1a8] ss:$16 sps:$4 sm:$0xff]  }
 0x5f8   : > { %11803 = vmatprep.subr.bf16.mxu0 %v26276_v19  ;;  %11905 = vmatprep.subr.bf16.mxu1 %v26279_v27  ;;  %v26312_v19 = vld [vmem:[%s36351_s3 + $0x1c4] ss:$16 sps:$4 sm:$0xff]   ;;  %v26315_v27 = vld [vmem:[%s36351_s3 + $0x1cc] ss:$16 sps:$4 sm:$0xff]  }
 0x5fb   : > { %11804 = vmatpush1.bf16.msra.mxu0 %v26274_v23  ;;  %11906 = vmatpush1.bf16.msra.mxu1 %v26277_v50  ;;  %v26310_v23 = vld [vmem:[%s36351_s3 + $0x1c0] ss:$16 sps:$4 sm:$0xff]   ;;  %v26313_v50 = vld [vmem:[%s36351_s3 + $0x1c8] ss:$16 sps:$4 sm:$0xff]  }
 0x5fc   : > { %11805 = vmatprep.subr.bf16.mxu0 %v26282_v61  ;;  %11907 = vmatprep.subr.bf16.mxu1 %v26285_v17  ;;  %v26318_v61 = vld [vmem:[%s36351_s3 + $0x1e4] ss:$16 sps:$4 sm:$0xff]   ;;  %v26321_v17 = vld [vmem:[%s36351_s3 + $0x1ec] ss:$16 sps:$4 sm:$0xff]  }
 0x5ff   : > { %11806 = vmatpush1.bf16.msra.mxu0 %v26280_v14  ;;  %11908 = vmatpush1.bf16.msra.mxu1 %v26283_v60  ;;  %v26316_v14 = vld [vmem:[%s36351_s3 + $0x1e0] ss:$16 sps:$4 sm:$0xff]   ;;  %v26319_v60 = vld [vmem:[%s36351_s3 + $0x1e8] ss:$16 sps:$4 sm:$0xff]  }
 0x600   : > { %11807 = vmatprep.subr.bf16.mxu0 %v26288_v26  ;;  %11909 = vmatprep.subr.bf16.mxu1 %v26291_v15  ;;  %v26324_v26 = vld [vmem:[%s36351_s3 + $0x204] ss:$16 sps:$4 sm:$0xff]   ;;  %v26327_v15 = vld [vmem:[%s36351_s3 + $0x20c] ss:$16 sps:$4 sm:$0xff]  }
 0x603   : > { %11808 = vmatpush1.bf16.msra.mxu0 %v26286_v24  ;;  %11910 = vmatpush1.bf16.msra.mxu1 %v26289_v41  ;;  %v26322_v24 = vld [vmem:[%s36351_s3 + $0x200] ss:$16 sps:$4 sm:$0xff]   ;;  %v26325_v41 = vld [vmem:[%s36351_s3 + $0x208] ss:$16 sps:$4 sm:$0xff]  }
 0x604   : > { %11809 = vmatprep.subr.bf16.mxu0 %v26294_v6  ;;  %11911 = vmatprep.subr.bf16.mxu1 %v26297_v36  ;;  %v21995_v6 = vcombine.high %v32335_v13, %v32335_v13  ;;  %v26330_v36 = vld [vmem:[%s36351_s3 + $0x224] ss:$16 sps:$4 sm:$0xff]   ;;  %v26331_v13 = vld [vmem:[%s36351_s3 + $0x228] ss:$16 sps:$4 sm:$0xff]  }
 0x607   : > { %11810 = vmatpush1.bf16.msra.mxu0 %v26292_v16  ;;  %11912 = vmatpush1.bf16.msra.mxu1 %v26295_v59  ;;  %v26333_v16 = vld [vmem:[%s36351_s3 + $0x22c] ss:$16 sps:$4 sm:$0xff]   ;;  %v26328_v59 = vld [vmem:[%s36351_s3 + $0x220] ss:$16 sps:$4 sm:$0xff]  }
 0x608   : > { %11811 = vmatprep.subr.bf16.mxu0 %v26300_v29  ;;  %11913 = vmatprep.subr.bf16.mxu1 %v26303_v51  ;;  %v26336_v29 = vld [vmem:[%s36351_s3 + $0x244] ss:$16 sps:$4 sm:$0xff]   ;;  %v26334_v51 = vld [vmem:[%s36351_s3 + $0x240] ss:$16 sps:$4 sm:$0xff]  }
 0x60b   : > { %11812 = vmatpush1.bf16.msra.mxu0 %v26298_v2  ;;  %11914 = vmatpush1.bf16.msra.mxu1 %v26301_v25  ;;  %v27802_v2 = vld [vmem:[#allocation2 + $0x20] sm:$0xff] }
 0x60c   : > { %11813 = vmatprep.subr.bf16.mxu0 %v26306_v11  ;;  %11915 = vmatprep.subr.bf16.mxu1 %v26309_v22  ;;  %v21994_v25 = vcombine.low %v27802_v2, %v27802_v2  ;;  %v26337_v11 = vld [vmem:[%s36351_s3 + $0x248] ss:$16 sps:$4 sm:$0xff]   ;;  %v26342_v22 = vld [vmem:[%s36351_s3 + $0x264] ss:$16 sps:$4 sm:$0xff]  }
 0x60d   : > { %v26378_v2 = vld [vmem:[%s36351_s3 + $0x324] ss:$16 sps:$4 sm:$0xff]  }
 0x60f   : > { %11814 = vmatpush1.bf16.msra.mxu0 %v26304_v28  ;;  %11916 = vmatpush1.bf16.msra.mxu1 %v26307_v45  ;;  %v26345_v28 = vld [vmem:[%s36351_s3 + $0x26c] ss:$16 sps:$4 sm:$0xff]   ;;  %v26340_v45 = vld [vmem:[%s36351_s3 + $0x260] ss:$16 sps:$4 sm:$0xff]  }
 0x610   : > { %11815 = vmatprep.subr.bf16.mxu0 %v26312_v19  ;;  %11917 = vmatprep.subr.bf16.mxu1 %v26315_v27  ;;  %v26343_v19 = vld [vmem:[%s36351_s3 + $0x268] ss:$16 sps:$4 sm:$0xff]   ;;  %v26348_v27 = vld [vmem:[%s36351_s3 + $0x284] ss:$16 sps:$4 sm:$0xff]  }
 0x613   : > { %11816 = vmatpush1.bf16.msra.mxu0 %v26310_v23  ;;  %11918 = vmatpush1.bf16.msra.mxu1 %v26313_v50  ;;  %v26351_v23 = vld [vmem:[%s36351_s3 + $0x28c] ss:$16 sps:$4 sm:$0xff]   ;;  %v26346_v50 = vld [vmem:[%s36351_s3 + $0x280] ss:$16 sps:$4 sm:$0xff]  }
 0x614   : > { %11817 = vmatprep.subr.bf16.mxu0 %v26318_v61  ;;  %11919 = vmatprep.subr.bf16.mxu1 %v26321_v17  ;;  %v26354_v61 = vld [vmem:[%s36351_s3 + $0x2a4] ss:$16 sps:$4 sm:$0xff]   ;;  %v26357_v17 = vld [vmem:[%s36351_s3 + $0x2ac] ss:$16 sps:$4 sm:$0xff]  }
 0x617   : > { %11818 = vmatpush1.bf16.msra.mxu0 %v26316_v14  ;;  %11920 = vmatpush1.bf16.msra.mxu1 %v26319_v60  ;;  %v26352_v14 = vld [vmem:[%s36351_s3 + $0x2a0] ss:$16 sps:$4 sm:$0xff]   ;;  %v26355_v60 = vld [vmem:[%s36351_s3 + $0x2a8] ss:$16 sps:$4 sm:$0xff]  }
 0x618   : > { %11838 = vmatprep.subr.bf16.mxu0 %v26324_v26  ;;  %11940 = vmatprep.subr.bf16.mxu1 %v26327_v15  ;;  %v26360_v26 = vld [vmem:[%s36351_s3 + $0x2c4] ss:$16 sps:$4 sm:$0xff]   ;;  %v26363_v15 = vld [vmem:[%s36351_s3 + $0x2cc] ss:$16 sps:$4 sm:$0xff]  }
 0x61a   : > { %11820 = vmatmul.mubr.bf16.vlgmr.msra.gmra.mrb[76].mxu0 %v32327_v44  ;;  %11922 = vmatmul.mubr.bf16.vlgmr.msra.gmra.mrb[76].mxu1 %v32327_v44  ;;  %v26339_v44 = vld [vmem:[%s36351_s3 + $0x24c] ss:$16 sps:$4 sm:$0xff]  }
 0x61b   : > { %11829 = vmatprep.mubr.bf16.mxu0 %v21995_v6  ;;  %11839 = vmatpush1.bf16.msra.mxu0 %v26322_v24  ;;  %v26358_v24 = vld [vmem:[%s36351_s3 + $0x2c0] ss:$16 sps:$4 sm:$0xff]  }
 0x61c   : > { %11931 = vmatprep.mubr.bf16.mxu1 %v21995_v6  ;;  %11941 = vmatpush1.bf16.msra.mxu1 %v26325_v41  ;;  %v26361_v41 = vld [vmem:[%s36351_s3 + $0x2c8] ss:$16 sps:$4 sm:$0xff]   ;;  %v26366_v6 = vld [vmem:[%s36351_s3 + $0x2e4] ss:$16 sps:$4 sm:$0xff]  }
 0x61d   : > { %11840 = vmatprep.subr.bf16.mxu0 %v26330_v36  ;;  %11942 = vmatprep.subr.bf16.mxu1 %v26333_v16  ;;  %v26369_v36 = vld [vmem:[%s36351_s3 + $0x2ec] ss:$16 sps:$4 sm:$0xff]   ;;  %v26364_v16 = vld [vmem:[%s36351_s3 + $0x2e0] ss:$16 sps:$4 sm:$0xff]  }
 0x61f   : > { %11841 = vmatpush1.bf16.msra.mxu0 %v26328_v59  ;;  %v26367_v59 = vld [vmem:[%s36351_s3 + $0x2e8] ss:$16 sps:$4 sm:$0xff]  }
 0x620   : > { %11943 = vmatpush1.bf16.msra.mxu1 %v26331_v13  ;;  %11842 = vmatprep.subr.bf16.mxu0 %v26336_v29  ;;  %v26372_v13 = vld [vmem:[%s36351_s3 + $0x304] ss:$16 sps:$4 sm:$0xff]   ;;  %v26375_v29 = vld [vmem:[%s36351_s3 + $0x30c] ss:$16 sps:$4 sm:$0xff]  }
 0x621   : > { %11944 = vmatprep.subr.bf16.mxu1 %v26339_v44  ;;  %v26370_v44 = vld [vmem:[%s36351_s3 + $0x300] ss:$16 sps:$4 sm:$0xff]  }
 0x622   : > { %11830 = vmatmul.mubr.bf16.gmra.mrb[88].mxu0 %v21994_v25  ;;  %11932 = vmatmul.mubr.bf16.gmra.mrb[88].mxu1 %v21994_v25  ;;  %v26381_v25 = vld [vmem:[%s36351_s3 + $0x32c] ss:$16 sps:$4 sm:$0xff]  }
 0x623   : > { %11843 = vmatpush1.bf16.msra.mxu0 %v26334_v51  ;;  %11870 = vmatprep.mubr.bf16.mxu0 %v32331_v32  ;;  %v26373_v51 = vld [vmem:[%s36351_s3 + $0x308] ss:$16 sps:$4 sm:$0xff]  }
 0x624   : > { %11945 = vmatpush1.bf16.msra.mxu1 %v26337_v11  ;;  %11972 = vmatprep.mubr.bf16.mxu1 %v32331_v32  ;;  %v26349_v32 = vld [vmem:[%s36351_s3 + $0x288] ss:$16 sps:$4 sm:$0xff]   ;;  %v26376_v11 = vld [vmem:[%s36351_s3 + $0x320] ss:$16 sps:$4 sm:$0xff]  }
 0x625   : > { %11844 = vmatprep.subr.bf16.mxu0 %v26342_v22  ;;  %11946 = vmatprep.subr.bf16.mxu1 %v26345_v28  ;;  %v26379_v22 = vld [vmem:[%s36351_s3 + $0x328] ss:$16 sps:$4 sm:$0xff]   ;;  %v26384_v28 = vld [vmem:[%s36351_s3 + $0x344] ss:$16 sps:$4 sm:$0xff]  }
 0x627   : > { %11845 = vmatpush1.bf16.msra.mxu0 %v26340_v45  ;;  %v26387_v45 = vld [vmem:[%s36351_s3 + $0x34c] ss:$16 sps:$4 sm:$0xff]  }
 0x628   : > { %11947 = vmatpush1.bf16.msra.mxu1 %v26343_v19  ;;  %11846 = vmatprep.subr.bf16.mxu0 %v26348_v27  ;;  %v26382_v19 = vld [vmem:[%s36351_s3 + $0x340] ss:$16 sps:$4 sm:$0xff]   ;;  %v26385_v27 = vld [vmem:[%s36351_s3 + $0x348] ss:$16 sps:$4 sm:$0xff]  }
 0x629   : > { %11948 = vmatprep.subr.bf16.mxu1 %v26351_v23  ;;  %v26390_v23 = vld [vmem:[%s36351_s3 + $0x364] ss:$16 sps:$4 sm:$0xff]  }
 0x62b   : > { %11847 = vmatpush1.bf16.msra.mxu0 %v26346_v50  ;;  %v26393_v50 = vld [vmem:[%s36351_s3 + $0x36c] ss:$16 sps:$4 sm:$0xff]  }
 0x62c   : > { %11949 = vmatpush1.bf16.msra.mxu1 %v26349_v32  ;;  %11848 = vmatprep.subr.bf16.mxu0 %v26354_v61  ;;  %v26388_v32 = vld [vmem:[%s36351_s3 + $0x360] ss:$16 sps:$4 sm:$0xff]   ;;  %v26391_v61 = vld [vmem:[%s36351_s3 + $0x368] ss:$16 sps:$4 sm:$0xff]  }
 0x62d   : > { %11950 = vmatprep.subr.bf16.mxu1 %v26357_v17  ;;  %v26396_v17 = vld [vmem:[%s36351_s3 + $0x384] ss:$16 sps:$4 sm:$0xff]  }
 0x62f   : > { %11849 = vmatpush1.bf16.msra.mxu0 %v26352_v14  ;;  %v26399_v14 = vld [vmem:[%s36351_s3 + $0x38c] ss:$16 sps:$4 sm:$0xff]  }
 0x630   : > { %11951 = vmatpush1.bf16.msra.mxu1 %v26355_v60  ;;  %11850 = vmatprep.subr.bf16.mxu0 %v26360_v26  ;;  %v26394_v60 = vld [vmem:[%s36351_s3 + $0x380] ss:$16 sps:$4 sm:$0xff]   ;;  %v26397_v26 = vld [vmem:[%s36351_s3 + $0x388] ss:$16 sps:$4 sm:$0xff]  }
 0x631   : > { %11952 = vmatprep.subr.bf16.mxu1 %v26363_v15  ;;  %v26402_v15 = vld [vmem:[%s36351_s3 + $0x3a4] ss:$16 sps:$4 sm:$0xff]  }
 0x633   : > { %11851 = vmatpush1.bf16.msra.mxu0 %v26358_v24  ;;  %v26405_v24 = vld [vmem:[%s36351_s3 + $0x3ac] ss:$16 sps:$4 sm:$0xff]  }
 0x634   : > { %11953 = vmatpush1.bf16.msra.mxu1 %v26361_v41  ;;  %11852 = vmatprep.subr.bf16.mxu0 %v26366_v6  ;;  %v26400_v41 = vld [vmem:[%s36351_s3 + $0x3a0] ss:$16 sps:$4 sm:$0xff]   ;;  %v26403_v6 = vld [vmem:[%s36351_s3 + $0x3a8] ss:$16 sps:$4 sm:$0xff]  }
 0x635   : > { %11954 = vmatprep.subr.bf16.mxu1 %v26369_v36  ;;  %v26408_v36 = vld [vmem:[%s36351_s3 + $0x3c4] ss:$16 sps:$4 sm:$0xff]  }
 0x637   : > { %11853 = vmatpush1.bf16.msra.mxu0 %v26364_v16  ;;  %v26411_v16 = vld [vmem:[%s36351_s3 + $0x3cc] ss:$16 sps:$4 sm:$0xff]  }
 0x638   : > { %11955 = vmatpush1.bf16.msra.mxu1 %v26367_v59  ;;  %11854 = vmatprep.subr.bf16.mxu0 %v26372_v13  ;;  %v26406_v59 = vld [vmem:[%s36351_s3 + $0x3c0] ss:$16 sps:$4 sm:$0xff]   ;;  %v26409_v13 = vld [vmem:[%s36351_s3 + $0x3c8] ss:$16 sps:$4 sm:$0xff]  }
 0x639   : > { %11956 = vmatprep.subr.bf16.mxu1 %v26375_v29  ;;  %v26414_v29 = vld [vmem:[%s36351_s3 + $0x3e4] ss:$16 sps:$4 sm:$0xff]  }
 0x63b   : > { %11855 = vmatpush1.bf16.msra.mxu0 %v26370_v44  ;;  %v26417_v44 = vld [vmem:[%s36351_s3 + $0x3ec] ss:$16 sps:$4 sm:$0xff]  }
 0x63c   : > { %11957 = vmatpush1.bf16.msra.mxu1 %v26373_v51  ;;  %11856 = vmatprep.subr.bf16.mxu0 %v26378_v2  ;;  %v26412_v51 = vld [vmem:[%s36351_s3 + $0x3e0] ss:$16 sps:$4 sm:$0xff]   ;;  %v26415_v2 = vld [vmem:[%s36351_s3 + $0x3e8] ss:$16 sps:$4 sm:$0xff]  }
 0x63d   : > { %11958 = vmatprep.subr.bf16.mxu1 %v26381_v25  ;;  %v26420_v25 = vld [vmem:[%s36351_s3 + $0x804] ss:$16 sps:$4 sm:$0xff]  }
 0x63f   : > { %11857 = vmatpush1.bf16.msra.mxu0 %v26376_v11  ;;  %v26423_v11 = vld [vmem:[%s36351_s3 + $0x80c] ss:$16 sps:$4 sm:$0xff]  }
 0x640   : > { %11959 = vmatpush1.bf16.msra.mxu1 %v26379_v22  ;;  %11858 = vmatprep.subr.bf16.mxu0 %v26384_v28  ;;  %v26418_v22 = vld [vmem:[%s36351_s3 + $0x800] ss:$16 sps:$4 sm:$0xff]   ;;  %v26421_v28 = vld [vmem:[%s36351_s3 + $0x808] ss:$16 sps:$4 sm:$0xff]  }
 0x641   : > { %11960 = vmatprep.subr.bf16.mxu1 %v26387_v45  ;;  %v27803_v45 = vld [vmem:[#allocation2 + $0x28] sm:$0xff] }
 0x643   : > { %11859 = vmatpush1.bf16.msra.mxu0 %v26382_v19  ;;  %v21997_v19 = vcombine.high %v27803_v45, %v27803_v45 }
 0x644   : > { %11961 = vmatpush1.bf16.msra.mxu1 %v26385_v27  ;;  %11860 = vmatprep.subr.bf16.mxu0 %v26390_v23  ;;  %v26426_v27 = vld [vmem:[%s36351_s3 + $0x824] ss:$16 sps:$4 sm:$0xff]   ;;  %v26429_v23 = vld [vmem:[%s36351_s3 + $0x82c] ss:$16 sps:$4 sm:$0xff]  }
 0x645   : > { %11962 = vmatprep.subr.bf16.mxu1 %v26393_v50  ;;  %v26424_v50 = vld [vmem:[%s36351_s3 + $0x820] ss:$16 sps:$4 sm:$0xff]  }
 0x647   : > { %11861 = vmatpush1.bf16.msra.mxu0 %v26388_v32  ;;  %v26427_v32 = vld [vmem:[%s36351_s3 + $0x828] ss:$16 sps:$4 sm:$0xff]  }
 0x648   : > { %11963 = vmatpush1.bf16.msra.mxu1 %v26391_v61  ;;  %11862 = vmatprep.subr.bf16.mxu0 %v26396_v17  ;;  %v26432_v61 = vld [vmem:[%s36351_s3 + $0x844] ss:$16 sps:$4 sm:$0xff]   ;;  %v21996_v17 = vcombine.low %v27803_v45, %v27803_v45 }
 0x649   : > { %11964 = vmatprep.subr.bf16.mxu1 %v26399_v14  ;;  %v26430_v14 = vld [vmem:[%s36351_s3 + $0x840] ss:$16 sps:$4 sm:$0xff]  }
 0x64b   : > { %11863 = vmatpush1.bf16.msra.mxu0 %v26394_v60  ;;  %v26433_v60 = vld [vmem:[%s36351_s3 + $0x848] ss:$16 sps:$4 sm:$0xff]  }
 0x64c   : > { %11965 = vmatpush1.bf16.msra.mxu1 %v26397_v26  ;;  %11864 = vmatprep.subr.bf16.mxu0 %v26402_v15  ;;  %v26438_v26 = vld [vmem:[%s36351_s3 + $0x864] ss:$16 sps:$4 sm:$0xff]   ;;  %v26441_v15 = vld [vmem:[%s36351_s3 + $0x86c] ss:$16 sps:$4 sm:$0xff]  }
 0x64d   : > { %11966 = vmatprep.subr.bf16.mxu1 %v26405_v24  ;;  %v26436_v24 = vld [vmem:[%s36351_s3 + $0x860] ss:$16 sps:$4 sm:$0xff]  }
 0x64f   : > { %11865 = vmatpush1.bf16.msra.mxu0 %v26400_v41  ;;  %v26439_v41 = vld [vmem:[%s36351_s3 + $0x868] ss:$16 sps:$4 sm:$0xff]  }
 0x650   : > { %11967 = vmatpush1.bf16.msra.mxu1 %v26403_v6  ;;  %11866 = vmatprep.subr.bf16.mxu0 %v26408_v36  ;;  %v26444_v6 = vld [vmem:[%s36351_s3 + $0x884] ss:$16 sps:$4 sm:$0xff]   ;;  %v26447_v36 = vld [vmem:[%s36351_s3 + $0x88c] ss:$16 sps:$4 sm:$0xff]  }
 0x651   : > { %11968 = vmatprep.subr.bf16.mxu1 %v26411_v16  ;;  %v26445_v16 = vld [vmem:[%s36351_s3 + $0x888] ss:$16 sps:$4 sm:$0xff]  }
 0x653   : > { %11867 = vmatpush1.bf16.msra.mxu0 %v26406_v59  ;;  %v26450_v59 = vld [vmem:[%s36351_s3 + $0x8a4] ss:$16 sps:$4 sm:$0xff]  }
 0x654   : > { %11969 = vmatpush1.bf16.msra.mxu1 %v26409_v13  ;;  %11868 = vmatprep.subr.bf16.mxu0 %v26414_v29  ;;  %v26453_v13 = vld [vmem:[%s36351_s3 + $0x8ac] ss:$16 sps:$4 sm:$0xff]   ;;  %v26448_v29 = vld [vmem:[%s36351_s3 + $0x8a0] ss:$16 sps:$4 sm:$0xff]  }
 0x655   : > { %11970 = vmatprep.subr.bf16.mxu1 %v26417_v44  ;;  %v26451_v44 = vld [vmem:[%s36351_s3 + $0x8a8] ss:$16 sps:$4 sm:$0xff]  }
 0x657   : > { %11869 = vmatpush1.bf16.msra.mxu0 %v26412_v51  ;;  %v26456_v51 = vld [vmem:[%s36351_s3 + $0x8c4] ss:$16 sps:$4 sm:$0xff]  }
 0x658   : > { %11971 = vmatpush1.bf16.msra.mxu1 %v26415_v2  ;;  %12792 = vmatprep.subr.bf16.mxu0 %v26420_v25  ;;  %v26459_v2 = vld [vmem:[%s36351_s3 + $0x8cc] ss:$16 sps:$4 sm:$0xff]   ;;  %v26454_v25 = vld [vmem:[%s36351_s3 + $0x8c0] ss:$16 sps:$4 sm:$0xff]  }
 0x659   : > { %12894 = vmatprep.subr.bf16.mxu1 %v26423_v11  ;;  %v26457_v11 = vld [vmem:[%s36351_s3 + $0x8c8] ss:$16 sps:$4 sm:$0xff]  }
 0x65a   : > { %11871 = vmatmul.mubr.bf16.vlgmr.msra.gmra.mrb[76].mxu0 %v32796_v56 }
 0x65b   : > { %11973 = vmatmul.mubr.bf16.vlgmr.msra.gmra.mrb[76].mxu1 %v32796_v56  ;;  %11880 = vmatprep.mubr.bf16.mxu0 %v21997_v19  ;;  %v26435_v56 = vld [vmem:[%s36351_s3 + $0x84c] ss:$16 sps:$4 sm:$0xff]  }
 0x65c   : > { %11982 = vmatprep.mubr.bf16.mxu1 %v21997_v19  ;;  %12793 = vmatpush1.bf16.msra.mxu0 %v26418_v22  ;;  %v26462_v22 = vld [vmem:[%s36351_s3 + $0x8e4] ss:$16 sps:$4 sm:$0xff]  }
 0x65d   : > { %12895 = vmatpush1.bf16.msra.mxu1 %v26421_v28  ;;  %12794 = vmatprep.subr.bf16.mxu0 %v26426_v27  ;;  %v26465_v28 = vld [vmem:[%s36351_s3 + $0x8ec] ss:$16 sps:$4 sm:$0xff]   ;;  %v26460_v27 = vld [vmem:[%s36351_s3 + $0x8e0] ss:$16 sps:$4 sm:$0xff]  }
 0x65e   : > { %12896 = vmatprep.subr.bf16.mxu1 %v26429_v23  ;;  %v26463_v23 = vld [vmem:[%s36351_s3 + $0x8e8] ss:$16 sps:$4 sm:$0xff]  }
 0x660   : > { %12795 = vmatpush1.bf16.msra.mxu0 %v26424_v50 }
 0x661   : > { %12897 = vmatpush1.bf16.msra.mxu1 %v26427_v32  ;;  %12796 = vmatprep.subr.bf16.mxu0 %v26432_v61  ;;  %v26468_v61 = vld [vmem:[%s36351_s3 + $0x904] ss:$16 sps:$4 sm:$0xff]  }
 0x662   : > { %11881 = vmatmul.mubr.bf16.gmra.mrb[92].mxu0 %v21996_v17  ;;  %12898 = vmatprep.subr.bf16.mxu1 %v26435_v56 }
 0x663   : > { %11983 = vmatmul.mubr.bf16.gmra.mrb[92].mxu1 %v21996_v17  ;;  %12824 = vmatprep.mubr.bf16.mxu0 %v32462_v53 }
 0x664   : > { %12797 = vmatpush1.bf16.msra.mxu0 %v26430_v14  ;;  %12926 = vmatprep.mubr.bf16.mxu1 %v32462_v53  ;;  %v26442_v53 = vld [vmem:[%s36351_s3 + $0x880] ss:$16 sps:$4 sm:$0xff]   ;;  %v26471_v14 = vld [vmem:[%s36351_s3 + $0x90c] ss:$16 sps:$4 sm:$0xff]  }
 0x665   : > { %12899 = vmatpush1.bf16.msra.mxu1 %v26433_v60  ;;  %12798 = vmatprep.subr.bf16.mxu0 %v26438_v26 }
 0x666   : > { %12900 = vmatprep.subr.bf16.mxu1 %v26441_v15  ;;  %v26466_v15 = vld [vmem:[%s36351_s3 + $0x900] ss:$16 sps:$4 sm:$0xff]  }
 0x668   : > { %12799 = vmatpush1.bf16.msra.mxu0 %v26436_v24  ;;  %v26469_v24 = vld [vmem:[%s36351_s3 + $0x908] ss:$16 sps:$4 sm:$0xff]  }
 0x669   : > { %12901 = vmatpush1.bf16.msra.mxu1 %v26439_v41  ;;  %12800 = vmatprep.subr.bf16.mxu0 %v26444_v6  ;;  %v26474_v41 = vld [vmem:[%s36351_s3 + $0x924] ss:$16 sps:$4 sm:$0xff]   ;;  %v26477_v6 = vld [vmem:[%s36351_s3 + $0x92c] ss:$16 sps:$4 sm:$0xff]  }
 0x66a   : > { %12902 = vmatprep.subr.bf16.mxu1 %v26447_v36  ;;  %v26472_v36 = vld [vmem:[%s36351_s3 + $0x920] ss:$16 sps:$4 sm:$0xff]  }
 0x66c   : > { %12801 = vmatpush1.bf16.msra.mxu0 %v26442_v53  ;;  %v26475_v53 = vld [vmem:[%s36351_s3 + $0x928] ss:$16 sps:$4 sm:$0xff]  }
 0x66d   : > { %12903 = vmatpush1.bf16.msra.mxu1 %v26445_v16  ;;  %12802 = vmatprep.subr.bf16.mxu0 %v26450_v59  ;;  %v26480_v16 = vld [vmem:[%s36351_s3 + $0x944] ss:$16 sps:$4 sm:$0xff]   ;;  %v26483_v59 = vld [vmem:[%s36351_s3 + $0x94c] ss:$16 sps:$4 sm:$0xff]  }
 0x66e   : > { %12904 = vmatprep.subr.bf16.mxu1 %v26453_v13  ;;  %v26478_v13 = vld [vmem:[%s36351_s3 + $0x940] ss:$16 sps:$4 sm:$0xff]  }
 0x670   : > { %12803 = vmatpush1.bf16.msra.mxu0 %v26448_v29  ;;  %v26481_v29 = vld [vmem:[%s36351_s3 + $0x948] ss:$16 sps:$4 sm:$0xff]  }
 0x671   : > { %12905 = vmatpush1.bf16.msra.mxu1 %v26451_v44  ;;  %12804 = vmatprep.subr.bf16.mxu0 %v26456_v51  ;;  %v26486_v44 = vld [vmem:[%s36351_s3 + $0x964] ss:$16 sps:$4 sm:$0xff]   ;;  %v26489_v51 = vld [vmem:[%s36351_s3 + $0x96c] ss:$16 sps:$4 sm:$0xff]  }
 0x672   : > { %12906 = vmatprep.subr.bf16.mxu1 %v26459_v2  ;;  %v26484_v2 = vld [vmem:[%s36351_s3 + $0x960] ss:$16 sps:$4 sm:$0xff]  }
 0x674   : > { %12805 = vmatpush1.bf16.msra.mxu0 %v26454_v25  ;;  %v33321_v45 = vpop.f32.mrb[80].mxu0  ;;  %v33323_v19 = vpop.f32.mrb[80].mxu1  ;;  %v26487_v25 = vld [vmem:[%s36351_s3 + $0x968] ss:$16 sps:$4 sm:$0xff]  }
 0x675   : > { %12907 = vmatpush1.bf16.msra.mxu1 %v26457_v11  ;;  %12806 = vmatprep.subr.bf16.mxu0 %v26462_v22  ;;  %v33331_v50 = vpop.f32.mrb[81].mxu0  ;;  %v33333_v32 = vpop.f32.mrb[81].mxu1  ;;  %v26492_v11 = vld [vmem:[%s36351_s3 + $0x984] ss:$16 sps:$4 sm:$0xff]   ;;  %v26495_v22 = vld [vmem:[%s36351_s3 + $0x98c] ss:$16 sps:$4 sm:$0xff]  }
 0x676   : > { %12908 = vmatprep.subr.bf16.mxu1 %v26465_v28  ;;  %v10979_v56 = vpop.f32.mrb[82].mxu0  ;;  %v11081_v17 = vpop.f32.mrb[82].mxu1  ;;  %v26490_v28 = vld [vmem:[%s36351_s3 + $0x980] ss:$16 sps:$4 sm:$0xff]  }
 0x677   : > { %v10980_v60 = vpop.f32.mrb[83].mxu0  ;;  %v11082_v26 = vpop.f32.mrb[83].mxu1  ;;  %v26496_v56 = vld [vmem:[%s36351_s3 + $0x9a0] ss:$16 sps:$4 sm:$0xff]   ;;  %v26499_v17 = vld [vmem:[%s36351_s3 + $0x9a8] ss:$16 sps:$4 sm:$0xff]  }
 0x678   : > { %12807 = vmatpush1.bf16.msra.mxu0 %v26460_v27  ;;  %v26493_v27 = vld [vmem:[%s36351_s3 + $0x988] ss:$16 sps:$4 sm:$0xff]   ;;  %v26507_v60 = vld [vmem:[%s36351_s3 + $0x9cc] ss:$16 sps:$4 sm:$0xff]   ;;  %v26502_v26 = vld [vmem:[%s36351_s3 + $0x9c0] ss:$16 sps:$4 sm:$0xff]  }
 0x679   : > { %12909 = vmatpush1.bf16.msra.mxu1 %v26463_v23  ;;  %12808 = vmatprep.subr.bf16.mxu0 %v26468_v61  ;;  %v26498_v23 = vld [vmem:[%s36351_s3 + $0x9a4] ss:$16 sps:$4 sm:$0xff]   ;;  %v26501_v61 = vld [vmem:[%s36351_s3 + $0x9ac] ss:$16 sps:$4 sm:$0xff]  }
 0x67a   : > { %12910 = vmatprep.subr.bf16.mxu1 %v26471_v14  ;;  %v26504_v14 = vld [vmem:[%s36351_s3 + $0x9c4] ss:$16 sps:$4 sm:$0xff]  }
 0x67c   : > { %12809 = vmatpush1.bf16.msra.mxu0 %v26466_v15  ;;  %v26505_v15 = vld [vmem:[%s36351_s3 + $0x9c8] ss:$16 sps:$4 sm:$0xff]  }
 0x67d   : > { %12911 = vmatpush1.bf16.msra.mxu1 %v26469_v24  ;;  %12810 = vmatprep.subr.bf16.mxu0 %v26474_v41  ;;  %v26510_v24 = vld [vmem:[%s36351_s3 + $0x9e4] ss:$16 sps:$4 sm:$0xff]   ;;  %v26513_v41 = vld [vmem:[%s36351_s3 + $0x9ec] ss:$16 sps:$4 sm:$0xff]  }
 0x67e   : > { %12912 = vmatprep.subr.bf16.mxu1 %v26477_v6  ;;  %v26508_v6 = vld [vmem:[%s36351_s3 + $0x9e0] ss:$16 sps:$4 sm:$0xff]  }
 0x680   : > { %12811 = vmatpush1.bf16.msra.mxu0 %v26472_v36  ;;  %v26511_v36 = vld [vmem:[%s36351_s3 + $0x9e8] ss:$16 sps:$4 sm:$0xff]  }
 0x681   : > { %12913 = vmatpush1.bf16.msra.mxu1 %v26475_v53  ;;  %12812 = vmatprep.subr.bf16.mxu0 %v26480_v16  ;;  %v26516_v53 = vld [vmem:[%s36351_s3 + $0xa04] ss:$16 sps:$4 sm:$0xff]   ;;  %v26519_v16 = vld [vmem:[%s36351_s3 + $0xa0c] ss:$16 sps:$4 sm:$0xff]  }
 0x682   : > { %12914 = vmatprep.subr.bf16.mxu1 %v26483_v59  ;;  %v26514_v59 = vld [vmem:[%s36351_s3 + $0xa00] ss:$16 sps:$4 sm:$0xff]  }
 0x684   : > { %12813 = vmatpush1.bf16.msra.mxu0 %v26478_v13  ;;  %v26517_v13 = vld [vmem:[%s36351_s3 + $0xa08] ss:$16 sps:$4 sm:$0xff]  }
 0x685   : > { %12915 = vmatpush1.bf16.msra.mxu1 %v26481_v29  ;;  %12814 = vmatprep.subr.bf16.mxu0 %v26486_v44  ;;  %v26522_v29 = vld [vmem:[%s36351_s3 + $0xa24] ss:$16 sps:$4 sm:$0xff]   ;;  %v26525_v44 = vld [vmem:[%s36351_s3 + $0xa2c] ss:$16 sps:$4 sm:$0xff]  }
 0x686   : > { %12916 = vmatprep.subr.bf16.mxu1 %v26489_v51  ;;  %v26520_v51 = vld [vmem:[%s36351_s3 + $0xa20] ss:$16 sps:$4 sm:$0xff]  }
 0x688   : > { %12815 = vmatpush1.bf16.msra.mxu0 %v26484_v2  ;;  %v26523_v2 = vld [vmem:[%s36351_s3 + $0xa28] ss:$16 sps:$4 sm:$0xff]  }
 0x689   : > { %12917 = vmatpush1.bf16.msra.mxu1 %v26487_v25  ;;  %12816 = vmatprep.subr.bf16.mxu0 %v26492_v11  ;;  %v26528_v25 = vld [vmem:[%s36351_s3 + $0xa44] ss:$16 sps:$4 sm:$0xff]   ;;  %v26529_v11 = vld [vmem:[%s36351_s3 + $0xa48] ss:$16 sps:$4 sm:$0xff]  }
 0x68a   : > { %12918 = vmatprep.subr.bf16.mxu1 %v26495_v22  ;;  %v26534_v22 = vld [vmem:[%s36351_s3 + $0xa64] ss:$16 sps:$4 sm:$0xff]  }
 0x68c   : > { %12817 = vmatpush1.bf16.msra.mxu0 %v26490_v28  ;;  %v26537_v28 = vld [vmem:[%s36351_s3 + $0xa6c] ss:$16 sps:$4 sm:$0xff]  }
 0x68d   : > { %12919 = vmatpush1.bf16.msra.mxu1 %v26493_v27  ;;  %12818 = vmatprep.subr.bf16.mxu0 %v26498_v23  ;;  %v26532_v27 = vld [vmem:[%s36351_s3 + $0xa60] ss:$16 sps:$4 sm:$0xff]   ;;  %v26535_v23 = vld [vmem:[%s36351_s3 + $0xa68] ss:$16 sps:$4 sm:$0xff]  }
 0x68e   : > { %12920 = vmatprep.subr.bf16.mxu1 %v26501_v61  ;;  %v26540_v61 = vld [vmem:[%s36351_s3 + $0xa84] ss:$16 sps:$4 sm:$0xff]  }
 0x690   : > { %12819 = vmatpush1.bf16.msra.mxu0 %v26496_v56  ;;  %v26541_v56 = vld [vmem:[%s36351_s3 + $0xa88] ss:$16 sps:$4 sm:$0xff]  }
 0x691   : > { %12921 = vmatpush1.bf16.msra.mxu1 %v26499_v17  ;;  %12820 = vmatprep.subr.bf16.mxu0 %v26504_v14  ;;  %v26546_v17 = vld [vmem:[%s36351_s3 + $0xaa4] ss:$16 sps:$4 sm:$0xff]   ;;  %v26549_v14 = vld [vmem:[%s36351_s3 + $0xaac] ss:$16 sps:$4 sm:$0xff]  }
 0x692   : > { %12922 = vmatprep.subr.bf16.mxu1 %v26507_v60  ;;  %v26544_v60 = vld [vmem:[%s36351_s3 + $0xaa0] ss:$16 sps:$4 sm:$0xff]  }
 0x694   : > { %12821 = vmatpush1.bf16.msra.mxu0 %v26502_v26  ;;  %v26547_v26 = vld [vmem:[%s36351_s3 + $0xaa8] ss:$16 sps:$4 sm:$0xff]  }
 0x695   : > { %12923 = vmatpush1.bf16.msra.mxu1 %v26505_v15  ;;  %12822 = vmatprep.subr.bf16.mxu0 %v26510_v24  ;;  %v26552_v15 = vld [vmem:[%s36351_s3 + $0xac4] ss:$16 sps:$4 sm:$0xff]   ;;  %v26555_v24 = vld [vmem:[%s36351_s3 + $0xacc] ss:$16 sps:$4 sm:$0xff]  }
 0x696   : > { %12924 = vmatprep.subr.bf16.mxu1 %v26513_v41  ;;  %v26550_v41 = vld [vmem:[%s36351_s3 + $0xac0] ss:$16 sps:$4 sm:$0xff]  }
 0x698   : > { %12823 = vmatpush1.bf16.msra.mxu0 %v26508_v6  ;;  %v26553_v6 = vld [vmem:[%s36351_s3 + $0xac8] ss:$16 sps:$4 sm:$0xff]  }
 0x699   : > { %12925 = vmatpush1.bf16.msra.mxu1 %v26511_v36  ;;  %12843 = vmatprep.subr.bf16.mxu0 %v26516_v53  ;;  %v26558_v36 = vld [vmem:[%s36351_s3 + $0xae4] ss:$16 sps:$4 sm:$0xff]   ;;  %v26561_v53 = vld [vmem:[%s36351_s3 + $0xaec] ss:$16 sps:$4 sm:$0xff]  }
 0x69a   : > { %12945 = vmatprep.subr.bf16.mxu1 %v26519_v16 }
 0x69b   : > { %12825 = vmatmul.mubr.bf16.vlgmr.msra.gmra.mrb[76].mxu0 %v32466_v8 }
 0x69c   : > { %12927 = vmatmul.mubr.bf16.vlgmr.msra.gmra.mrb[76].mxu1 %v32466_v8  ;;  %12834 = vmatprep.mubr.bf16.mxu0 %v32435_v20  ;;  %v26531_v8 = vld [vmem:[%s36351_s3 + $0xa4c] ss:$16 sps:$4 sm:$0xff]  }
 0x69d   : > { %12844 = vmatpush1.bf16.msra.mxu0 %v26514_v59  ;;  %12936 = vmatprep.mubr.bf16.mxu1 %v32435_v20  ;;  %v26526_v20 = vld [vmem:[%s36351_s3 + $0xa40] ss:$16 sps:$4 sm:$0xff]  }
 0x69e   : > { %12946 = vmatpush1.bf16.msra.mxu1 %v26517_v13  ;;  %12845 = vmatprep.subr.bf16.mxu0 %v26522_v29 }
 0x69f   : > { %12947 = vmatprep.subr.bf16.mxu1 %v26525_v44 }
 0x6a1   : > { %12846 = vmatpush1.bf16.msra.mxu0 %v26520_v51 }
 0x6a2   : > { %12948 = vmatpush1.bf16.msra.mxu1 %v26523_v2  ;;  %12847 = vmatprep.subr.bf16.mxu0 %v26528_v25  ;;  %v26556_v2 = vld [vmem:[%s36351_s3 + $0xae0] ss:$16 sps:$4 sm:$0xff]  }
 0x6a3   : > { %12835 = vmatmul.mubr.bf16.gmra.mrb[96].mxu0 %v32437_v54  ;;  %12949 = vmatprep.subr.bf16.mxu1 %v26531_v8 }
 0x6a4   : > { %12937 = vmatmul.mubr.bf16.gmra.mrb[96].mxu1 %v32437_v54  ;;  %12875 = vmatprep.mubr.bf16.mxu0 %v32476_v31  ;;  %v26543_v54 = vld [vmem:[%s36351_s3 + $0xa8c] ss:$16 sps:$4 sm:$0xff]  }
 0x6a5   : > { %12848 = vmatpush1.bf16.msra.mxu0 %v26526_v20  ;;  %12977 = vmatprep.mubr.bf16.mxu1 %v32476_v31  ;;  %v26538_v31 = vld [vmem:[%s36351_s3 + $0xa80] ss:$16 sps:$4 sm:$0xff]  }
 0x6a6   : > { %12950 = vmatpush1.bf16.msra.mxu1 %v26529_v11  ;;  %12849 = vmatprep.subr.bf16.mxu0 %v26534_v22  ;;  %v26564_v11 = vld [vmem:[%s36351_s3 + $0xb04] ss:$16 sps:$4 sm:$0xff]  }
 0x6a7   : > { %12951 = vmatprep.subr.bf16.mxu1 %v26537_v28 }
 0x6a9   : > { %12850 = vmatpush1.bf16.msra.mxu0 %v26532_v27  ;;  %v26565_v27 = vld [vmem:[%s36351_s3 + $0xb08] ss:$16 sps:$4 sm:$0xff]  }
 0x6aa   : > { %12952 = vmatpush1.bf16.msra.mxu1 %v26535_v23  ;;  %12851 = vmatprep.subr.bf16.mxu0 %v26540_v61  ;;  %v26570_v23 = vld [vmem:[%s36351_s3 + $0xb24] ss:$16 sps:$4 sm:$0xff]   ;;  %v26573_v61 = vld [vmem:[%s36351_s3 + $0xb2c] ss:$16 sps:$4 sm:$0xff]  }
 0x6ab   : > { %12953 = vmatprep.subr.bf16.mxu1 %v26543_v54  ;;  %v26568_v54 = vld [vmem:[%s36351_s3 + $0xb20] ss:$16 sps:$4 sm:$0xff]  }
 0x6ad   : > { %12852 = vmatpush1.bf16.msra.mxu0 %v26538_v31  ;;  %v26571_v31 = vld [vmem:[%s36351_s3 + $0xb28] ss:$16 sps:$4 sm:$0xff]  }
 0x6ae   : > { %12954 = vmatpush1.bf16.msra.mxu1 %v26541_v56  ;;  %12853 = vmatprep.subr.bf16.mxu0 %v26546_v17  ;;  %v26576_v56 = vld [vmem:[%s36351_s3 + $0xb44] ss:$16 sps:$4 sm:$0xff]   ;;  %v26579_v17 = vld [vmem:[%s36351_s3 + $0xb4c] ss:$16 sps:$4 sm:$0xff]  }
 0x6af   : > { %12955 = vmatprep.subr.bf16.mxu1 %v26549_v14  ;;  %v26574_v14 = vld [vmem:[%s36351_s3 + $0xb40] ss:$16 sps:$4 sm:$0xff]  }
 0x6b1   : > { %12854 = vmatpush1.bf16.msra.mxu0 %v26544_v60  ;;  %v26577_v60 = vld [vmem:[%s36351_s3 + $0xb48] ss:$16 sps:$4 sm:$0xff]  }
 0x6b2   : > { %12956 = vmatpush1.bf16.msra.mxu1 %v26547_v26  ;;  %12855 = vmatprep.subr.bf16.mxu0 %v26552_v15  ;;  %v26582_v26 = vld [vmem:[%s36351_s3 + $0xb64] ss:$16 sps:$4 sm:$0xff]   ;;  %v26585_v15 = vld [vmem:[%s36351_s3 + $0xb6c] ss:$16 sps:$4 sm:$0xff]  }
 0x6b3   : > { %12957 = vmatprep.subr.bf16.mxu1 %v26555_v24  ;;  %v26580_v24 = vld [vmem:[%s36351_s3 + $0xb60] ss:$16 sps:$4 sm:$0xff]  }
 0x6b4   : > { %v11026_v16 = vpop.f32.mrb[84].mxu0  ;;  %v11128_v59 = vpop.f32.mrb[84].mxu1 }
 0x6b5   : > { %12856 = vmatpush1.bf16.msra.mxu0 %v26550_v41  ;;  %v33530_v13 = vadd.f32 %v11026_v16, %v33321_v45  ;;  %v33533_v29 = vadd.f32 %v11128_v59, %v33323_v19  ;;  %v11028_v44 = vpop.f32.mrb[85].mxu0  ;;  %v11130_v51 = vpop.f32.mrb[85].mxu1  ;;  %v26559_v45 = vld [vmem:[%s36351_s3 + $0xae8] ss:$16 sps:$4 sm:$0xff]   ;;  %v26594_v59 = vld [vmem:[%s36351_s3 + $0xba4] ss:$16 sps:$4 sm:$0xff]  }
 0x6b6   : > { %12958 = vmatpush1.bf16.msra.mxu1 %v26553_v6  ;;  %v33539_v25 = vadd.f32 %v11028_v44, %v33331_v50  ;;  %v33542_v8 = vadd.f32 %v11130_v51, %v33333_v32  ;;  %12857 = vmatprep.subr.bf16.mxu0 %v26558_v36  ;;  %v11030_v19 = vpop.f32.mrb[86].mxu0  ;;  %v11132_v20 = vpop.f32.mrb[86].mxu1  ;;  %v26567_v50 = vld [vmem:[%s36351_s3 + $0xb0c] ss:$16 sps:$4 sm:$0xff]   ;;  %v26562_v32 = vld [vmem:[%s36351_s3 + $0xb00] ss:$16 sps:$4 sm:$0xff]  }
 0x6b7   : > { %12959 = vmatprep.subr.bf16.mxu1 %v26561_v53  ;;  %v11031_v22 = vpop.f32.mrb[87].mxu0  ;;  %v11133_v28 = vpop.f32.mrb[87].mxu1  ;;  %v26583_v41 = vld [vmem:[%s36351_s3 + $0xb68] ss:$16 sps:$4 sm:$0xff]   ;;  %v26588_v6 = vld [vmem:[%s36351_s3 + $0xb84] ss:$16 sps:$4 sm:$0xff]  }
 0x6b8   : > { %v26591_v36 = vld [vmem:[%s36351_s3 + $0xb8c] ss:$16 sps:$4 sm:$0xff]   ;;  %v26586_v53 = vld [vmem:[%s36351_s3 + $0xb80] ss:$16 sps:$4 sm:$0xff]   ;;  %v26589_v16 = vld [vmem:[%s36351_s3 + $0xb88] ss:$16 sps:$4 sm:$0xff]  }
 0x6b9   : > { %12858 = vmatpush1.bf16.msra.mxu0 %v26556_v2  ;;  %v26597_v44 = vld [vmem:[%s36351_s3 + $0xbac] ss:$16 sps:$4 sm:$0xff]   ;;  %v26592_v51 = vld [vmem:[%s36351_s3 + $0xba0] ss:$16 sps:$4 sm:$0xff]   ;;  %v26595_v2 = vld [vmem:[%s36351_s3 + $0xba8] ss:$16 sps:$4 sm:$0xff]  }
 0x6ba   : > { %12960 = vmatpush1.bf16.msra.mxu1 %v26559_v45  ;;  %12859 = vmatprep.subr.bf16.mxu0 %v26564_v11  ;;  %v26600_v45 = vld [vmem:[%s36351_s3 + $0xbc4] ss:$16 sps:$4 sm:$0xff]   ;;  %v26603_v19 = vld [vmem:[%s36351_s3 + $0xbcc] ss:$16 sps:$4 sm:$0xff]   ;;  %v26598_v20 = vld [vmem:[%s36351_s3 + $0xbc0] ss:$16 sps:$4 sm:$0xff]  }
 0x6bb   : > { %12961 = vmatprep.subr.bf16.mxu1 %v26567_v50  ;;  %v26601_v11 = vld [vmem:[%s36351_s3 + $0xbc8] ss:$16 sps:$4 sm:$0xff]   ;;  %v26606_v22 = vld [vmem:[%s36351_s3 + $0xbe4] ss:$16 sps:$4 sm:$0xff]   ;;  %v26609_v28 = vld [vmem:[%s36351_s3 + $0xbec] ss:$16 sps:$4 sm:$0xff]  }
 0x6bc   : > { %v26604_v50 = vld [vmem:[%s36351_s3 + $0xbe0] ss:$16 sps:$4 sm:$0xff]  }
 0x6bd   : > { %12860 = vmatpush1.bf16.msra.mxu0 %v26562_v32  ;;  %v26607_v32 = vld [vmem:[%s36351_s3 + $0xbe8] ss:$16 sps:$4 sm:$0xff]  }
 0x6be   : > { %12962 = vmatpush1.bf16.msra.mxu1 %v26565_v27  ;;  %12861 = vmatprep.subr.bf16.mxu0 %v26570_v23  ;;  %v26612_v27 = vld [vmem:[%s36351_s3 + $0xc04] ss:$16 sps:$4 sm:$0xff]   ;;  %v26615_v23 = vld [vmem:[%s36351_s3 + $0xc0c] ss:$16 sps:$4 sm:$0xff]  }
 0x6bf   : > { %12963 = vmatprep.subr.bf16.mxu1 %v26573_v61  ;;  %v26610_v61 = vld [vmem:[%s36351_s3 + $0xc00] ss:$16 sps:$4 sm:$0xff]  }
 0x6c1   : > { %12862 = vmatpush1.bf16.msra.mxu0 %v26568_v54  ;;  %v26613_v54 = vld [vmem:[%s36351_s3 + $0xc08] ss:$16 sps:$4 sm:$0xff]  }
 0x6c2   : > { %12964 = vmatpush1.bf16.msra.mxu1 %v26571_v31  ;;  %12863 = vmatprep.subr.bf16.mxu0 %v26576_v56  ;;  %v26618_v31 = vld [vmem:[%s36351_s3 + $0xc24] ss:$16 sps:$4 sm:$0xff]   ;;  %v26621_v56 = vld [vmem:[%s36351_s3 + $0xc2c] ss:$16 sps:$4 sm:$0xff]  }
 0x6c3   : > { %12965 = vmatprep.subr.bf16.mxu1 %v26579_v17  ;;  %v26616_v17 = vld [vmem:[%s36351_s3 + $0xc20] ss:$16 sps:$4 sm:$0xff]  }
 0x6c5   : > { %12864 = vmatpush1.bf16.msra.mxu0 %v26574_v14  ;;  %v26619_v14 = vld [vmem:[%s36351_s3 + $0xc28] ss:$16 sps:$4 sm:$0xff]  }
 0x6c6   : > { %12966 = vmatpush1.bf16.msra.mxu1 %v26577_v60  ;;  %12865 = vmatprep.subr.bf16.mxu0 %v26582_v26  ;;  %v26624_v60 = vld [vmem:[%s36351_s3 + $0xc44] ss:$16 sps:$4 sm:$0xff]   ;;  %v26625_v26 = vld [vmem:[%s36351_s3 + $0xc48] ss:$16 sps:$4 sm:$0xff]  }
 0x6c7   : > { %12967 = vmatprep.subr.bf16.mxu1 %v26585_v15  ;;  %v26630_v15 = vld [vmem:[%s36351_s3 + $0xc64] ss:$16 sps:$4 sm:$0xff]  }
 0x6c9   : > { %12866 = vmatpush1.bf16.msra.mxu0 %v26580_v24  ;;  %v26633_v24 = vld [vmem:[%s36351_s3 + $0xc6c] ss:$16 sps:$4 sm:$0xff]  }
 0x6ca   : > { %12968 = vmatpush1.bf16.msra.mxu1 %v26583_v41  ;;  %12867 = vmatprep.subr.bf16.mxu0 %v26588_v6  ;;  %v26628_v41 = vld [vmem:[%s36351_s3 + $0xc60] ss:$16 sps:$4 sm:$0xff]   ;;  %v26631_v6 = vld [vmem:[%s36351_s3 + $0xc68] ss:$16 sps:$4 sm:$0xff]  }
 0x6cb   : > { %12969 = vmatprep.subr.bf16.mxu1 %v26591_v36  ;;  %v26636_v36 = vld [vmem:[%s36351_s3 + $0xc84] ss:$16 sps:$4 sm:$0xff]  }
 0x6cd   : > { %12868 = vmatpush1.bf16.msra.mxu0 %v26586_v53  ;;  %v26637_v53 = vld [vmem:[%s36351_s3 + $0xc88] ss:$16 sps:$4 sm:$0xff]  }
 0x6ce   : > { %12970 = vmatpush1.bf16.msra.mxu1 %v26589_v16  ;;  %12869 = vmatprep.subr.bf16.mxu0 %v26594_v59  ;;  %v26642_v16 = vld [vmem:[%s36351_s3 + $0xca4] ss:$16 sps:$4 sm:$0xff]   ;;  %v26645_v59 = vld [vmem:[%s36351_s3 + $0xcac] ss:$16 sps:$4 sm:$0xff]  }
 0x6cf   : > { %12971 = vmatprep.subr.bf16.mxu1 %v26597_v44  ;;  %v26640_v44 = vld [vmem:[%s36351_s3 + $0xca0] ss:$16 sps:$4 sm:$0xff]  }
 0x6d1   : > { %12870 = vmatpush1.bf16.msra.mxu0 %v26592_v51  ;;  %v26643_v51 = vld [vmem:[%s36351_s3 + $0xca8] ss:$16 sps:$4 sm:$0xff]  }
 0x6d2   : > { %12972 = vmatpush1.bf16.msra.mxu1 %v26595_v2  ;;  %12871 = vmatprep.subr.bf16.mxu0 %v26600_v45  ;;  %v26648_v2 = vld [vmem:[%s36351_s3 + $0xcc4] ss:$16 sps:$4 sm:$0xff]   ;;  %v26651_v45 = vld [vmem:[%s36351_s3 + $0xccc] ss:$16 sps:$4 sm:$0xff]  }
 0x6d3   : > { %12973 = vmatprep.subr.bf16.mxu1 %v26603_v19  ;;  %v26646_v19 = vld [vmem:[%s36351_s3 + $0xcc0] ss:$16 sps:$4 sm:$0xff]  }
 0x6d5   : > { %12872 = vmatpush1.bf16.msra.mxu0 %v26598_v20  ;;  %v26649_v20 = vld [vmem:[%s36351_s3 + $0xcc8] ss:$16 sps:$4 sm:$0xff]  }
 0x6d6   : > { %12974 = vmatpush1.bf16.msra.mxu1 %v26601_v11  ;;  %12873 = vmatprep.subr.bf16.mxu0 %v26606_v22  ;;  %v26654_v11 = vld [vmem:[%s36351_s3 + $0xce4] ss:$16 sps:$4 sm:$0xff]   ;;  %v26657_v22 = vld [vmem:[%s36351_s3 + $0xcec] ss:$16 sps:$4 sm:$0xff]  }
 0x6d7   : > { %12975 = vmatprep.subr.bf16.mxu1 %v26609_v28 }
 0x6d9   : > { %12874 = vmatpush1.bf16.msra.mxu0 %v26604_v50 }
 0x6da   : > { %12976 = vmatpush1.bf16.msra.mxu1 %v26607_v32  ;;  %13821 = vmatprep.subr.bf16.mxu0 %v26612_v27 }
 0x6db   : > { %13923 = vmatprep.subr.bf16.mxu1 %v26615_v23 }
 0x6dc   : > { %12876 = vmatmul.mubr.bf16.vlgmr.msra.gmra.mrb[76].mxu0 %v32493_v34 }
 0x6dd   : > { %12978 = vmatmul.mubr.bf16.vlgmr.msra.gmra.mrb[76].mxu1 %v32493_v34  ;;  %12885 = vmatprep.mubr.bf16.mxu0 %v32451_v52  ;;  %v26622_v34 = vld [vmem:[%s36351_s3 + $0xc40] ss:$16 sps:$4 sm:$0xff]  }
 0x6de   : > { %12987 = vmatprep.mubr.bf16.mxu1 %v32451_v52  ;;  %13822 = vmatpush1.bf16.msra.mxu0 %v26610_v61  ;;  %v26627_v52 = vld [vmem:[%s36351_s3 + $0xc4c] ss:$16 sps:$4 sm:$0xff]  }
 0x6df   : > { %13924 = vmatpush1.bf16.msra.mxu1 %v26613_v54  ;;  %13823 = vmatprep.subr.bf16.mxu0 %v26618_v31  ;;  %v26652_v54 = vld [vmem:[%s36351_s3 + $0xce0] ss:$16 sps:$4 sm:$0xff]  }
 0x6e0   : > { %13925 = vmatprep.subr.bf16.mxu1 %v26621_v56 }
 0x6e2   : > { %13824 = vmatpush1.bf16.msra.mxu0 %v26616_v17 }
 0x6e3   : > { %13926 = vmatpush1.bf16.msra.mxu1 %v26619_v14  ;;  %13825 = vmatprep.subr.bf16.mxu0 %v26624_v60  ;;  %v26660_v14 = vld [vmem:[%s36351_s3 + $0xd04] ss:$16 sps:$4 sm:$0xff]  }
 0x6e4   : > { %12886 = vmatmul.mubr.bf16.gmra.mrb[100].mxu0 %v32469_v18  ;;  %13927 = vmatprep.subr.bf16.mxu1 %v26627_v52 }
 0x6e5   : > { %12988 = vmatmul.mubr.bf16.gmra.mrb[100].mxu1 %v32469_v18  ;;  %13853 = vmatprep.mubr.bf16.mxu0 %v32505_v57  ;;  %v26639_v18 = vld [vmem:[%s36351_s3 + $0xc8c] ss:$16 sps:$4 sm:$0xff]  }
 0x6e6   : > { %13826 = vmatpush1.bf16.msra.mxu0 %v26622_v34  ;;  %13955 = vmatprep.mubr.bf16.mxu1 %v32505_v57  ;;  %v26634_v57 = vld [vmem:[%s36351_s3 + $0xc80] ss:$16 sps:$4 sm:$0xff]   ;;  %v26661_v34 = vld [vmem:[%s36351_s3 + $0xd08] ss:$16 sps:$4 sm:$0xff]  }
 0x6e7   : > { %13928 = vmatpush1.bf16.msra.mxu1 %v26625_v26  ;;  %13827 = vmatprep.subr.bf16.mxu0 %v26630_v15  ;;  %v26666_v26 = vld [vmem:[%s36351_s3 + $0xd24] ss:$16 sps:$4 sm:$0xff]   ;;  %v26669_v15 = vld [vmem:[%s36351_s3 + $0xd2c] ss:$16 sps:$4 sm:$0xff]  }
 0x6e8   : > { %13929 = vmatprep.subr.bf16.mxu1 %v26633_v24  ;;  %v26664_v24 = vld [vmem:[%s36351_s3 + $0xd20] ss:$16 sps:$4 sm:$0xff]  }
 0x6ea   : > { %13828 = vmatpush1.bf16.msra.mxu0 %v26628_v41  ;;  %v26667_v41 = vld [vmem:[%s36351_s3 + $0xd28] ss:$16 sps:$4 sm:$0xff]  }
 0x6eb   : > { %13930 = vmatpush1.bf16.msra.mxu1 %v26631_v6  ;;  %13829 = vmatprep.subr.bf16.mxu0 %v26636_v36  ;;  %v26672_v6 = vld [vmem:[%s36351_s3 + $0xd44] ss:$16 sps:$4 sm:$0xff]   ;;  %v26675_v36 = vld [vmem:[%s36351_s3 + $0xd4c] ss:$16 sps:$4 sm:$0xff]  }
 0x6ec   : > { %13931 = vmatprep.subr.bf16.mxu1 %v26639_v18  ;;  %v26670_v18 = vld [vmem:[%s36351_s3 + $0xd40] ss:$16 sps:$4 sm:$0xff]  }
 0x6ee   : > { %13830 = vmatpush1.bf16.msra.mxu0 %v26634_v57  ;;  %v26673_v57 = vld [vmem:[%s36351_s3 + $0xd48] ss:$16 sps:$4 sm:$0xff]  }
 0x6ef   : > { %13932 = vmatpush1.bf16.msra.mxu1 %v26637_v53  ;;  %13831 = vmatprep.subr.bf16.mxu0 %v26642_v16  ;;  %v26678_v53 = vld [vmem:[%s36351_s3 + $0xd64] ss:$16 sps:$4 sm:$0xff]   ;;  %v26681_v16 = vld [vmem:[%s36351_s3 + $0xd6c] ss:$16 sps:$4 sm:$0xff]  }
 0x6f0   : > { %13933 = vmatprep.subr.bf16.mxu1 %v26645_v59  ;;  %v26676_v59 = vld [vmem:[%s36351_s3 + $0xd60] ss:$16 sps:$4 sm:$0xff]  }
 0x6f2   : > { %13832 = vmatpush1.bf16.msra.mxu0 %v26640_v44  ;;  %v26679_v44 = vld [vmem:[%s36351_s3 + $0xd68] ss:$16 sps:$4 sm:$0xff]  }
 0x6f3   : > { %13934 = vmatpush1.bf16.msra.mxu1 %v26643_v51  ;;  %13833 = vmatprep.subr.bf16.mxu0 %v26648_v2  ;;  %v26684_v51 = vld [vmem:[%s36351_s3 + $0xd84] ss:$16 sps:$4 sm:$0xff]   ;;  %v26687_v2 = vld [vmem:[%s36351_s3 + $0xd8c] ss:$16 sps:$4 sm:$0xff]  }
 0x6f4   : > { %13935 = vmatprep.subr.bf16.mxu1 %v26651_v45  ;;  %v26682_v45 = vld [vmem:[%s36351_s3 + $0xd80] ss:$16 sps:$4 sm:$0xff]  }
 0x6f5   : > { %v11831_v28 = vpop.f32.mrb[88].mxu0  ;;  %v11933_v50 = vpop.f32.mrb[88].mxu1 }
 0x6f6   : > { %13834 = vmatpush1.bf16.msra.mxu0 %v26646_v19  ;;  %v33742_v32 = vadd.f32 %v11831_v28, %v33530_v13  ;;  %v33745_v27 = vadd.f32 %v11933_v50, %v33533_v29  ;;  %v11833_v23 = vpop.f32.mrb[89].mxu0  ;;  %v11935_v61 = vpop.f32.mrb[89].mxu1  ;;  %v26655_v13 = vld [vmem:[%s36351_s3 + $0xce8] ss:$16 sps:$4 sm:$0xff]   ;;  %v26696_v50 = vld [vmem:[%s36351_s3 + $0xdc4] ss:$16 sps:$4 sm:$0xff]  }
 0x6f7   : > { %13936 = vmatpush1.bf16.msra.mxu1 %v26649_v20  ;;  %v33751_v31 = vadd.f32 %v11833_v23, %v33539_v25  ;;  %v33754_v56 = vadd.f32 %v11935_v61, %v33542_v8  ;;  %13835 = vmatprep.subr.bf16.mxu0 %v26654_v11  ;;  %v11835_v29 = vpop.f32.mrb[90].mxu0  ;;  %v11937_v17 = vpop.f32.mrb[90].mxu1  ;;  %v26663_v25 = vld [vmem:[%s36351_s3 + $0xd0c] ss:$16 sps:$4 sm:$0xff]   ;;  %v26658_v8 = vld [vmem:[%s36351_s3 + $0xd00] ss:$16 sps:$4 sm:$0xff]  }
 0x6f8   : > { %13937 = vmatprep.subr.bf16.mxu1 %v26657_v22  ;;  %v11836_v60 = vpop.f32.mrb[91].mxu0  ;;  %v11938_v52 = vpop.f32.mrb[91].mxu1  ;;  %v26685_v19 = vld [vmem:[%s36351_s3 + $0xd88] ss:$16 sps:$4 sm:$0xff]   ;;  %v26690_v20 = vld [vmem:[%s36351_s3 + $0xda4] ss:$16 sps:$4 sm:$0xff]  }
 0x6f9   : > { %v26693_v11 = vld [vmem:[%s36351_s3 + $0xdac] ss:$16 sps:$4 sm:$0xff]   ;;  %v26688_v22 = vld [vmem:[%s36351_s3 + $0xda0] ss:$16 sps:$4 sm:$0xff]   ;;  %v26691_v28 = vld [vmem:[%s36351_s3 + $0xda8] ss:$16 sps:$4 sm:$0xff]  }
 0x6fa   : > { %13836 = vmatpush1.bf16.msra.mxu0 %v26652_v54  ;;  %v26699_v23 = vld [vmem:[%s36351_s3 + $0xdcc] ss:$16 sps:$4 sm:$0xff]   ;;  %v26694_v61 = vld [vmem:[%s36351_s3 + $0xdc0] ss:$16 sps:$4 sm:$0xff]   ;;  %v26697_v54 = vld [vmem:[%s36351_s3 + $0xdc8] ss:$16 sps:$4 sm:$0xff]  }
 0x6fb   : > { %13938 = vmatpush1.bf16.msra.mxu1 %v26655_v13  ;;  %13837 = vmatprep.subr.bf16.mxu0 %v26660_v14  ;;  %v26702_v13 = vld [vmem:[%s36351_s3 + $0xde4] ss:$16 sps:$4 sm:$0xff]   ;;  %v26705_v29 = vld [vmem:[%s36351_s3 + $0xdec] ss:$16 sps:$4 sm:$0xff]   ;;  %v26700_v17 = vld [vmem:[%s36351_s3 + $0xde0] ss:$16 sps:$4 sm:$0xff]  }
 0x6fc   : > { %13939 = vmatprep.subr.bf16.mxu1 %v26663_v25  ;;  %v26703_v14 = vld [vmem:[%s36351_s3 + $0xde8] ss:$16 sps:$4 sm:$0xff]   ;;  %v26708_v60 = vld [vmem:[%s36351_s3 + $0xe04] ss:$16 sps:$4 sm:$0xff]   ;;  %v26711_v52 = vld [vmem:[%s36351_s3 + $0xe0c] ss:$16 sps:$4 sm:$0xff]  }
 0x6fd   : > { %v26706_v25 = vld [vmem:[%s36351_s3 + $0xe00] ss:$16 sps:$4 sm:$0xff]  }
 0x6fe   : > { %13838 = vmatpush1.bf16.msra.mxu0 %v26658_v8  ;;  %v26709_v8 = vld [vmem:[%s36351_s3 + $0xe08] ss:$16 sps:$4 sm:$0xff]  }
 0x6ff   : > { %13940 = vmatpush1.bf16.msra.mxu1 %v26661_v34  ;;  %13839 = vmatprep.subr.bf16.mxu0 %v26666_v26  ;;  %v26714_v34 = vld [vmem:[%s36351_s3 + $0xe24] ss:$16 sps:$4 sm:$0xff]   ;;  %v26717_v26 = vld [vmem:[%s36351_s3 + $0xe2c] ss:$16 sps:$4 sm:$0xff]  }
 0x700   : > { %13941 = vmatprep.subr.bf16.mxu1 %v26669_v15  ;;  %v26712_v15 = vld [vmem:[%s36351_s3 + $0xe20] ss:$16 sps:$4 sm:$0xff]  }
 0x702   : > { %13840 = vmatpush1.bf16.msra.mxu0 %v26664_v24  ;;  %v26715_v24 = vld [vmem:[%s36351_s3 + $0xe28] ss:$16 sps:$4 sm:$0xff]  }
 0x703   : > { %13942 = vmatpush1.bf16.msra.mxu1 %v26667_v41  ;;  %13841 = vmatprep.subr.bf16.mxu0 %v26672_v6  ;;  %v26720_v41 = vld [vmem:[%s36351_s3 + $0xe44] ss:$16 sps:$4 sm:$0xff]   ;;  %v26721_v6 = vld [vmem:[%s36351_s3 + $0xe48] ss:$16 sps:$4 sm:$0xff]  }
 0x704   : > { %13943 = vmatprep.subr.bf16.mxu1 %v26675_v36  ;;  %v26726_v36 = vld [vmem:[%s36351_s3 + $0xe64] ss:$16 sps:$4 sm:$0xff]  }
 0x706   : > { %13842 = vmatpush1.bf16.msra.mxu0 %v26670_v18  ;;  %v26729_v18 = vld [vmem:[%s36351_s3 + $0xe6c] ss:$16 sps:$4 sm:$0xff]  }
 0x707   : > { %13944 = vmatpush1.bf16.msra.mxu1 %v26673_v57  ;;  %13843 = vmatprep.subr.bf16.mxu0 %v26678_v53  ;;  %v26724_v57 = vld [vmem:[%s36351_s3 + $0xe60] ss:$16 sps:$4 sm:$0xff]   ;;  %v26727_v53 = vld [vmem:[%s36351_s3 + $0xe68] ss:$16 sps:$4 sm:$0xff]  }
 0x708   : > { %13945 = vmatprep.subr.bf16.mxu1 %v26681_v16  ;;  %v26732_v16 = vld [vmem:[%s36351_s3 + $0xe84] ss:$16 sps:$4 sm:$0xff]  }
 0x70a   : > { %13844 = vmatpush1.bf16.msra.mxu0 %v26676_v59  ;;  %v26733_v59 = vld [vmem:[%s36351_s3 + $0xe88] ss:$16 sps:$4 sm:$0xff]  }
 0x70b   : > { %13946 = vmatpush1.bf16.msra.mxu1 %v26679_v44  ;;  %13845 = vmatprep.subr.bf16.mxu0 %v26684_v51  ;;  %v26738_v44 = vld [vmem:[%s36351_s3 + $0xea4] ss:$16 sps:$4 sm:$0xff]   ;;  %v26741_v51 = vld [vmem:[%s36351_s3 + $0xeac] ss:$16 sps:$4 sm:$0xff]  }
 0x70c   : > { %13947 = vmatprep.subr.bf16.mxu1 %v26687_v2  ;;  %v26736_v2 = vld [vmem:[%s36351_s3 + $0xea0] ss:$16 sps:$4 sm:$0xff]  }
 0x70e   : > { %13846 = vmatpush1.bf16.msra.mxu0 %v26682_v45  ;;  %v26739_v45 = vld [vmem:[%s36351_s3 + $0xea8] ss:$16 sps:$4 sm:$0xff]  }
 0x70f   : > { %13948 = vmatpush1.bf16.msra.mxu1 %v26685_v19  ;;  %13847 = vmatprep.subr.bf16.mxu0 %v26690_v20  ;;  %v26744_v19 = vld [vmem:[%s36351_s3 + $0xec4] ss:$16 sps:$4 sm:$0xff]   ;;  %v26747_v20 = vld [vmem:[%s36351_s3 + $0xecc] ss:$16 sps:$4 sm:$0xff]  }
 0x710   : > { %13949 = vmatprep.subr.bf16.mxu1 %v26693_v11  ;;  %v26742_v11 = vld [vmem:[%s36351_s3 + $0xec0] ss:$16 sps:$4 sm:$0xff]  }
 0x712   : > { %13848 = vmatpush1.bf16.msra.mxu0 %v26688_v22  ;;  %v26745_v22 = vld [vmem:[%s36351_s3 + $0xec8] ss:$16 sps:$4 sm:$0xff]  }
 0x713   : > { %13950 = vmatpush1.bf16.msra.mxu1 %v26691_v28  ;;  %13849 = vmatprep.subr.bf16.mxu0 %v26696_v50  ;;  %v26750_v28 = vld [vmem:[%s36351_s3 + $0xee4] ss:$16 sps:$4 sm:$0xff]  }
 0x714   : > { %13951 = vmatprep.subr.bf16.mxu1 %v26699_v23  ;;  %v26753_v23 = vld [vmem:[%s36351_s3 + $0xeec] ss:$16 sps:$4 sm:$0xff]  }
 0x716   : > { %13850 = vmatpush1.bf16.msra.mxu0 %v26694_v61 }
 0x717   : > { %13952 = vmatpush1.bf16.msra.mxu1 %v26697_v54  ;;  %13851 = vmatprep.subr.bf16.mxu0 %v26702_v13 }
 0x718   : > { %13953 = vmatprep.subr.bf16.mxu1 %v26705_v29 }
 0x71a   : > { %13852 = vmatpush1.bf16.msra.mxu0 %v26700_v17 }
 0x71b   : > { %13954 = vmatpush1.bf16.msra.mxu1 %v26703_v14  ;;  %13872 = vmatprep.subr.bf16.mxu0 %v26708_v60  ;;  %v26748_v60 = vld [vmem:[%s36351_s3 + $0xee0] ss:$16 sps:$4 sm:$0xff]  }
 0x71c   : > { %13974 = vmatprep.subr.bf16.mxu1 %v26711_v52 }
 0x71d   : > { %13854 = vmatmul.mubr.bf16.vlgmr.msra.gmra.mrb[76].mxu0 %v32511_v48 }
 0x71e   : > { %13956 = vmatmul.mubr.bf16.vlgmr.msra.gmra.mrb[76].mxu1 %v32511_v48  ;;  %13863 = vmatprep.mubr.bf16.mxu0 %v32480_v58  ;;  %v26723_v48 = vld [vmem:[%s36351_s3 + $0xe4c] ss:$16 sps:$4 sm:$0xff]  }
 0x71f   : > { %13873 = vmatpush1.bf16.msra.mxu0 %v26706_v25  ;;  %13965 = vmatprep.mubr.bf16.mxu1 %v32480_v58  ;;  %v26718_v58 = vld [vmem:[%s36351_s3 + $0xe40] ss:$16 sps:$4 sm:$0xff]  }
 0x720   : > { %13975 = vmatpush1.bf16.msra.mxu1 %v26709_v8  ;;  %13874 = vmatprep.subr.bf16.mxu0 %v26714_v34 }
 0x721   : > { %13976 = vmatprep.subr.bf16.mxu1 %v26717_v26  ;;  %v26759_v26 = vld [vmem:[%s36351_s3 + $0xf0c] ss:$16 sps:$4 sm:$0xff]  }
 0x723   : > { %13875 = vmatpush1.bf16.msra.mxu0 %v26712_v15  ;;  %v26757_v15 = vld [vmem:[%s36351_s3 + $0xf08] ss:$16 sps:$4 sm:$0xff]  }
 0x724   : > { %13977 = vmatpush1.bf16.msra.mxu1 %v26715_v24  ;;  %13876 = vmatprep.subr.bf16.mxu0 %v26720_v41  ;;  %v26762_v24 = vld [vmem:[%s36351_s3 + $0xf24] ss:$16 sps:$4 sm:$0xff]   ;;  %v26765_v41 = vld [vmem:[%s36351_s3 + $0xf2c] ss:$16 sps:$4 sm:$0xff]  }
 0x725   : > { %13864 = vmatmul.mubr.bf16.gmra.mrb[104].mxu0 %v32478_v21  ;;  %13978 = vmatprep.subr.bf16.mxu1 %v26723_v48  ;;  %v26760_v48 = vld [vmem:[%s36351_s3 + $0xf20] ss:$16 sps:$4 sm:$0xff]  }
 0x726   : > { %13966 = vmatmul.mubr.bf16.gmra.mrb[104].mxu1 %v32478_v21  ;;  %13904 = vmatprep.mubr.bf16.mxu0 %v32526_v38  ;;  %v26735_v21 = vld [vmem:[%s36351_s3 + $0xe8c] ss:$16 sps:$4 sm:$0xff]  }
 0x727   : > { %13877 = vmatpush1.bf16.msra.mxu0 %v26718_v58  ;;  %14006 = vmatprep.mubr.bf16.mxu1 %v32526_v38  ;;  %v26730_v38 = vld [vmem:[%s36351_s3 + $0xe80] ss:$16 sps:$4 sm:$0xff]   ;;  %v26763_v58 = vld [vmem:[%s36351_s3 + $0xf28] ss:$16 sps:$4 sm:$0xff]  }
 0x728   : > { %13979 = vmatpush1.bf16.msra.mxu1 %v26721_v6  ;;  %13878 = vmatprep.subr.bf16.mxu0 %v26726_v36  ;;  %v26768_v6 = vld [vmem:[%s36351_s3 + $0xf44] ss:$16 sps:$4 sm:$0xff]   ;;  %v26771_v36 = vld [vmem:[%s36351_s3 + $0xf4c] ss:$16 sps:$4 sm:$0xff]  }
 0x729   : > { %13980 = vmatprep.subr.bf16.mxu1 %v26729_v18  ;;  %v26766_v18 = vld [vmem:[%s36351_s3 + $0xf40] ss:$16 sps:$4 sm:$0xff]  }
 0x72b   : > { %13879 = vmatpush1.bf16.msra.mxu0 %v26724_v57  ;;  %v26769_v57 = vld [vmem:[%s36351_s3 + $0xf48] ss:$16 sps:$4 sm:$0xff]  }
 0x72c   : > { %13981 = vmatpush1.bf16.msra.mxu1 %v26727_v53  ;;  %13880 = vmatprep.subr.bf16.mxu0 %v26732_v16  ;;  %v26774_v53 = vld [vmem:[%s36351_s3 + $0xf64] ss:$16 sps:$4 sm:$0xff]   ;;  %v26777_v16 = vld [vmem:[%s36351_s3 + $0xf6c] ss:$16 sps:$4 sm:$0xff]  }
 0x72d   : > { %13982 = vmatprep.subr.bf16.mxu1 %v26735_v21  ;;  %v26772_v21 = vld [vmem:[%s36351_s3 + $0xf60] ss:$16 sps:$4 sm:$0xff]  }
 0x72f   : > { %13881 = vmatpush1.bf16.msra.mxu0 %v26730_v38  ;;  %v26775_v38 = vld [vmem:[%s36351_s3 + $0xf68] ss:$16 sps:$4 sm:$0xff]  }
 0x730   : > { %13983 = vmatpush1.bf16.msra.mxu1 %v26733_v59  ;;  %13882 = vmatprep.subr.bf16.mxu0 %v26738_v44  ;;  %v26780_v59 = vld [vmem:[%s36351_s3 + $0xf84] ss:$16 sps:$4 sm:$0xff]   ;;  %v26783_v44 = vld [vmem:[%s36351_s3 + $0xf8c] ss:$16 sps:$4 sm:$0xff]  }
 0x731   : > { %13984 = vmatprep.subr.bf16.mxu1 %v26741_v51  ;;  %v26778_v51 = vld [vmem:[%s36351_s3 + $0xf80] ss:$16 sps:$4 sm:$0xff]  }
 0x733   : > { %13883 = vmatpush1.bf16.msra.mxu0 %v26736_v2  ;;  %v26781_v2 = vld [vmem:[%s36351_s3 + $0xf88] ss:$16 sps:$4 sm:$0xff]  }
 0x734   : > { %13985 = vmatpush1.bf16.msra.mxu1 %v26739_v45  ;;  %13884 = vmatprep.subr.bf16.mxu0 %v26744_v19  ;;  %v26786_v45 = vld [vmem:[%s36351_s3 + $0xfa4] ss:$16 sps:$4 sm:$0xff]   ;;  %v26789_v19 = vld [vmem:[%s36351_s3 + $0xfac] ss:$16 sps:$4 sm:$0xff]  }
 0x735   : > { %13986 = vmatprep.subr.bf16.mxu1 %v26747_v20  ;;  %v11882_v50 = vpop.f32.mrb[92].mxu0  ;;  %v26784_v20 = vld [vmem:[%s36351_s3 + $0xfa0] ss:$16 sps:$4 sm:$0xff]  }
 0x736   : > { %v33954_v61 = vadd.f32 %v11882_v50, %v33742_v32  ;;  %v11984_v54 = vpop.f32.mrb[92].mxu1  ;;  %v11884_v13 = vpop.f32.mrb[93].mxu0  ;;  %v26751_v32 = vld [vmem:[%s36351_s3 + $0xee8] ss:$16 sps:$4 sm:$0xff]   ;;  %v26790_v50 = vld [vmem:[%s36351_s3 + $0xfc0] ss:$16 sps:$4 sm:$0xff]  }
 0x737   : > { %13885 = vmatpush1.bf16.msra.mxu0 %v26742_v11  ;;  %v33957_v29 = vadd.f32 %v11984_v54, %v33745_v27  ;;  %v33960_v17 = vadd.f32 %v11884_v13, %v33751_v31  ;;  %v11986_v14 = vpop.f32.mrb[93].mxu1  ;;  %v11886_v52 = vpop.f32.mrb[94].mxu0  ;;  %v26756_v31 = vld [vmem:[%s36351_s3 + $0xf04] ss:$16 sps:$4 sm:$0xff]   ;;  %v26787_v11 = vld [vmem:[%s36351_s3 + $0xfa8] ss:$16 sps:$4 sm:$0xff]  }
 0x738   : > { %13987 = vmatpush1.bf16.msra.mxu1 %v26745_v22  ;;  %v33966_v25 = vadd.f32 %v11986_v14, %v33754_v56  ;;  %13886 = vmatprep.subr.bf16.mxu0 %v26750_v28  ;;  %v11988_v27 = vpop.f32.mrb[94].mxu1  ;;  %v11887_v8 = vpop.f32.mrb[95].mxu0  ;;  %v26754_v56 = vld [vmem:[%s36351_s3 + $0xf00] ss:$16 sps:$4 sm:$0xff]   ;;  %v26792_v22 = vld [vmem:[%s36351_s3 + $0xfc4] ss:$16 sps:$4 sm:$0xff]  }
 0x739   : > { %13988 = vmatprep.subr.bf16.mxu1 %v26753_v23  ;;  %v11989_v34 = vpop.f32.mrb[95].mxu1  ;;  %v26795_v28 = vld [vmem:[%s36351_s3 + $0xfcc] ss:$16 sps:$4 sm:$0xff]   ;;  %v26793_v23 = vld [vmem:[%s36351_s3 + $0xfc8] ss:$16 sps:$4 sm:$0xff]  }
 0x73a   : > { %v26798_v54 = vld [vmem:[%s36351_s3 + $0xfe4] ss:$16 sps:$4 sm:$0xff]   ;;  %v26801_v13 = vld [vmem:[%s36351_s3 + $0xfec] ss:$16 sps:$4 sm:$0xff]   ;;  %v26796_v14 = vld [vmem:[%s36351_s3 + $0xfe0] ss:$16 sps:$4 sm:$0xff]  }
 0x73b   : > { %13887 = vmatpush1.bf16.msra.mxu0 %v26748_v60  ;;  %v26799_v60 = vld [vmem:[%s36351_s3 + $0xfe8] ss:$16 sps:$4 sm:$0xff]   ;;  %v26804_v52 = vld [vmem:[%s36351_s3 + $0x1004] ss:$16 sps:$4 sm:$0xff]   ;;  %v26802_v27 = vld [vmem:[%s36351_s3 + $0x1000] ss:$16 sps:$4 sm:$0xff]  }
 0x73c   : > { %13989 = vmatpush1.bf16.msra.mxu1 %v26751_v32  ;;  %13888 = vmatprep.subr.bf16.mxu0 %v26756_v31  ;;  %v26807_v32 = vld [vmem:[%s36351_s3 + $0x100c] ss:$16 sps:$4 sm:$0xff]   ;;  %v26805_v8 = vld [vmem:[%s36351_s3 + $0x1008] ss:$16 sps:$4 sm:$0xff]   ;;  %v26810_v31 = vld [vmem:[%s36351_s3 + $0x1024] ss:$16 sps:$4 sm:$0xff]  }
 0x73d   : > { %13990 = vmatprep.subr.bf16.mxu1 %v26759_v26  ;;  %v26813_v34 = vld [vmem:[%s36351_s3 + $0x102c] ss:$16 sps:$4 sm:$0xff]   ;;  %v26808_v26 = vld [vmem:[%s36351_s3 + $0x1020] ss:$16 sps:$4 sm:$0xff]  }
 0x73f   : > { %13889 = vmatpush1.bf16.msra.mxu0 %v26754_v56  ;;  %v26811_v56 = vld [vmem:[%s36351_s3 + $0x1028] ss:$16 sps:$4 sm:$0xff]  }
 0x740   : > { %13991 = vmatpush1.bf16.msra.mxu1 %v26757_v15  ;;  %13890 = vmatprep.subr.bf16.mxu0 %v26762_v24  ;;  %v26816_v15 = vld [vmem:[%s36351_s3 + $0x1044] ss:$16 sps:$4 sm:$0xff]   ;;  %v26817_v24 = vld [vmem:[%s36351_s3 + $0x1048] ss:$16 sps:$4 sm:$0xff]  }
 0x741   : > { %13992 = vmatprep.subr.bf16.mxu1 %v26765_v41  ;;  %v26822_v41 = vld [vmem:[%s36351_s3 + $0x1064] ss:$16 sps:$4 sm:$0xff]  }
 0x743   : > { %13891 = vmatpush1.bf16.msra.mxu0 %v26760_v48  ;;  %v26825_v48 = vld [vmem:[%s36351_s3 + $0x106c] ss:$16 sps:$4 sm:$0xff]  }
 0x744   : > { %13993 = vmatpush1.bf16.msra.mxu1 %v26763_v58  ;;  %13892 = vmatprep.subr.bf16.mxu0 %v26768_v6  ;;  %v26820_v58 = vld [vmem:[%s36351_s3 + $0x1060] ss:$16 sps:$4 sm:$0xff]   ;;  %v26823_v6 = vld [vmem:[%s36351_s3 + $0x1068] ss:$16 sps:$4 sm:$0xff]  }
 0x745   : > { %13994 = vmatprep.subr.bf16.mxu1 %v26771_v36  ;;  %v26828_v36 = vld [vmem:[%s36351_s3 + $0x1084] ss:$16 sps:$4 sm:$0xff]  }
 0x747   : > { %13893 = vmatpush1.bf16.msra.mxu0 %v26766_v18  ;;  %v26829_v18 = vld [vmem:[%s36351_s3 + $0x1088] ss:$16 sps:$4 sm:$0xff]  }
 0x748   : > { %13995 = vmatpush1.bf16.msra.mxu1 %v26769_v57  ;;  %13894 = vmatprep.subr.bf16.mxu0 %v26774_v53  ;;  %v26834_v57 = vld [vmem:[%s36351_s3 + $0x10a4] ss:$16 sps:$4 sm:$0xff]   ;;  %v26837_v53 = vld [vmem:[%s36351_s3 + $0x10ac] ss:$16 sps:$4 sm:$0xff]  }
 0x749   : > { %13996 = vmatprep.subr.bf16.mxu1 %v26777_v16  ;;  %v26832_v16 = vld [vmem:[%s36351_s3 + $0x10a0] ss:$16 sps:$4 sm:$0xff]  }
 0x74b   : > { %13895 = vmatpush1.bf16.msra.mxu0 %v26772_v21  ;;  %v26835_v21 = vld [vmem:[%s36351_s3 + $0x10a8] ss:$16 sps:$4 sm:$0xff]  }
 0x74c   : > { %13997 = vmatpush1.bf16.msra.mxu1 %v26775_v38  ;;  %13896 = vmatprep.subr.bf16.mxu0 %v26780_v59  ;;  %v26840_v38 = vld [vmem:[%s36351_s3 + $0x10c4] ss:$16 sps:$4 sm:$0xff]   ;;  %v26843_v59 = vld [vmem:[%s36351_s3 + $0x10cc] ss:$16 sps:$4 sm:$0xff]  }
 0x74d   : > { %13998 = vmatprep.subr.bf16.mxu1 %v26783_v44  ;;  %v26838_v44 = vld [vmem:[%s36351_s3 + $0x10c0] ss:$16 sps:$4 sm:$0xff]  }
 0x74f   : > { %13897 = vmatpush1.bf16.msra.mxu0 %v26778_v51  ;;  %v26841_v51 = vld [vmem:[%s36351_s3 + $0x10c8] ss:$16 sps:$4 sm:$0xff]  }
 0x750   : > { %13999 = vmatpush1.bf16.msra.mxu1 %v26781_v2  ;;  %13898 = vmatprep.subr.bf16.mxu0 %v26786_v45  ;;  %v26846_v2 = vld [vmem:[%s36351_s3 + $0x10e4] ss:$16 sps:$4 sm:$0xff]  }
 0x751   : > { %14000 = vmatprep.subr.bf16.mxu1 %v26789_v19  ;;  %v26849_v19 = vld [vmem:[%s36351_s3 + $0x10ec] ss:$16 sps:$4 sm:$0xff]  }
 0x753   : > { %13899 = vmatpush1.bf16.msra.mxu0 %v26784_v20 }
 0x754   : > { %14001 = vmatpush1.bf16.msra.mxu1 %v26787_v11  ;;  %13900 = vmatprep.subr.bf16.mxu0 %v26792_v22 }
 0x755   : > { %14002 = vmatprep.subr.bf16.mxu1 %v26795_v28  ;;  %v26844_v28 = vld [vmem:[%s36351_s3 + $0x10e0] ss:$16 sps:$4 sm:$0xff]  }
 0x757   : > { %13901 = vmatpush1.bf16.msra.mxu0 %v26790_v50 }
 0x758   : > { %14003 = vmatpush1.bf16.msra.mxu1 %v26793_v23  ;;  %13902 = vmatprep.subr.bf16.mxu0 %v26798_v54  ;;  %v26847_v23 = vld [vmem:[%s36351_s3 + $0x10e8] ss:$16 sps:$4 sm:$0xff]  }
 0x759   : > { %14004 = vmatprep.subr.bf16.mxu1 %v26801_v13 }
 0x75b   : > { %13903 = vmatpush1.bf16.msra.mxu0 %v26796_v14  ;;  %v26852_v14 = vld [vmem:[%s36351_s3 + $0x1104] ss:$16 sps:$4 sm:$0xff]  }
 0x75c   : > { %14005 = vmatpush1.bf16.msra.mxu1 %v26799_v60  ;;  %14894 = vmatprep.subr.bf16.mxu0 %v26804_v52  ;;  %v26855_v52 = vld [vmem:[%s36351_s3 + $0x110c] ss:$16 sps:$4 sm:$0xff]  }
 0x75d   : > { %14996 = vmatprep.subr.bf16.mxu1 %v26807_v32  ;;  %v26850_v32 = vld [vmem:[%s36351_s3 + $0x1100] ss:$16 sps:$4 sm:$0xff]  }
 0x75e   : > { %13905 = vmatmul.mubr.bf16.vlgmr.msra.gmra.mrb[76].mxu0 %v32517_v37 }
 0x75f   : > { %14007 = vmatmul.mubr.bf16.vlgmr.msra.gmra.mrb[76].mxu1 %v32517_v37  ;;  %13914 = vmatprep.mubr.bf16.mxu0 %v32495_v7  ;;  %v26814_v37 = vld [vmem:[%s36351_s3 + $0x1040] ss:$16 sps:$4 sm:$0xff]  }
 0x760   : > { %14016 = vmatprep.mubr.bf16.mxu1 %v32495_v7  ;;  %14895 = vmatpush1.bf16.msra.mxu0 %v26802_v27  ;;  %v26819_v7 = vld [vmem:[%s36351_s3 + $0x104c] ss:$16 sps:$4 sm:$0xff]   ;;  %v26853_v27 = vld [vmem:[%s36351_s3 + $0x1108] ss:$16 sps:$4 sm:$0xff]  }
 0x761   : > { %14997 = vmatpush1.bf16.msra.mxu1 %v26805_v8  ;;  %14896 = vmatprep.subr.bf16.mxu0 %v26810_v31  ;;  %v26858_v8 = vld [vmem:[%s36351_s3 + $0x1124] ss:$16 sps:$4 sm:$0xff]   ;;  %v26861_v31 = vld [vmem:[%s36351_s3 + $0x112c] ss:$16 sps:$4 sm:$0xff]  }
 0x762   : > { %14998 = vmatprep.subr.bf16.mxu1 %v26813_v34  ;;  %v26856_v34 = vld [vmem:[%s36351_s3 + $0x1120] ss:$16 sps:$4 sm:$0xff]  }
 0x764   : > { %14897 = vmatpush1.bf16.msra.mxu0 %v26808_v26  ;;  %v26859_v26 = vld [vmem:[%s36351_s3 + $0x1128] ss:$16 sps:$4 sm:$0xff]  }
 0x765   : > { %14999 = vmatpush1.bf16.msra.mxu1 %v26811_v56  ;;  %14898 = vmatprep.subr.bf16.mxu0 %v26816_v15  ;;  %v26864_v56 = vld [vmem:[%s36351_s3 + $0x1144] ss:$16 sps:$4 sm:$0xff]   ;;  %v26867_v15 = vld [vmem:[%s36351_s3 + $0x114c] ss:$16 sps:$4 sm:$0xff]  }
 0x766   : > { %13915 = vmatmul.mubr.bf16.gmra.mrb[108].mxu0 %v32482_v5  ;;  %15000 = vmatprep.subr.bf16.mxu1 %v26819_v7  ;;  %v26862_v7 = vld [vmem:[%s36351_s3 + $0x1140] ss:$16 sps:$4 sm:$0xff]  }
 0x767   : > { %14017 = vmatmul.mubr.bf16.gmra.mrb[108].mxu1 %v32482_v5  ;;  %14926 = vmatprep.mubr.bf16.mxu0 %v32571_v40  ;;  %v26831_v5 = vld [vmem:[%s36351_s3 + $0x108c] ss:$16 sps:$4 sm:$0xff]  }
 0x768   : > { %14899 = vmatpush1.bf16.msra.mxu0 %v26814_v37  ;;  %15028 = vmatprep.mubr.bf16.mxu1 %v32571_v40  ;;  %v26826_v40 = vld [vmem:[%s36351_s3 + $0x1080] ss:$16 sps:$4 sm:$0xff]   ;;  %v26865_v37 = vld [vmem:[%s36351_s3 + $0x1148] ss:$16 sps:$4 sm:$0xff]  }
 0x769   : > { %15001 = vmatpush1.bf16.msra.mxu1 %v26817_v24  ;;  %14900 = vmatprep.subr.bf16.mxu0 %v26822_v41  ;;  %v26870_v24 = vld [vmem:[%s36351_s3 + $0x1164] ss:$16 sps:$4 sm:$0xff]   ;;  %v26873_v41 = vld [vmem:[%s36351_s3 + $0x116c] ss:$16 sps:$4 sm:$0xff]  }
 0x76a   : > { %15002 = vmatprep.subr.bf16.mxu1 %v26825_v48  ;;  %v26868_v48 = vld [vmem:[%s36351_s3 + $0x1160] ss:$16 sps:$4 sm:$0xff]  }
 0x76c   : > { %14901 = vmatpush1.bf16.msra.mxu0 %v26820_v58  ;;  %v26871_v58 = vld [vmem:[%s36351_s3 + $0x1168] ss:$16 sps:$4 sm:$0xff]  }
 0x76d   : > { %15003 = vmatpush1.bf16.msra.mxu1 %v26823_v6  ;;  %14902 = vmatprep.subr.bf16.mxu0 %v26828_v36  ;;  %v26876_v6 = vld [vmem:[%s36351_s3 + $0x1184] ss:$16 sps:$4 sm:$0xff]   ;;  %v26879_v36 = vld [vmem:[%s36351_s3 + $0x118c] ss:$16 sps:$4 sm:$0xff]  }
 0x76e   : > { %15004 = vmatprep.subr.bf16.mxu1 %v26831_v5  ;;  %v26874_v5 = vld [vmem:[%s36351_s3 + $0x1180] ss:$16 sps:$4 sm:$0xff]  }
 0x770   : > { %14903 = vmatpush1.bf16.msra.mxu0 %v26826_v40  ;;  %v26877_v40 = vld [vmem:[%s36351_s3 + $0x1188] ss:$16 sps:$4 sm:$0xff]  }
 0x771   : > { %15005 = vmatpush1.bf16.msra.mxu1 %v26829_v18  ;;  %14904 = vmatprep.subr.bf16.mxu0 %v26834_v57  ;;  %v26882_v18 = vld [vmem:[%s36351_s3 + $0x11a4] ss:$16 sps:$4 sm:$0xff]   ;;  %v26885_v57 = vld [vmem:[%s36351_s3 + $0x11ac] ss:$16 sps:$4 sm:$0xff]  }
 0x772   : > { %15006 = vmatprep.subr.bf16.mxu1 %v26837_v53  ;;  %v26880_v53 = vld [vmem:[%s36351_s3 + $0x11a0] ss:$16 sps:$4 sm:$0xff]  }
 0x774   : > { %14905 = vmatpush1.bf16.msra.mxu0 %v26832_v16  ;;  %v26883_v16 = vld [vmem:[%s36351_s3 + $0x11a8] ss:$16 sps:$4 sm:$0xff]  }
 0x775   : > { %15007 = vmatpush1.bf16.msra.mxu1 %v26835_v21  ;;  %14906 = vmatprep.subr.bf16.mxu0 %v26840_v38  ;;  %v26888_v21 = vld [vmem:[%s36351_s3 + $0x11c4] ss:$16 sps:$4 sm:$0xff]   ;;  %v26891_v38 = vld [vmem:[%s36351_s3 + $0x11cc] ss:$16 sps:$4 sm:$0xff]  }
 0x776   : > { %15008 = vmatprep.subr.bf16.mxu1 %v26843_v59  ;;  %v34162_v45 = vpop.f32.mrb[96].mxu0  ;;  %v26886_v59 = vld [vmem:[%s36351_s3 + $0x11c0] ss:$16 sps:$4 sm:$0xff]  }
 0x777   : > { %v34167_v20 = vpop.f32.mrb[96].mxu1  ;;  %v34169_v11 = vpop.f32.mrb[97].mxu0 }
 0x778   : > { %14907 = vmatpush1.bf16.msra.mxu0 %v26838_v44  ;;  %v34171_v22 = vpop.f32.mrb[97].mxu1  ;;  %v12840_v50 = vpop.f32.mrb[98].mxu0  ;;  %v26889_v44 = vld [vmem:[%s36351_s3 + $0x11c8] ss:$16 sps:$4 sm:$0xff]  }
 0x779   : > { %15009 = vmatpush1.bf16.msra.mxu1 %v26841_v51  ;;  %14908 = vmatprep.subr.bf16.mxu0 %v26846_v2  ;;  %v12942_v54 = vpop.f32.mrb[98].mxu1  ;;  %v12841_v13 = vpop.f32.mrb[99].mxu0  ;;  %v26894_v51 = vld [vmem:[%s36351_s3 + $0x11e4] ss:$16 sps:$4 sm:$0xff]   ;;  %v26897_v2 = vld [vmem:[%s36351_s3 + $0x11ec] ss:$16 sps:$4 sm:$0xff]  }
 0x77a   : > { %15010 = vmatprep.subr.bf16.mxu1 %v26849_v19  ;;  %v12943_v60 = vpop.f32.mrb[99].mxu1  ;;  %v26892_v19 = vld [vmem:[%s36351_s3 + $0x11e0] ss:$16 sps:$4 sm:$0xff]   ;;  %v26900_v50 = vld [vmem:[%s36351_s3 + $0x1204] ss:$16 sps:$4 sm:$0xff]  }
 0x77b   : > { %v26898_v54 = vld [vmem:[%s36351_s3 + $0x1200] ss:$16 sps:$4 sm:$0xff]   ;;  %v26901_v13 = vld [vmem:[%s36351_s3 + $0x1208] ss:$16 sps:$4 sm:$0xff]   ;;  %v26909_v60 = vld [vmem:[%s36351_s3 + $0x122c] ss:$16 sps:$4 sm:$0xff]  }
 0x77c   : > { %14909 = vmatpush1.bf16.msra.mxu0 %v26844_v28  ;;  %v26895_v28 = vld [vmem:[%s36351_s3 + $0x11e8] ss:$16 sps:$4 sm:$0xff]  }
 0x77d   : > { %15011 = vmatpush1.bf16.msra.mxu1 %v26847_v23  ;;  %14910 = vmatprep.subr.bf16.mxu0 %v26852_v14  ;;  %v26903_v23 = vld [vmem:[%s36351_s3 + $0x120c] ss:$16 sps:$4 sm:$0xff]   ;;  %v26906_v14 = vld [vmem:[%s36351_s3 + $0x1224] ss:$16 sps:$4 sm:$0xff]  }
 0x77e   : > { %15012 = vmatprep.subr.bf16.mxu1 %v26855_v52  ;;  %v26904_v52 = vld [vmem:[%s36351_s3 + $0x1220] ss:$16 sps:$4 sm:$0xff]  }
 0x780   : > { %14911 = vmatpush1.bf16.msra.mxu0 %v26850_v32  ;;  %v26907_v32 = vld [vmem:[%s36351_s3 + $0x1228] ss:$16 sps:$4 sm:$0xff]  }
 0x781   : > { %15013 = vmatpush1.bf16.msra.mxu1 %v26853_v27  ;;  %14912 = vmatprep.subr.bf16.mxu0 %v26858_v8  ;;  %v26912_v27 = vld [vmem:[%s36351_s3 + $0x1244] ss:$16 sps:$4 sm:$0xff]   ;;  %v26913_v8 = vld [vmem:[%s36351_s3 + $0x1248] ss:$16 sps:$4 sm:$0xff]  }
 0x782   : > { %15014 = vmatprep.subr.bf16.mxu1 %v26861_v31  ;;  %v26918_v31 = vld [vmem:[%s36351_s3 + $0x1264] ss:$16 sps:$4 sm:$0xff]  }
 0x784   : > { %14913 = vmatpush1.bf16.msra.mxu0 %v26856_v34  ;;  %v26921_v34 = vld [vmem:[%s36351_s3 + $0x126c] ss:$16 sps:$4 sm:$0xff]  }
 0x785   : > { %15015 = vmatpush1.bf16.msra.mxu1 %v26859_v26  ;;  %14914 = vmatprep.subr.bf16.mxu0 %v26864_v56  ;;  %v26916_v26 = vld [vmem:[%s36351_s3 + $0x1260] ss:$16 sps:$4 sm:$0xff]   ;;  %v26919_v56 = vld [vmem:[%s36351_s3 + $0x1268] ss:$16 sps:$4 sm:$0xff]  }
 0x786   : > { %15016 = vmatprep.subr.bf16.mxu1 %v26867_v15  ;;  %v26924_v15 = vld [vmem:[%s36351_s3 + $0x1284] ss:$16 sps:$4 sm:$0xff]  }
 0x788   : > { %14915 = vmatpush1.bf16.msra.mxu0 %v26862_v7  ;;  %v26925_v7 = vld [vmem:[%s36351_s3 + $0x1288] ss:$16 sps:$4 sm:$0xff]  }
 0x789   : > { %15017 = vmatpush1.bf16.msra.mxu1 %v26865_v37  ;;  %14916 = vmatprep.subr.bf16.mxu0 %v26870_v24  ;;  %v26930_v37 = vld [vmem:[%s36351_s3 + $0x12a4] ss:$16 sps:$4 sm:$0xff]   ;;  %v26933_v24 = vld [vmem:[%s36351_s3 + $0x12ac] ss:$16 sps:$4 sm:$0xff]  }
 0x78a   : > { %15018 = vmatprep.subr.bf16.mxu1 %v26873_v41  ;;  %v26928_v41 = vld [vmem:[%s36351_s3 + $0x12a0] ss:$16 sps:$4 sm:$0xff]  }
 0x78c   : > { %14917 = vmatpush1.bf16.msra.mxu0 %v26868_v48  ;;  %v26931_v48 = vld [vmem:[%s36351_s3 + $0x12a8] ss:$16 sps:$4 sm:$0xff]  }
 0x78d   : > { %15019 = vmatpush1.bf16.msra.mxu1 %v26871_v58  ;;  %14918 = vmatprep.subr.bf16.mxu0 %v26876_v6  ;;  %v26936_v58 = vld [vmem:[%s36351_s3 + $0x12c4] ss:$16 sps:$4 sm:$0xff]   ;;  %v26939_v6 = vld [vmem:[%s36351_s3 + $0x12cc] ss:$16 sps:$4 sm:$0xff]  }
 0x78e   : > { %15020 = vmatprep.subr.bf16.mxu1 %v26879_v36  ;;  %v26934_v36 = vld [vmem:[%s36351_s3 + $0x12c0] ss:$16 sps:$4 sm:$0xff]  }
 0x790   : > { %14919 = vmatpush1.bf16.msra.mxu0 %v26874_v5  ;;  %v26937_v5 = vld [vmem:[%s36351_s3 + $0x12c8] ss:$16 sps:$4 sm:$0xff]  }
 0x791   : > { %15021 = vmatpush1.bf16.msra.mxu1 %v26877_v40  ;;  %14920 = vmatprep.subr.bf16.mxu0 %v26882_v18  ;;  %v26942_v40 = vld [vmem:[%s36351_s3 + $0x12e4] ss:$16 sps:$4 sm:$0xff]  }
 0x792   : > { %15022 = vmatprep.subr.bf16.mxu1 %v26885_v57  ;;  %v26945_v57 = vld [vmem:[%s36351_s3 + $0x12ec] ss:$16 sps:$4 sm:$0xff]  }
 0x794   : > { %14921 = vmatpush1.bf16.msra.mxu0 %v26880_v53 }
 0x795   : > { %15023 = vmatpush1.bf16.msra.mxu1 %v26883_v16  ;;  %14922 = vmatprep.subr.bf16.mxu0 %v26888_v21 }
 0x796   : > { %15024 = vmatprep.subr.bf16.mxu1 %v26891_v38 }
 0x798   : > { %14923 = vmatpush1.bf16.msra.mxu0 %v26886_v59 }
 0x799   : > { %15025 = vmatpush1.bf16.msra.mxu1 %v26889_v44  ;;  %14924 = vmatprep.subr.bf16.mxu0 %v26894_v51  ;;  %v26940_v51 = vld [vmem:[%s36351_s3 + $0x12e0] ss:$16 sps:$4 sm:$0xff]  }
 0x79a   : > { %15026 = vmatprep.subr.bf16.mxu1 %v26897_v2 }
 0x79c   : > { %14925 = vmatpush1.bf16.msra.mxu0 %v26892_v19 }
 0x79d   : > { %15027 = vmatpush1.bf16.msra.mxu1 %v26895_v28  ;;  %14945 = vmatprep.subr.bf16.mxu0 %v26900_v50 }
 0x79e   : > { %15047 = vmatprep.subr.bf16.mxu1 %v26903_v23 }
 0x79f   : > { %14927 = vmatmul.mubr.bf16.vlgmr.msra.gmra.mrb[76].mxu0 %v32580_v9 }
 0x7a0   : > { %15029 = vmatmul.mubr.bf16.vlgmr.msra.gmra.mrb[76].mxu1 %v32580_v9  ;;  %14936 = vmatprep.mubr.bf16.mxu0 %v32549_v10  ;;  %v26915_v9 = vld [vmem:[%s36351_s3 + $0x124c] ss:$16 sps:$4 sm:$0xff]  }
 0x7a1   : > { %14946 = vmatpush1.bf16.msra.mxu0 %v26898_v54  ;;  %15038 = vmatprep.mubr.bf16.mxu1 %v32549_v10  ;;  %v26910_v10 = vld [vmem:[%s36351_s3 + $0x1240] ss:$16 sps:$4 sm:$0xff]  }
 0x7a2   : > { %15048 = vmatpush1.bf16.msra.mxu1 %v26901_v13  ;;  %14947 = vmatprep.subr.bf16.mxu0 %v26906_v14  ;;  %v26946_v14 = vld [vmem:[%s36351_s3 + $0x1300] ss:$16 sps:$4 sm:$0xff]  }
 0x7a3   : > { %15049 = vmatprep.subr.bf16.mxu1 %v26909_v60  ;;  %v26952_v60 = vld [vmem:[%s36351_s3 + $0x1320] ss:$16 sps:$4 sm:$0xff]  }
 0x7a5   : > { %14948 = vmatpush1.bf16.msra.mxu0 %v26904_v52  ;;  %v26955_v52 = vld [vmem:[%s36351_s3 + $0x1328] ss:$16 sps:$4 sm:$0xff]  }
 0x7a6   : > { %15050 = vmatpush1.bf16.msra.mxu1 %v26907_v32  ;;  %14949 = vmatprep.subr.bf16.mxu0 %v26912_v27  ;;  %v26960_v32 = vld [vmem:[%s36351_s3 + $0x1344] ss:$16 sps:$4 sm:$0xff]   ;;  %v26963_v27 = vld [vmem:[%s36351_s3 + $0x134c] ss:$16 sps:$4 sm:$0xff]  }
 0x7a7   : > { %14937 = vmatmul.mubr.bf16.gmra.mrb[112].mxu0 %v32556_v63  ;;  %15051 = vmatprep.subr.bf16.mxu1 %v26915_v9  ;;  %v26958_v9 = vld [vmem:[%s36351_s3 + $0x1340] ss:$16 sps:$4 sm:$0xff]  }
 0x7a8   : > { %15039 = vmatmul.mubr.bf16.gmra.mrb[112].mxu1 %v32556_v63  ;;  %14977 = vmatprep.mubr.bf16.mxu0 %v32584_v47  ;;  %v26927_v63 = vld [vmem:[%s36351_s3 + $0x128c] ss:$16 sps:$4 sm:$0xff]  }
 0x7a9   : > { %14950 = vmatpush1.bf16.msra.mxu0 %v26910_v10  ;;  %15079 = vmatprep.mubr.bf16.mxu1 %v32584_v47  ;;  %v26922_v47 = vld [vmem:[%s36351_s3 + $0x1280] ss:$16 sps:$4 sm:$0xff]   ;;  %v26961_v10 = vld [vmem:[%s36351_s3 + $0x1348] ss:$16 sps:$4 sm:$0xff]  }
 0x7aa   : > { %15052 = vmatpush1.bf16.msra.mxu1 %v26913_v8  ;;  %14951 = vmatprep.subr.bf16.mxu0 %v26918_v31  ;;  %v26966_v8 = vld [vmem:[%s36351_s3 + $0x1364] ss:$16 sps:$4 sm:$0xff]   ;;  %v26969_v31 = vld [vmem:[%s36351_s3 + $0x136c] ss:$16 sps:$4 sm:$0xff]  }
 0x7ab   : > { %15053 = vmatprep.subr.bf16.mxu1 %v26921_v34  ;;  %v26964_v34 = vld [vmem:[%s36351_s3 + $0x1360] ss:$16 sps:$4 sm:$0xff]  }
 0x7ad   : > { %14952 = vmatpush1.bf16.msra.mxu0 %v26916_v26  ;;  %v26967_v26 = vld [vmem:[%s36351_s3 + $0x1368] ss:$16 sps:$4 sm:$0xff]  }
 0x7ae   : > { %15054 = vmatpush1.bf16.msra.mxu1 %v26919_v56  ;;  %14953 = vmatprep.subr.bf16.mxu0 %v26924_v15  ;;  %v26972_v56 = vld [vmem:[%s36351_s3 + $0x1384] ss:$16 sps:$4 sm:$0xff]   ;;  %v26975_v15 = vld [vmem:[%s36351_s3 + $0x138c] ss:$16 sps:$4 sm:$0xff]  }
 0x7af   : > { %15055 = vmatprep.subr.bf16.mxu1 %v26927_v63  ;;  %v26970_v63 = vld [vmem:[%s36351_s3 + $0x1380] ss:$16 sps:$4 sm:$0xff]  }
 0x7b1   : > { %14954 = vmatpush1.bf16.msra.mxu0 %v26922_v47  ;;  %v26973_v47 = vld [vmem:[%s36351_s3 + $0x1388] ss:$16 sps:$4 sm:$0xff]  }
 0x7b2   : > { %15056 = vmatpush1.bf16.msra.mxu1 %v26925_v7  ;;  %14955 = vmatprep.subr.bf16.mxu0 %v26930_v37  ;;  %v26978_v7 = vld [vmem:[%s36351_s3 + $0x13a4] ss:$16 sps:$4 sm:$0xff]   ;;  %v26981_v37 = vld [vmem:[%s36351_s3 + $0x13ac] ss:$16 sps:$4 sm:$0xff]  }
 0x7b3   : > { %15057 = vmatprep.subr.bf16.mxu1 %v26933_v24  ;;  %v26976_v24 = vld [vmem:[%s36351_s3 + $0x13a0] ss:$16 sps:$4 sm:$0xff]  }
 0x7b5   : > { %14956 = vmatpush1.bf16.msra.mxu0 %v26928_v41  ;;  %v26979_v41 = vld [vmem:[%s36351_s3 + $0x13a8] ss:$16 sps:$4 sm:$0xff]  }
 0x7b6   : > { %15058 = vmatpush1.bf16.msra.mxu1 %v26931_v48  ;;  %14957 = vmatprep.subr.bf16.mxu0 %v26936_v58  ;;  %v26984_v48 = vld [vmem:[%s36351_s3 + $0x13c4] ss:$16 sps:$4 sm:$0xff]   ;;  %v26987_v58 = vld [vmem:[%s36351_s3 + $0x13cc] ss:$16 sps:$4 sm:$0xff]  }
 0x7b7   : > { %15059 = vmatprep.subr.bf16.mxu1 %v26939_v6  ;;  %v12887_v18 = vpop.f32.mrb[100].mxu0  ;;  %v26982_v6 = vld [vmem:[%s36351_s3 + $0x13c0] ss:$16 sps:$4 sm:$0xff]  }
 0x7b8   : > { %v12888_v53 = vadd.f32 %v12887_v18, %v34162_v45  ;;  %v12989_v16 = vpop.f32.mrb[100].mxu1  ;;  %v12889_v21 = vpop.f32.mrb[101].mxu0  ;;  %v26943_v45 = vld [vmem:[%s36351_s3 + $0x12e8] ss:$16 sps:$4 sm:$0xff]   ;;  %v26988_v18 = vld [vmem:[%s36351_s3 + $0x13e0] ss:$16 sps:$4 sm:$0xff]  }
 0x7b9   : > { %14958 = vmatpush1.bf16.msra.mxu0 %v26934_v36  ;;  %v12990_v38 = vadd.f32 %v12989_v16, %v34167_v20  ;;  %v12890_v59 = vadd.f32 %v12889_v21, %v34169_v11  ;;  %v12991_v44 = vpop.f32.mrb[101].mxu1  ;;  %v12891_v2 = vpop.f32.mrb[102].mxu0  ;;  %v26948_v11 = vld [vmem:[%s36351_s3 + $0x1304] ss:$16 sps:$4 sm:$0xff]   ;;  %v26985_v36 = vld [vmem:[%s36351_s3 + $0x13c8] ss:$16 sps:$4 sm:$0xff]  }
 0x7ba   : > { %15060 = vmatpush1.bf16.msra.mxu1 %v26937_v5  ;;  %v34380_v19 = vadd.f32 %v12888_v53, %v33954_v61  ;;  %v12992_v28 = vadd.f32 %v12991_v44, %v34171_v22  ;;  %14959 = vmatprep.subr.bf16.mxu0 %v26942_v40  ;;  %v12993_v20 = vpop.f32.mrb[102].mxu1  ;;  %v12892_v50 = vpop.f32.mrb[103].mxu0  ;;  %v26951_v22 = vld [vmem:[%s36351_s3 + $0x130c] ss:$16 sps:$4 sm:$0xff]   ;;  %v26990_v5 = vld [vmem:[%s36351_s3 + $0x13e4] ss:$16 sps:$4 sm:$0xff]  }
 0x7bb   : > { %v34390_v23 = vadd.f32 %v12990_v38, %v33957_v29  ;;  %v34393_v54 = vadd.f32 %v12890_v59, %v33960_v17  ;;  %15061 = vmatprep.subr.bf16.mxu1 %v26945_v57  ;;  %v12994_v61 = vpop.f32.mrb[103].mxu1  ;;  %v26949_v29 = vld [vmem:[%s36351_s3 + $0x1308] ss:$16 sps:$4 sm:$0xff]   ;;  %v26954_v17 = vld [vmem:[%s36351_s3 + $0x1324] ss:$16 sps:$4 sm:$0xff]  }
 0x7bc   : > { %v34399_v13 = vadd.f32 %v12992_v28, %v33966_v25  ;;  %v26957_v25 = vld [vmem:[%s36351_s3 + $0x132c] ss:$16 sps:$4 sm:$0xff]   ;;  %v26991_v57 = vld [vmem:[%s36351_s3 + $0x13e8] ss:$16 sps:$4 sm:$0xff]   ;;  %v26996_v53 = vld [vmem:[%s36351_s3 + $0x1404] ss:$16 sps:$4 sm:$0xff]  }
 0x7bd   : > { %14960 = vmatpush1.bf16.msra.mxu0 %v26940_v51  ;;  %v26993_v40 = vld [vmem:[%s36351_s3 + $0x13ec] ss:$16 sps:$4 sm:$0xff]   ;;  %v26994_v21 = vld [vmem:[%s36351_s3 + $0x1400] ss:$16 sps:$4 sm:$0xff]   ;;  %v26997_v38 = vld [vmem:[%s36351_s3 + $0x1408] ss:$16 sps:$4 sm:$0xff]  }
 0x7be   : > { %15062 = vmatpush1.bf16.msra.mxu1 %v26943_v45  ;;  %14961 = vmatprep.subr.bf16.mxu0 %v26948_v11  ;;  %v26999_v16 = vld [vmem:[%s36351_s3 + $0x140c] ss:$16 sps:$4 sm:$0xff]   ;;  %v27002_v59 = vld [vmem:[%s36351_s3 + $0x1424] ss:$16 sps:$4 sm:$0xff]   ;;  %v27000_v51 = vld [vmem:[%s36351_s3 + $0x1420] ss:$16 sps:$4 sm:$0xff]  }
 0x7bf   : > { %15063 = vmatprep.subr.bf16.mxu1 %v26951_v22  ;;  %v27005_v44 = vld [vmem:[%s36351_s3 + $0x142c] ss:$16 sps:$4 sm:$0xff]   ;;  %v27003_v2 = vld [vmem:[%s36351_s3 + $0x1428] ss:$16 sps:$4 sm:$0xff]   ;;  %v27008_v28 = vld [vmem:[%s36351_s3 + $0x1444] ss:$16 sps:$4 sm:$0xff]  }
 0x7c0   : > { %v27009_v45 = vld [vmem:[%s36351_s3 + $0x1448] ss:$16 sps:$4 sm:$0xff]   ;;  %v27014_v20 = vld [vmem:[%s36351_s3 + $0x1464] ss:$16 sps:$4 sm:$0xff]   ;;  %v27017_v11 = vld [vmem:[%s36351_s3 + $0x146c] ss:$16 sps:$4 sm:$0xff]  }
 0x7c1   : > { %14962 = vmatpush1.bf16.msra.mxu0 %v26946_v14  ;;  %v36453_v50 = vld [vmem:[#allocation23_spill] sm:$0xff]  ;;  %v27015_v14 = vld [vmem:[%s36351_s3 + $0x1468] ss:$16 sps:$4 sm:$0xff]  }
 0x7c2   : > { %15064 = vmatpush1.bf16.msra.mxu1 %v26949_v29  ;;  %14963 = vmatprep.subr.bf16.mxu0 %v26954_v17  ;;  %v36454_v61 = vld [vmem:[#allocation19_spill] sm:$0xff]  ;;  %v27023_v17 = vld [vmem:[%s36351_s3 + $0x148c] ss:$16 sps:$4 sm:$0xff]  }
 0x7c3   : > { %15065 = vmatprep.subr.bf16.mxu1 %v26957_v25  ;;  %v27012_v22 = vld [vmem:[%s36351_s3 + $0x1460] ss:$16 sps:$4 sm:$0xff]   ;;  %v27020_v29 = vld [vmem:[%s36351_s3 + $0x1484] ss:$16 sps:$4 sm:$0xff]  }
 0x7c4   : > { %v27018_v25 = vld [vmem:[%s36351_s3 + $0x1480] ss:$16 sps:$4 sm:$0xff]  }
 0x7c5   : > { %14964 = vmatpush1.bf16.msra.mxu0 %v26952_v60  ;;  %v27021_v60 = vld [vmem:[%s36351_s3 + $0x1488] ss:$16 sps:$4 sm:$0xff]  }
 0x7c6   : > { %15066 = vmatpush1.bf16.msra.mxu1 %v26955_v52  ;;  %14965 = vmatprep.subr.bf16.mxu0 %v26960_v32  ;;  %v27026_v52 = vld [vmem:[%s36351_s3 + $0x14a4] ss:$16 sps:$4 sm:$0xff]   ;;  %v27029_v32 = vld [vmem:[%s36351_s3 + $0x14ac] ss:$16 sps:$4 sm:$0xff]  }
 0x7c7   : > { %15067 = vmatprep.subr.bf16.mxu1 %v26963_v27  ;;  %v27024_v27 = vld [vmem:[%s36351_s3 + $0x14a0] ss:$16 sps:$4 sm:$0xff]  }
 0x7c9   : > { %14966 = vmatpush1.bf16.msra.mxu0 %v26958_v9  ;;  %v27027_v9 = vld [vmem:[%s36351_s3 + $0x14a8] ss:$16 sps:$4 sm:$0xff]  }
 0x7ca   : > { %15068 = vmatpush1.bf16.msra.mxu1 %v26961_v10  ;;  %14967 = vmatprep.subr.bf16.mxu0 %v26966_v8  ;;  %v27032_v10 = vld [vmem:[%s36351_s3 + $0x14c4] ss:$16 sps:$4 sm:$0xff]   ;;  %v27035_v8 = vld [vmem:[%s36351_s3 + $0x14cc] ss:$16 sps:$4 sm:$0xff]  }
 0x7cb   : > { %15069 = vmatprep.subr.bf16.mxu1 %v26969_v31  ;;  %v27030_v31 = vld [vmem:[%s36351_s3 + $0x14c0] ss:$16 sps:$4 sm:$0xff]  }
 0x7cd   : > { %14968 = vmatpush1.bf16.msra.mxu0 %v26964_v34  ;;  %v27033_v34 = vld [vmem:[%s36351_s3 + $0x14c8] ss:$16 sps:$4 sm:$0xff]  }
 0x7ce   : > { %15070 = vmatpush1.bf16.msra.mxu1 %v26967_v26  ;;  %14969 = vmatprep.subr.bf16.mxu0 %v26972_v56  ;;  %v27038_v26 = vld [vmem:[%s36351_s3 + $0x14e4] ss:$16 sps:$4 sm:$0xff]  }
 0x7cf   : > { %15071 = vmatprep.subr.bf16.mxu1 %v26975_v15  ;;  %v27041_v15 = vld [vmem:[%s36351_s3 + $0x14ec] ss:$16 sps:$4 sm:$0xff]  }
 0x7d1   : > { %14970 = vmatpush1.bf16.msra.mxu0 %v26970_v63 }
 0x7d2   : > { %15072 = vmatpush1.bf16.msra.mxu1 %v26973_v47  ;;  %14971 = vmatprep.subr.bf16.mxu0 %v26978_v7 }
 0x7d3   : > { %15073 = vmatprep.subr.bf16.mxu1 %v26981_v37  ;;  %v27036_v37 = vld [vmem:[%s36351_s3 + $0x14e0] ss:$16 sps:$4 sm:$0xff]  }
 0x7d5   : > { %14972 = vmatpush1.bf16.msra.mxu0 %v26976_v24 }
 0x7d6   : > { %15074 = vmatpush1.bf16.msra.mxu1 %v26979_v41  ;;  %14973 = vmatprep.subr.bf16.mxu0 %v26984_v48  ;;  %v27039_v41 = vld [vmem:[%s36351_s3 + $0x14e8] ss:$16 sps:$4 sm:$0xff]  }
 0x7d7   : > { %15075 = vmatprep.subr.bf16.mxu1 %v26987_v58 }
 0x7d9   : > { %14974 = vmatpush1.bf16.msra.mxu0 %v26982_v6  ;;  %v27044_v6 = vld [vmem:[%s36351_s3 + $0x1504] ss:$16 sps:$4 sm:$0xff]  }
 0x7da   : > { %15076 = vmatpush1.bf16.msra.mxu1 %v26985_v36  ;;  %14975 = vmatprep.subr.bf16.mxu0 %v26990_v5  ;;  %v27047_v5 = vld [vmem:[%s36351_s3 + $0x150c] ss:$16 sps:$4 sm:$0xff]  }
 0x7db   : > { %15077 = vmatprep.subr.bf16.mxu1 %v26993_v40  ;;  %v27042_v40 = vld [vmem:[%s36351_s3 + $0x1500] ss:$16 sps:$4 sm:$0xff]  }
 0x7dd   : > { %14976 = vmatpush1.bf16.msra.mxu0 %v26988_v18  ;;  %v27045_v18 = vld [vmem:[%s36351_s3 + $0x1508] ss:$16 sps:$4 sm:$0xff]  }
 0x7de   : > { %15078 = vmatpush1.bf16.msra.mxu1 %v26991_v57  ;;  %15895 = vmatprep.subr.bf16.mxu0 %v26996_v53  ;;  %v27050_v57 = vld [vmem:[%s36351_s3 + $0x1524] ss:$16 sps:$4 sm:$0xff]   ;;  %v27053_v53 = vld [vmem:[%s36351_s3 + $0x152c] ss:$16 sps:$4 sm:$0xff]  }
 0x7df   : > { %15997 = vmatprep.subr.bf16.mxu1 %v26999_v16  ;;  %v27048_v16 = vld [vmem:[%s36351_s3 + $0x1520] ss:$16 sps:$4 sm:$0xff]  }
 0x7e0   : > { %14978 = vmatmul.mubr.bf16.vlgmr.msra.gmra.mrb[76].mxu0 %v32611_v1 }
 0x7e1   : > { %15080 = vmatmul.mubr.bf16.vlgmr.msra.gmra.mrb[76].mxu1 %v32611_v1  ;;  %14987 = vmatprep.mubr.bf16.mxu0 %v32574_v43  ;;  %v27006_v1 = vld [vmem:[%s36351_s3 + $0x1440] ss:$16 sps:$4 sm:$0xff]  }
 0x7e2   : > { %15089 = vmatprep.mubr.bf16.mxu1 %v32574_v43  ;;  %15896 = vmatpush1.bf16.msra.mxu0 %v26994_v21  ;;  %v27011_v43 = vld [vmem:[%s36351_s3 + $0x144c] ss:$16 sps:$4 sm:$0xff]   ;;  %v27051_v21 = vld [vmem:[%s36351_s3 + $0x1528] ss:$16 sps:$4 sm:$0xff]  }
 0x7e3   : > { %15998 = vmatpush1.bf16.msra.mxu1 %v26997_v38  ;;  %15897 = vmatprep.subr.bf16.mxu0 %v27002_v59  ;;  %v27056_v38 = vld [vmem:[%s36351_s3 + $0x1544] ss:$16 sps:$4 sm:$0xff]   ;;  %v27059_v59 = vld [vmem:[%s36351_s3 + $0x154c] ss:$16 sps:$4 sm:$0xff]  }
 0x7e4   : > { %15999 = vmatprep.subr.bf16.mxu1 %v27005_v44  ;;  %v27054_v44 = vld [vmem:[%s36351_s3 + $0x1540] ss:$16 sps:$4 sm:$0xff]  }
 0x7e6   : > { %15898 = vmatpush1.bf16.msra.mxu0 %v27000_v51  ;;  %v27057_v51 = vld [vmem:[%s36351_s3 + $0x1548] ss:$16 sps:$4 sm:$0xff]  }
 0x7e7   : > { %16000 = vmatpush1.bf16.msra.mxu1 %v27003_v2  ;;  %15899 = vmatprep.subr.bf16.mxu0 %v27008_v28  ;;  %v27062_v2 = vld [vmem:[%s36351_s3 + $0x1564] ss:$16 sps:$4 sm:$0xff]   ;;  %v27065_v28 = vld [vmem:[%s36351_s3 + $0x156c] ss:$16 sps:$4 sm:$0xff]  }
 0x7e8   : > { %14988 = vmatmul.mubr.bf16.gmra.mrb[116].mxu0 %v36453_v50  ;;  %16001 = vmatprep.subr.bf16.mxu1 %v27011_v43  ;;  %v27060_v43 = vld [vmem:[%s36351_s3 + $0x1560] ss:$16 sps:$4 sm:$0xff]  }
 0x7e9   : > { %15090 = vmatmul.mubr.bf16.gmra.mrb[116].mxu1 %v36453_v50  ;;  %15927 = vmatprep.mubr.bf16.mxu0 %v36454_v61  ;;  %v27066_v50 = vld [vmem:[%s36351_s3 + $0x1580] ss:$16 sps:$4 sm:$0xff]  }
 0x7ea   : > { %15900 = vmatpush1.bf16.msra.mxu0 %v27006_v1  ;;  %16029 = vmatprep.mubr.bf16.mxu1 %v36454_v61  ;;  %v27063_v1 = vld [vmem:[%s36351_s3 + $0x1568] ss:$16 sps:$4 sm:$0xff]   ;;  %v27074_v61 = vld [vmem:[%s36351_s3 + $0x15a4] ss:$16 sps:$4 sm:$0xff]  }
 0x7eb   : > { %16002 = vmatpush1.bf16.msra.mxu1 %v27009_v45  ;;  %15901 = vmatprep.subr.bf16.mxu0 %v27014_v20  ;;  %v27068_v45 = vld [vmem:[%s36351_s3 + $0x1584] ss:$16 sps:$4 sm:$0xff]   ;;  %v27071_v20 = vld [vmem:[%s36351_s3 + $0x158c] ss:$16 sps:$4 sm:$0xff]  }
 0x7ec   : > { %16003 = vmatprep.subr.bf16.mxu1 %v27017_v11  ;;  %v27069_v11 = vld [vmem:[%s36351_s3 + $0x1588] ss:$16 sps:$4 sm:$0xff]  }
 0x7ee   : > { %15902 = vmatpush1.bf16.msra.mxu0 %v27012_v22  ;;  %v27077_v22 = vld [vmem:[%s36351_s3 + $0x15ac] ss:$16 sps:$4 sm:$0xff]  }
 0x7ef   : > { %16004 = vmatpush1.bf16.msra.mxu1 %v27015_v14  ;;  %15903 = vmatprep.subr.bf16.mxu0 %v27020_v29  ;;  %v27072_v14 = vld [vmem:[%s36351_s3 + $0x15a0] ss:$16 sps:$4 sm:$0xff]   ;;  %v27075_v29 = vld [vmem:[%s36351_s3 + $0x15a8] ss:$16 sps:$4 sm:$0xff]  }
 0x7f0   : > { %16005 = vmatprep.subr.bf16.mxu1 %v27023_v17  ;;  %v27080_v17 = vld [vmem:[%s36351_s3 + $0x15c4] ss:$16 sps:$4 sm:$0xff]  }
 0x7f2   : > { %15904 = vmatpush1.bf16.msra.mxu0 %v27018_v25  ;;  %v27083_v25 = vld [vmem:[%s36351_s3 + $0x15cc] ss:$16 sps:$4 sm:$0xff]  }
 0x7f3   : > { %16006 = vmatpush1.bf16.msra.mxu1 %v27021_v60  ;;  %15905 = vmatprep.subr.bf16.mxu0 %v27026_v52  ;;  %v27078_v60 = vld [vmem:[%s36351_s3 + $0x15c0] ss:$16 sps:$4 sm:$0xff]   ;;  %v27081_v52 = vld [vmem:[%s36351_s3 + $0x15c8] ss:$16 sps:$4 sm:$0xff]  }
 0x7f4   : > { %16007 = vmatprep.subr.bf16.mxu1 %v27029_v32  ;;  %v27086_v32 = vld [vmem:[%s36351_s3 + $0x15e4] ss:$16 sps:$4 sm:$0xff]  }
 0x7f6   : > { %15906 = vmatpush1.bf16.msra.mxu0 %v27024_v27  ;;  %v27089_v27 = vld [vmem:[%s36351_s3 + $0x15ec] ss:$16 sps:$4 sm:$0xff]  }
 0x7f7   : > { %16008 = vmatpush1.bf16.msra.mxu1 %v27027_v9  ;;  %15907 = vmatprep.subr.bf16.mxu0 %v27032_v10  ;;  %v27084_v9 = vld [vmem:[%s36351_s3 + $0x15e0] ss:$16 sps:$4 sm:$0xff]   ;;  %v27087_v10 = vld [vmem:[%s36351_s3 + $0x15e8] ss:$16 sps:$4 sm:$0xff]  }
 0x7f8   : > { %16009 = vmatprep.subr.bf16.mxu1 %v27035_v8  ;;  %v34586_v56 = vpop.f32.mrb[104].mxu0  ;;  %v27092_v8 = vld [vmem:[%s36351_s3 + $0x1604] ss:$16 sps:$4 sm:$0xff]  }
 0x7f9   : > { %v34591_v63 = vpop.f32.mrb[104].mxu1  ;;  %v34593_v47 = vpop.f32.mrb[105].mxu0 }
 0x7fa   : > { %15908 = vmatpush1.bf16.msra.mxu0 %v27030_v31  ;;  %v34595_v7 = vpop.f32.mrb[105].mxu1  ;;  %v13869_v24 = vpop.f32.mrb[106].mxu0  ;;  %v27095_v31 = vld [vmem:[%s36351_s3 + $0x160c] ss:$16 sps:$4 sm:$0xff]  }
 0x7fb   : > { %16010 = vmatpush1.bf16.msra.mxu1 %v27033_v34  ;;  %15909 = vmatprep.subr.bf16.mxu0 %v27038_v26  ;;  %v13971_v48 = vpop.f32.mrb[106].mxu1  ;;  %v13870_v58 = vpop.f32.mrb[107].mxu0  ;;  %v27090_v34 = vld [vmem:[%s36351_s3 + $0x1600] ss:$16 sps:$4 sm:$0xff]   ;;  %v27093_v26 = vld [vmem:[%s36351_s3 + $0x1608] ss:$16 sps:$4 sm:$0xff]  }
 0x7fc   : > { %16011 = vmatprep.subr.bf16.mxu1 %v27041_v15  ;;  %v13972_v36 = vpop.f32.mrb[107].mxu1  ;;  %v27804_v15 = vld [vmem:[#allocation2 + $0x30] sm:$0xff]  ;;  %v27102_v48 = vld [vmem:[%s36351_s3 + $0x162c] ss:$16 sps:$4 sm:$0xff]  }
 0x7fd   : > { %v27099_v24 = vld [vmem:[%s36351_s3 + $0x1624] ss:$16 sps:$4 sm:$0xff]   ;;  %v27097_v58 = vld [vmem:[%s36351_s3 + $0x1620] ss:$16 sps:$4 sm:$0xff]  }
 0x7fe   : > { %15910 = vmatpush1.bf16.msra.mxu0 %v27036_v37  ;;  %v23043_v37 = vcombine.high %v27804_v15, %v27804_v15  ;;  %v27106_v36 = vld [vmem:[%s36351_s3 + $0x1644] ss:$16 sps:$4 sm:$0xff]  }
 0x7ff   : > { %16012 = vmatpush1.bf16.msra.mxu1 %v27039_v41  ;;  %15911 = vmatprep.subr.bf16.mxu0 %v27044_v6  ;;  %v36455_v41 = vld [vmem:[#allocation20_spill] sm:$0xff] }
 0x800   : > { %16013 = vmatprep.subr.bf16.mxu1 %v27047_v5  ;;  %v27100_v6 = vld [vmem:[%s36351_s3 + $0x1628] ss:$16 sps:$4 sm:$0xff]   ;;  %v27109_v5 = vld [vmem:[%s36351_s3 + $0x164c] ss:$16 sps:$4 sm:$0xff]  }
 0x802   : > { %15912 = vmatpush1.bf16.msra.mxu0 %v27042_v40  ;;  %v23042_v40 = vcombine.low %v27804_v15, %v27804_v15 }
 0x803   : > { %16014 = vmatpush1.bf16.msra.mxu1 %v27045_v18  ;;  %15913 = vmatprep.subr.bf16.mxu0 %v27050_v57  ;;  %v27104_v18 = vld [vmem:[%s36351_s3 + $0x1640] ss:$16 sps:$4 sm:$0xff]   ;;  %v27107_v57 = vld [vmem:[%s36351_s3 + $0x1648] ss:$16 sps:$4 sm:$0xff]  }
 0x804   : > { %16015 = vmatprep.subr.bf16.mxu1 %v27053_v53  ;;  %v27112_v53 = vld [vmem:[%s36351_s3 + $0x1664] ss:$16 sps:$4 sm:$0xff]  }
 0x806   : > { %15914 = vmatpush1.bf16.msra.mxu0 %v27048_v16  ;;  %v27115_v16 = vld [vmem:[%s36351_s3 + $0x166c] ss:$16 sps:$4 sm:$0xff]  }
 0x807   : > { %16016 = vmatpush1.bf16.msra.mxu1 %v27051_v21  ;;  %15915 = vmatprep.subr.bf16.mxu0 %v27056_v38  ;;  %v36456_v21 = vld [vmem:[#allocation21_spill] sm:$0xff] }
 0x808   : > { %16017 = vmatprep.subr.bf16.mxu1 %v27059_v59  ;;  %v27110_v38 = vld [vmem:[%s36351_s3 + $0x1660] ss:$16 sps:$4 sm:$0xff]   ;;  %v27113_v59 = vld [vmem:[%s36351_s3 + $0x1668] ss:$16 sps:$4 sm:$0xff]  }
 0x80a   : > { %15916 = vmatpush1.bf16.msra.mxu0 %v27054_v44  ;;  %v27118_v44 = vld [vmem:[%s36351_s3 + $0x1684] ss:$16 sps:$4 sm:$0xff]  }
 0x80b   : > { %16018 = vmatpush1.bf16.msra.mxu1 %v27057_v51  ;;  %15917 = vmatprep.subr.bf16.mxu0 %v27062_v2  ;;  %v27121_v51 = vld [vmem:[%s36351_s3 + $0x168c] ss:$16 sps:$4 sm:$0xff]   ;;  %v27116_v2 = vld [vmem:[%s36351_s3 + $0x1680] ss:$16 sps:$4 sm:$0xff]  }
 0x80c   : > { %16019 = vmatprep.subr.bf16.mxu1 %v27065_v28  ;;  %v27119_v28 = vld [vmem:[%s36351_s3 + $0x1688] ss:$16 sps:$4 sm:$0xff]  }
 0x80e   : > { %15918 = vmatpush1.bf16.msra.mxu0 %v27060_v43  ;;  %v27124_v43 = vld [vmem:[%s36351_s3 + $0x16a4] ss:$16 sps:$4 sm:$0xff]  }
 0x80f   : > { %16020 = vmatpush1.bf16.msra.mxu1 %v27063_v1  ;;  %15919 = vmatprep.subr.bf16.mxu0 %v27068_v45  ;;  %v27127_v1 = vld [vmem:[%s36351_s3 + $0x16ac] ss:$16 sps:$4 sm:$0xff]   ;;  %v27122_v45 = vld [vmem:[%s36351_s3 + $0x16a0] ss:$16 sps:$4 sm:$0xff]  }
 0x810   : > { %16021 = vmatprep.subr.bf16.mxu1 %v27071_v20  ;;  %v27125_v20 = vld [vmem:[%s36351_s3 + $0x16a8] ss:$16 sps:$4 sm:$0xff]  }
 0x812   : > { %15920 = vmatpush1.bf16.msra.mxu0 %v27066_v50  ;;  %v27130_v50 = vld [vmem:[%s36351_s3 + $0x16c4] ss:$16 sps:$4 sm:$0xff]  }
 0x813   : > { %16022 = vmatpush1.bf16.msra.mxu1 %v27069_v11  ;;  %15921 = vmatprep.subr.bf16.mxu0 %v27074_v61  ;;  %v27133_v11 = vld [vmem:[%s36351_s3 + $0x16cc] ss:$16 sps:$4 sm:$0xff]   ;;  %v27128_v61 = vld [vmem:[%s36351_s3 + $0x16c0] ss:$16 sps:$4 sm:$0xff]  }
 0x814   : > { %16023 = vmatprep.subr.bf16.mxu1 %v27077_v22  ;;  %v27131_v22 = vld [vmem:[%s36351_s3 + $0x16c8] ss:$16 sps:$4 sm:$0xff]  }
 0x816   : > { %15922 = vmatpush1.bf16.msra.mxu0 %v27072_v14  ;;  %v27136_v14 = vld [vmem:[%s36351_s3 + $0x16e4] ss:$16 sps:$4 sm:$0xff]  }
 0x817   : > { %16024 = vmatpush1.bf16.msra.mxu1 %v27075_v29  ;;  %15923 = vmatprep.subr.bf16.mxu0 %v27080_v17  ;;  %v27139_v17 = vld [vmem:[%s36351_s3 + $0x16ec] ss:$16 sps:$4 sm:$0xff]  }
 0x818   : > { %16025 = vmatprep.subr.bf16.mxu1 %v27083_v25 }
 0x81a   : > { %15924 = vmatpush1.bf16.msra.mxu0 %v27078_v60 }
 0x81b   : > { %16026 = vmatpush1.bf16.msra.mxu1 %v27081_v52  ;;  %15925 = vmatprep.subr.bf16.mxu0 %v27086_v32 }
 0x81c   : > { %16027 = vmatprep.subr.bf16.mxu1 %v27089_v27 }
 0x81e   : > { %15926 = vmatpush1.bf16.msra.mxu0 %v27084_v9 }
 0x81f   : > { %16028 = vmatpush1.bf16.msra.mxu1 %v27087_v10  ;;  %15946 = vmatprep.subr.bf16.mxu0 %v27092_v8  ;;  %v27134_v10 = vld [vmem:[%s36351_s3 + $0x16e0] ss:$16 sps:$4 sm:$0xff]  }
 0x820   : > { %16048 = vmatprep.subr.bf16.mxu1 %v27095_v31 }
 0x821   : > { %15928 = vmatmul.mubr.bf16.vlgmr.msra.gmra.mrb[76].mxu0 %v36455_v41 }
 0x822   : > { %16030 = vmatmul.mubr.bf16.vlgmr.msra.gmra.mrb[76].mxu1 %v36455_v41  ;;  %15937 = vmatprep.mubr.bf16.mxu0 %v23043_v37  ;;  %v27140_v41 = vld [vmem:[%s36351_s3 + $0x1700] ss:$16 sps:$4 sm:$0xff]  }
 0x823   : > { %15947 = vmatpush1.bf16.msra.mxu0 %v27090_v34  ;;  %16039 = vmatprep.mubr.bf16.mxu1 %v23043_v37 }
 0x824   : > { %16049 = vmatpush1.bf16.msra.mxu1 %v27093_v26  ;;  %15948 = vmatprep.subr.bf16.mxu0 %v27099_v24 }
 0x825   : > { %16050 = vmatprep.subr.bf16.mxu1 %v27102_v48  ;;  %v27146_v48 = vld [vmem:[%s36351_s3 + $0x1720] ss:$16 sps:$4 sm:$0xff]  }
 0x827   : > { %15949 = vmatpush1.bf16.msra.mxu0 %v27097_v58  ;;  %v27149_v58 = vld [vmem:[%s36351_s3 + $0x1728] ss:$16 sps:$4 sm:$0xff]  }
 0x828   : > { %16051 = vmatpush1.bf16.msra.mxu1 %v27100_v6  ;;  %15950 = vmatprep.subr.bf16.mxu0 %v27106_v36  ;;  %v27154_v6 = vld [vmem:[%s36351_s3 + $0x1744] ss:$16 sps:$4 sm:$0xff]   ;;  %v27157_v36 = vld [vmem:[%s36351_s3 + $0x174c] ss:$16 sps:$4 sm:$0xff]  }
 0x829   : > { %15938 = vmatmul.mubr.bf16.gmra.mrb[120].mxu0 %v23042_v40  ;;  %16052 = vmatprep.subr.bf16.mxu1 %v27109_v5  ;;  %v27152_v5 = vld [vmem:[%s36351_s3 + $0x1740] ss:$16 sps:$4 sm:$0xff]  }
 0x82a   : > { %16040 = vmatmul.mubr.bf16.gmra.mrb[120].mxu1 %v23042_v40  ;;  %15978 = vmatprep.mubr.bf16.mxu0 %v36456_v21  ;;  %v27155_v40 = vld [vmem:[%s36351_s3 + $0x1748] ss:$16 sps:$4 sm:$0xff]  }
 0x82b   : > { %15951 = vmatpush1.bf16.msra.mxu0 %v27104_v18  ;;  %16080 = vmatprep.mubr.bf16.mxu1 %v36456_v21  ;;  %v27160_v18 = vld [vmem:[%s36351_s3 + $0x1764] ss:$16 sps:$4 sm:$0xff]  }
 0x82c   : > { %16053 = vmatpush1.bf16.msra.mxu1 %v27107_v57  ;;  %15952 = vmatprep.subr.bf16.mxu0 %v27112_v53  ;;  %v27163_v57 = vld [vmem:[%s36351_s3 + $0x176c] ss:$16 sps:$4 sm:$0xff]   ;;  %v27158_v53 = vld [vmem:[%s36351_s3 + $0x1760] ss:$16 sps:$4 sm:$0xff]   ;;  %v27166_v21 = vld [vmem:[%s36351_s3 + $0x1784] ss:$16 sps:$4 sm:$0xff]  }
 0x82d   : > { %16054 = vmatprep.subr.bf16.mxu1 %v27115_v16  ;;  %v27161_v16 = vld [vmem:[%s36351_s3 + $0x1768] ss:$16 sps:$4 sm:$0xff]  }
 0x82f   : > { %15953 = vmatpush1.bf16.msra.mxu0 %v27110_v38  ;;  %v27169_v38 = vld [vmem:[%s36351_s3 + $0x178c] ss:$16 sps:$4 sm:$0xff]  }
 0x830   : > { %16055 = vmatpush1.bf16.msra.mxu1 %v27113_v59  ;;  %15954 = vmatprep.subr.bf16.mxu0 %v27118_v44  ;;  %v27164_v59 = vld [vmem:[%s36351_s3 + $0x1780] ss:$16 sps:$4 sm:$0xff]   ;;  %v27167_v44 = vld [vmem:[%s36351_s3 + $0x1788] ss:$16 sps:$4 sm:$0xff]  }
 0x831   : > { %16056 = vmatprep.subr.bf16.mxu1 %v27121_v51  ;;  %v27172_v51 = vld [vmem:[%s36351_s3 + $0x17a4] ss:$16 sps:$4 sm:$0xff]  }
 0x833   : > { %15955 = vmatpush1.bf16.msra.mxu0 %v27116_v2  ;;  %v27175_v2 = vld [vmem:[%s36351_s3 + $0x17ac] ss:$16 sps:$4 sm:$0xff]  }
 0x834   : > { %16057 = vmatpush1.bf16.msra.mxu1 %v27119_v28  ;;  %15956 = vmatprep.subr.bf16.mxu0 %v27124_v43  ;;  %v27170_v28 = vld [vmem:[%s36351_s3 + $0x17a0] ss:$16 sps:$4 sm:$0xff]   ;;  %v27173_v43 = vld [vmem:[%s36351_s3 + $0x17a8] ss:$16 sps:$4 sm:$0xff]  }
 0x835   : > { %16058 = vmatprep.subr.bf16.mxu1 %v27127_v1  ;;  %v27178_v1 = vld [vmem:[%s36351_s3 + $0x17c4] ss:$16 sps:$4 sm:$0xff]  }
 0x837   : > { %15957 = vmatpush1.bf16.msra.mxu0 %v27122_v45  ;;  %v27181_v45 = vld [vmem:[%s36351_s3 + $0x17cc] ss:$16 sps:$4 sm:$0xff]  }
 0x838   : > { %16059 = vmatpush1.bf16.msra.mxu1 %v27125_v20  ;;  %15958 = vmatprep.subr.bf16.mxu0 %v27130_v50  ;;  %v27176_v20 = vld [vmem:[%s36351_s3 + $0x17c0] ss:$16 sps:$4 sm:$0xff]   ;;  %v27179_v50 = vld [vmem:[%s36351_s3 + $0x17c8] ss:$16 sps:$4 sm:$0xff]  }
 0x839   : > { %16060 = vmatprep.subr.bf16.mxu1 %v27133_v11  ;;  %v13916_v29 = vpop.f32.mrb[108].mxu0  ;;  %v27184_v11 = vld [vmem:[%s36351_s3 + $0x17e4] ss:$16 sps:$4 sm:$0xff]  }
 0x83a   : > { %v13917_v25 = vadd.f32 %v13916_v29, %v34586_v56  ;;  %v14018_v60 = vpop.f32.mrb[108].mxu1  ;;  %v13918_v52 = vpop.f32.mrb[109].mxu0  ;;  %v27137_v56 = vld [vmem:[%s36351_s3 + $0x16e8] ss:$16 sps:$4 sm:$0xff]   ;;  %v27190_v29 = vld [vmem:[%s36351_s3 + $0x1804] ss:$16 sps:$4 sm:$0xff]  }
 0x83b   : > { %15959 = vmatpush1.bf16.msra.mxu0 %v27128_v61  ;;  %v14019_v32 = vadd.f32 %v14018_v60, %v34591_v63  ;;  %v13919_v27 = vadd.f32 %v13918_v52, %v34593_v47  ;;  %v14020_v9 = vpop.f32.mrb[109].mxu1  ;;  %v13920_v8 = vpop.f32.mrb[110].mxu0  ;;  %v27142_v47 = vld [vmem:[%s36351_s3 + $0x1704] ss:$16 sps:$4 sm:$0xff]   ;;  %v27187_v61 = vld [vmem:[%s36351_s3 + $0x17ec] ss:$16 sps:$4 sm:$0xff]  }
 0x83c   : > { %16061 = vmatpush1.bf16.msra.mxu1 %v27131_v22  ;;  %v34800_v31 = vadd.f32 %v13917_v25, %v34380_v19  ;;  %v14021_v34 = vadd.f32 %v14020_v9, %v34595_v7  ;;  %15960 = vmatprep.subr.bf16.mxu0 %v27136_v14  ;;  %v14022_v63 = vpop.f32.mrb[110].mxu1  ;;  %v13921_v26 = vpop.f32.mrb[111].mxu0  ;;  %v27145_v7 = vld [vmem:[%s36351_s3 + $0x170c] ss:$16 sps:$4 sm:$0xff]   ;;  %v27182_v22 = vld [vmem:[%s36351_s3 + $0x17e0] ss:$16 sps:$4 sm:$0xff]  }
 0x83d   : > { %v34810_v15 = vadd.f32 %v14019_v32, %v34390_v23  ;;  %v34813_v37 = vadd.f32 %v13919_v27, %v34393_v54  ;;  %16062 = vmatprep.subr.bf16.mxu1 %v27139_v17  ;;  %v14023_v19 = vpop.f32.mrb[111].mxu1  ;;  %v27143_v23 = vld [vmem:[%s36351_s3 + $0x1708] ss:$16 sps:$4 sm:$0xff]   ;;  %v27148_v54 = vld [vmem:[%s36351_s3 + $0x1724] ss:$16 sps:$4 sm:$0xff]  }
 0x83e   : > { %v34819_v24 = vadd.f32 %v14021_v34, %v34399_v13  ;;  %v27151_v13 = vld [vmem:[%s36351_s3 + $0x172c] ss:$16 sps:$4 sm:$0xff]   ;;  %v27185_v14 = vld [vmem:[%s36351_s3 + $0x17e8] ss:$16 sps:$4 sm:$0xff]   ;;  %v34917_v25 = vld [vmem:[#allocation2 + $0x40] sm:$0x33] }
 0x83f   : > { %15961 = vmatpush1.bf16.msra.mxu0 %v27134_v10  ;;  %v27193_v17 = vld [vmem:[%s36351_s3 + $0x180c] ss:$16 sps:$4 sm:$0xff]   ;;  %v27188_v60 = vld [vmem:[%s36351_s3 + $0x1800] ss:$16 sps:$4 sm:$0xff]   ;;  %v27191_v52 = vld [vmem:[%s36351_s3 + $0x1808] ss:$16 sps:$4 sm:$0xff]  }
 0x840   : > { %16063 = vmatpush1.bf16.msra.mxu1 %v27137_v56  ;;  %15962 = vmatprep.subr.bf16.mxu0 %v27142_v47  ;;  %v27805_v32 = vld [vmem:[#allocation2 + $0x38] sm:$0xff]  ;;  %v27197_v9 = vld [vmem:[%s36351_s3 + $0x1824] ss:$16 sps:$4 sm:$0xff]   ;;  %v27195_v63 = vld [vmem:[%s36351_s3 + $0x1820] ss:$16 sps:$4 sm:$0xff]  }
 0x841   : > { %16064 = vmatprep.subr.bf16.mxu1 %v27145_v7  ;;  %v23045_v27 = vcombine.high %v27805_v32, %v27805_v32  ;;  %v36457_v10 = vld [vmem:[#allocation22_spill] sm:$0xff]  ;;  %v34932_v34 = vld [vmem:[#allocation2 + $0x30] sm:$0xff] }
 0x842   : > { %v27200_v8 = vld [vmem:[%s36351_s3 + $0x182c] ss:$16 sps:$4 sm:$0xff]   ;;  %v23307_v56 = vcombine.high %v34932_v34, %v34917_v25  ;;  %v27198_v26 = vld [vmem:[%s36351_s3 + $0x1828] ss:$16 sps:$4 sm:$0xff]   ;;  %v27204_v47 = vld [vmem:[%s36351_s3 + $0x1844] ss:$16 sps:$4 sm:$0xff]  }
 0x843   : > { %15963 = vmatpush1.bf16.msra.mxu0 %v27140_v41  ;;  %v27207_v19 = vld [vmem:[%s36351_s3 + $0x184c] ss:$16 sps:$4 sm:$0xff]   ;;  %v23044_v41 = vcombine.low %v27805_v32, %v27805_v32 }
 0x844   : > { %16065 = vmatpush1.bf16.msra.mxu1 %v27143_v23  ;;  %15964 = vmatprep.subr.bf16.mxu0 %v27148_v54  ;;  %v34949_v7 = vrot.slane %v23307_v56, 2  ;;  %v27202_v23 = vld [vmem:[%s36351_s3 + $0x1840] ss:$16 sps:$4 sm:$0xff]   ;;  %v36458_v54 = vld [vmem:[#allocation24_spill] sm:$0xff] }
 0x845   : > { %16066 = vmatprep.subr.bf16.mxu1 %v27151_v13  ;;  %v16283_v13 = vrot.slane %v36458_v54, 2  ;;  %v27253_v56 = vld [vmem:[%s36351_s3 + $0x192c] ss:$16 sps:$4 sm:$0xff]   ;;  %v27262_v54 = vld [vmem:[%s36351_s3 + $0x1964] ss:$16 sps:$4 sm:$0xff]  }
 0x847   : > { %15965 = vmatpush1.bf16.msra.mxu0 %v27146_v48  ;;  %v27205_v48 = vld [vmem:[%s36351_s3 + $0x1848] ss:$16 sps:$4 sm:$0xff]  }
 0x848   : > { %16067 = vmatpush1.bf16.msra.mxu1 %v27149_v58  ;;  %15966 = vmatprep.subr.bf16.mxu0 %v27154_v6  ;;  %v27214_v58 = vld [vmem:[%s36351_s3 + $0x1864] ss:$16 sps:$4 sm:$0xff]   ;;  %v16285_v6 = vsel %vm36459_vm0, %v16283_v13, %v34949_v7  ;;  %v27265_v13 = vld [vmem:[%s36351_s3 + $0x196c] ss:$16 sps:$4 sm:$0xff]  }
 0x849   : > { %16068 = vmatprep.subr.bf16.mxu1 %v27157_v36  ;;  %v27217_v36 = vld [vmem:[%s36351_s3 + $0x186c] ss:$16 sps:$4 sm:$0xff]  }
 0x84b   : > { %15967 = vmatpush1.bf16.msra.mxu0 %v27152_v5  ;;  %v27212_v5 = vld [vmem:[%s36351_s3 + $0x1860] ss:$16 sps:$4 sm:$0xff]  }
 0x84c   : > { %16069 = vmatpush1.bf16.msra.mxu1 %v27155_v40  ;;  %15968 = vmatprep.subr.bf16.mxu0 %v27160_v18  ;;  %v27215_v40 = vld [vmem:[%s36351_s3 + $0x1868] ss:$16 sps:$4 sm:$0xff]   ;;  %v27220_v18 = vld [vmem:[%s36351_s3 + $0x1884] ss:$16 sps:$4 sm:$0xff]  }
 0x84d   : > { %16070 = vmatprep.subr.bf16.mxu1 %v27163_v57  ;;  %v27223_v57 = vld [vmem:[%s36351_s3 + $0x188c] ss:$16 sps:$4 sm:$0xff]  }
 0x84f   : > { %15969 = vmatpush1.bf16.msra.mxu0 %v27158_v53  ;;  %v27218_v53 = vld [vmem:[%s36351_s3 + $0x1880] ss:$16 sps:$4 sm:$0xff]  }
 0x850   : > { %16071 = vmatpush1.bf16.msra.mxu1 %v27161_v16  ;;  %15970 = vmatprep.subr.bf16.mxu0 %v27166_v21  ;;  %v27221_v16 = vld [vmem:[%s36351_s3 + $0x1888] ss:$16 sps:$4 sm:$0xff]   ;;  %v27226_v21 = vld [vmem:[%s36351_s3 + $0x18a4] ss:$16 sps:$4 sm:$0xff]  }
 0x851   : > { %16072 = vmatprep.subr.bf16.mxu1 %v27169_v38  ;;  %v27229_v38 = vld [vmem:[%s36351_s3 + $0x18ac] ss:$16 sps:$4 sm:$0xff]  }
 0x853   : > { %15971 = vmatpush1.bf16.msra.mxu0 %v27164_v59  ;;  %v27224_v59 = vld [vmem:[%s36351_s3 + $0x18a0] ss:$16 sps:$4 sm:$0xff]  }
 0x854   : > { %16073 = vmatpush1.bf16.msra.mxu1 %v27167_v44  ;;  %15972 = vmatprep.subr.bf16.mxu0 %v27172_v51  ;;  %v27227_v44 = vld [vmem:[%s36351_s3 + $0x18a8] ss:$16 sps:$4 sm:$0xff]   ;;  %v27232_v51 = vld [vmem:[%s36351_s3 + $0x18c4] ss:$16 sps:$4 sm:$0xff]  }
 0x855   : > { %16074 = vmatprep.subr.bf16.mxu1 %v27175_v2  ;;  %v27235_v2 = vld [vmem:[%s36351_s3 + $0x18cc] ss:$16 sps:$4 sm:$0xff]  }
 0x857   : > { %15973 = vmatpush1.bf16.msra.mxu0 %v27170_v28  ;;  %v27230_v28 = vld [vmem:[%s36351_s3 + $0x18c0] ss:$16 sps:$4 sm:$0xff]  }
 0x858   : > { %16075 = vmatpush1.bf16.msra.mxu1 %v27173_v43  ;;  %15974 = vmatprep.subr.bf16.mxu0 %v27178_v1  ;;  %v27233_v43 = vld [vmem:[%s36351_s3 + $0x18c8] ss:$16 sps:$4 sm:$0xff]   ;;  %v27238_v1 = vld [vmem:[%s36351_s3 + $0x18e4] ss:$16 sps:$4 sm:$0xff]  }
 0x859   : > { %16076 = vmatprep.subr.bf16.mxu1 %v27181_v45 }
 0x85b   : > { %15975 = vmatpush1.bf16.msra.mxu0 %v27176_v20  ;;  %v27241_v20 = vld [vmem:[%s36351_s3 + $0x18ec] ss:$16 sps:$4 sm:$0xff]  }
 0x85c   : > { %16077 = vmatpush1.bf16.msra.mxu1 %v27179_v50  ;;  %15976 = vmatprep.subr.bf16.mxu0 %v27184_v11 }
 0x85d   : > { %16078 = vmatprep.subr.bf16.mxu1 %v27187_v61 }
 0x85f   : > { %15977 = vmatpush1.bf16.msra.mxu0 %v27182_v22  ;;  %v27236_v22 = vld [vmem:[%s36351_s3 + $0x18e0] ss:$16 sps:$4 sm:$0xff]  }
 0x860   : > { %16079 = vmatpush1.bf16.msra.mxu1 %v27185_v14  ;;  %16940 = vmatprep.subr.bf16.mxu0 %v27190_v29  ;;  %v27239_v29 = vld [vmem:[%s36351_s3 + $0x18e8] ss:$16 sps:$4 sm:$0xff]  }
 0x861   : > { %17042 = vmatprep.subr.bf16.mxu1 %v27193_v17 }
 0x862   : > { %15979 = vmatmul.mubr.bf16.vlgmr.msra.gmra.mrb[76].mxu0 %v36457_v10 }
 0x863   : > { %16081 = vmatmul.mubr.bf16.vlgmr.msra.gmra.mrb[76].mxu1 %v36457_v10  ;;  %15988 = vmatprep.mubr.bf16.mxu0 %v23045_v27  ;;  %v27245_v10 = vld [vmem:[%s36351_s3 + $0x1908] ss:$16 sps:$4 sm:$0xff]  }
 0x864   : > { %16090 = vmatprep.mubr.bf16.mxu1 %v23045_v27  ;;  %16941 = vmatpush1.bf16.msra.mxu0 %v27188_v60  ;;  %v27247_v27 = vld [vmem:[%s36351_s3 + $0x190c] ss:$16 sps:$4 sm:$0xff]  }
 0x865   : > { %17043 = vmatpush1.bf16.msra.mxu1 %v27191_v52  ;;  %16942 = vmatprep.subr.bf16.mxu0 %v27197_v9  ;;  %v27244_v52 = vld [vmem:[%s36351_s3 + $0x1904] ss:$16 sps:$4 sm:$0xff]   ;;  %v27242_v9 = vld [vmem:[%s36351_s3 + $0x1900] ss:$16 sps:$4 sm:$0xff]  }
 0x866   : > { %17044 = vmatprep.subr.bf16.mxu1 %v27200_v8  ;;  %v27250_v8 = vld [vmem:[%s36351_s3 + $0x1924] ss:$16 sps:$4 sm:$0xff]  }
 0x868   : > { %16943 = vmatpush1.bf16.msra.mxu0 %v27195_v63  ;;  %v27248_v63 = vld [vmem:[%s36351_s3 + $0x1920] ss:$16 sps:$4 sm:$0xff]  }
 0x869   : > { %17045 = vmatpush1.bf16.msra.mxu1 %v27198_v26  ;;  %16944 = vmatprep.subr.bf16.mxu0 %v27204_v47  ;;  %v27251_v26 = vld [vmem:[%s36351_s3 + $0x1928] ss:$16 sps:$4 sm:$0xff]   ;;  %v27256_v47 = vld [vmem:[%s36351_s3 + $0x1944] ss:$16 sps:$4 sm:$0xff]  }
 0x86a   : > { %15989 = vmatmul.mubr.bf16.gmra.mrb[124].mxu0 %v23044_v41  ;;  %17046 = vmatprep.subr.bf16.mxu1 %v27207_v19  ;;  %v27259_v19 = vld [vmem:[%s36351_s3 + $0x194c] ss:$16 sps:$4 sm:$0xff]  }
 0x86b   : > { %16091 = vmatmul.mubr.bf16.gmra.mrb[124].mxu1 %v23044_v41  ;;  %16972 = vmatprep.mubr.bf16.mxu0 %v16285_v6  ;;  %v27254_v41 = vld [vmem:[%s36351_s3 + $0x1940] ss:$16 sps:$4 sm:$0xff]  }
 0x86c   : > { %16945 = vmatpush1.bf16.msra.mxu0 %v27202_v23  ;;  %17074 = vmatprep.mubr.bf16.mxu1 %v16285_v6  ;;  %v27257_v23 = vld [vmem:[%s36351_s3 + $0x1948] ss:$16 sps:$4 sm:$0xff]   ;;  %v27268_v6 = vld [vmem:[%s36351_s3 + $0x1984] ss:$16 sps:$4 sm:$0xff]  }
 0x86d   : > { %17047 = vmatpush1.bf16.msra.mxu1 %v27205_v48  ;;  %16946 = vmatprep.subr.bf16.mxu0 %v27214_v58  ;;  %v27260_v48 = vld [vmem:[%s36351_s3 + $0x1960] ss:$16 sps:$4 sm:$0xff]   ;;  %v27263_v58 = vld [vmem:[%s36351_s3 + $0x1968] ss:$16 sps:$4 sm:$0xff]  }
 0x86e   : > { %17048 = vmatprep.subr.bf16.mxu1 %v27217_v36  ;;  %v27271_v36 = vld [vmem:[%s36351_s3 + $0x198c] ss:$16 sps:$4 sm:$0xff]  }
 0x870   : > { %16947 = vmatpush1.bf16.msra.mxu0 %v27212_v5  ;;  %v27266_v5 = vld [vmem:[%s36351_s3 + $0x1980] ss:$16 sps:$4 sm:$0xff]  }
 0x871   : > { %17049 = vmatpush1.bf16.msra.mxu1 %v27215_v40  ;;  %16948 = vmatprep.subr.bf16.mxu0 %v27220_v18  ;;  %v27269_v40 = vld [vmem:[%s36351_s3 + $0x1988] ss:$16 sps:$4 sm:$0xff]   ;;  %v27274_v18 = vld [vmem:[%s36351_s3 + $0x19a4] ss:$16 sps:$4 sm:$0xff]  }
 0x872   : > { %17050 = vmatprep.subr.bf16.mxu1 %v27223_v57  ;;  %v27277_v57 = vld [vmem:[%s36351_s3 + $0x19ac] ss:$16 sps:$4 sm:$0xff]  }
 0x874   : > { %16949 = vmatpush1.bf16.msra.mxu0 %v27218_v53  ;;  %v27272_v53 = vld [vmem:[%s36351_s3 + $0x19a0] ss:$16 sps:$4 sm:$0xff]  }
 0x875   : > { %17051 = vmatpush1.bf16.msra.mxu1 %v27221_v16  ;;  %16950 = vmatprep.subr.bf16.mxu0 %v27226_v21  ;;  %v27275_v16 = vld [vmem:[%s36351_s3 + $0x19a8] ss:$16 sps:$4 sm:$0xff]   ;;  %v27280_v21 = vld [vmem:[%s36351_s3 + $0x19c4] ss:$16 sps:$4 sm:$0xff]  }
 0x876   : > { %17052 = vmatprep.subr.bf16.mxu1 %v27229_v38  ;;  %v27283_v38 = vld [vmem:[%s36351_s3 + $0x19cc] ss:$16 sps:$4 sm:$0xff]  }
 0x878   : > { %16951 = vmatpush1.bf16.msra.mxu0 %v27224_v59  ;;  %v27278_v59 = vld [vmem:[%s36351_s3 + $0x19c0] ss:$16 sps:$4 sm:$0xff]  }
 0x879   : > { %17053 = vmatpush1.bf16.msra.mxu1 %v27227_v44  ;;  %16952 = vmatprep.subr.bf16.mxu0 %v27232_v51  ;;  %v27281_v44 = vld [vmem:[%s36351_s3 + $0x19c8] ss:$16 sps:$4 sm:$0xff]   ;;  %v27286_v51 = vld [vmem:[%s36351_s3 + $0x19e4] ss:$16 sps:$4 sm:$0xff]  }
 0x87a   : > { %17054 = vmatprep.subr.bf16.mxu1 %v27235_v2  ;;  %v35011_v45 = vpop.f32.mrb[112].mxu0  ;;  %v23306_v2 = vcombine.low %v34932_v34, %v34917_v25  ;;  %v27292_v25 = vld [vmem:[%s36351_s3 + $0x1a04] ss:$16 sps:$4 sm:$0xff]  }
 0x87b   : > { %v35016_v50 = vpop.f32.mrb[112].mxu1  ;;  %v35018_v11 = vpop.f32.mrb[113].mxu0 }
 0x87c   : > { %16953 = vmatpush1.bf16.msra.mxu0 %v27230_v28  ;;  %v35020_v61 = vpop.f32.mrb[113].mxu1  ;;  %v14942_v14 = vpop.f32.mrb[114].mxu0  ;;  %v27289_v28 = vld [vmem:[%s36351_s3 + $0x19ec] ss:$16 sps:$4 sm:$0xff]   ;;  %v16281_v34 = vrot.slane %v23306_v2, 2 }
 0x87d   : > { %17055 = vmatpush1.bf16.msra.mxu1 %v27233_v43  ;;  %16954 = vmatprep.subr.bf16.mxu0 %v27238_v1  ;;  %v15044_v17 = vpop.f32.mrb[114].mxu1  ;;  %v14943_v60 = vpop.f32.mrb[115].mxu0  ;;  %v27284_v43 = vld [vmem:[%s36351_s3 + $0x19e0] ss:$16 sps:$4 sm:$0xff]   ;;  %v27287_v1 = vld [vmem:[%s36351_s3 + $0x19e8] ss:$16 sps:$4 sm:$0xff]  }
 0x87e   : > { %17056 = vmatprep.subr.bf16.mxu1 %v27241_v20  ;;  %v15045_v32 = vpop.f32.mrb[115].mxu1  ;;  %v27295_v20 = vld [vmem:[%s36351_s3 + $0x1a0c] ss:$16 sps:$4 sm:$0xff]   ;;  %v27290_v17 = vld [vmem:[%s36351_s3 + $0x1a00] ss:$16 sps:$4 sm:$0xff]  }
 0x87f   : > { %v27298_v32 = vld [vmem:[%s36351_s3 + $0x1a24] ss:$16 sps:$4 sm:$0xff]  }
 0x880   : > { %16955 = vmatpush1.bf16.msra.mxu0 %v27236_v22  ;;  %v36460_v22 = vld [vmem:[#allocation25_spill] sm:$0xff] }
 0x881   : > { %17057 = vmatpush1.bf16.msra.mxu1 %v27239_v29  ;;  %16956 = vmatprep.subr.bf16.mxu0 %v27244_v52  ;;  %v16280_v14 = vrot.slane %v36460_v22, 2  ;;  %v35133_v29 = vld [vmem:[#allocation2 + $0x48] sm:$0x33]  ;;  %v27338_v2 = vld [vmem:[%s36351_s3 + $0x1ae4] ss:$16 sps:$4 sm:$0xff]  }
 0x882   : > { %17058 = vmatprep.subr.bf16.mxu1 %v27247_v27  ;;  %v27293_v52 = vld [vmem:[%s36351_s3 + $0x1a08] ss:$16 sps:$4 sm:$0xff]   ;;  %v27301_v27 = vld [vmem:[%s36351_s3 + $0x1a2c] ss:$16 sps:$4 sm:$0xff]  }
 0x883   : > { %v16282_v60 = vsel %vm36461_vm2, %v16280_v14, %v16281_v34 }
 0x884   : > { %16957 = vmatpush1.bf16.msra.mxu0 %v27242_v9  ;;  %v35148_v9 = vld [vmem:[#allocation2 + $0x38] sm:$0xff] }
 0x885   : > { %17059 = vmatpush1.bf16.msra.mxu1 %v27245_v10  ;;  %16958 = vmatprep.subr.bf16.mxu0 %v27250_v8  ;;  %v23309_v10 = vcombine.high %v35148_v9, %v35133_v29  ;;  %v27296_v8 = vld [vmem:[%s36351_s3 + $0x1a20] ss:$16 sps:$4 sm:$0xff]  }
 0x886   : > { %17060 = vmatprep.subr.bf16.mxu1 %v27253_v56  ;;  %v27299_v56 = vld [vmem:[%s36351_s3 + $0x1a28] ss:$16 sps:$4 sm:$0xff]  }
 0x888   : > { %16959 = vmatpush1.bf16.msra.mxu0 %v27248_v63  ;;  %v27304_v63 = vld [vmem:[%s36351_s3 + $0x1a44] ss:$16 sps:$4 sm:$0xff]  }
 0x889   : > { %17061 = vmatpush1.bf16.msra.mxu1 %v27251_v26  ;;  %16960 = vmatprep.subr.bf16.mxu0 %v27256_v47  ;;  %v27307_v26 = vld [vmem:[%s36351_s3 + $0x1a4c] ss:$16 sps:$4 sm:$0xff]   ;;  %v27302_v47 = vld [vmem:[%s36351_s3 + $0x1a40] ss:$16 sps:$4 sm:$0xff]  }
 0x88a   : > { %17062 = vmatprep.subr.bf16.mxu1 %v27259_v19  ;;  %v36462_v19 = vld [vmem:[#allocation26_spill] sm:$0xff] }
 0x88c   : > { %16961 = vmatpush1.bf16.msra.mxu0 %v27254_v41  ;;  %v16289_v41 = vrot.slane %v36462_v19, 2  ;;  %v27356_v19 = vld [vmem:[%s36351_s3 + $0x1b44] ss:$16 sps:$4 sm:$0xff]  }
 0x88d   : > { %17063 = vmatpush1.bf16.msra.mxu1 %v27257_v23  ;;  %16962 = vmatprep.subr.bf16.mxu0 %v27262_v54  ;;  %v27305_v23 = vld [vmem:[%s36351_s3 + $0x1a48] ss:$16 sps:$4 sm:$0xff]   ;;  %v27314_v54 = vld [vmem:[%s36351_s3 + $0x1a64] ss:$16 sps:$4 sm:$0xff]  }
 0x88e   : > { %17064 = vmatprep.subr.bf16.mxu1 %v27265_v13 }
 0x890   : > { %16963 = vmatpush1.bf16.msra.mxu0 %v27260_v48  ;;  %v27317_v48 = vld [vmem:[%s36351_s3 + $0x1a6c] ss:$16 sps:$4 sm:$0xff]  }
 0x891   : > { %17065 = vmatpush1.bf16.msra.mxu1 %v27263_v58  ;;  %16964 = vmatprep.subr.bf16.mxu0 %v27268_v6  ;;  %v27312_v58 = vld [vmem:[%s36351_s3 + $0x1a60] ss:$16 sps:$4 sm:$0xff]   ;;  %v27315_v6 = vld [vmem:[%s36351_s3 + $0x1a68] ss:$16 sps:$4 sm:$0xff]  }
 0x892   : > { %17066 = vmatprep.subr.bf16.mxu1 %v27271_v36  ;;  %v27320_v36 = vld [vmem:[%s36351_s3 + $0x1a84] ss:$16 sps:$4 sm:$0xff]  }
 0x894   : > { %16965 = vmatpush1.bf16.msra.mxu0 %v27266_v5  ;;  %v27323_v5 = vld [vmem:[%s36351_s3 + $0x1a8c] ss:$16 sps:$4 sm:$0xff]  }
 0x895   : > { %17067 = vmatpush1.bf16.msra.mxu1 %v27269_v40  ;;  %16966 = vmatprep.subr.bf16.mxu0 %v27274_v18  ;;  %v27318_v40 = vld [vmem:[%s36351_s3 + $0x1a80] ss:$16 sps:$4 sm:$0xff]   ;;  %v27321_v18 = vld [vmem:[%s36351_s3 + $0x1a88] ss:$16 sps:$4 sm:$0xff]  }
 0x896   : > { %17068 = vmatprep.subr.bf16.mxu1 %v27277_v57  ;;  %v27326_v57 = vld [vmem:[%s36351_s3 + $0x1aa4] ss:$16 sps:$4 sm:$0xff]  }
 0x898   : > { %16967 = vmatpush1.bf16.msra.mxu0 %v27272_v53  ;;  %v27329_v53 = vld [vmem:[%s36351_s3 + $0x1aac] ss:$16 sps:$4 sm:$0xff]  }
 0x899   : > { %17069 = vmatpush1.bf16.msra.mxu1 %v27275_v16  ;;  %16968 = vmatprep.subr.bf16.mxu0 %v27280_v21  ;;  %v27324_v16 = vld [vmem:[%s36351_s3 + $0x1aa0] ss:$16 sps:$4 sm:$0xff]   ;;  %v27327_v21 = vld [vmem:[%s36351_s3 + $0x1aa8] ss:$16 sps:$4 sm:$0xff]  }
 0x89a   : > { %17070 = vmatprep.subr.bf16.mxu1 %v27283_v38  ;;  %v27332_v38 = vld [vmem:[%s36351_s3 + $0x1ac4] ss:$16 sps:$4 sm:$0xff]  }
 0x89c   : > { %16969 = vmatpush1.bf16.msra.mxu0 %v27278_v59  ;;  %v27335_v59 = vld [vmem:[%s36351_s3 + $0x1acc] ss:$16 sps:$4 sm:$0xff]  }
 0x89d   : > { %17071 = vmatpush1.bf16.msra.mxu1 %v27281_v44  ;;  %16970 = vmatprep.subr.bf16.mxu0 %v27286_v51  ;;  %v27330_v44 = vld [vmem:[%s36351_s3 + $0x1ac0] ss:$16 sps:$4 sm:$0xff]   ;;  %v27333_v51 = vld [vmem:[%s36351_s3 + $0x1ac8] ss:$16 sps:$4 sm:$0xff]  }
 0x89e   : > { %17072 = vmatprep.subr.bf16.mxu1 %v27289_v28 }
 0x8a0   : > { %16971 = vmatpush1.bf16.msra.mxu0 %v27284_v43  ;;  %v27341_v43 = vld [vmem:[%s36351_s3 + $0x1aec] ss:$16 sps:$4 sm:$0xff]  }
 0x8a1   : > { %17073 = vmatpush1.bf16.msra.mxu1 %v27287_v1  ;;  %16991 = vmatprep.subr.bf16.mxu0 %v27292_v25 }
 0x8a2   : > { %17093 = vmatprep.subr.bf16.mxu1 %v27295_v20 }
 0x8a3   : > { %16973 = vmatmul.mubr.bf16.vlgmr.msra.gmra.mrb[76].mxu0 %v16282_v60 }
 0x8a4   : > { %17075 = vmatmul.mubr.bf16.vlgmr.msra.gmra.mrb[76].mxu1 %v16282_v60  ;;  %16982 = vmatprep.mubr.bf16.mxu0 %v34949_v7 }
 0x8a5   : > { %16992 = vmatpush1.bf16.msra.mxu0 %v27290_v17  ;;  %17084 = vmatprep.mubr.bf16.mxu1 %v34949_v7  ;;  %v35166_v7 = vrot.slane %v23309_v10, 2  ;;  %v27336_v17 = vld [vmem:[%s36351_s3 + $0x1ae0] ss:$16 sps:$4 sm:$0xff]  }
 0x8a6   : > { %17094 = vmatpush1.bf16.msra.mxu1 %v27293_v52  ;;  %16993 = vmatprep.subr.bf16.mxu0 %v27298_v32 }
 0x8a7   : > { %17095 = vmatprep.subr.bf16.mxu1 %v27301_v27  ;;  %v16291_v13 = vsel %vm36463_vm5, %v16289_v41, %v35166_v7  ;;  %v27359_v41 = vld [vmem:[%s36351_s3 + $0x1b4c] ss:$16 sps:$4 sm:$0xff]  }
 0x8a9   : > { %16994 = vmatpush1.bf16.msra.mxu0 %v27296_v8 }
 0x8aa   : > { %17096 = vmatpush1.bf16.msra.mxu1 %v27299_v56  ;;  %16995 = vmatprep.subr.bf16.mxu0 %v27304_v63  ;;  %v27342_v63 = vld [vmem:[%s36351_s3 + $0x1b00] ss:$16 sps:$4 sm:$0xff]  }
 0x8ab   : > { %16983 = vmatmul.mubr.bf16.gmra.mrb[128].mxu0 %v16281_v34  ;;  %17097 = vmatprep.subr.bf16.mxu1 %v27307_v26  ;;  %v27348_v26 = vld [vmem:[%s36351_s3 + $0x1b20] ss:$16 sps:$4 sm:$0xff]  }
 0x8ac   : > { %17085 = vmatmul.mubr.bf16.gmra.mrb[128].mxu1 %v16281_v34  ;;  %17023 = vmatprep.mubr.bf16.mxu0 %v16291_v13 }
 0x8ad   : > { %16996 = vmatpush1.bf16.msra.mxu0 %v27302_v47  ;;  %17125 = vmatprep.mubr.bf16.mxu1 %v16291_v13  ;;  %v27351_v47 = vld [vmem:[%s36351_s3 + $0x1b28] ss:$16 sps:$4 sm:$0xff]   ;;  %v27362_v13 = vld [vmem:[%s36351_s3 + $0x1b64] ss:$16 sps:$4 sm:$0xff]  }
 0x8ae   : > { %17098 = vmatpush1.bf16.msra.mxu1 %v27305_v23  ;;  %16997 = vmatprep.subr.bf16.mxu0 %v27314_v54  ;;  %v27354_v23 = vld [vmem:[%s36351_s3 + $0x1b40] ss:$16 sps:$4 sm:$0xff]   ;;  %v27357_v54 = vld [vmem:[%s36351_s3 + $0x1b48] ss:$16 sps:$4 sm:$0xff]  }
 0x8af   : > { %17099 = vmatprep.subr.bf16.mxu1 %v27317_v48  ;;  %v27365_v48 = vld [vmem:[%s36351_s3 + $0x1b6c] ss:$16 sps:$4 sm:$0xff]  }
 0x8b1   : > { %16998 = vmatpush1.bf16.msra.mxu0 %v27312_v58  ;;  %v27360_v58 = vld [vmem:[%s36351_s3 + $0x1b60] ss:$16 sps:$4 sm:$0xff]  }
 0x8b2   : > { %17100 = vmatpush1.bf16.msra.mxu1 %v27315_v6  ;;  %16999 = vmatprep.subr.bf16.mxu0 %v27320_v36  ;;  %v27363_v6 = vld [vmem:[%s36351_s3 + $0x1b68] ss:$16 sps:$4 sm:$0xff]   ;;  %v27368_v36 = vld [vmem:[%s36351_s3 + $0x1b84] ss:$16 sps:$4 sm:$0xff]  }
 0x8b3   : > { %17101 = vmatprep.subr.bf16.mxu1 %v27323_v5  ;;  %v27371_v5 = vld [vmem:[%s36351_s3 + $0x1b8c] ss:$16 sps:$4 sm:$0xff]  }
 0x8b5   : > { %17000 = vmatpush1.bf16.msra.mxu0 %v27318_v40  ;;  %v27366_v40 = vld [vmem:[%s36351_s3 + $0x1b80] ss:$16 sps:$4 sm:$0xff]  }
 0x8b6   : > { %17102 = vmatpush1.bf16.msra.mxu1 %v27321_v18  ;;  %17001 = vmatprep.subr.bf16.mxu0 %v27326_v57  ;;  %v27369_v18 = vld [vmem:[%s36351_s3 + $0x1b88] ss:$16 sps:$4 sm:$0xff]   ;;  %v27374_v57 = vld [vmem:[%s36351_s3 + $0x1ba4] ss:$16 sps:$4 sm:$0xff]  }
 0x8b7   : > { %17103 = vmatprep.subr.bf16.mxu1 %v27329_v53  ;;  %v27377_v53 = vld [vmem:[%s36351_s3 + $0x1bac] ss:$16 sps:$4 sm:$0xff]  }
 0x8b9   : > { %17002 = vmatpush1.bf16.msra.mxu0 %v27324_v16  ;;  %v27372_v16 = vld [vmem:[%s36351_s3 + $0x1ba0] ss:$16 sps:$4 sm:$0xff]  }
 0x8ba   : > { %17104 = vmatpush1.bf16.msra.mxu1 %v27327_v21  ;;  %17003 = vmatprep.subr.bf16.mxu0 %v27332_v38  ;;  %v27375_v21 = vld [vmem:[%s36351_s3 + $0x1ba8] ss:$16 sps:$4 sm:$0xff]   ;;  %v27380_v38 = vld [vmem:[%s36351_s3 + $0x1bc4] ss:$16 sps:$4 sm:$0xff]  }
 0x8bb   : > { %17105 = vmatprep.subr.bf16.mxu1 %v27335_v59  ;;  %v14989_v28 = vpop.f32.mrb[116].mxu0  ;;  %v27383_v59 = vld [vmem:[%s36351_s3 + $0x1bcc] ss:$16 sps:$4 sm:$0xff]  }
 0x8bc   : > { %v14990_v1 = vadd.f32 %v14989_v28, %v35011_v45  ;;  %v15091_v25 = vpop.f32.mrb[116].mxu1  ;;  %v14991_v34 = vpop.f32.mrb[117].mxu0  ;;  %v27339_v45 = vld [vmem:[%s36351_s3 + $0x1ae8] ss:$16 sps:$4 sm:$0xff]   ;;  %v23308_v28 = vcombine.low %v35148_v9, %v35133_v29  ;;  %v27392_v29 = vld [vmem:[%s36351_s3 + $0x1c04] ss:$16 sps:$4 sm:$0xff]  }
 0x8bd   : > { %17004 = vmatpush1.bf16.msra.mxu0 %v27330_v44  ;;  %v15092_v20 = vadd.f32 %v15091_v25, %v35016_v50  ;;  %v14992_v22 = vadd.f32 %v14991_v34, %v35018_v11  ;;  %v15093_v14 = vpop.f32.mrb[117].mxu1  ;;  %v14993_v60 = vpop.f32.mrb[118].mxu0  ;;  %v27344_v11 = vld [vmem:[%s36351_s3 + $0x1b04] ss:$16 sps:$4 sm:$0xff]   ;;  %v27378_v44 = vld [vmem:[%s36351_s3 + $0x1bc0] ss:$16 sps:$4 sm:$0xff]  }
 0x8be   : > { %17106 = vmatpush1.bf16.msra.mxu1 %v27333_v51  ;;  %v35238_v52 = vadd.f32 %v14990_v1, %v34800_v31  ;;  %v15094_v32 = vadd.f32 %v15093_v14, %v35020_v61  ;;  %17005 = vmatprep.subr.bf16.mxu0 %v27338_v2  ;;  %v15095_v50 = vpop.f32.mrb[118].mxu1  ;;  %v14994_v27 = vpop.f32.mrb[119].mxu0  ;;  %v27347_v61 = vld [vmem:[%s36351_s3 + $0x1b0c] ss:$16 sps:$4 sm:$0xff]   ;;  %v27381_v51 = vld [vmem:[%s36351_s3 + $0x1bc8] ss:$16 sps:$4 sm:$0xff]  }
 0x8bf   : > { %v35248_v10 = vadd.f32 %v15092_v20, %v34810_v15  ;;  %v35251_v8 = vadd.f32 %v14992_v22, %v34813_v37  ;;  %17107 = vmatprep.subr.bf16.mxu1 %v27341_v43  ;;  %v15096_v31 = vpop.f32.mrb[119].mxu1  ;;  %v27345_v15 = vld [vmem:[%s36351_s3 + $0x1b08] ss:$16 sps:$4 sm:$0xff]   ;;  %v27350_v37 = vld [vmem:[%s36351_s3 + $0x1b24] ss:$16 sps:$4 sm:$0xff]   ;;  %v16287_v9 = vrot.slane %v23308_v28, 2 }
 0x8c0   : > { %v35257_v56 = vadd.f32 %v15094_v32, %v34819_v24  ;;  %v27353_v24 = vld [vmem:[%s36351_s3 + $0x1b2c] ss:$16 sps:$4 sm:$0xff]   ;;  %v27386_v2 = vld [vmem:[%s36351_s3 + $0x1be4] ss:$16 sps:$4 sm:$0xff]   ;;  %v27384_v1 = vld [vmem:[%s36351_s3 + $0x1be0] ss:$16 sps:$4 sm:$0xff]  }
 0x8c1   : > { %17006 = vmatpush1.bf16.msra.mxu0 %v27336_v17  ;;  %v27389_v43 = vld [vmem:[%s36351_s3 + $0x1bec] ss:$16 sps:$4 sm:$0xff]   ;;  %v27387_v25 = vld [vmem:[%s36351_s3 + $0x1be8] ss:$16 sps:$4 sm:$0xff]   ;;  %v36464_v20 = vld [vmem:[#allocation27_spill] sm:$0xff] }
 0x8c2   : > { %17108 = vmatpush1.bf16.msra.mxu1 %v27339_v45  ;;  %17007 = vmatprep.subr.bf16.mxu0 %v27344_v11  ;;  %v27395_v34 = vld [vmem:[%s36351_s3 + $0x1c0c] ss:$16 sps:$4 sm:$0xff]   ;;  %v16286_v22 = vrot.slane %v36464_v20, 2  ;;  %v27390_v14 = vld [vmem:[%s36351_s3 + $0x1c00] ss:$16 sps:$4 sm:$0xff]  }
 0x8c3   : > { %17109 = vmatprep.subr.bf16.mxu1 %v27347_v61  ;;  %v27393_v60 = vld [vmem:[%s36351_s3 + $0x1c08] ss:$16 sps:$4 sm:$0xff]   ;;  %v27398_v32 = vld [vmem:[%s36351_s3 + $0x1c24] ss:$16 sps:$4 sm:$0xff]   ;;  %v27401_v45 = vld [vmem:[%s36351_s3 + $0x1c2c] ss:$16 sps:$4 sm:$0xff]  }
 0x8c4   : > { %v16288_v17 = vsel %vm36465_vm14, %v16286_v22, %v16287_v9  ;;  %v27396_v50 = vld [vmem:[%s36351_s3 + $0x1c20] ss:$16 sps:$4 sm:$0xff]   ;;  %v27399_v27 = vld [vmem:[%s36351_s3 + $0x1c28] ss:$16 sps:$4 sm:$0xff]   ;;  %v27404_v11 = vld [vmem:[%s36351_s3 + $0x1c44] ss:$16 sps:$4 sm:$0xff]  }
 0x8c5   : > { %17008 = vmatpush1.bf16.msra.mxu0 %v27342_v63  ;;  %v27402_v31 = vld [vmem:[%s36351_s3 + $0x1c40] ss:$16 sps:$4 sm:$0xff]   ;;  %v27405_v61 = vld [vmem:[%s36351_s3 + $0x1c48] ss:$16 sps:$4 sm:$0xff]   ;;  %v27412_v63 = vld [vmem:[%s36351_s3 + $0x1c64] ss:$16 sps:$4 sm:$0xff]  }
 0x8c6   : > { %17110 = vmatpush1.bf16.msra.mxu1 %v27345_v15  ;;  %17009 = vmatprep.subr.bf16.mxu0 %v27350_v37  ;;  %v27415_v15 = vld [vmem:[%s36351_s3 + $0x1c6c] ss:$16 sps:$4 sm:$0xff]   ;;  %v36466_v37 = vld [vmem:[#allocation29_spill] sm:$0xff] }
 0x8c7   : > { %17111 = vmatprep.subr.bf16.mxu1 %v27353_v24  ;;  %v27410_v24 = vld [vmem:[%s36351_s3 + $0x1c60] ss:$16 sps:$4 sm:$0xff]   ;;  %v27451_v20 = vld [vmem:[%s36351_s3 + $0x1d2c] ss:$16 sps:$4 sm:$0xff]  }
 0x8c8   : > { %v27446_v22 = vld [vmem:[%s36351_s3 + $0x1d20] ss:$16 sps:$4 sm:$0xff]  }
 0x8c9   : > { %17010 = vmatpush1.bf16.msra.mxu0 %v27348_v26  ;;  %v27413_v26 = vld [vmem:[%s36351_s3 + $0x1c68] ss:$16 sps:$4 sm:$0xff]  }
 0x8ca   : > { %17112 = vmatpush1.bf16.msra.mxu1 %v27351_v47  ;;  %17011 = vmatprep.subr.bf16.mxu0 %v27356_v19  ;;  %v27418_v47 = vld [vmem:[%s36351_s3 + $0x1c84] ss:$16 sps:$4 sm:$0xff]   ;;  %v27421_v19 = vld [vmem:[%s36351_s3 + $0x1c8c] ss:$16 sps:$4 sm:$0xff]  }
 0x8cb   : > { %17113 = vmatprep.subr.bf16.mxu1 %v27359_v41  ;;  %v27416_v41 = vld [vmem:[%s36351_s3 + $0x1c80] ss:$16 sps:$4 sm:$0xff]  }
 0x8cd   : > { %17012 = vmatpush1.bf16.msra.mxu0 %v27354_v23  ;;  %v27419_v23 = vld [vmem:[%s36351_s3 + $0x1c88] ss:$16 sps:$4 sm:$0xff]  }
 0x8ce   : > { %17114 = vmatpush1.bf16.msra.mxu1 %v27357_v54  ;;  %17013 = vmatprep.subr.bf16.mxu0 %v27362_v13  ;;  %v27424_v54 = vld [vmem:[%s36351_s3 + $0x1ca4] ss:$16 sps:$4 sm:$0xff]   ;;  %v27427_v13 = vld [vmem:[%s36351_s3 + $0x1cac] ss:$16 sps:$4 sm:$0xff]  }
 0x8cf   : > { %17115 = vmatprep.subr.bf16.mxu1 %v27365_v48  ;;  %v27422_v48 = vld [vmem:[%s36351_s3 + $0x1ca0] ss:$16 sps:$4 sm:$0xff]  }
 0x8d1   : > { %17014 = vmatpush1.bf16.msra.mxu0 %v27360_v58  ;;  %v27425_v58 = vld [vmem:[%s36351_s3 + $0x1ca8] ss:$16 sps:$4 sm:$0xff]  }
 0x8d2   : > { %17116 = vmatpush1.bf16.msra.mxu1 %v27363_v6  ;;  %17015 = vmatprep.subr.bf16.mxu0 %v27368_v36  ;;  %v27430_v6 = vld [vmem:[%s36351_s3 + $0x1cc4] ss:$16 sps:$4 sm:$0xff]   ;;  %v27433_v36 = vld [vmem:[%s36351_s3 + $0x1ccc] ss:$16 sps:$4 sm:$0xff]  }
 0x8d3   : > { %17117 = vmatprep.subr.bf16.mxu1 %v27371_v5  ;;  %v27428_v5 = vld [vmem:[%s36351_s3 + $0x1cc0] ss:$16 sps:$4 sm:$0xff]  }
 0x8d5   : > { %17016 = vmatpush1.bf16.msra.mxu0 %v27366_v40  ;;  %v27431_v40 = vld [vmem:[%s36351_s3 + $0x1cc8] ss:$16 sps:$4 sm:$0xff]  }
 0x8d6   : > { %17118 = vmatpush1.bf16.msra.mxu1 %v27369_v18  ;;  %17017 = vmatprep.subr.bf16.mxu0 %v27374_v57  ;;  %v27436_v18 = vld [vmem:[%s36351_s3 + $0x1ce4] ss:$16 sps:$4 sm:$0xff]  }
 0x8d7   : > { %17119 = vmatprep.subr.bf16.mxu1 %v27377_v53  ;;  %v27439_v53 = vld [vmem:[%s36351_s3 + $0x1cec] ss:$16 sps:$4 sm:$0xff]  }
 0x8d9   : > { %17018 = vmatpush1.bf16.msra.mxu0 %v27372_v16 }
 0x8da   : > { %17120 = vmatpush1.bf16.msra.mxu1 %v27375_v21  ;;  %17019 = vmatprep.subr.bf16.mxu0 %v27380_v38 }
 0x8db   : > { %17121 = vmatprep.subr.bf16.mxu1 %v27383_v59  ;;  %v27434_v59 = vld [vmem:[%s36351_s3 + $0x1ce0] ss:$16 sps:$4 sm:$0xff]  }
 0x8dd   : > { %17020 = vmatpush1.bf16.msra.mxu0 %v27378_v44 }
 0x8de   : > { %17122 = vmatpush1.bf16.msra.mxu1 %v27381_v51  ;;  %17021 = vmatprep.subr.bf16.mxu0 %v27386_v2  ;;  %v27437_v51 = vld [vmem:[%s36351_s3 + $0x1ce8] ss:$16 sps:$4 sm:$0xff]  }
 0x8df   : > { %17123 = vmatprep.subr.bf16.mxu1 %v27389_v43  ;;  %v27442_v43 = vld [vmem:[%s36351_s3 + $0x1d04] ss:$16 sps:$4 sm:$0xff]  }
 0x8e1   : > { %17022 = vmatpush1.bf16.msra.mxu0 %v27384_v1 }
 0x8e2   : > { %17124 = vmatpush1.bf16.msra.mxu1 %v27387_v25  ;;  %18013 = vmatprep.subr.bf16.mxu0 %v27392_v29  ;;  %v27445_v25 = vld [vmem:[%s36351_s3 + $0x1d0c] ss:$16 sps:$4 sm:$0xff]   ;;  %v27440_v29 = vld [vmem:[%s36351_s3 + $0x1d00] ss:$16 sps:$4 sm:$0xff]  }
 0x8e3   : > { %18115 = vmatprep.subr.bf16.mxu1 %v27395_v34  ;;  %v27448_v34 = vld [vmem:[%s36351_s3 + $0x1d24] ss:$16 sps:$4 sm:$0xff]  }
 0x8e4   : > { %17024 = vmatmul.mubr.bf16.vlgmr.msra.gmra.mrb[76].mxu0 %v16288_v17 }
 0x8e5   : > { %17126 = vmatmul.mubr.bf16.vlgmr.msra.gmra.mrb[76].mxu1 %v16288_v17  ;;  %17033 = vmatprep.mubr.bf16.mxu0 %v35166_v7  ;;  %v27454_v17 = vld [vmem:[%s36351_s3 + $0x1d44] ss:$16 sps:$4 sm:$0xff]  }
 0x8e6   : > { %17135 = vmatprep.mubr.bf16.mxu1 %v35166_v7  ;;  %18014 = vmatpush1.bf16.msra.mxu0 %v27390_v14  ;;  %v27407_v7 = vld [vmem:[%s36351_s3 + $0x1c4c] ss:$16 sps:$4 sm:$0xff]   ;;  %v27449_v14 = vld [vmem:[%s36351_s3 + $0x1d28] ss:$16 sps:$4 sm:$0xff]  }
 0x8e7   : > { %18116 = vmatpush1.bf16.msra.mxu1 %v27393_v60  ;;  %18015 = vmatprep.subr.bf16.mxu0 %v27398_v32  ;;  %v27457_v60 = vld [vmem:[%s36351_s3 + $0x1d4c] ss:$16 sps:$4 sm:$0xff]   ;;  %v27452_v32 = vld [vmem:[%s36351_s3 + $0x1d40] ss:$16 sps:$4 sm:$0xff]  }
 0x8e8   : > { %18117 = vmatprep.subr.bf16.mxu1 %v27401_v45  ;;  %v27455_v45 = vld [vmem:[%s36351_s3 + $0x1d48] ss:$16 sps:$4 sm:$0xff]  }
 0x8ea   : > { %18016 = vmatpush1.bf16.msra.mxu0 %v27396_v50  ;;  %v27460_v50 = vld [vmem:[%s36351_s3 + $0x1d64] ss:$16 sps:$4 sm:$0xff]  }
 0x8eb   : > { %18118 = vmatpush1.bf16.msra.mxu1 %v27399_v27  ;;  %18017 = vmatprep.subr.bf16.mxu0 %v27404_v11  ;;  %v27463_v27 = vld [vmem:[%s36351_s3 + $0x1d6c] ss:$16 sps:$4 sm:$0xff]   ;;  %v27458_v11 = vld [vmem:[%s36351_s3 + $0x1d60] ss:$16 sps:$4 sm:$0xff]  }
 0x8ec   : > { %17034 = vmatmul.mubr.bf16.gmra.mrb[132].mxu0 %v16287_v9  ;;  %18119 = vmatprep.subr.bf16.mxu1 %v27407_v7  ;;  %v27461_v7 = vld [vmem:[%s36351_s3 + $0x1d68] ss:$16 sps:$4 sm:$0xff]  }
 0x8ed   : > { %17136 = vmatmul.mubr.bf16.gmra.mrb[132].mxu1 %v16287_v9  ;;  %18045 = vmatprep.mubr.bf16.mxu0 %v36466_v37  ;;  %v27443_v9 = vld [vmem:[%s36351_s3 + $0x1d08] ss:$16 sps:$4 sm:$0xff]  }
 0x8ee   : > { %18018 = vmatpush1.bf16.msra.mxu0 %v27402_v31  ;;  %18147 = vmatprep.mubr.bf16.mxu1 %v36466_v37  ;;  %v27466_v31 = vld [vmem:[%s36351_s3 + $0x1d84] ss:$16 sps:$4 sm:$0xff]  }
 0x8ef   : > { %18120 = vmatpush1.bf16.msra.mxu1 %v27405_v61  ;;  %18019 = vmatprep.subr.bf16.mxu0 %v27412_v63  ;;  %v27469_v61 = vld [vmem:[%s36351_s3 + $0x1d8c] ss:$16 sps:$4 sm:$0xff]   ;;  %v27464_v63 = vld [vmem:[%s36351_s3 + $0x1d80] ss:$16 sps:$4 sm:$0xff]   ;;  %v27472_v37 = vld [vmem:[%s36351_s3 + $0x1da4] ss:$16 sps:$4 sm:$0xff]  }
 0x8f0   : > { %18121 = vmatprep.subr.bf16.mxu1 %v27415_v15  ;;  %v27467_v15 = vld [vmem:[%s36351_s3 + $0x1d88] ss:$16 sps:$4 sm:$0xff]  }
 0x8f2   : > { %18020 = vmatpush1.bf16.msra.mxu0 %v27410_v24  ;;  %v27475_v24 = vld [vmem:[%s36351_s3 + $0x1dac] ss:$16 sps:$4 sm:$0xff]  }
 0x8f3   : > { %18122 = vmatpush1.bf16.msra.mxu1 %v27413_v26  ;;  %18021 = vmatprep.subr.bf16.mxu0 %v27418_v47  ;;  %v27470_v26 = vld [vmem:[%s36351_s3 + $0x1da0] ss:$16 sps:$4 sm:$0xff]   ;;  %v27473_v47 = vld [vmem:[%s36351_s3 + $0x1da8] ss:$16 sps:$4 sm:$0xff]  }
 0x8f4   : > { %18123 = vmatprep.subr.bf16.mxu1 %v27421_v19  ;;  %v27478_v19 = vld [vmem:[%s36351_s3 + $0x1dc4] ss:$16 sps:$4 sm:$0xff]  }
 0x8f6   : > { %18022 = vmatpush1.bf16.msra.mxu0 %v27416_v41  ;;  %v27481_v41 = vld [vmem:[%s36351_s3 + $0x1dcc] ss:$16 sps:$4 sm:$0xff]  }
 0x8f7   : > { %18124 = vmatpush1.bf16.msra.mxu1 %v27419_v23  ;;  %18023 = vmatprep.subr.bf16.mxu0 %v27424_v54  ;;  %v27476_v23 = vld [vmem:[%s36351_s3 + $0x1dc0] ss:$16 sps:$4 sm:$0xff]   ;;  %v27479_v54 = vld [vmem:[%s36351_s3 + $0x1dc8] ss:$16 sps:$4 sm:$0xff]  }
 0x8f8   : > { %18125 = vmatprep.subr.bf16.mxu1 %v27427_v13  ;;  %v27484_v13 = vld [vmem:[%s36351_s3 + $0x1de4] ss:$16 sps:$4 sm:$0xff]  }
 0x8fa   : > { %18024 = vmatpush1.bf16.msra.mxu0 %v27422_v48  ;;  %v27487_v48 = vld [vmem:[%s36351_s3 + $0x1dec] ss:$16 sps:$4 sm:$0xff]  }
 0x8fb   : > { %18126 = vmatpush1.bf16.msra.mxu1 %v27425_v58  ;;  %18025 = vmatprep.subr.bf16.mxu0 %v27430_v6  ;;  %v27482_v58 = vld [vmem:[%s36351_s3 + $0x1de0] ss:$16 sps:$4 sm:$0xff]   ;;  %v27485_v6 = vld [vmem:[%s36351_s3 + $0x1de8] ss:$16 sps:$4 sm:$0xff]  }
 0x8fc   : > { %18127 = vmatprep.subr.bf16.mxu1 %v27433_v36  ;;  %v35444_v57 = vpop.f32.mrb[120].mxu0  ;;  %v27490_v36 = vld [vmem:[%s36351_s3 + $0x1e04] ss:$16 sps:$4 sm:$0xff]  }
 0x8fd   : > { %v35449_v16 = vpop.f32.mrb[120].mxu1  ;;  %v35451_v21 = vpop.f32.mrb[121].mxu0 }
 0x8fe   : > { %18026 = vmatpush1.bf16.msra.mxu0 %v27428_v5  ;;  %v35453_v38 = vpop.f32.mrb[121].mxu1  ;;  %v15943_v44 = vpop.f32.mrb[122].mxu0  ;;  %v27493_v5 = vld [vmem:[%s36351_s3 + $0x1e0c] ss:$16 sps:$4 sm:$0xff]  }
 0x8ff   : > { %18128 = vmatpush1.bf16.msra.mxu1 %v27431_v40  ;;  %18027 = vmatprep.subr.bf16.mxu0 %v27436_v18  ;;  %v16045_v2 = vpop.f32.mrb[122].mxu1  ;;  %v15944_v28 = vpop.f32.mrb[123].mxu0  ;;  %v27488_v40 = vld [vmem:[%s36351_s3 + $0x1e00] ss:$16 sps:$4 sm:$0xff]   ;;  %v27491_v18 = vld [vmem:[%s36351_s3 + $0x1e08] ss:$16 sps:$4 sm:$0xff]  }
 0x900   : > { %18129 = vmatprep.subr.bf16.mxu1 %v27439_v53  ;;  %v16046_v1 = vpop.f32.mrb[123].mxu1  ;;  %v27496_v53 = vld [vmem:[%s36351_s3 + $0x1e24] ss:$16 sps:$4 sm:$0xff]   ;;  %v36467_v44 = vld [vmem:[#allocation28_spill] sm:$0xff] }
 0x901   : > { %v27497_v2 = vld [vmem:[%s36351_s3 + $0x1e28] ss:$16 sps:$4 sm:$0xff]   ;;  %v27502_v28 = vld [vmem:[%s36351_s3 + $0x1e44] ss:$16 sps:$4 sm:$0xff]  }
 0x902   : > { %18028 = vmatpush1.bf16.msra.mxu0 %v27434_v59  ;;  %v27499_v59 = vld [vmem:[%s36351_s3 + $0x1e2c] ss:$16 sps:$4 sm:$0xff]   ;;  %v27503_v1 = vld [vmem:[%s36351_s3 + $0x1e48] ss:$16 sps:$4 sm:$0xff]  }
 0x903   : > { %18130 = vmatpush1.bf16.msra.mxu1 %v27437_v51  ;;  %18029 = vmatprep.subr.bf16.mxu0 %v27442_v43  ;;  %v27494_v51 = vld [vmem:[%s36351_s3 + $0x1e20] ss:$16 sps:$4 sm:$0xff]  }
 0x904   : > { %18131 = vmatprep.subr.bf16.mxu1 %v27445_v25  ;;  %v27500_v43 = vld [vmem:[%s36351_s3 + $0x1e40] ss:$16 sps:$4 sm:$0xff]   ;;  %v27510_v25 = vld [vmem:[%s36351_s3 + $0x1e64] ss:$16 sps:$4 sm:$0xff]  }
 0x906   : > { %18030 = vmatpush1.bf16.msra.mxu0 %v27440_v29  ;;  %v36468_v29 = vld [vmem:[#allocation30_spill] sm:$0xff] }
 0x907   : > { %18132 = vmatpush1.bf16.msra.mxu1 %v27443_v9  ;;  %18031 = vmatprep.subr.bf16.mxu0 %v27448_v34  ;;  %v27513_v9 = vld [vmem:[%s36351_s3 + $0x1e6c] ss:$16 sps:$4 sm:$0xff]   ;;  %v27508_v34 = vld [vmem:[%s36351_s3 + $0x1e60] ss:$16 sps:$4 sm:$0xff]  }
 0x908   : > { %18133 = vmatprep.subr.bf16.mxu1 %v27451_v20  ;;  %v27511_v20 = vld [vmem:[%s36351_s3 + $0x1e68] ss:$16 sps:$4 sm:$0xff]  }
 0x90a   : > { %18032 = vmatpush1.bf16.msra.mxu0 %v27446_v22  ;;  %v27516_v22 = vld [vmem:[%s36351_s3 + $0x1e84] ss:$16 sps:$4 sm:$0xff]  }
 0x90b   : > { %18134 = vmatpush1.bf16.msra.mxu1 %v27449_v14  ;;  %18033 = vmatprep.subr.bf16.mxu0 %v27454_v17  ;;  %v27519_v14 = vld [vmem:[%s36351_s3 + $0x1e8c] ss:$16 sps:$4 sm:$0xff]   ;;  %v27517_v17 = vld [vmem:[%s36351_s3 + $0x1e88] ss:$16 sps:$4 sm:$0xff]  }
 0x90c   : > { %18135 = vmatprep.subr.bf16.mxu1 %v27457_v60  ;;  %v27522_v60 = vld [vmem:[%s36351_s3 + $0x1ea4] ss:$16 sps:$4 sm:$0xff]  }
 0x90e   : > { %18034 = vmatpush1.bf16.msra.mxu0 %v27452_v32  ;;  %v27525_v32 = vld [vmem:[%s36351_s3 + $0x1eac] ss:$16 sps:$4 sm:$0xff]  }
 0x90f   : > { %18136 = vmatpush1.bf16.msra.mxu1 %v27455_v45  ;;  %18035 = vmatprep.subr.bf16.mxu0 %v27460_v50  ;;  %v27520_v45 = vld [vmem:[%s36351_s3 + $0x1ea0] ss:$16 sps:$4 sm:$0xff]   ;;  %v27523_v50 = vld [vmem:[%s36351_s3 + $0x1ea8] ss:$16 sps:$4 sm:$0xff]  }
 0x910   : > { %18137 = vmatprep.subr.bf16.mxu1 %v27463_v27  ;;  %v27528_v27 = vld [vmem:[%s36351_s3 + $0x1ec4] ss:$16 sps:$4 sm:$0xff]  }
 0x912   : > { %18036 = vmatpush1.bf16.msra.mxu0 %v27458_v11  ;;  %v27531_v11 = vld [vmem:[%s36351_s3 + $0x1ecc] ss:$16 sps:$4 sm:$0xff]  }
 0x913   : > { %18138 = vmatpush1.bf16.msra.mxu1 %v27461_v7  ;;  %18037 = vmatprep.subr.bf16.mxu0 %v27466_v31  ;;  %v27526_v7 = vld [vmem:[%s36351_s3 + $0x1ec0] ss:$16 sps:$4 sm:$0xff]   ;;  %v27529_v31 = vld [vmem:[%s36351_s3 + $0x1ec8] ss:$16 sps:$4 sm:$0xff]  }
 0x914   : > { %18139 = vmatprep.subr.bf16.mxu1 %v27469_v61  ;;  %v27534_v61 = vld [vmem:[%s36351_s3 + $0x1ee4] ss:$16 sps:$4 sm:$0xff]  }
 0x916   : > { %18038 = vmatpush1.bf16.msra.mxu0 %v27464_v63 }
 0x917   : > { %18140 = vmatpush1.bf16.msra.mxu1 %v27467_v15  ;;  %18039 = vmatprep.subr.bf16.mxu0 %v27472_v37  ;;  %v27537_v15 = vld [vmem:[%s36351_s3 + $0x1eec] ss:$16 sps:$4 sm:$0xff]  }
 0x918   : > { %18141 = vmatprep.subr.bf16.mxu1 %v27475_v24 }
 0x91a   : > { %18040 = vmatpush1.bf16.msra.mxu0 %v27470_v26 }
 0x91b   : > { %18142 = vmatpush1.bf16.msra.mxu1 %v27473_v47  ;;  %18041 = vmatprep.subr.bf16.mxu0 %v27478_v19 }
 0x91c   : > { %18143 = vmatprep.subr.bf16.mxu1 %v27481_v41 }
 0x91e   : > { %18042 = vmatpush1.bf16.msra.mxu0 %v27476_v23  ;;  %v27532_v23 = vld [vmem:[%s36351_s3 + $0x1ee0] ss:$16 sps:$4 sm:$0xff]  }
 0x91f   : > { %18144 = vmatpush1.bf16.msra.mxu1 %v27479_v54  ;;  %18043 = vmatprep.subr.bf16.mxu0 %v27484_v13 }
 0x920   : > { %18145 = vmatprep.subr.bf16.mxu1 %v27487_v48 }
 0x922   : > { %18044 = vmatpush1.bf16.msra.mxu0 %v27482_v58 }
 0x923   : > { %18146 = vmatpush1.bf16.msra.mxu1 %v27485_v6  ;;  %18064 = vmatprep.subr.bf16.mxu0 %v27490_v36 }
 0x924   : > { %18166 = vmatprep.subr.bf16.mxu1 %v27493_v5 }
 0x925   : > { %18046 = vmatmul.mubr.bf16.vlgmr.msra.gmra.mrb[76].mxu0 %v32698_v0 }
 0x926   : > { %18148 = vmatmul.mubr.bf16.vlgmr.msra.gmra.mrb[76].mxu1 %v32698_v0  ;;  %18055 = vmatprep.mubr.bf16.mxu0 %v36467_v44  ;;  %v27505_v0 = vld [vmem:[%s36351_s3 + $0x1e4c] ss:$16 sps:$4 sm:$0xff]  }
 0x927   : > { %18065 = vmatpush1.bf16.msra.mxu0 %v27488_v40  ;;  %18157 = vmatprep.mubr.bf16.mxu1 %v36467_v44  ;;  %v27538_v40 = vld [vmem:[%s36351_s3 + $0x1f00] ss:$16 sps:$4 sm:$0xff]   ;;  %v27555_v44 = vld [vmem:[%s36351_s3 + $0x1f4c] ss:$16 sps:$4 sm:$0xff]  }
 0x928   : > { %18167 = vmatpush1.bf16.msra.mxu1 %v27491_v18  ;;  %18066 = vmatprep.subr.bf16.mxu0 %v27496_v53  ;;  %v27544_v18 = vld [vmem:[%s36351_s3 + $0x1f20] ss:$16 sps:$4 sm:$0xff]   ;;  %v27547_v53 = vld [vmem:[%s36351_s3 + $0x1f28] ss:$16 sps:$4 sm:$0xff]  }
 0x929   : > { %18168 = vmatprep.subr.bf16.mxu1 %v27499_v59  ;;  %v27552_v59 = vld [vmem:[%s36351_s3 + $0x1f44] ss:$16 sps:$4 sm:$0xff]  }
 0x92b   : > { %18067 = vmatpush1.bf16.msra.mxu0 %v27494_v51  ;;  %v27550_v51 = vld [vmem:[%s36351_s3 + $0x1f40] ss:$16 sps:$4 sm:$0xff]  }
 0x92c   : > { %18169 = vmatpush1.bf16.msra.mxu1 %v27497_v2  ;;  %18068 = vmatprep.subr.bf16.mxu0 %v27502_v28  ;;  %v27553_v2 = vld [vmem:[%s36351_s3 + $0x1f48] ss:$16 sps:$4 sm:$0xff]   ;;  %v27558_v28 = vld [vmem:[%s36351_s3 + $0x1f64] ss:$16 sps:$4 sm:$0xff]  }
 0x92d   : > { %18056 = vmatmul.mubr.bf16.gmra.mrb[136].mxu0 %v36468_v29  ;;  %18170 = vmatprep.subr.bf16.mxu1 %v27505_v0  ;;  %v27561_v0 = vld [vmem:[%s36351_s3 + $0x1f6c] ss:$16 sps:$4 sm:$0xff]  }
 0x92e   : > { %18158 = vmatmul.mubr.bf16.gmra.mrb[136].mxu1 %v36468_v29  ;;  %18096 = vmatprep.mubr.bf16.mxu0 %v32721_v42  ;;  %v27567_v29 = vld [vmem:[%s36351_s3 + $0x1f8c] ss:$16 sps:$4 sm:$0xff]  }
 0x92f   : > { %18069 = vmatpush1.bf16.msra.mxu0 %v27500_v43  ;;  %18198 = vmatprep.mubr.bf16.mxu1 %v32721_v42  ;;  %v27514_v42 = vld [vmem:[%s36351_s3 + $0x1e80] ss:$16 sps:$4 sm:$0xff]  }
 0x930   : > { %18171 = vmatpush1.bf16.msra.mxu1 %v27503_v1  ;;  %18070 = vmatprep.subr.bf16.mxu0 %v27510_v25  ;;  %v27556_v43 = vld [vmem:[%s36351_s3 + $0x1f60] ss:$16 sps:$4 sm:$0xff]   ;;  %v27559_v1 = vld [vmem:[%s36351_s3 + $0x1f68] ss:$16 sps:$4 sm:$0xff]   ;;  %v27564_v25 = vld [vmem:[%s36351_s3 + $0x1f84] ss:$16 sps:$4 sm:$0xff]  }
 0x931   : > { %18172 = vmatprep.subr.bf16.mxu1 %v27513_v9  ;;  %v27562_v9 = vld [vmem:[%s36351_s3 + $0x1f80] ss:$16 sps:$4 sm:$0xff]  }
 0x933   : > { %18071 = vmatpush1.bf16.msra.mxu0 %v27508_v34  ;;  %v27565_v34 = vld [vmem:[%s36351_s3 + $0x1f88] ss:$16 sps:$4 sm:$0xff]  }
 0x934   : > { %18173 = vmatpush1.bf16.msra.mxu1 %v27511_v20  ;;  %18072 = vmatprep.subr.bf16.mxu0 %v27516_v22  ;;  %v27570_v20 = vld [vmem:[%s36351_s3 + $0x1fa4] ss:$16 sps:$4 sm:$0xff]   ;;  %v27573_v22 = vld [vmem:[%s36351_s3 + $0x1fac] ss:$16 sps:$4 sm:$0xff]  }
 0x935   : > { %18174 = vmatprep.subr.bf16.mxu1 %v27519_v14  ;;  %v27568_v14 = vld [vmem:[%s36351_s3 + $0x1fa0] ss:$16 sps:$4 sm:$0xff]  }
 0x937   : > { %18073 = vmatpush1.bf16.msra.mxu0 %v27514_v42  ;;  %v27571_v42 = vld [vmem:[%s36351_s3 + $0x1fa8] ss:$16 sps:$4 sm:$0xff]  }
 0x938   : > { %18175 = vmatpush1.bf16.msra.mxu1 %v27517_v17  ;;  %18074 = vmatprep.subr.bf16.mxu0 %v27522_v60  ;;  %v27576_v17 = vld [vmem:[%s36351_s3 + $0x1fc4] ss:$16 sps:$4 sm:$0xff]   ;;  %v27579_v60 = vld [vmem:[%s36351_s3 + $0x1fcc] ss:$16 sps:$4 sm:$0xff]  }
 0x939   : > { %18176 = vmatprep.subr.bf16.mxu1 %v27525_v32  ;;  %v27574_v32 = vld [vmem:[%s36351_s3 + $0x1fc0] ss:$16 sps:$4 sm:$0xff]  }
 0x93b   : > { %18075 = vmatpush1.bf16.msra.mxu0 %v27520_v45  ;;  %v27577_v45 = vld [vmem:[%s36351_s3 + $0x1fc8] ss:$16 sps:$4 sm:$0xff]  }
 0x93c   : > { %18177 = vmatpush1.bf16.msra.mxu1 %v27523_v50  ;;  %18076 = vmatprep.subr.bf16.mxu0 %v27528_v27  ;;  %v27582_v50 = vld [vmem:[%s36351_s3 + $0x1fe4] ss:$16 sps:$4 sm:$0xff]   ;;  %v27585_v27 = vld [vmem:[%s36351_s3 + $0x1fec] ss:$16 sps:$4 sm:$0xff]  }
 0x93d   : > { %18178 = vmatprep.subr.bf16.mxu1 %v27531_v11  ;;  %v15990_v63 = vpop.f32.mrb[124].mxu0  ;;  %v27580_v11 = vld [vmem:[%s36351_s3 + $0x1fe0] ss:$16 sps:$4 sm:$0xff]  }
 0x93e   : > { %v15991_v37 = vadd.f32 %v15990_v63, %v35444_v57  ;;  %v16092_v24 = vpop.f32.mrb[124].mxu1  ;;  %v15992_v26 = vpop.f32.mrb[125].mxu0  ;;  %v27535_v57 = vld [vmem:[%s36351_s3 + $0x1ee8] ss:$16 sps:$4 sm:$0xff]   ;;  %v27586_v63 = vld [vmem:[%s36351_s3 + $0x2000] ss:$16 sps:$4 sm:$0xff]  }
 0x93f   : > { %18077 = vmatpush1.bf16.msra.mxu0 %v27526_v7  ;;  %v16093_v47 = vadd.f32 %v16092_v24, %v35449_v16  ;;  %v15993_v19 = vadd.f32 %v15992_v26, %v35451_v21  ;;  %v16094_v41 = vpop.f32.mrb[125].mxu1  ;;  %v15994_v54 = vpop.f32.mrb[126].mxu0  ;;  %v27540_v21 = vld [vmem:[%s36351_s3 + $0x1f04] ss:$16 sps:$4 sm:$0xff]   ;;  %v27583_v7 = vld [vmem:[%s36351_s3 + $0x1fe8] ss:$16 sps:$4 sm:$0xff]  }
 0x940   : > { %18179 = vmatpush1.bf16.msra.mxu1 %v27529_v31  ;;  %v35662_v13 = vadd.f32 %v15991_v37, %v35238_v52  ;;  %v16095_v48 = vadd.f32 %v16094_v41, %v35453_v38  ;;  %18078 = vmatprep.subr.bf16.mxu0 %v27534_v61  ;;  %v16096_v16 = vpop.f32.mrb[126].mxu1  ;;  %v15995_v58 = vpop.f32.mrb[127].mxu0  ;;  %v27543_v38 = vld [vmem:[%s36351_s3 + $0x1f0c] ss:$16 sps:$4 sm:$0xff]   ;;  %v27588_v31 = vld [vmem:[%s36351_s3 + $0x2004] ss:$16 sps:$4 sm:$0xff]  }
 0x941   : > { %v35672_v6 = vadd.f32 %v16093_v47, %v35248_v10  ;;  %v35675_v36 = vadd.f32 %v15993_v19, %v35251_v8  ;;  %18180 = vmatprep.subr.bf16.mxu1 %v27537_v15  ;;  %v16097_v52 = vpop.f32.mrb[127].mxu1  ;;  %v27541_v10 = vld [vmem:[%s36351_s3 + $0x1f08] ss:$16 sps:$4 sm:$0xff]   ;;  %v27546_v8 = vld [vmem:[%s36351_s3 + $0x1f24] ss:$16 sps:$4 sm:$0xff]  }
 0x942   : > { %v35681_v5 = vadd.f32 %v16095_v48, %v35257_v56  ;;  %v27549_v56 = vld [vmem:[%s36351_s3 + $0x1f2c] ss:$16 sps:$4 sm:$0xff]   ;;  %v27589_v15 = vld [vmem:[%s36351_s3 + $0x2008] ss:$16 sps:$4 sm:$0xff]   ;;  %v27594_v37 = vld [vmem:[%s36351_s3 + $0x2024] ss:$16 sps:$4 sm:$0xff]  }
 0x943   : > { %18079 = vmatpush1.bf16.msra.mxu0 %v27532_v23  ;;  %v27591_v61 = vld [vmem:[%s36351_s3 + $0x200c] ss:$16 sps:$4 sm:$0xff]   ;;  %v27592_v26 = vld [vmem:[%s36351_s3 + $0x2020] ss:$16 sps:$4 sm:$0xff]   ;;  %v27595_v47 = vld [vmem:[%s36351_s3 + $0x2028] ss:$16 sps:$4 sm:$0xff]  }
 0x944   : > { %18181 = vmatpush1.bf16.msra.mxu1 %v27535_v57  ;;  %18080 = vmatprep.subr.bf16.mxu0 %v27540_v21  ;;  %v27597_v24 = vld [vmem:[%s36351_s3 + $0x202c] ss:$16 sps:$4 sm:$0xff]   ;;  %v27600_v19 = vld [vmem:[%s36351_s3 + $0x2044] ss:$16 sps:$4 sm:$0xff]   ;;  %v27601_v41 = vld [vmem:[%s36351_s3 + $0x2048] ss:$16 sps:$4 sm:$0xff]  }
 0x945   : > { %18182 = vmatprep.subr.bf16.mxu1 %v27543_v38  ;;  %v27608_v23 = vld [vmem:[%s36351_s3 + $0x2064] ss:$16 sps:$4 sm:$0xff]   ;;  %v27611_v54 = vld [vmem:[%s36351_s3 + $0x206c] ss:$16 sps:$4 sm:$0xff]   ;;  %v27606_v48 = vld [vmem:[%s36351_s3 + $0x2060] ss:$16 sps:$4 sm:$0xff]  }
 0x946   : > { %v27609_v57 = vld [vmem:[%s36351_s3 + $0x2068] ss:$16 sps:$4 sm:$0xff]   ;;  %v27614_v16 = vld [vmem:[%s36351_s3 + $0x2084] ss:$16 sps:$4 sm:$0xff]   ;;  %v27623_v52 = vld [vmem:[%s36351_s3 + $0x20ac] ss:$16 sps:$4 sm:$0xff]  }
 0x947   : > { %18081 = vmatpush1.bf16.msra.mxu0 %v27538_v40  ;;  %v27615_v58 = vld [vmem:[%s36351_s3 + $0x2088] ss:$16 sps:$4 sm:$0xff]   ;;  %v27620_v21 = vld [vmem:[%s36351_s3 + $0x20a4] ss:$16 sps:$4 sm:$0xff]   ;;  %v27618_v38 = vld [vmem:[%s36351_s3 + $0x20a0] ss:$16 sps:$4 sm:$0xff]  }
 0x948   : > { %18183 = vmatpush1.bf16.msra.mxu1 %v27541_v10  ;;  %18082 = vmatprep.subr.bf16.mxu0 %v27546_v8  ;;  %v27621_v40 = vld [vmem:[%s36351_s3 + $0x20a8] ss:$16 sps:$4 sm:$0xff]   ;;  %v27626_v10 = vld [vmem:[%s36351_s3 + $0x20c4] ss:$16 sps:$4 sm:$0xff]   ;;  %v27629_v8 = vld [vmem:[%s36351_s3 + $0x20cc] ss:$16 sps:$4 sm:$0xff]  }
 0x949   : > { %18184 = vmatprep.subr.bf16.mxu1 %v27549_v56  ;;  %v27624_v56 = vld [vmem:[%s36351_s3 + $0x20c0] ss:$16 sps:$4 sm:$0xff]  }
 0x94b   : > { %18083 = vmatpush1.bf16.msra.mxu0 %v27544_v18  ;;  %v27627_v18 = vld [vmem:[%s36351_s3 + $0x20c8] ss:$16 sps:$4 sm:$0xff]  }
 0x94c   : > { %18185 = vmatpush1.bf16.msra.mxu1 %v27547_v53  ;;  %18084 = vmatprep.subr.bf16.mxu0 %v27552_v59  ;;  %v27632_v53 = vld [vmem:[%s36351_s3 + $0x20e4] ss:$16 sps:$4 sm:$0xff]  }
 0x94d   : > { %18186 = vmatprep.subr.bf16.mxu1 %v27555_v44  ;;  %v27635_v44 = vld [vmem:[%s36351_s3 + $0x20ec] ss:$16 sps:$4 sm:$0xff]  }
 0x94f   : > { %18085 = vmatpush1.bf16.msra.mxu0 %v27550_v51 }
 0x950   : > { %18187 = vmatpush1.bf16.msra.mxu1 %v27553_v2  ;;  %18086 = vmatprep.subr.bf16.mxu0 %v27558_v28 }
 0x951   : > { %18188 = vmatprep.subr.bf16.mxu1 %v27561_v0  ;;  %v27630_v0 = vld [vmem:[%s36351_s3 + $0x20e0] ss:$16 sps:$4 sm:$0xff]  }
 0x953   : > { %18087 = vmatpush1.bf16.msra.mxu0 %v27556_v43 }
 0x954   : > { %18189 = vmatpush1.bf16.msra.mxu1 %v27559_v1  ;;  %18088 = vmatprep.subr.bf16.mxu0 %v27564_v25  ;;  %v27633_v1 = vld [vmem:[%s36351_s3 + $0x20e8] ss:$16 sps:$4 sm:$0xff]  }
 0x955   : > { %18190 = vmatprep.subr.bf16.mxu1 %v27567_v29 }
 0x957   : > { %18089 = vmatpush1.bf16.msra.mxu0 %v27562_v9  ;;  %v27638_v9 = vld [vmem:[%s36351_s3 + $0x2104] ss:$16 sps:$4 sm:$0xff]  }
 0x958   : > { %18191 = vmatpush1.bf16.msra.mxu1 %v27565_v34  ;;  %18090 = vmatprep.subr.bf16.mxu0 %v27570_v20  ;;  %v27641_v20 = vld [vmem:[%s36351_s3 + $0x210c] ss:$16 sps:$4 sm:$0xff]  }
 0x959   : > { %18192 = vmatprep.subr.bf16.mxu1 %v27573_v22  ;;  %v27636_v22 = vld [vmem:[%s36351_s3 + $0x2100] ss:$16 sps:$4 sm:$0xff]  }
 0x95b   : > { %18091 = vmatpush1.bf16.msra.mxu0 %v27568_v14  ;;  %v27639_v14 = vld [vmem:[%s36351_s3 + $0x2108] ss:$16 sps:$4 sm:$0xff]  }
 0x95c   : > { %18193 = vmatpush1.bf16.msra.mxu1 %v27571_v42  ;;  %18092 = vmatprep.subr.bf16.mxu0 %v27576_v17  ;;  %v27644_v42 = vld [vmem:[%s36351_s3 + $0x2124] ss:$16 sps:$4 sm:$0xff]   ;;  %v27647_v17 = vld [vmem:[%s36351_s3 + $0x212c] ss:$16 sps:$4 sm:$0xff]  }
 0x95d   : > { %18194 = vmatprep.subr.bf16.mxu1 %v27579_v60  ;;  %v27642_v60 = vld [vmem:[%s36351_s3 + $0x2120] ss:$16 sps:$4 sm:$0xff]  }
 0x95f   : > { %18093 = vmatpush1.bf16.msra.mxu0 %v27574_v32  ;;  %v27645_v32 = vld [vmem:[%s36351_s3 + $0x2128] ss:$16 sps:$4 sm:$0xff]  }
 0x960   : > { %18195 = vmatpush1.bf16.msra.mxu1 %v27577_v45  ;;  %18094 = vmatprep.subr.bf16.mxu0 %v27582_v50  ;;  %v27650_v45 = vld [vmem:[%s36351_s3 + $0x2144] ss:$16 sps:$4 sm:$0xff]   ;;  %v27653_v50 = vld [vmem:[%s36351_s3 + $0x214c] ss:$16 sps:$4 sm:$0xff]  }
 0x961   : > { %18196 = vmatprep.subr.bf16.mxu1 %v27585_v27  ;;  %v27648_v27 = vld [vmem:[%s36351_s3 + $0x2140] ss:$16 sps:$4 sm:$0xff]  }
 0x963   : > { %18095 = vmatpush1.bf16.msra.mxu0 %v27580_v11  ;;  %v27651_v11 = vld [vmem:[%s36351_s3 + $0x2148] ss:$16 sps:$4 sm:$0xff]  }
 0x964   : > { %18197 = vmatpush1.bf16.msra.mxu1 %v27583_v7  ;;  %19030 = vmatprep.subr.bf16.mxu0 %v27588_v31  ;;  %v27656_v7 = vld [vmem:[%s36351_s3 + $0x2164] ss:$16 sps:$4 sm:$0xff]   ;;  %v27659_v31 = vld [vmem:[%s36351_s3 + $0x216c] ss:$16 sps:$4 sm:$0xff]  }
 0x965   : > { %19132 = vmatprep.subr.bf16.mxu1 %v27591_v61  ;;  %v27654_v61 = vld [vmem:[%s36351_s3 + $0x2160] ss:$16 sps:$4 sm:$0xff]  }
 0x966   : > { %18097 = vmatmul.mubr.bf16.vlgmr.msra.gmra.mrb[76].mxu0 %v32736_v3 }
 0x967   : > { %18199 = vmatmul.mubr.bf16.vlgmr.msra.gmra.mrb[76].mxu1 %v32736_v3  ;;  %18106 = vmatprep.mubr.bf16.mxu0 %v32706_v33  ;;  %v27598_v3 = vld [vmem:[%s36351_s3 + $0x2040] ss:$16 sps:$4 sm:$0xff]  }
 0x968   : > { %18208 = vmatprep.mubr.bf16.mxu1 %v32706_v33  ;;  %19031 = vmatpush1.bf16.msra.mxu0 %v27586_v63  ;;  %v27603_v33 = vld [vmem:[%s36351_s3 + $0x204c] ss:$16 sps:$4 sm:$0xff]   ;;  %v27657_v63 = vld [vmem:[%s36351_s3 + $0x2168] ss:$16 sps:$4 sm:$0xff]  }
 0x969   : > { %19133 = vmatpush1.bf16.msra.mxu1 %v27589_v15  ;;  %19032 = vmatprep.subr.bf16.mxu0 %v27594_v37  ;;  %v27662_v15 = vld [vmem:[%s36351_s3 + $0x2184] ss:$16 sps:$4 sm:$0xff]   ;;  %v27665_v37 = vld [vmem:[%s36351_s3 + $0x218c] ss:$16 sps:$4 sm:$0xff]  }
 0x96a   : > { %19134 = vmatprep.subr.bf16.mxu1 %v27597_v24  ;;  %v27660_v24 = vld [vmem:[%s36351_s3 + $0x2180] ss:$16 sps:$4 sm:$0xff]  }
 0x96c   : > { %19033 = vmatpush1.bf16.msra.mxu0 %v27592_v26  ;;  %v27663_v26 = vld [vmem:[%s36351_s3 + $0x2188] ss:$16 sps:$4 sm:$0xff]  }
 0x96d   : > { %19135 = vmatpush1.bf16.msra.mxu1 %v27595_v47  ;;  %19034 = vmatprep.subr.bf16.mxu0 %v27600_v19  ;;  %v27668_v47 = vld [vmem:[%s36351_s3 + $0x21a4] ss:$16 sps:$4 sm:$0xff]   ;;  %v27671_v19 = vld [vmem:[%s36351_s3 + $0x21ac] ss:$16 sps:$4 sm:$0xff]  }
 0x96e   : > { %18107 = vmatmul.mubr.bf16.gmra.mrb[140].mxu0 %v32714_v35  ;;  %19136 = vmatprep.subr.bf16.mxu1 %v27603_v33  ;;  %v27666_v33 = vld [vmem:[%s36351_s3 + $0x21a0] ss:$16 sps:$4 sm:$0xff]  }
 0x96f   : > { %18209 = vmatmul.mubr.bf16.gmra.mrb[140].mxu1 %v32714_v35  ;;  %19062 = vmatprep.mubr.bf16.mxu0 %v32725_v12  ;;  %v27617_v35 = vld [vmem:[%s36351_s3 + $0x208c] ss:$16 sps:$4 sm:$0xff]  }
 0x970   : > { %19035 = vmatpush1.bf16.msra.mxu0 %v27598_v3  ;;  %19164 = vmatprep.mubr.bf16.mxu1 %v32725_v12  ;;  %v27612_v12 = vld [vmem:[%s36351_s3 + $0x2080] ss:$16 sps:$4 sm:$0xff]   ;;  %v27669_v3 = vld [vmem:[%s36351_s3 + $0x21a8] ss:$16 sps:$4 sm:$0xff]  }
 0x971   : > { %19137 = vmatpush1.bf16.msra.mxu1 %v27601_v41  ;;  %19036 = vmatprep.subr.bf16.mxu0 %v27608_v23  ;;  %v27674_v41 = vld [vmem:[%s36351_s3 + $0x21c4] ss:$16 sps:$4 sm:$0xff]   ;;  %v27677_v23 = vld [vmem:[%s36351_s3 + $0x21cc] ss:$16 sps:$4 sm:$0xff]  }
 0x972   : > { %19138 = vmatprep.subr.bf16.mxu1 %v27611_v54  ;;  %v27672_v54 = vld [vmem:[%s36351_s3 + $0x21c0] ss:$16 sps:$4 sm:$0xff]  }
 0x974   : > { %19037 = vmatpush1.bf16.msra.mxu0 %v27606_v48  ;;  %v27675_v48 = vld [vmem:[%s36351_s3 + $0x21c8] ss:$16 sps:$4 sm:$0xff]  }
 0x975   : > { %19139 = vmatpush1.bf16.msra.mxu1 %v27609_v57  ;;  %19038 = vmatprep.subr.bf16.mxu0 %v27614_v16  ;;  %v27680_v57 = vld [vmem:[%s36351_s3 + $0x21e4] ss:$16 sps:$4 sm:$0xff]   ;;  %v27683_v16 = vld [vmem:[%s36351_s3 + $0x21ec] ss:$16 sps:$4 sm:$0xff]  }
 0x976   : > { %19140 = vmatprep.subr.bf16.mxu1 %v27617_v35  ;;  %v27678_v35 = vld [vmem:[%s36351_s3 + $0x21e0] ss:$16 sps:$4 sm:$0xff]  }
 0x978   : > { %19039 = vmatpush1.bf16.msra.mxu0 %v27612_v12  ;;  %v27681_v12 = vld [vmem:[%s36351_s3 + $0x21e8] ss:$16 sps:$4 sm:$0xff]  }
 0x979   : > { %19141 = vmatpush1.bf16.msra.mxu1 %v27615_v58  ;;  %19040 = vmatprep.subr.bf16.mxu0 %v27620_v21  ;;  %v27686_v58 = vld [vmem:[%s36351_s3 + $0x2204] ss:$16 sps:$4 sm:$0xff]   ;;  %v27689_v21 = vld [vmem:[%s36351_s3 + $0x220c] ss:$16 sps:$4 sm:$0xff]  }
 0x97a   : > { %19142 = vmatprep.subr.bf16.mxu1 %v27623_v52  ;;  %v27684_v52 = vld [vmem:[%s36351_s3 + $0x2200] ss:$16 sps:$4 sm:$0xff]  }
 0x97c   : > { %19041 = vmatpush1.bf16.msra.mxu0 %v27618_v38  ;;  %v27687_v38 = vld [vmem:[%s36351_s3 + $0x2208] ss:$16 sps:$4 sm:$0xff]  }
 0x97d   : > { %19143 = vmatpush1.bf16.msra.mxu1 %v27621_v40  ;;  %19042 = vmatprep.subr.bf16.mxu0 %v27626_v10  ;;  %v27692_v40 = vld [vmem:[%s36351_s3 + $0x2224] ss:$16 sps:$4 sm:$0xff]   ;;  %v27695_v10 = vld [vmem:[%s36351_s3 + $0x222c] ss:$16 sps:$4 sm:$0xff]  }
 0x97e   : > { %19144 = vmatprep.subr.bf16.mxu1 %v27629_v8  ;;  %v35868_v59 = vpop.f32.mrb[128].mxu0  ;;  %v27690_v8 = vld [vmem:[%s36351_s3 + $0x2220] ss:$16 sps:$4 sm:$0xff]  }
 0x97f   : > { %v35873_v51 = vpop.f32.mrb[128].mxu1  ;;  %v35875_v2 = vpop.f32.mrb[129].mxu0 }
 0x980   : > { %19043 = vmatpush1.bf16.msra.mxu0 %v27624_v56  ;;  %v35877_v28 = vpop.f32.mrb[129].mxu1  ;;  %v16988_v43 = vpop.f32.mrb[130].mxu0  ;;  %v27693_v56 = vld [vmem:[%s36351_s3 + $0x2228] ss:$16 sps:$4 sm:$0xff]  }
 0x981   : > { %19145 = vmatpush1.bf16.msra.mxu1 %v27627_v18  ;;  %19044 = vmatprep.subr.bf16.mxu0 %v27632_v53  ;;  %v17090_v25 = vpop.f32.mrb[130].mxu1  ;;  %v16989_v29 = vpop.f32.mrb[131].mxu0  ;;  %v27698_v18 = vld [vmem:[%s36351_s3 + $0x2244] ss:$16 sps:$4 sm:$0xff]   ;;  %v27699_v53 = vld [vmem:[%s36351_s3 + $0x2248] ss:$16 sps:$4 sm:$0xff]  }
 0x982   : > { %19146 = vmatprep.subr.bf16.mxu1 %v27635_v44  ;;  %v17091_v34 = vpop.f32.mrb[131].mxu1  ;;  %v27706_v44 = vld [vmem:[%s36351_s3 + $0x2264] ss:$16 sps:$4 sm:$0xff]   ;;  %v27704_v43 = vld [vmem:[%s36351_s3 + $0x2260] ss:$16 sps:$4 sm:$0xff]  }
 0x983   : > { %v27712_v25 = vld [vmem:[%s36351_s3 + $0x2284] ss:$16 sps:$4 sm:$0xff]   ;;  %v27713_v29 = vld [vmem:[%s36351_s3 + $0x2288] ss:$16 sps:$4 sm:$0xff]   ;;  %v27721_v34 = vld [vmem:[%s36351_s3 + $0x22ac] ss:$16 sps:$4 sm:$0xff]  }
 0x984   : > { %19045 = vmatpush1.bf16.msra.mxu0 %v27630_v0  ;;  %v27709_v0 = vld [vmem:[%s36351_s3 + $0x226c] ss:$16 sps:$4 sm:$0xff]  }
 0x985   : > { %19147 = vmatpush1.bf16.msra.mxu1 %v27633_v1  ;;  %19046 = vmatprep.subr.bf16.mxu0 %v27638_v9  ;;  %v27707_v1 = vld [vmem:[%s36351_s3 + $0x2268] ss:$16 sps:$4 sm:$0xff]   ;;  %v27718_v9 = vld [vmem:[%s36351_s3 + $0x22a4] ss:$16 sps:$4 sm:$0xff]  }
 0x986   : > { %19148 = vmatprep.subr.bf16.mxu1 %v27641_v20  ;;  %v27716_v20 = vld [vmem:[%s36351_s3 + $0x22a0] ss:$16 sps:$4 sm:$0xff]  }
 0x988   : > { %19047 = vmatpush1.bf16.msra.mxu0 %v27636_v22  ;;  %v27719_v22 = vld [vmem:[%s36351_s3 + $0x22a8] ss:$16 sps:$4 sm:$0xff]  }
 0x989   : > { %19149 = vmatpush1.bf16.msra.mxu1 %v27639_v14  ;;  %19048 = vmatprep.subr.bf16.mxu0 %v27644_v42  ;;  %v27724_v14 = vld [vmem:[%s36351_s3 + $0x22c4] ss:$16 sps:$4 sm:$0xff]   ;;  %v27727_v42 = vld [vmem:[%s36351_s3 + $0x22cc] ss:$16 sps:$4 sm:$0xff]  }
 0x98a   : > { %19150 = vmatprep.subr.bf16.mxu1 %v27647_v17  ;;  %v27722_v17 = vld [vmem:[%s36351_s3 + $0x22c0] ss:$16 sps:$4 sm:$0xff]  }
 0x98c   : > { %19049 = vmatpush1.bf16.msra.mxu0 %v27642_v60  ;;  %v27725_v60 = vld [vmem:[%s36351_s3 + $0x22c8] ss:$16 sps:$4 sm:$0xff]  }
 0x98d   : > { %19151 = vmatpush1.bf16.msra.mxu1 %v27645_v32  ;;  %19050 = vmatprep.subr.bf16.mxu0 %v27650_v45  ;;  %v27730_v32 = vld [vmem:[%s36351_s3 + $0x22e4] ss:$16 sps:$4 sm:$0xff]  }
 0x98e   : > { %19152 = vmatprep.subr.bf16.mxu1 %v27653_v50  ;;  %v27733_v50 = vld [vmem:[%s36351_s3 + $0x22ec] ss:$16 sps:$4 sm:$0xff]  }
 0x990   : > { %19051 = vmatpush1.bf16.msra.mxu0 %v27648_v27 }
 0x991   : > { %19153 = vmatpush1.bf16.msra.mxu1 %v27651_v11  ;;  %19052 = vmatprep.subr.bf16.mxu0 %v27656_v7 }
 0x992   : > { %19154 = vmatprep.subr.bf16.mxu1 %v27659_v31 }
 0x994   : > { %19053 = vmatpush1.bf16.msra.mxu0 %v27654_v61 }
 0x995   : > { %19155 = vmatpush1.bf16.msra.mxu1 %v27657_v63  ;;  %19054 = vmatprep.subr.bf16.mxu0 %v27662_v15  ;;  %v27728_v15 = vld [vmem:[%s36351_s3 + $0x22e0] ss:$16 sps:$4 sm:$0xff]  }
 0x996   : > { %19156 = vmatprep.subr.bf16.mxu1 %v27665_v37 }
 0x998   : > { %19055 = vmatpush1.bf16.msra.mxu0 %v27660_v24 }
 0x999   : > { %19157 = vmatpush1.bf16.msra.mxu1 %v27663_v26  ;;  %19056 = vmatprep.subr.bf16.mxu0 %v27668_v47 }
 0x99a   : > { %19158 = vmatprep.subr.bf16.mxu1 %v27671_v19 }
 0x99c   : > { %19057 = vmatpush1.bf16.msra.mxu0 %v27666_v33 }
 0x99d   : > { %19159 = vmatpush1.bf16.msra.mxu1 %v27669_v3  ;;  %19058 = vmatprep.subr.bf16.mxu0 %v27674_v41  ;;  %v27734_v41 = vld [vmem:[%s36351_s3 + $0x2300] ss:$16 sps:$4 sm:$0xff]  }
 0x99e   : > { %19160 = vmatprep.subr.bf16.mxu1 %v27677_v23  ;;  %v27740_v23 = vld [vmem:[%s36351_s3 + $0x2320] ss:$16 sps:$4 sm:$0xff]  }
 0x9a0   : > { %19059 = vmatpush1.bf16.msra.mxu0 %v27672_v54  ;;  %v27743_v54 = vld [vmem:[%s36351_s3 + $0x2328] ss:$16 sps:$4 sm:$0xff]  }
 0x9a1   : > { %19161 = vmatpush1.bf16.msra.mxu1 %v27675_v48  ;;  %19060 = vmatprep.subr.bf16.mxu0 %v27680_v57  ;;  %v27748_v48 = vld [vmem:[%s36351_s3 + $0x2344] ss:$16 sps:$4 sm:$0xff]   ;;  %v27751_v57 = vld [vmem:[%s36351_s3 + $0x234c] ss:$16 sps:$4 sm:$0xff]  }
 0x9a2   : > { %19162 = vmatprep.subr.bf16.mxu1 %v27683_v16  ;;  %v27746_v16 = vld [vmem:[%s36351_s3 + $0x2340] ss:$16 sps:$4 sm:$0xff]  }
 0x9a4   : > { %19061 = vmatpush1.bf16.msra.mxu0 %v27678_v35  ;;  %v27749_v35 = vld [vmem:[%s36351_s3 + $0x2348] ss:$16 sps:$4 sm:$0xff]  }
 0x9a5   : > { %19163 = vmatpush1.bf16.msra.mxu1 %v27681_v12  ;;  %19081 = vmatprep.subr.bf16.mxu0 %v27686_v58  ;;  %v27754_v12 = vld [vmem:[%s36351_s3 + $0x2364] ss:$16 sps:$4 sm:$0xff]   ;;  %v27757_v58 = vld [vmem:[%s36351_s3 + $0x236c] ss:$16 sps:$4 sm:$0xff]  }
 0x9a6   : > { %19183 = vmatprep.subr.bf16.mxu1 %v27689_v21  ;;  %v27752_v21 = vld [vmem:[%s36351_s3 + $0x2360] ss:$16 sps:$4 sm:$0xff]  }
 0x9a7   : > { %19063 = vmatmul.mubr.bf16.vlgmr.msra.gmra.mrb[76].mxu0 %v32729_v30 }
 0x9a8   : > { %19165 = vmatmul.mubr.bf16.vlgmr.msra.gmra.mrb[76].mxu1 %v32729_v30  ;;  %19072 = vmatprep.mubr.bf16.mxu0 %v32709_v46  ;;  %v27701_v30 = vld [vmem:[%s36351_s3 + $0x224c] ss:$16 sps:$4 sm:$0xff]  }
 0x9a9   : > { %19082 = vmatpush1.bf16.msra.mxu0 %v27684_v52  ;;  %19174 = vmatprep.mubr.bf16.mxu1 %v32709_v46  ;;  %v27696_v46 = vld [vmem:[%s36351_s3 + $0x2240] ss:$16 sps:$4 sm:$0xff]   ;;  %v27755_v52 = vld [vmem:[%s36351_s3 + $0x2368] ss:$16 sps:$4 sm:$0xff]  }
 0x9aa   : > { %19184 = vmatpush1.bf16.msra.mxu1 %v27687_v38  ;;  %19083 = vmatprep.subr.bf16.mxu0 %v27692_v40  ;;  %v27760_v38 = vld [vmem:[%s36351_s3 + $0x2384] ss:$16 sps:$4 sm:$0xff]   ;;  %v27763_v40 = vld [vmem:[%s36351_s3 + $0x238c] ss:$16 sps:$4 sm:$0xff]  }
 0x9ab   : > { %19185 = vmatprep.subr.bf16.mxu1 %v27695_v10  ;;  %v27758_v10 = vld [vmem:[%s36351_s3 + $0x2380] ss:$16 sps:$4 sm:$0xff]  }
 0x9ad   : > { %19084 = vmatpush1.bf16.msra.mxu0 %v27690_v8  ;;  %v27761_v8 = vld [vmem:[%s36351_s3 + $0x2388] ss:$16 sps:$4 sm:$0xff]  }
 0x9ae   : > { %19186 = vmatpush1.bf16.msra.mxu1 %v27693_v56  ;;  %19085 = vmatprep.subr.bf16.mxu0 %v27698_v18  ;;  %v27766_v56 = vld [vmem:[%s36351_s3 + $0x23a4] ss:$16 sps:$4 sm:$0xff]   ;;  %v27769_v18 = vld [vmem:[%s36351_s3 + $0x23ac] ss:$16 sps:$4 sm:$0xff]  }
 0x9af   : > { %19073 = vmatmul.mubr.bf16.gmra.mrb[144].mxu0 %v32712_v4  ;;  %19187 = vmatprep.subr.bf16.mxu1 %v27701_v30  ;;  %v27764_v30 = vld [vmem:[%s36351_s3 + $0x23a0] ss:$16 sps:$4 sm:$0xff]  }
 0x9b0   : > { %19175 = vmatmul.mubr.bf16.gmra.mrb[144].mxu1 %v32712_v4  ;;  %19113 = vmatprep.mubr.bf16.mxu0 %v32752_v62  ;;  %v27715_v4 = vld [vmem:[%s36351_s3 + $0x228c] ss:$16 sps:$4 sm:$0xff]  }
 0x9b1   : > { %19086 = vmatpush1.bf16.msra.mxu0 %v27696_v46  ;;  %19215 = vmatprep.mubr.bf16.mxu1 %v32752_v62  ;;  %v27710_v62 = vld [vmem:[%s36351_s3 + $0x2280] ss:$16 sps:$4 sm:$0xff]   ;;  %v27767_v46 = vld [vmem:[%s36351_s3 + $0x23a8] ss:$16 sps:$4 sm:$0xff]  }
 0x9b2   : > { %19188 = vmatpush1.bf16.msra.mxu1 %v27699_v53  ;;  %19087 = vmatprep.subr.bf16.mxu0 %v27706_v44  ;;  %v27772_v53 = vld [vmem:[%s36351_s3 + $0x23c4] ss:$16 sps:$4 sm:$0xff]   ;;  %v27775_v44 = vld [vmem:[%s36351_s3 + $0x23cc] ss:$16 sps:$4 sm:$0xff]  }
 0x9b3   : > { %19189 = vmatprep.subr.bf16.mxu1 %v27709_v0  ;;  %v27770_v0 = vld [vmem:[%s36351_s3 + $0x23c0] ss:$16 sps:$4 sm:$0xff]  }
 0x9b5   : > { %19088 = vmatpush1.bf16.msra.mxu0 %v27704_v43  ;;  %v27773_v43 = vld [vmem:[%s36351_s3 + $0x23c8] ss:$16 sps:$4 sm:$0xff]  }
 0x9b6   : > { %19190 = vmatpush1.bf16.msra.mxu1 %v27707_v1  ;;  %19089 = vmatprep.subr.bf16.mxu0 %v27712_v25  ;;  %v27778_v1 = vld [vmem:[%s36351_s3 + $0x23e4] ss:$16 sps:$4 sm:$0xff]   ;;  %v27781_v25 = vld [vmem:[%s36351_s3 + $0x23ec] ss:$16 sps:$4 sm:$0xff]  }
 0x9b7   : > { %19191 = vmatprep.subr.bf16.mxu1 %v27715_v4  ;;  %v27776_v4 = vld [vmem:[%s36351_s3 + $0x23e0] ss:$16 sps:$4 sm:$0xff]  }
 0x9b9   : > { %19090 = vmatpush1.bf16.msra.mxu0 %v27710_v62  ;;  %v27779_v62 = vld [vmem:[%s36351_s3 + $0x23e8] ss:$16 sps:$4 sm:$0xff]  }
 0x9ba   : > { %19192 = vmatpush1.bf16.msra.mxu1 %v27713_v29  ;;  %19091 = vmatprep.subr.bf16.mxu0 %v27718_v9 }
 0x9bb   : > { %19193 = vmatprep.subr.bf16.mxu1 %v27721_v34 }
 0x9bd   : > { %19092 = vmatpush1.bf16.msra.mxu0 %v27716_v20 }
 0x9be   : > { %19194 = vmatpush1.bf16.msra.mxu1 %v27719_v22  ;;  %19093 = vmatprep.subr.bf16.mxu0 %v27724_v14 }
 0x9bf   : > { %19195 = vmatprep.subr.bf16.mxu1 %v27727_v42  ;;  %v17035_v45 = vpop.f32.mrb[132].mxu0 }
 0x9c0   : > { %v17036_v27 = vadd.f32 %v17035_v45, %v35868_v59  ;;  %v17137_v11 = vpop.f32.mrb[132].mxu1  ;;  %v17037_v7 = vpop.f32.mrb[133].mxu0  ;;  %v27731_v59 = vld [vmem:[%s36351_s3 + $0x22e8] ss:$16 sps:$4 sm:$0xff]  }
 0x9c1   : > { %19094 = vmatpush1.bf16.msra.mxu0 %v27722_v17  ;;  %v17138_v31 = vadd.f32 %v17137_v11, %v35873_v51  ;;  %v17038_v61 = vadd.f32 %v17037_v7, %v35875_v2  ;;  %v17139_v63 = vpop.f32.mrb[133].mxu1  ;;  %v17039_v37 = vpop.f32.mrb[134].mxu0  ;;  %v27736_v2 = vld [vmem:[%s36351_s3 + $0x2304] ss:$16 sps:$4 sm:$0xff]  }
 0x9c2   : > { %19196 = vmatpush1.bf16.msra.mxu1 %v27725_v60  ;;  %v36086_v24 = vadd.f32 %v17036_v27, %v35662_v13  ;;  %v17140_v26 = vadd.f32 %v17139_v63, %v35877_v28  ;;  %19095 = vmatprep.subr.bf16.mxu0 %v27730_v32  ;;  %v17141_v51 = vpop.f32.mrb[134].mxu1  ;;  %v17040_v47 = vpop.f32.mrb[135].mxu0  ;;  %v27739_v28 = vld [vmem:[%s36351_s3 + $0x230c] ss:$16 sps:$4 sm:$0xff]  }
 0x9c3   : > { %v36096_v19 = vadd.f32 %v17138_v31, %v35672_v6  ;;  %v36099_v33 = vadd.f32 %v17038_v61, %v35675_v36  ;;  %19197 = vmatprep.subr.bf16.mxu1 %v27733_v50  ;;  %v17142_v13 = vpop.f32.mrb[135].mxu1  ;;  %v27737_v6 = vld [vmem:[%s36351_s3 + $0x2308] ss:$16 sps:$4 sm:$0xff]   ;;  %v27742_v36 = vld [vmem:[%s36351_s3 + $0x2324] ss:$16 sps:$4 sm:$0xff]  }
 0x9c4   : > { %v36105_v3 = vadd.f32 %v17140_v26, %v35681_v5  ;;  %v27745_v5 = vld [vmem:[%s36351_s3 + $0x232c] ss:$16 sps:$4 sm:$0xff]  }
 0x9c5   : > { %19096 = vmatpush1.bf16.msra.mxu0 %v27728_v15 }
 0x9c6   : > { %19198 = vmatpush1.bf16.msra.mxu1 %v27731_v59  ;;  %19097 = vmatprep.subr.bf16.mxu0 %v27736_v2 }
 0x9c7   : > { %19199 = vmatprep.subr.bf16.mxu1 %v27739_v28 }
 0x9c9   : > { %19098 = vmatpush1.bf16.msra.mxu0 %v27734_v41  ;;  %v36469_v41 = vld [vmem:[#allocation3_spill] sm:$0xff] }
 0x9ca   : > { %19200 = vmatpush1.bf16.msra.mxu1 %v27737_v6  ;;  %19099 = vmatprep.subr.bf16.mxu0 %v27742_v36  ;;  %v19326_v36 = vld [vmem:[%s307_s12] sm:$0xf] }
 0x9cb   : > { %19201 = vmatprep.subr.bf16.mxu1 %v27745_v5  ;;  %v36470_v5 = vld [vmem:[#allocation4_spill] sm:$0xff] }
 0x9cd   : > { %19100 = vmatpush1.bf16.msra.mxu0 %v27740_v23 }
 0x9ce   : > { %19202 = vmatpush1.bf16.msra.mxu1 %v27743_v54  ;;  %19101 = vmatprep.subr.bf16.mxu0 %v27748_v48  ;;  %v36471_v54 = vld [vmem:[#allocation5_spill] sm:$0xff] }
 0x9cf   : > { %19203 = vmatprep.subr.bf16.mxu1 %v27751_v57 }
 0x9d1   : > { %19102 = vmatpush1.bf16.msra.mxu0 %v27746_v16  ;;  %v36472_v16 = vld [vmem:[#allocation6_spill] sm:$0xff] }
 0x9d2   : > { %19204 = vmatpush1.bf16.msra.mxu1 %v27749_v35  ;;  %19103 = vmatprep.subr.bf16.mxu0 %v27754_v12 }
 0x9d3   : > { %19205 = vmatprep.subr.bf16.mxu1 %v27757_v58 }
 0x9d5   : > { %19104 = vmatpush1.bf16.msra.mxu0 %v27752_v21 }
 0x9d6   : > { %19206 = vmatpush1.bf16.msra.mxu1 %v27755_v52  ;;  %19105 = vmatprep.subr.bf16.mxu0 %v27760_v38  ;;  %v36256_v38 = vrot.slane %v19326_v36, %v36469_v41 }
 0x9d7   : > { %19207 = vmatprep.subr.bf16.mxu1 %v27763_v40 }
 0x9d9   : > { %19106 = vmatpush1.bf16.msra.mxu0 %v27758_v10 }
 0x9da   : > { %19208 = vmatpush1.bf16.msra.mxu1 %v27761_v8  ;;  %19107 = vmatprep.subr.bf16.mxu0 %v27766_v56 }
 0x9db   : > { %19209 = vmatprep.subr.bf16.mxu1 %v27769_v18  ;;  %v36263_v18 = vrot.slane %v19326_v36, %v36470_v5 }
 0x9dd   : > { %19108 = vmatpush1.bf16.msra.mxu0 %v27764_v30 }
 0x9de   : > { %19210 = vmatpush1.bf16.msra.mxu1 %v27767_v46  ;;  %19109 = vmatprep.subr.bf16.mxu0 %v27772_v53  ;;  %v36267_v46 = vrot.slane %v19326_v36, %v36471_v54 }
 0x9df   : > { %19211 = vmatprep.subr.bf16.mxu1 %v27775_v44 }
 0x9e1   : > { %19110 = vmatpush1.bf16.msra.mxu0 %v27770_v0 }
 0x9e2   : > { %19212 = vmatpush1.bf16.msra.mxu1 %v27773_v43  ;;  %19111 = vmatprep.subr.bf16.mxu0 %v27778_v1  ;;  %v36272_v1 = vrot.slane %v19326_v36, %v36472_v16 }
 0x9e3   : > { %19213 = vmatprep.subr.bf16.mxu1 %v27781_v25 }
 0x9e5   : > { %19112 = vmatpush1.bf16.msra.mxu0 %v27776_v4 }
 0x9e6   : > { %19214 = vmatpush1.bf16.msra.mxu1 %v27779_v62 }
 0x9e8   : > { %19114 = vmatmul.mubr.bf16.vlgmr.msra.gmra.mrb[76].mxu0 %v32756_v39 }
 0x9e9   : > { %19216 = vmatmul.mubr.bf16.vlgmr.msra.gmra.mrb[76].mxu1 %v32756_v39  ;;  %19123 = vmatprep.mubr.bf16.mxu0 %v32739_v49 }
 0x9ea   : > { %19225 = vmatprep.mubr.bf16.mxu1 %v32739_v49 }
 0x9f0   : > { %19124 = vmatmul.mubr.bf16.gmra.mrb[148].mxu0 %v32742_v55 }
 0x9f1   : > { %19226 = vmatmul.mubr.bf16.gmra.mrb[148].mxu1 %v32742_v55 }
 0xa00   : > { %v18057_v29 = vpop.f32.mrb[136].mxu0 }
 0xa01   : > { %v18159_v9 = vpop.f32.mrb[136].mxu1  ;;  %v18059_v34 = vpop.f32.mrb[137].mxu0 }
 0xa02   : > { %v18161_v20 = vpop.f32.mrb[137].mxu1  ;;  %v18061_v22 = vpop.f32.mrb[138].mxu0 }
 0xa03   : > { %v18163_v14 = vpop.f32.mrb[138].mxu1  ;;  %v18062_v42 = vpop.f32.mrb[139].mxu0 }
 0xa04   : > { %v18164_v17 = vpop.f32.mrb[139].mxu1  ;;  %v36473_v14 = vld [vmem:[#allocation7_spill] sm:$0xff] }
 0xa41   : > { %v18108_v60 = vpop.f32.mrb[140].mxu0 }
 0xa42   : > { %v18109_v32 = vadd.f32 %v18108_v60, %v18057_v29  ;;  %v18210_v45 = vpop.f32.mrb[140].mxu1  ;;  %v18110_v39 = vpop.f32.mrb[141].mxu0 }
 0xa43   : > { %v18211_v50 = vadd.f32 %v18210_v45, %v18159_v9  ;;  %v18111_v27 = vadd.f32 %v18110_v39, %v18059_v34  ;;  %v18212_v11 = vpop.f32.mrb[141].mxu1  ;;  %v18112_v49 = vpop.f32.mrb[142].mxu0  ;;  %v36474_v45 = vld [vmem:[#allocation8_spill] sm:$0xff] }
 0xa44   : > { %v36204_v7 = vadd.f32 %v18109_v32, %v36086_v24  ;;  %v18213_v55 = vadd.f32 %v18212_v11, %v18161_v20  ;;  %v18214_v31 = vpop.f32.mrb[142].mxu1  ;;  %v18113_v61 = vpop.f32.mrb[143].mxu0 }
 0xa45   : > { %v36207_v63 = vadd.f32 %v18211_v50, %v36096_v19  ;;  %v36210_v15 = vadd.f32 %v18111_v27, %v36099_v33  ;;  %v18215_v37 = vpop.f32.mrb[143].mxu1  ;;  %v19247_v33 = vld [vmem:[%s36352_s4] sm:$0xf]  ;;  %v36475_v50 = vld [vmem:[#allocation9_spill] sm:$0xff]  ;;  %v36476_v31 = vld [vmem:[#allocation10_spill] sm:$0xff] }
 0xa46   : > { %v36213_v26 = vadd.f32 %v18213_v55, %v36105_v3  ;;  %v19246_v3 = vld [vmem:[%s303_s29] sm:$0xf]  ;;  %v36234_v6 = vrot.slane %v19247_v33, %v36469_v41  ;;  %v36237_v23 = vrot.slane %v19247_v33, %v36470_v5  ;;  %v36240_v48 = vrot.slane %v19247_v33, %v36471_v54 }
 0xa47   : > { %v36243_v57 = vrot.slane %v19246_v3, %v36469_v41  ;;  %v36246_v35 = vrot.slane %v19247_v33, %v36472_v16  ;;  %v36249_v58 = vrot.slane %v19246_v3, %v36470_v5  ;;  %v36252_v21 = vrot.slane %v19246_v3, %v36471_v54  ;;  %v36477_v37 = vld [vmem:[#allocation11_spill] sm:$0xff]  ;;  %v36478_v33 = vld [vmem:[#allocation12_spill] sm:$0xff]  ;;  %v36479_v41 = vld [vmem:[#allocation13_spill] sm:$0xff] }
 0xa48   : > { %v36259_v8 = vrot.slane %v19246_v3, %v36472_v16 }
 0xa82   : > { %v36215_v59 = vpop.f32.mrb[144].mxu0 }
 0xa83   : > { %v36217_v51 = vpop.f32.mrb[144].mxu1  ;;  %v36219_v24 = vpop.f32.mrb[145].mxu0 }
 0xa84   : > { %v36221_v47 = vpop.f32.mrb[145].mxu1  ;;  %v19078_v2 = vpop.f32.mrb[146].mxu0 }
 0xa85   : > { %v19180_v13 = vpop.f32.mrb[146].mxu1  ;;  %v19079_v28 = vpop.f32.mrb[147].mxu0 }
 0xa86   : > { %v19181_v19 = vpop.f32.mrb[147].mxu1 }
 0xabb   : > { %v19115_v12 = vpop.f32.mrb[76].mxu0 }
 0xabc   : > { %v19269_v52 = vadd.f32 %v36234_v6, %v19115_v12  ;;  %v19217_v40 = vpop.f32.mrb[76].mxu1  ;;  %v19117_v10 = vpop.f32.mrb[77].mxu0 }
 0xabd   : > { %v19271_v56 = vadd.f32 %v36237_v23, %v19217_v40  ;;  %v19270_v30 = vadd.f32 %v36240_v48, %v19117_v10  ;;  %v19219_v53 = vpop.f32.mrb[77].mxu1  ;;  %v19119_v44 = vpop.f32.mrb[78].mxu0 }
 0xabe   : > { %v19302_v0 = vmul.f32 %v36243_v57, %v19269_v52  ;;  %v19272_v43 = vadd.f32 %v36246_v35, %v19219_v53  ;;  %v19273_v25 = vadd.f32 %v36234_v6, %v19119_v44  ;;  %v19221_v4 = vpop.f32.mrb[78].mxu1  ;;  %v19121_v62 = vpop.f32.mrb[79].mxu0 }
 0xabf   : > { %v19304_v29 = vmul.f32 %v36249_v58, %v19271_v56  ;;  %v19303_v9 = vmul.f32 %v36252_v21, %v19270_v30  ;;  %v19275_v34 = vadd.f32 %v36237_v23, %v19221_v4  ;;  %v19274_v20 = vadd.f32 %v36240_v48, %v19121_v62  ;;  %v19223_v22 = vpop.f32.mrb[79].mxu1 }
 0xac0   : > { %v19314_v42 = vadd.f32 %v19302_v0, %v36473_v14  ;;  %v19305_v17 = vmul.f32 %v36259_v8, %v19272_v43  ;;  %v19306_v60 = vmul.f32 %v36243_v57, %v19273_v25  ;;  %v19276_v32 = vadd.f32 %v36246_v35, %v19223_v22  ;;  %v36480_v22 = vld [vmem:[#allocation14_spill] sm:$0xff] }
 0xac1   : > { %v19316_v39 = vadd.f32 %v19304_v29, %v36474_v45  ;;  %v19315_v27 = vadd.f32 %v19303_v9, %v36475_v50  ;;  %v19308_v11 = vmul.f32 %v36249_v58, %v19275_v34  ;;  %v19307_v49 = vmul.f32 %v36252_v21, %v19274_v20 }
 0xac2   : > { %v19348_v55 = vadd.f32 %v36256_v38, %v19314_v42  ;;  %v19317_v61 = vadd.f32 %v19305_v17, %v36476_v31  ;;  %v19318_v2 = vadd.f32 %v19306_v60, %v36477_v37  ;;  %v19309_v13 = vmul.f32 %v36259_v8, %v19276_v32 }
 0xac3   : > { %v19350_v28 = vadd.f32 %v36263_v18, %v19316_v39  ;;  %v19349_v19 = vadd.f32 %v36267_v46, %v19315_v27  ;;  %v19320_v3 = vadd.f32 %v19308_v11, %v36478_v33  ;;  %v19319_v36 = vadd.f32 %v19307_v49, %v36479_v41  ;;  %v19125_v5 = vpop.f32.mrb[148].mxu0  ;;  %v36482_v33 = vld [vmem:[#allocation16_spill] sm:$0xff]  ;;  %v36483_v41 = vld [vmem:[#allocation17_spill] sm:$0xff] }
 0xac4   : > { %vm19360_vm9 = vcmp.gt.f32.partialorder %v19348_v55, 0.0  ;;  %v19372_v54 = vmul.f32 0.2, %v19348_v55  ;;  %v19351_v16 = vadd.f32 %v36272_v1, %v19317_v61  ;;  %v19352_v12 = vadd.f32 %v36256_v38, %v19318_v2  ;;  %v19227_v52 = vpop.f32.mrb[148].mxu1  ;;  %v19127_v40 = vpop.f32.mrb[149].mxu0 }
 0xac5   : > { %vm19362_vm10 = vcmp.gt.f32.partialorder %v19350_v28, 0.0  ;;  %v19374_v10 = vmul.f32 0.2, %v19350_v28  ;;  %vm19361_vm11 = vcmp.gt.f32.partialorder %v19349_v19, 0.0  ;;  %v19373_v56 = vmul.f32 0.2, %v19349_v19 }
 0xac6   : > { %v19384_v30 = vsel %vm19360_vm9, %v19348_v55, %v19372_v54  ;;  %vm19363_vm12 = vcmp.gt.f32.partialorder %v19351_v16, 0.0  ;;  %v19375_v53 = vmul.f32 0.2, %v19351_v16  ;;  %vm19364_vm13 = vcmp.gt.f32.partialorder %v19352_v12, 0.0  ;;  %v19229_v44 = vpop.f32.mrb[149].mxu1  ;;  %v19129_v0 = vpop.f32.mrb[150].mxu0 }
 0xac7   : > { %19396 = vst [vmem:[%s36300_s14] sm:$0xff] %v19384_v30  ;;  %v19386_v43 = vsel %vm19362_vm10, %v19350_v28, %v19374_v10  ;;  %v19385_v25 = vsel %vm19361_vm11, %v19349_v19, %v19373_v56  ;;  %v19376_v4 = vmul.f32 0.2, %v19352_v12  ;;  %v19354_v62 = vadd.f32 %v36263_v18, %v19320_v3  ;;  %v19231_v29 = vpop.f32.mrb[150].mxu1  ;;  %v19130_v9 = vpop.f32.mrb[151].mxu0  ;;  %v36481_v19 = vld [vmem:[#allocation15_spill] sm:$0xff] }
 0xac8   : > { %19398 = vst [vmem:[%s36300_s14 + $0x10] sm:$0xff] %v19386_v43  ;;  %19397 = vst [vmem:[%s36300_s14 + $0x8] sm:$0xff] %v19385_v25  ;;  %v19387_v34 = vsel %vm19363_vm12, %v19351_v16, %v19375_v53  ;;  %v19353_v20 = vadd.f32 %v36267_v46, %v19319_v36  ;;  %v19321_v14 = vadd.f32 %v19309_v13, %v36480_v22  ;;  %v19232_v17 = vpop.f32.mrb[151].mxu1  ;;  %v36484_v36 = vld [vmem:[#allocation18_spill] sm:$0xff] }
 0xac9   : > { %v19126_v42 = vadd.f32 %v19125_v5, %v36215_v59  ;;  %19399 = vst [vmem:[%s36300_s14 + $0x18] sm:$0xff] %v19387_v34  ;;  %v19388_v60 = vsel %vm19364_vm13, %v19352_v12, %v19376_v4  ;;  %vm19366_vm15 = vcmp.gt.f32.partialorder %v19354_v62, 0.0  ;;  %v19378_v32 = vmul.f32 0.2, %v19354_v62 }
 0xaca   : > { %v19228_v45 = vadd.f32 %v19227_v52, %v36217_v51  ;;  %19400 = vst [vmem:[%s36300_s14 + $0x20] sm:$0xff] %v19388_v60  ;;  %vm19365_vm6 = vcmp.gt.f32.partialorder %v19353_v20, 0.0  ;;  %v19377_v39 = vmul.f32 0.2, %v19353_v20  ;;  %v19355_v50 = vadd.f32 %v36272_v1, %v19321_v14 }
 0xacb   : > { %v19242_v27 = vadd.f32 %v19126_v42, %v36204_v7  ;;  %v19390_v11 = vsel %vm19366_vm15, %v19354_v62, %v19378_v32  ;;  %v19128_v49 = vadd.f32 %v19127_v40, %v36219_v24  ;;  %v19230_v55 = vadd.f32 %v19229_v44, %v36221_v47 }
 0xacc   : > { %v19244_v59 = vadd.f32 %v19228_v45, %v36207_v63  ;;  %19402 = vst [vmem:[%s36300_s14 + $0x30] sm:$0xff] %v19390_v11  ;;  %v19389_v31 = vsel %vm19365_vm6, %v19353_v20, %v19377_v39  ;;  %vm19367_vm7 = vcmp.gt.f32.partialorder %v19355_v50, 0.0  ;;  %v19379_v61 = vmul.f32 0.2, %v19355_v50 }
 0xacd   : > { %v19277_v51 = vadd.f32 %v36234_v6, %v19242_v27  ;;  %19401 = vst [vmem:[%s36300_s14 + $0x28] sm:$0xff] %v19389_v31  ;;  %v19243_v2 = vadd.f32 %v19128_v49, %v36210_v15  ;;  %v19245_v7 = vadd.f32 %v19230_v55, %v36213_v26 }
 0xace   : > { %v19279_v37 = vadd.f32 %v36237_v23, %v19244_v59  ;;  %v19391_v13 = vsel %vm19367_vm7, %v19355_v50, %v19379_v61 }
 0xacf   : > { %v19310_v63 = vmul.f32 %v36243_v57, %v19277_v51  ;;  %19403 = vst [vmem:[%s36300_s14 + $0x38] sm:$0xff] %v19391_v13  ;;  %v19278_v47 = vadd.f32 %v36240_v48, %v19243_v2  ;;  %v19280_v28 = vadd.f32 %v36246_v35, %v19245_v7 }
 0xad0   : > { %v19312_v24 = vmul.f32 %v36249_v58, %v19279_v37 }
 0xad1   : > { %v19322_v6 = vadd.f32 %v19310_v63, %v36481_v19  ;;  %v19311_v23 = vmul.f32 %v36252_v21, %v19278_v47  ;;  %v19313_v15 = vmul.f32 %v36259_v8, %v19280_v28 }
 0xad2   : > { %v19324_v3 = vadd.f32 %v19312_v24, %v36482_v33 }
 0xad3   : > { %v19356_v26 = vadd.f32 %v36256_v38, %v19322_v6  ;;  %v19323_v58 = vadd.f32 %v19311_v23, %v36483_v41  ;;  %v19325_v48 = vadd.f32 %v19313_v15, %v36484_v36 }
 0xad4   : > { %v19358_v57 = vadd.f32 %v36263_v18, %v19324_v3 }
 0xad5   : > { %vm19368_vm1 = vcmp.gt.f32.partialorder %v19356_v26, 0.0  ;;  %v19380_v35 = vmul.f32 0.2, %v19356_v26  ;;  %v19357_v54 = vadd.f32 %v36267_v46, %v19323_v58  ;;  %v19359_v21 = vadd.f32 %v36272_v1, %v19325_v48 }
 0xad6   : > { %vm19370_vm3 = vcmp.gt.f32.partialorder %v19358_v57, 0.0  ;;  %v19382_v5 = vmul.f32 0.2, %v19358_v57 }
 0xad7   : > { %v19392_v8 = vsel %vm19368_vm1, %v19356_v26, %v19380_v35  ;;  %vm19369_vm8 = vcmp.gt.f32.partialorder %v19357_v54, 0.0  ;;  %v19381_v16 = vmul.f32 0.2, %v19357_v54  ;;  %vm19371_vm4 = vcmp.gt.f32.partialorder %v19359_v21, 0.0 }
 0xad8   : > { %19404 = vst [vmem:[%s36300_s14 + $0x40] sm:$0xff] %v19392_v8  ;;  %v19394_v38 = vsel %vm19370_vm3, %v19358_v57, %v19382_v5  ;;  %v19383_v18 = vmul.f32 0.2, %v19359_v21 }
 0xad9   : > { %19406 = vst [vmem:[%s36300_s14 + $0x50] sm:$0xff] %v19394_v38  ;;  %v19393_v12 = vsel %vm19369_vm8, %v19357_v54, %v19381_v16 }
 0xada   : > { %19405 = vst [vmem:[%s36300_s14 + $0x48] sm:$0xff] %v19393_v12  ;;  %v19395_v52 = vsel %vm19371_vm4, %v19359_v21, %v19383_v18 }
 0xadb   : > { %19407 = vst [vmem:[%s36300_s14 + $0x58] sm:$0xff] %v19395_v52 }
 0xadc PF: > { %s17_s24 = sadd.s32 1, %s27814_s24  }
 0xadd   : > { %p14_p4 = scmp.ge.s32.totalorder %s17_s24, 4  }
 0xadf   :  { %16 = sbr.rel (!%p14_p4) target bundleno = 1 (0x1), region = 100 }

</bundles_post_ra>
